<compile_context>
chip_gen: v5e
topology: v5e:2x2
jax: 0.10.0
libtpu: 0.0.40
codegen_flags: <defaults>
</compile_context>

<pallas_src>
import functools
import math

import jax
import jax.numpy as jnp
from jax.experimental import pallas as pl
from jax.experimental.pallas import tpu as pltpu

LN_EPS = 1e-5          # nn.LayerNorm default
KERNEL_EPS = 1e-4      # eps in softmax_kernel


def _layernorm(x, g, b):
    mu = jnp.mean(x, axis=-1, keepdims=True)
    var = jnp.mean((x - mu) ** 2, axis=-1, keepdims=True)
    return (x - mu) * jax.lax.rsqrt(var + LN_EPS) * g + b


# ----------------------------------------------------------------------------
# Fused Performer residual block kernel (LN + fused projection + feature map +
# linear attention + residual)
# ----------------------------------------------------------------------------
def performer_block_kernel(x_ref, g_ref, b_ref, w_ref, bias_ref, diag_ref,
                           hbc_ref, sum_ref, *out_refs,
                           R, C, E, H, F, ratio, mean_qk):
    HF = H * F
    Dh = E // H
    M = R * C
    out_ref = out_refs[0]
    attn_ref = None if mean_qk else out_refs[1]

    x = x_ref[...]                                            # (M, E) f32
    xn = _layernorm(x, g_ref[...], b_ref[...])

    # Fused projection: [qdash | kdash | q | k | v] in one MXU pass (review #2).
    proj = jnp.dot(xn, w_ref[...],
                   preferred_element_type=jnp.float32) + bias_ref[...]   # (M, 2HF+3E)
    qdash = proj[:, :HF]                                      # (M, HF) vreg-aligned
    kdash = proj[:, HF:2 * HF]                                # (M, HF)
    qk = proj[:, 2 * HF:2 * HF + 2 * E]                       # (M, 2E)  [q | k]
    v = proj[:, 2 * HF + 2 * E:]                              # (M, E)

    # Per-head diag terms for q AND k with ONE full-width indicator matmul.
    diag_qk = jnp.dot(qk * qk, diag_ref[...],
                      preferred_element_type=jnp.float32)     # (M, 2HF)
    diag_q = diag_qk[:, :HF]
    diag_k = diag_qk[:, HF:]

    # Per-head maxes: q per token, k per (row, head) block; broadcast back to
    # (M, HF) lanes with a tiny indicator matmul instead of per-head tiling.
    qmax_cols, kmax_cols = [], []
    for h in range(H):                                        # H=4, static
        qmax_cols.append(jnp.max(qdash[:, h * F:(h + 1) * F], axis=-1, keepdims=True))
        kmax_cols.append(jnp.max(kdash[:, h * F:(h + 1) * F], axis=-1, keepdims=True))
    qmax_tok = jnp.concatenate(qmax_cols, axis=-1)            # (M, H)
    kmax_tok = jnp.concatenate(kmax_cols, axis=-1)            # (M, H)
    kmax_blk = jnp.max(kmax_tok.reshape(R, C, H), axis=1, keepdims=True)   # (R,1,H)
    kmax_tok = jnp.broadcast_to(kmax_blk, (R, C, H)).reshape(M, H)
    qmax_big = jnp.dot(qmax_tok, hbc_ref[...], preferred_element_type=jnp.float32)
    kmax_big = jnp.dot(kmax_tok, hbc_ref[...], preferred_element_type=jnp.float32)

    # softmax-kernel feature maps: ONE (M, 128) exp pass each (review #1).
    qf = ratio * (jnp.exp(qdash - diag_q - qmax_big) + KERNEL_EPS)
    kf = ratio * (jnp.exp(kdash - diag_k - kmax_big) + KERNEL_EPS)

    # Normalizer (exact reciprocal, f32 — review correctness concerns).
    if mean_qk:   # cell block: mean of the feature maps over rows
        qm = jnp.mean(qf.reshape(R, C, HF), axis=0)           # (C, HF)
        km = jnp.mean(kf.reshape(R, C, HF), axis=0)           # (C, HF)
        denom = jnp.dot(qm * jnp.sum(km, axis=0, keepdims=True), sum_ref[...],
                        preferred_element_type=jnp.float32)   # (C, H)
    else:         # gene block
        ks = jnp.sum(kf.reshape(R, C, HF), axis=1)            # (R, HF)
        ksb = jnp.broadcast_to(ks[:, None, :], (R, C, HF)).reshape(M, HF)
        dtok = jnp.dot(qf * ksb, sum_ref[...],
                       preferred_element_type=jnp.float32)    # (M, H)
        denom = jnp.sum(dtok.reshape(R, C, H), axis=0)        # (C, H)
    d_inv = 1.0 / denom                                       # (C, H)

    # Per-head linear attention: batched dot_general over the row axis so heads
    # never leave the lane dimension (review #9).  H=4 static unroll of 2-3
    # small matmuls each; all elementwise work above is already full-width.
    outs = []
    attn_parts = []
    for h in range(H):
        if mean_qk:
            a_h = jax.lax.dot_general(
                qm[:, h * F:(h + 1) * F], km[:, h * F:(h + 1) * F],
                (((1,), (1,)), ((), ())),
                preferred_element_type=jnp.float32)           # (C, C)
        else:
            qf_h = qf[:, h * F:(h + 1) * F].reshape(R, C, F)
            kf_h = kf[:, h * F:(h + 1) * F].reshape(R, C, F)
            s_h = jax.lax.dot_general(
                qf_h, kf_h, (((2,), (2,)), ((0,), (0,))),
                preferred_element_type=jnp.float32)           # (R, C, C)
            a_h = jnp.sum(s_h, axis=0)                        # (C, C)
            attn_parts.append(a_h)
        v_h = v[:, h * Dh:(h + 1) * Dh].reshape(R, C, Dh)
        a_b = jnp.broadcast_to(a_h[None], (R, C, C))
        o_h = jax.lax.dot_general(
            a_b, v_h, (((2,), (1,)), ((0,), (0,))),
            preferred_element_type=jnp.float32)               # (R, C, Dh)
        outs.append(o_h * d_inv[:, h:h + 1])

    delta = jnp.concatenate(outs, axis=-1)                    # (R, C, E)
    # TODO(synk): the (M, E=32) residual store is lane-masked; an (M*E/128, 128)
    #             output layout (reshape wrapper-side) would make it fully dense.
    out_ref[...] = x + delta.reshape(M, E)
    if attn_ref is not None:
        # Lane-denser (C, H*C) slab; the (H, C, C) permutation is done
        # wrapper-side on the HBM result (review #3/#4).
        attn_ref[...] = jnp.concatenate(attn_parts, axis=-1)


# ----------------------------------------------------------------------------
# Fused FFN residual block kernel: x + fc2(GELU(fc1(LN(x))))
# ----------------------------------------------------------------------------
def ffn_kernel(x_ref, g_ref, b_ref, w1_ref, b1_ref, w2_ref, b2_ref, o_ref):
    x = x_ref[...]
    xn = _layernorm(x, g_ref[...], b_ref[...])
    w1 = w1_ref[...]
    w2 = w2_ref[...]
    h = jnp.dot(xn.astype(w1.dtype), w1,
                preferred_element_type=jnp.float32) + b1_ref[...]
    # TODO(synk): PyTorch nn.GELU uses exact erf-GELU; tanh approximation used here.
    h = jax.nn.gelu(h, approximate=True)
    y = jnp.dot(h.astype(w2.dtype), w2,
                preferred_element_type=jnp.float32) + b2_ref[...]
    o_ref[...] = x + y


# ----------------------------------------------------------------------------
# Pallas wrappers
# ----------------------------------------------------------------------------
def _num_tensorcores():
    try:
        kind = jax.devices()[0].device_kind.lower()
    except Exception:
        return 1
    return 2 if "v7" in kind else 1


def performer_block(x, p, *, mean_qk):
    """NormalizedResidualBlock(Gene/cell_Performer_attn), fully fused. x: (R,C,E)."""
    R, C, E = x.shape
    H, HF = p["head_bcast"].shape
    F = HF // H
    M = R * C
    x2d = x.reshape(M, E)

    kern = functools.partial(performer_block_kernel, R=R, C=C, E=E, H=H, F=F,
                             ratio=float(F) ** -0.5, mean_qk=mean_qk)
    if mean_qk:
        out_shape = jax.ShapeDtypeStruct((M, E), jnp.float32)
    else:
        out_shape = (jax.ShapeDtypeStruct((M, E), jnp.float32),
                     jax.ShapeDtypeStruct((C, H * C), jnp.float32))

    res = pl.pallas_call(kern, out_shape=out_shape)(
        x2d, p["ln_g"], p["ln_b"], p["w_fused"], p["b_fused"],
        p["diag_ind"], p["head_bcast"], p["sum_ind"])

    if mean_qk:
        out2d, attn = res, None
    else:
        out2d, slab = res
        attn = slab.reshape(C, H, C).transpose(1, 0, 2)       # (H, C, C), wrapper-side
    return out2d.reshape(R, C, E), attn


def ffn_block(x, p):
    R, C, E = x.shape
    M = R * C
    Fh = p["w1"].shape[1]
    x2d = x.reshape(M, E)
    n_tc = _num_tensorcores()
    args = (x2d, p["ln_g"], p["ln_b"], p["w1"], p["b1"], p["w2"], p["b2"])
    out_shape = jax.ShapeDtypeStruct((M, E), jnp.float32)
    if n_tc > 1 and M % (8 * n_tc) == 0:
        tm = M // n_tc          # one row block per TensorCore (v7x)
        out2d = pl.pallas_call(
            ffn_kernel,
            grid=(n_tc,),
            in_specs=[
                pl.BlockSpec((tm, E), lambda i: (i, 0)),
                pl.BlockSpec((1, E), lambda i: (0, 0)),
                pl.BlockSpec((1, E), lambda i: (0, 0)),
                pl.BlockSpec((E, Fh), lambda i: (0, 0)),
                pl.BlockSpec((1, Fh), lambda i: (0, 0)),
                pl.BlockSpec((Fh, E), lambda i: (0, 0)),
                pl.BlockSpec((1, E), lambda i: (0, 0)),
            ],
            out_specs=pl.BlockSpec((tm, E), lambda i: (i, 0)),
            out_shape=out_shape,
            compiler_params=pltpu.CompilerParams(dimension_semantics=("parallel",)),
        )(*args)
    else:
        # single TensorCore (v5e/v6e): one grid step, no pipeline overhead
        out2d = pl.pallas_call(ffn_kernel, out_shape=out_shape)(*args)
    return out2d.reshape(R, C, E)


# ----------------------------------------------------------------------------
# Model glue
# ----------------------------------------------------------------------------
def grn_transformer_forward(x, prep):
    x, attn = performer_block(x, prep["gene"], mean_qk=False)
    x = jnp.swapaxes(x, 0, 1)
    x, _ = performer_block(x, prep["cell"], mean_qk=True)
    x = jnp.swapaxes(x, 0, 1)
    x = ffn_block(x, prep["ffn"])
    return x, attn


# ----------------------------------------------------------------------------
# Deterministic parameter initialization (mirrors the torch module's init)
# ----------------------------------------------------------------------------
def gaussian_orthogonal_random_matrix(key, nb_rows, nb_cols):
    nb_full_blocks = nb_rows // nb_cols
    keys = jax.random.split(key, nb_full_blocks + 2)
    blocks = []
    for i in range(nb_full_blocks):
        u = jax.random.normal(keys[i], (nb_cols, nb_cols), jnp.float32)
        q, _ = jnp.linalg.qr(u)
        blocks.append(q.T)
    remaining = nb_rows - nb_full_blocks * nb_cols
    if remaining > 0:
        u = jax.random.normal(keys[nb_full_blocks], (nb_cols, nb_cols), jnp.float32)
        q, _ = jnp.linalg.qr(u)
        blocks.append(q.T[:remaining])
    final = jnp.concatenate(blocks, axis=0)
    multiplier = jnp.linalg.norm(
        jax.random.normal(keys[-1], (nb_rows, nb_cols), jnp.float32), axis=1)
    return multiplier[:, None] * final     # (nb_rows, nb_cols)


def init_linear(key, in_dim, out_dim):
    k1, k2 = jax.random.split(key)
    bound = 1.0 / math.sqrt(in_dim)
    w = jax.random.uniform(k1, (in_dim, out_dim), jnp.float32, -bound, bound)
    b = jax.random.uniform(k2, (1, out_dim), jnp.float32, -bound, bound)
    return w, b


def make_params(key, E, H, ffn_dim):
    Dh = E // H
    keys = jax.random.split(key, 10)

    def attn_params(ks):
        wq, bq = init_linear(ks[0], E, E)
        wk, bk = init_linear(ks[1], E, E)
        wv, bv = init_linear(ks[2], E, E)
        proj = gaussian_orthogonal_random_matrix(ks[3], E, Dh)   # (F=E, Dh)
        return dict(num_heads=H, wq=wq, bq=bq, wk=wk, bk=bk, wv=wv, bv=bv,
                    projT=jnp.asarray(proj.T),                   # (Dh, F)
                    ln_g=jnp.ones((1, E), jnp.float32),
                    ln_b=jnp.zeros((1, E), jnp.float32))

    gene = attn_params(keys[0:4])
    cell = attn_params(keys[4:8])
    w1, b1 = init_linear(keys[8], E, ffn_dim)
    w2, b2 = init_linear(keys[9], ffn_dim, E)
    ffn = dict(w1=w1, b1=b1, w2=w2, b2=b2,
               ln_g=jnp.ones((1, E), jnp.float32),
               ln_b=jnp.zeros((1, E), jnp.float32))
    return dict(gene=gene, cell=cell, ffn=ffn)


# ----------------------------------------------------------------------------
# One-time kernel-ready parameter preparation (hoisted out of the forward pass).
# The resulting pytree contains ONLY arrays (no Python ints -> jit-safe).
# ----------------------------------------------------------------------------
def prepare_params(raw):
    def prep_attn(p):
        E = p["wq"].shape[0]
        Dh, F = p["projT"].shape
        H = E // Dh
        dn = float(Dh) ** -0.25
        eye_h = jnp.eye(H, dtype=jnp.float32)
        wfeat = jnp.kron(eye_h, dn * p["projT"])                      # (E, H*F)
        # Fold the random-feature projection into the QKV weight (review #2):
        # column order = [qdash | kdash | q | k | v].
        w_fused = jnp.concatenate(
            [p["wq"] @ wfeat, p["wk"] @ wfeat, p["wq"], p["wk"], p["wv"]], axis=1)
        b_fused = jnp.concatenate(
            [p["bq"] @ wfeat, p["bk"] @ wfeat, p["bq"], p["bk"], p["bv"]], axis=1)
        blk = jnp.kron(eye_h, jnp.ones((Dh, F), jnp.float32))         # (E, H*F)
        zeros = jnp.zeros_like(blk)
        diag_ind = (0.5 * dn * dn) * jnp.concatenate(
            [jnp.concatenate([blk, zeros], axis=1),
             jnp.concatenate([zeros, blk], axis=1)], axis=0)          # (2E, 2HF)
        head_bcast = jnp.kron(eye_h, jnp.ones((1, F), jnp.float32))   # (H, HF)
        sum_ind = jnp.kron(eye_h, jnp.ones((F, 1), jnp.float32))      # (HF, H)
        return dict(ln_g=p["ln_g"], ln_b=p["ln_b"],
                    w_fused=w_fused, b_fused=b_fused, diag_ind=diag_ind,
                    head_bcast=head_bcast, sum_ind=sum_ind)

    f = raw["ffn"]
    ffn = dict(ln_g=f["ln_g"], ln_b=f["ln_b"],
               w1=f["w1"].astype(jnp.bfloat16), b1=f["b1"],
               w2=f["w2"].astype(jnp.bfloat16), b2=f["b2"])
    return dict(gene=prep_attn(raw["gene"]), cell=prep_attn(raw["cell"]), ffn=ffn)


# ----------------------------------------------------------------------------
# Pure-JAX reference (direct translation of the torch forward) for sanity check
# ----------------------------------------------------------------------------
def _ref_ln(x, g, b):
    mu = jnp.mean(x, -1, keepdims=True)
    var = jnp.mean((x - mu) ** 2, -1, keepdims=True)
    return (x - mu) / jnp.sqrt(var + LN_EPS) * g + b


def _ref_performer_block(x, p, mean_qk):
    R, C, E = x.shape
    H = p["num_heads"]
    Dh = E // H
    proj = p["projT"].T                               # (F, Dh), like the torch buffer
    xn = _ref_ln(x, p["ln_g"], p["ln_b"])

    def lin(w, b):
        return xn.reshape(-1, E) @ w + b

    q = lin(p["wq"], p["bq"]).reshape(R, C, H, Dh).transpose(0, 2, 1, 3)
    k = lin(p["wk"], p["bk"]).reshape(R, C, H, Dh).transpose(0, 2, 1, 3)
    v = lin(p["wv"], p["bv"]).reshape(R, C, H, Dh).transpose(0, 2, 1, 3)

    dn = Dh ** -0.25
    ratio = proj.shape[0] ** -0.5

    def feat(d, is_query):
        dd = jnp.einsum('rhid,jd->rhij', dn * d, proj)
        diag = (jnp.sum(d ** 2, -1) / 2.0 * dn ** 2)[..., None]
        if is_query:
            m = jnp.max(dd, axis=-1, keepdims=True)
        else:
            m = jnp.max(dd, axis=(-1, -2), keepdims=True)
        return ratio * (jnp.exp(dd - diag - m) + KERNEL_EPS)

    qf, kf = feat(q, True), feat(k, False)
    if mean_qk:
        qh, kh = qf.mean(0), kf.mean(0)
    else:
        qh = qf.transpose(1, 2, 0, 3).reshape(H, C, -1)
        kh = kf.transpose(1, 2, 0, 3).reshape(H, C, -1)
    vh = v.transpose(1, 2, 0, 3).reshape(H, C, -1)

    k_cumsum = kh.sum(-2)
    d_inv = 1.0 / jnp.einsum('hnd,hd->hn', qh, k_cumsum)
    context = jnp.einsum('hnd,hne->hde', kh, vh)
    out = jnp.einsum('hde,hnd,hn->hne', context, qh, d_inv)
    out = out.reshape(H, C, R, Dh).transpose(2, 1, 0, 3).reshape(R, C, E)
    attn = jnp.einsum('hqf,hkf->hqk', qh, kh)
    return x + out, attn


def reference_forward(x, params):
    x, attn = _ref_performer_block(x, params["gene"], False)
    x = jnp.swapaxes(x, 0, 1)
    x, _ = _ref_performer_block(x, params["cell"], True)
    x = jnp.swapaxes(x, 0, 1)
    p = params["ffn"]
    xn = _ref_ln(x, p["ln_g"], p["ln_b"])
    h = jax.nn.gelu(xn @ p["w1"] + p["b1"], approximate=True)
    x = x + (h @ p["w2"] + p["b2"])
    return x, attn


# ----------------------------------------------------------------------------
if __name__ == "__main__":
    R, C, E, H, FFN = 8, 16, 32, 4, 32   # rows=8, cols=16, embed=32, heads=4
    key = jax.random.PRNGKey(0)
    kx, kp = jax.random.split(key)
    x = jax.random.normal(kx, (R, C, E), jnp.float32)
    raw_params = make_params(kp, E, H, FFN)
    prep = prepare_params(raw_params)     # one-time weight prep (review #8)

    fwd = jax.jit(grn_transformer_forward)
    out, attn = jax.block_until_ready(fwd(x, prep))
    assert out.shape == (R, C, E) and attn.shape == (H, C, C)

    ref_out, ref_attn = reference_forward(x, raw_params)
    err_o = float(jnp.max(jnp.abs(out - ref_out)) / (jnp.max(jnp.abs(ref_out)) + 1e-6))
    err_a = float(jnp.max(jnp.abs(attn - ref_attn)) / (jnp.max(jnp.abs(ref_attn)) + 1e-6))
    # Performer/attn path is full f32 (tight); FFN uses bf16 weights (looser).
    assert err_o < 1e-2 and err_a < 1e-3, (err_o, err_a)

    print("KERNEL_OK")
</pallas_src>

<mosaic_0001>
module attributes {stable_mosaic.version = 11 : i64} {
  func.func @performer_block_kernel(%arg0: memref<128x32xf32, #tpu.memory_space<vmem>>, %arg1: memref<1x32xf32, #tpu.memory_space<vmem>>, %arg2: memref<1x32xf32, #tpu.memory_space<vmem>>, %arg3: memref<32x352xf32, #tpu.memory_space<vmem>>, %arg4: memref<1x352xf32, #tpu.memory_space<vmem>>, %arg5: memref<64x256xf32, #tpu.memory_space<vmem>>, %arg6: memref<4x128xf32, #tpu.memory_space<vmem>>, %arg7: memref<128x4xf32, #tpu.memory_space<vmem>>, %arg8: memref<128x32xf32, #tpu.memory_space<vmem>>, %arg9: memref<16x64xf32, #tpu.memory_space<vmem>>) attributes {dimension_semantics = [], scalar_prefetch = 0 : i64, scratch_operands = 0 : i64, tpu.core_type = #tpu.core_type<tc>} {
    %c0 = arith.constant 0 : index
    %c0_0 = arith.constant 0 : index
    %0 = vector.load %arg0[%c0, %c0_0] : memref<128x32xf32, #tpu.memory_space<vmem>>, vector<128x32xf32>
    %c0_1 = arith.constant 0 : index
    %c0_2 = arith.constant 0 : index
    %1 = vector.load %arg1[%c0_1, %c0_2] : memref<1x32xf32, #tpu.memory_space<vmem>>, vector<1x32xf32>
    %c0_3 = arith.constant 0 : index
    %c0_4 = arith.constant 0 : index
    %2 = vector.load %arg2[%c0_3, %c0_4] : memref<1x32xf32, #tpu.memory_space<vmem>>, vector<1x32xf32>
    %cst = arith.constant dense<0.000000e+00> : vector<128xf32>
    %3 = vector.multi_reduction <add>, %0, %cst [1] : vector<128x32xf32> to vector<128xf32>
    %4 = vector.shape_cast %3 : vector<128xf32> to vector<128x1xf32>
    %cst_5 = arith.constant 3.200000e+01 : f32
    %5 = vector.broadcast %cst_5 : f32 to vector<128x1xf32>
    %6 = arith.divf %4, %5 : vector<128x1xf32>
    %7 = vector.broadcast %6 : vector<128x1xf32> to vector<128x32xf32>
    %8 = arith.subf %0, %7 : vector<128x32xf32>
    %9 = arith.mulf %8, %8 : vector<128x32xf32>
    %cst_6 = arith.constant dense<0.000000e+00> : vector<128xf32>
    %10 = vector.multi_reduction <add>, %9, %cst_6 [1] : vector<128x32xf32> to vector<128xf32>
    %11 = vector.shape_cast %10 : vector<128xf32> to vector<128x1xf32>
    %cst_7 = arith.constant 3.200000e+01 : f32
    %12 = vector.broadcast %cst_7 : f32 to vector<128x1xf32>
    %13 = arith.divf %11, %12 : vector<128x1xf32>
    %14 = vector.broadcast %6 : vector<128x1xf32> to vector<128x32xf32>
    %15 = arith.subf %0, %14 : vector<128x32xf32>
    %cst_8 = arith.constant 9.99999974E-6 : f32
    %16 = vector.broadcast %cst_8 : f32 to vector<128x1xf32>
    %17 = arith.addf %13, %16 : vector<128x1xf32>
    %18 = math.rsqrt %17 : vector<128x1xf32>
    %19 = vector.broadcast %18 : vector<128x1xf32> to vector<128x32xf32>
    %20 = arith.mulf %15, %19 : vector<128x32xf32>
    %21 = vector.broadcast %1 : vector<1x32xf32> to vector<128x32xf32>
    %22 = arith.mulf %20, %21 : vector<128x32xf32>
    %23 = vector.broadcast %2 : vector<1x32xf32> to vector<128x32xf32>
    %24 = arith.addf %22, %23 : vector<128x32xf32>
    %c0_9 = arith.constant 0 : index
    %c0_10 = arith.constant 0 : index
    %25 = vector.load %arg3[%c0_9, %c0_10] : memref<32x352xf32, #tpu.memory_space<vmem>>, vector<32x352xf32>
    %cst_11 = arith.constant dense<0.000000e+00> : vector<128x352xf32>
    %26 = tpu.matmul %24, %25, %cst_11 {dimension_numbers = #tpu.dot_dimension_numbers<[1], [0], [0], [1], [0, 0, 1, 1], [], []>} : vector<128x32xf32>, vector<32x352xf32>, vector<128x352xf32> -> vector<128x352xf32>
    %c0_12 = arith.constant 0 : index
    %c0_13 = arith.constant 0 : index
    %27 = vector.load %arg4[%c0_12, %c0_13] : memref<1x352xf32, #tpu.memory_space<vmem>>, vector<1x352xf32>
    %28 = vector.broadcast %27 : vector<1x352xf32> to vector<128x352xf32>
    %29 = arith.addf %26, %28 : vector<128x352xf32>
    %30 = vector.extract_strided_slice %29 {offsets = [0, 0], sizes = [128, 128], strides = [1, 1]} : vector<128x352xf32> to vector<128x128xf32>
    %31 = vector.extract_strided_slice %29 {offsets = [0, 128], sizes = [128, 128], strides = [1, 1]} : vector<128x352xf32> to vector<128x128xf32>
    %32 = vector.extract_strided_slice %29 {offsets = [0, 256], sizes = [128, 64], strides = [1, 1]} : vector<128x352xf32> to vector<128x64xf32>
    %33 = vector.extract_strided_slice %29 {offsets = [0, 320], sizes = [128, 32], strides = [1, 1]} : vector<128x352xf32> to vector<128x32xf32>
    %34 = arith.mulf %32, %32 : vector<128x64xf32>
    %c0_14 = arith.constant 0 : index
    %c0_15 = arith.constant 0 : index
    %35 = vector.load %arg5[%c0_14, %c0_15] : memref<64x256xf32, #tpu.memory_space<vmem>>, vector<64x256xf32>
    %cst_16 = arith.constant dense<0.000000e+00> : vector<128x256xf32>
    %36 = tpu.matmul %34, %35, %cst_16 {dimension_numbers = #tpu.dot_dimension_numbers<[1], [0], [0], [1], [0, 0, 1, 1], [], []>} : vector<128x64xf32>, vector<64x256xf32>, vector<128x256xf32> -> vector<128x256xf32>
    %37 = vector.extract_strided_slice %36 {offsets = [0, 0], sizes = [128, 128], strides = [1, 1]} : vector<128x256xf32> to vector<128x128xf32>
    %38 = vector.extract_strided_slice %36 {offsets = [0, 128], sizes = [128, 128], strides = [1, 1]} : vector<128x256xf32> to vector<128x128xf32>
    %39 = vector.extract_strided_slice %30 {offsets = [0, 0], sizes = [128, 32], strides = [1, 1]} : vector<128x128xf32> to vector<128x32xf32>
    %cst_17 = arith.constant dense<0xFF800000> : vector<128xf32>
    %40 = vector.multi_reduction <maximumf>, %39, %cst_17 [1] : vector<128x32xf32> to vector<128xf32>
    %41 = vector.shape_cast %40 : vector<128xf32> to vector<128x1xf32>
    %42 = vector.extract_strided_slice %31 {offsets = [0, 0], sizes = [128, 32], strides = [1, 1]} : vector<128x128xf32> to vector<128x32xf32>
    %cst_18 = arith.constant dense<0xFF800000> : vector<128xf32>
    %43 = vector.multi_reduction <maximumf>, %42, %cst_18 [1] : vector<128x32xf32> to vector<128xf32>
    %44 = vector.shape_cast %43 : vector<128xf32> to vector<128x1xf32>
    %45 = vector.extract_strided_slice %30 {offsets = [0, 32], sizes = [128, 32], strides = [1, 1]} : vector<128x128xf32> to vector<128x32xf32>
    %cst_19 = arith.constant dense<0xFF800000> : vector<128xf32>
    %46 = vector.multi_reduction <maximumf>, %45, %cst_19 [1] : vector<128x32xf32> to vector<128xf32>
    %47 = vector.shape_cast %46 : vector<128xf32> to vector<128x1xf32>
    %48 = vector.extract_strided_slice %31 {offsets = [0, 32], sizes = [128, 32], strides = [1, 1]} : vector<128x128xf32> to vector<128x32xf32>
    %cst_20 = arith.constant dense<0xFF800000> : vector<128xf32>
    %49 = vector.multi_reduction <maximumf>, %48, %cst_20 [1] : vector<128x32xf32> to vector<128xf32>
    %50 = vector.shape_cast %49 : vector<128xf32> to vector<128x1xf32>
    %51 = vector.extract_strided_slice %30 {offsets = [0, 64], sizes = [128, 32], strides = [1, 1]} : vector<128x128xf32> to vector<128x32xf32>
    %cst_21 = arith.constant dense<0xFF800000> : vector<128xf32>
    %52 = vector.multi_reduction <maximumf>, %51, %cst_21 [1] : vector<128x32xf32> to vector<128xf32>
    %53 = vector.shape_cast %52 : vector<128xf32> to vector<128x1xf32>
    %54 = vector.extract_strided_slice %31 {offsets = [0, 64], sizes = [128, 32], strides = [1, 1]} : vector<128x128xf32> to vector<128x32xf32>
    %cst_22 = arith.constant dense<0xFF800000> : vector<128xf32>
    %55 = vector.multi_reduction <maximumf>, %54, %cst_22 [1] : vector<128x32xf32> to vector<128xf32>
    %56 = vector.shape_cast %55 : vector<128xf32> to vector<128x1xf32>
    %57 = vector.extract_strided_slice %30 {offsets = [0, 96], sizes = [128, 32], strides = [1, 1]} : vector<128x128xf32> to vector<128x32xf32>
    %cst_23 = arith.constant dense<0xFF800000> : vector<128xf32>
    %58 = vector.multi_reduction <maximumf>, %57, %cst_23 [1] : vector<128x32xf32> to vector<128xf32>
    %59 = vector.shape_cast %58 : vector<128xf32> to vector<128x1xf32>
    %60 = vector.extract_strided_slice %31 {offsets = [0, 96], sizes = [128, 32], strides = [1, 1]} : vector<128x128xf32> to vector<128x32xf32>
    %cst_24 = arith.constant dense<0xFF800000> : vector<128xf32>
    %61 = vector.multi_reduction <maximumf>, %60, %cst_24 [1] : vector<128x32xf32> to vector<128xf32>
    %62 = vector.shape_cast %61 : vector<128xf32> to vector<128x1xf32>
    %63 = tpu.concatenate %41, %47, %53, %59 in 1 : vector<128x1xf32>, vector<128x1xf32>, vector<128x1xf32>, vector<128x1xf32> -> vector<128x4xf32>
    %64 = tpu.concatenate %44, %50, %56, %62 in 1 : vector<128x1xf32>, vector<128x1xf32>, vector<128x1xf32>, vector<128x1xf32> -> vector<128x4xf32>
    %65 = vector.shape_cast %64 : vector<128x4xf32> to vector<8x16x4xf32>
    %cst_25 = arith.constant dense<0xFF800000> : vector<8x4xf32>
    %66 = vector.multi_reduction <maximumf>, %65, %cst_25 [1] : vector<8x16x4xf32> to vector<8x4xf32>
    %67 = vector.shape_cast %66 : vector<8x4xf32> to vector<8x1x4xf32>
    %68 = vector.shape_cast %67 : vector<8x1x4xf32> to vector<8x1x4xf32>
    %69 = vector.broadcast %68 : vector<8x1x4xf32> to vector<8x16x4xf32>
    %70 = vector.shape_cast %69 : vector<8x16x4xf32> to vector<128x4xf32>
    %c0_26 = arith.constant 0 : index
    %c0_27 = arith.constant 0 : index
    %71 = vector.load %arg6[%c0_26, %c0_27] : memref<4x128xf32, #tpu.memory_space<vmem>>, vector<4x128xf32>
    %cst_28 = arith.constant dense<0.000000e+00> : vector<128x128xf32>
    %72 = tpu.matmul %63, %71, %cst_28 {dimension_numbers = #tpu.dot_dimension_numbers<[1], [0], [0], [1], [0, 0, 1, 1], [], []>} : vector<128x4xf32>, vector<4x128xf32>, vector<128x128xf32> -> vector<128x128xf32>
    %c0_29 = arith.constant 0 : index
    %c0_30 = arith.constant 0 : index
    %73 = vector.load %arg6[%c0_29, %c0_30] : memref<4x128xf32, #tpu.memory_space<vmem>>, vector<4x128xf32>
    %cst_31 = arith.constant dense<0.000000e+00> : vector<128x128xf32>
    %74 = tpu.matmul %70, %73, %cst_31 {dimension_numbers = #tpu.dot_dimension_numbers<[1], [0], [0], [1], [0, 0, 1, 1], [], []>} : vector<128x4xf32>, vector<4x128xf32>, vector<128x128xf32> -> vector<128x128xf32>
    %75 = arith.subf %30, %37 : vector<128x128xf32>
    %76 = arith.subf %75, %72 : vector<128x128xf32>
    %77 = math.exp %76 : vector<128x128xf32>
    %cst_32 = arith.constant 9.99999974E-5 : f32
    %78 = vector.broadcast %cst_32 : f32 to vector<128x128xf32>
    %79 = arith.addf %77, %78 : vector<128x128xf32>
    %cst_33 = arith.constant 0.176776692 : f32
    %80 = vector.broadcast %cst_33 : f32 to vector<128x128xf32>
    %81 = arith.mulf %80, %79 : vector<128x128xf32>
    %82 = arith.subf %31, %38 : vector<128x128xf32>
    %83 = arith.subf %82, %74 : vector<128x128xf32>
    %84 = math.exp %83 : vector<128x128xf32>
    %cst_34 = arith.constant 9.99999974E-5 : f32
    %85 = vector.broadcast %cst_34 : f32 to vector<128x128xf32>
    %86 = arith.addf %84, %85 : vector<128x128xf32>
    %cst_35 = arith.constant 0.176776692 : f32
    %87 = vector.broadcast %cst_35 : f32 to vector<128x128xf32>
    %88 = arith.mulf %87, %86 : vector<128x128xf32>
    %89 = vector.shape_cast %88 : vector<128x128xf32> to vector<8x16x128xf32>
    %cst_36 = arith.constant dense<0.000000e+00> : vector<8x128xf32>
    %90 = vector.multi_reduction <add>, %89, %cst_36 [1] : vector<8x16x128xf32> to vector<8x128xf32>
    %91 = vector.shape_cast %90 : vector<8x128xf32> to vector<8x1x128xf32>
    %92 = vector.shape_cast %91 : vector<8x1x128xf32> to vector<8x1x128xf32>
    %93 = vector.broadcast %92 : vector<8x1x128xf32> to vector<8x16x128xf32>
    %94 = vector.shape_cast %93 : vector<8x16x128xf32> to vector<128x128xf32>
    %95 = arith.mulf %81, %94 : vector<128x128xf32>
    %c0_37 = arith.constant 0 : index
    %c0_38 = arith.constant 0 : index
    %96 = vector.load %arg7[%c0_37, %c0_38] : memref<128x4xf32, #tpu.memory_space<vmem>>, vector<128x4xf32>
    %cst_39 = arith.constant dense<0.000000e+00> : vector<128x4xf32>
    %97 = tpu.matmul %95, %96, %cst_39 {dimension_numbers = #tpu.dot_dimension_numbers<[1], [0], [0], [1], [0, 0, 1, 1], [], []>} : vector<128x128xf32>, vector<128x4xf32>, vector<128x4xf32> -> vector<128x4xf32>
    %98 = vector.shape_cast %97 : vector<128x4xf32> to vector<8x16x4xf32>
    %cst_40 = arith.constant dense<0.000000e+00> : vector<16x4xf32>
    %99 = vector.multi_reduction <add>, %98, %cst_40 [0] : vector<8x16x4xf32> to vector<16x4xf32>
    %cst_41 = arith.constant 1.000000e+00 : f32
    %100 = vector.broadcast %cst_41 : f32 to vector<16x4xf32>
    %101 = arith.divf %100, %99 : vector<16x4xf32>
    %102 = vector.extract_strided_slice %81 {offsets = [0, 0], sizes = [128, 32], strides = [1, 1]} : vector<128x128xf32> to vector<128x32xf32>
    %103 = vector.shape_cast %102 : vector<128x32xf32> to vector<8x16x32xf32>
    %104 = vector.extract_strided_slice %88 {offsets = [0, 0], sizes = [128, 32], strides = [1, 1]} : vector<128x128xf32> to vector<128x32xf32>
    %105 = vector.shape_cast %104 : vector<128x32xf32> to vector<8x16x32xf32>
    %cst_42 = arith.constant dense<0.000000e+00> : vector<8x16x16xf32>
    %106 = tpu.matmul %103, %105, %cst_42 {dimension_numbers = #tpu.dot_dimension_numbers<[2], [2], [1], [1], [0, 0, 0, 1, 1, 1], [0], [0]>} : vector<8x16x32xf32>, vector<8x16x32xf32>, vector<8x16x16xf32> -> vector<8x16x16xf32>
    %cst_43 = arith.constant dense<0.000000e+00> : vector<16x16xf32>
    %107 = vector.multi_reduction <add>, %106, %cst_43 [0] : vector<8x16x16xf32> to vector<16x16xf32>
    %108 = vector.extract_strided_slice %33 {offsets = [0, 0], sizes = [128, 8], strides = [1, 1]} : vector<128x32xf32> to vector<128x8xf32>
    %109 = vector.shape_cast %108 : vector<128x8xf32> to vector<8x16x8xf32>
    %110 = vector.shape_cast %107 : vector<16x16xf32> to vector<1x16x16xf32>
    %111 = vector.shape_cast %110 : vector<1x16x16xf32> to vector<1x16x16xf32>
    %112 = vector.broadcast %111 : vector<1x16x16xf32> to vector<8x16x16xf32>
    %cst_44 = arith.constant dense<0.000000e+00> : vector<8x16x8xf32>
    %113 = tpu.matmul %112, %109, %cst_44 {dimension_numbers = #tpu.dot_dimension_numbers<[2], [1], [1], [2], [0, 0, 0, 1, 1, 2], [0], [0]>} : vector<8x16x16xf32>, vector<8x16x8xf32>, vector<8x16x8xf32> -> vector<8x16x8xf32>
    %114 = vector.extract_strided_slice %101 {offsets = [0, 0], sizes = [16, 1], strides = [1, 1]} : vector<16x4xf32> to vector<16x1xf32>
    %115 = vector.shape_cast %114 : vector<16x1xf32> to vector<1x16x1xf32>
    %116 = vector.broadcast %115 : vector<1x16x1xf32> to vector<8x16x8xf32>
    %117 = arith.mulf %113, %116 : vector<8x16x8xf32>
    %118 = vector.extract_strided_slice %81 {offsets = [0, 32], sizes = [128, 32], strides = [1, 1]} : vector<128x128xf32> to vector<128x32xf32>
    %119 = vector.shape_cast %118 : vector<128x32xf32> to vector<8x16x32xf32>
    %120 = vector.extract_strided_slice %88 {offsets = [0, 32], sizes = [128, 32], strides = [1, 1]} : vector<128x128xf32> to vector<128x32xf32>
    %121 = vector.shape_cast %120 : vector<128x32xf32> to vector<8x16x32xf32>
    %cst_45 = arith.constant dense<0.000000e+00> : vector<8x16x16xf32>
    %122 = tpu.matmul %119, %121, %cst_45 {dimension_numbers = #tpu.dot_dimension_numbers<[2], [2], [1], [1], [0, 0, 0, 1, 1, 1], [0], [0]>} : vector<8x16x32xf32>, vector<8x16x32xf32>, vector<8x16x16xf32> -> vector<8x16x16xf32>
    %cst_46 = arith.constant dense<0.000000e+00> : vector<16x16xf32>
    %123 = vector.multi_reduction <add>, %122, %cst_46 [0] : vector<8x16x16xf32> to vector<16x16xf32>
    %124 = vector.extract_strided_slice %33 {offsets = [0, 8], sizes = [128, 8], strides = [1, 1]} : vector<128x32xf32> to vector<128x8xf32>
    %125 = vector.shape_cast %124 : vector<128x8xf32> to vector<8x16x8xf32>
    %126 = vector.shape_cast %123 : vector<16x16xf32> to vector<1x16x16xf32>
    %127 = vector.shape_cast %126 : vector<1x16x16xf32> to vector<1x16x16xf32>
    %128 = vector.broadcast %127 : vector<1x16x16xf32> to vector<8x16x16xf32>
    %cst_47 = arith.constant dense<0.000000e+00> : vector<8x16x8xf32>
    %129 = tpu.matmul %128, %125, %cst_47 {dimension_numbers = #tpu.dot_dimension_numbers<[2], [1], [1], [2], [0, 0, 0, 1, 1, 2], [0], [0]>} : vector<8x16x16xf32>, vector<8x16x8xf32>, vector<8x16x8xf32> -> vector<8x16x8xf32>
    %130 = vector.extract_strided_slice %101 {offsets = [0, 1], sizes = [16, 1], strides = [1, 1]} : vector<16x4xf32> to vector<16x1xf32>
    %131 = vector.shape_cast %130 : vector<16x1xf32> to vector<1x16x1xf32>
    %132 = vector.broadcast %131 : vector<1x16x1xf32> to vector<8x16x8xf32>
    %133 = arith.mulf %129, %132 : vector<8x16x8xf32>
    %134 = vector.extract_strided_slice %81 {offsets = [0, 64], sizes = [128, 32], strides = [1, 1]} : vector<128x128xf32> to vector<128x32xf32>
    %135 = vector.shape_cast %134 : vector<128x32xf32> to vector<8x16x32xf32>
    %136 = vector.extract_strided_slice %88 {offsets = [0, 64], sizes = [128, 32], strides = [1, 1]} : vector<128x128xf32> to vector<128x32xf32>
    %137 = vector.shape_cast %136 : vector<128x32xf32> to vector<8x16x32xf32>
    %cst_48 = arith.constant dense<0.000000e+00> : vector<8x16x16xf32>
    %138 = tpu.matmul %135, %137, %cst_48 {dimension_numbers = #tpu.dot_dimension_numbers<[2], [2], [1], [1], [0, 0, 0, 1, 1, 1], [0], [0]>} : vector<8x16x32xf32>, vector<8x16x32xf32>, vector<8x16x16xf32> -> vector<8x16x16xf32>
    %cst_49 = arith.constant dense<0.000000e+00> : vector<16x16xf32>
    %139 = vector.multi_reduction <add>, %138, %cst_49 [0] : vector<8x16x16xf32> to vector<16x16xf32>
    %140 = vector.extract_strided_slice %33 {offsets = [0, 16], sizes = [128, 8], strides = [1, 1]} : vector<128x32xf32> to vector<128x8xf32>
    %141 = vector.shape_cast %140 : vector<128x8xf32> to vector<8x16x8xf32>
    %142 = vector.shape_cast %139 : vector<16x16xf32> to vector<1x16x16xf32>
    %143 = vector.shape_cast %142 : vector<1x16x16xf32> to vector<1x16x16xf32>
    %144 = vector.broadcast %143 : vector<1x16x16xf32> to vector<8x16x16xf32>
    %cst_50 = arith.constant dense<0.000000e+00> : vector<8x16x8xf32>
    %145 = tpu.matmul %144, %141, %cst_50 {dimension_numbers = #tpu.dot_dimension_numbers<[2], [1], [1], [2], [0, 0, 0, 1, 1, 2], [0], [0]>} : vector<8x16x16xf32>, vector<8x16x8xf32>, vector<8x16x8xf32> -> vector<8x16x8xf32>
    %146 = vector.extract_strided_slice %101 {offsets = [0, 2], sizes = [16, 1], strides = [1, 1]} : vector<16x4xf32> to vector<16x1xf32>
    %147 = vector.shape_cast %146 : vector<16x1xf32> to vector<1x16x1xf32>
    %148 = vector.broadcast %147 : vector<1x16x1xf32> to vector<8x16x8xf32>
    %149 = arith.mulf %145, %148 : vector<8x16x8xf32>
    %150 = vector.extract_strided_slice %81 {offsets = [0, 96], sizes = [128, 32], strides = [1, 1]} : vector<128x128xf32> to vector<128x32xf32>
    %151 = vector.shape_cast %150 : vector<128x32xf32> to vector<8x16x32xf32>
    %152 = vector.extract_strided_slice %88 {offsets = [0, 96], sizes = [128, 32], strides = [1, 1]} : vector<128x128xf32> to vector<128x32xf32>
    %153 = vector.shape_cast %152 : vector<128x32xf32> to vector<8x16x32xf32>
    %cst_51 = arith.constant dense<0.000000e+00> : vector<8x16x16xf32>
    %154 = tpu.matmul %151, %153, %cst_51 {dimension_numbers = #tpu.dot_dimension_numbers<[2], [2], [1], [1], [0, 0, 0, 1, 1, 1], [0], [0]>} : vector<8x16x32xf32>, vector<8x16x32xf32>, vector<8x16x16xf32> -> vector<8x16x16xf32>
    %cst_52 = arith.constant dense<0.000000e+00> : vector<16x16xf32>
    %155 = vector.multi_reduction <add>, %154, %cst_52 [0] : vector<8x16x16xf32> to vector<16x16xf32>
    %156 = vector.extract_strided_slice %33 {offsets = [0, 24], sizes = [128, 8], strides = [1, 1]} : vector<128x32xf32> to vector<128x8xf32>
    %157 = vector.shape_cast %156 : vector<128x8xf32> to vector<8x16x8xf32>
    %158 = vector.shape_cast %155 : vector<16x16xf32> to vector<1x16x16xf32>
    %159 = vector.shape_cast %158 : vector<1x16x16xf32> to vector<1x16x16xf32>
    %160 = vector.broadcast %159 : vector<1x16x16xf32> to vector<8x16x16xf32>
    %cst_53 = arith.constant dense<0.000000e+00> : vector<8x16x8xf32>
    %161 = tpu.matmul %160, %157, %cst_53 {dimension_numbers = #tpu.dot_dimension_numbers<[2], [1], [1], [2], [0, 0, 0, 1, 1, 2], [0], [0]>} : vector<8x16x16xf32>, vector<8x16x8xf32>, vector<8x16x8xf32> -> vector<8x16x8xf32>
    %162 = vector.extract_strided_slice %101 {offsets = [0, 3], sizes = [16, 1], strides = [1, 1]} : vector<16x4xf32> to vector<16x1xf32>
    %163 = vector.shape_cast %162 : vector<16x1xf32> to vector<1x16x1xf32>
    %164 = vector.broadcast %163 : vector<1x16x1xf32> to vector<8x16x8xf32>
    %165 = arith.mulf %161, %164 : vector<8x16x8xf32>
    %166 = tpu.concatenate %117, %133, %149, %165 in 2 : vector<8x16x8xf32>, vector<8x16x8xf32>, vector<8x16x8xf32>, vector<8x16x8xf32> -> vector<8x16x32xf32>
    %167 = vector.shape_cast %166 : vector<8x16x32xf32> to vector<128x32xf32>
    %168 = arith.addf %0, %167 : vector<128x32xf32>
    %c0_54 = arith.constant 0 : index
    %c0_55 = arith.constant 0 : index
    %169 = vector.load %arg8[%c0_54, %c0_55] : memref<128x32xf32, #tpu.memory_space<vmem>>, vector<128x32xf32>
    tpu.vector_store %arg8[%c0_54, %c0_55], %168 {strides = array<i32>} : memref<128x32xf32, #tpu.memory_space<vmem>>, vector<128x32xf32>,
    %170 = tpu.concatenate %107, %123, %139, %155 in 1 : vector<16x16xf32>, vector<16x16xf32>, vector<16x16xf32>, vector<16x16xf32> -> vector<16x64xf32>
    %c0_56 = arith.constant 0 : index
    %c0_57 = arith.constant 0 : index
    %171 = vector.load %arg9[%c0_56, %c0_57] : memref<16x64xf32, #tpu.memory_space<vmem>>, vector<16x64xf32>
    tpu.vector_store %arg9[%c0_56, %c0_57], %170 {strides = array<i32>} : memref<16x64xf32, #tpu.memory_space<vmem>>, vector<16x64xf32>,
    return
  }
}

module attributes {stable_mosaic.version = 11 : i64} {
  func.func @performer_block_kernel(%arg0: memref<128x32xf32, #tpu.memory_space<vmem>>, %arg1: memref<1x32xf32, #tpu.memory_space<vmem>>, %arg2: memref<1x32xf32, #tpu.memory_space<vmem>>, %arg3: memref<32x352xf32, #tpu.memory_space<vmem>>, %arg4: memref<1x352xf32, #tpu.memory_space<vmem>>, %arg5: memref<64x256xf32, #tpu.memory_space<vmem>>, %arg6: memref<4x128xf32, #tpu.memory_space<vmem>>, %arg7: memref<128x4xf32, #tpu.memory_space<vmem>>, %arg8: memref<128x32xf32, #tpu.memory_space<vmem>>) attributes {dimension_semantics = [], scalar_prefetch = 0 : i64, scratch_operands = 0 : i64, tpu.core_type = #tpu.core_type<tc>} {
    %c0 = arith.constant 0 : index
    %c0_0 = arith.constant 0 : index
    %0 = vector.load %arg0[%c0, %c0_0] : memref<128x32xf32, #tpu.memory_space<vmem>>, vector<128x32xf32>
    %c0_1 = arith.constant 0 : index
    %c0_2 = arith.constant 0 : index
    %1 = vector.load %arg1[%c0_1, %c0_2] : memref<1x32xf32, #tpu.memory_space<vmem>>, vector<1x32xf32>
    %c0_3 = arith.constant 0 : index
    %c0_4 = arith.constant 0 : index
    %2 = vector.load %arg2[%c0_3, %c0_4] : memref<1x32xf32, #tpu.memory_space<vmem>>, vector<1x32xf32>
    %cst = arith.constant dense<0.000000e+00> : vector<128xf32>
    %3 = vector.multi_reduction <add>, %0, %cst [1] : vector<128x32xf32> to vector<128xf32>
    %4 = vector.shape_cast %3 : vector<128xf32> to vector<128x1xf32>
    %cst_5 = arith.constant 3.200000e+01 : f32
    %5 = vector.broadcast %cst_5 : f32 to vector<128x1xf32>
    %6 = arith.divf %4, %5 : vector<128x1xf32>
    %7 = vector.broadcast %6 : vector<128x1xf32> to vector<128x32xf32>
    %8 = arith.subf %0, %7 : vector<128x32xf32>
    %9 = arith.mulf %8, %8 : vector<128x32xf32>
    %cst_6 = arith.constant dense<0.000000e+00> : vector<128xf32>
    %10 = vector.multi_reduction <add>, %9, %cst_6 [1] : vector<128x32xf32> to vector<128xf32>
    %11 = vector.shape_cast %10 : vector<128xf32> to vector<128x1xf32>
    %cst_7 = arith.constant 3.200000e+01 : f32
    %12 = vector.broadcast %cst_7 : f32 to vector<128x1xf32>
    %13 = arith.divf %11, %12 : vector<128x1xf32>
    %14 = vector.broadcast %6 : vector<128x1xf32> to vector<128x32xf32>
    %15 = arith.subf %0, %14 : vector<128x32xf32>
    %cst_8 = arith.constant 9.99999974E-6 : f32
    %16 = vector.broadcast %cst_8 : f32 to vector<128x1xf32>
    %17 = arith.addf %13, %16 : vector<128x1xf32>
    %18 = math.rsqrt %17 : vector<128x1xf32>
    %19 = vector.broadcast %18 : vector<128x1xf32> to vector<128x32xf32>
    %20 = arith.mulf %15, %19 : vector<128x32xf32>
    %21 = vector.broadcast %1 : vector<1x32xf32> to vector<128x32xf32>
    %22 = arith.mulf %20, %21 : vector<128x32xf32>
    %23 = vector.broadcast %2 : vector<1x32xf32> to vector<128x32xf32>
    %24 = arith.addf %22, %23 : vector<128x32xf32>
    %c0_9 = arith.constant 0 : index
    %c0_10 = arith.constant 0 : index
    %25 = vector.load %arg3[%c0_9, %c0_10] : memref<32x352xf32, #tpu.memory_space<vmem>>, vector<32x352xf32>
    %cst_11 = arith.constant dense<0.000000e+00> : vector<128x352xf32>
    %26 = tpu.matmul %24, %25, %cst_11 {dimension_numbers = #tpu.dot_dimension_numbers<[1], [0], [0], [1], [0, 0, 1, 1], [], []>} : vector<128x32xf32>, vector<32x352xf32>, vector<128x352xf32> -> vector<128x352xf32>
    %c0_12 = arith.constant 0 : index
    %c0_13 = arith.constant 0 : index
    %27 = vector.load %arg4[%c0_12, %c0_13] : memref<1x352xf32, #tpu.memory_space<vmem>>, vector<1x352xf32>
    %28 = vector.broadcast %27 : vector<1x352xf32> to vector<128x352xf32>
    %29 = arith.addf %26, %28 : vector<128x352xf32>
    %30 = vector.extract_strided_slice %29 {offsets = [0, 0], sizes = [128, 128], strides = [1, 1]} : vector<128x352xf32> to vector<128x128xf32>
    %31 = vector.extract_strided_slice %29 {offsets = [0, 128], sizes = [128, 128], strides = [1, 1]} : vector<128x352xf32> to vector<128x128xf32>
    %32 = vector.extract_strided_slice %29 {offsets = [0, 256], sizes = [128, 64], strides = [1, 1]} : vector<128x352xf32> to vector<128x64xf32>
    %33 = vector.extract_strided_slice %29 {offsets = [0, 320], sizes = [128, 32], strides = [1, 1]} : vector<128x352xf32> to vector<128x32xf32>
    %34 = arith.mulf %32, %32 : vector<128x64xf32>
    %c0_14 = arith.constant 0 : index
    %c0_15 = arith.constant 0 : index
    %35 = vector.load %arg5[%c0_14, %c0_15] : memref<64x256xf32, #tpu.memory_space<vmem>>, vector<64x256xf32>
    %cst_16 = arith.constant dense<0.000000e+00> : vector<128x256xf32>
    %36 = tpu.matmul %34, %35, %cst_16 {dimension_numbers = #tpu.dot_dimension_numbers<[1], [0], [0], [1], [0, 0, 1, 1], [], []>} : vector<128x64xf32>, vector<64x256xf32>, vector<128x256xf32> -> vector<128x256xf32>
    %37 = vector.extract_strided_slice %36 {offsets = [0, 0], sizes = [128, 128], strides = [1, 1]} : vector<128x256xf32> to vector<128x128xf32>
    %38 = vector.extract_strided_slice %36 {offsets = [0, 128], sizes = [128, 128], strides = [1, 1]} : vector<128x256xf32> to vector<128x128xf32>
    %39 = vector.extract_strided_slice %30 {offsets = [0, 0], sizes = [128, 32], strides = [1, 1]} : vector<128x128xf32> to vector<128x32xf32>
    %cst_17 = arith.constant dense<0xFF800000> : vector<128xf32>
    %40 = vector.multi_reduction <maximumf>, %39, %cst_17 [1] : vector<128x32xf32> to vector<128xf32>
    %41 = vector.shape_cast %40 : vector<128xf32> to vector<128x1xf32>
    %42 = vector.extract_strided_slice %31 {offsets = [0, 0], sizes = [128, 32], strides = [1, 1]} : vector<128x128xf32> to vector<128x32xf32>
    %cst_18 = arith.constant dense<0xFF800000> : vector<128xf32>
    %43 = vector.multi_reduction <maximumf>, %42, %cst_18 [1] : vector<128x32xf32> to vector<128xf32>
    %44 = vector.shape_cast %43 : vector<128xf32> to vector<128x1xf32>
    %45 = vector.extract_strided_slice %30 {offsets = [0, 32], sizes = [128, 32], strides = [1, 1]} : vector<128x128xf32> to vector<128x32xf32>
    %cst_19 = arith.constant dense<0xFF800000> : vector<128xf32>
    %46 = vector.multi_reduction <maximumf>, %45, %cst_19 [1] : vector<128x32xf32> to vector<128xf32>
    %47 = vector.shape_cast %46 : vector<128xf32> to vector<128x1xf32>
    %48 = vector.extract_strided_slice %31 {offsets = [0, 32], sizes = [128, 32], strides = [1, 1]} : vector<128x128xf32> to vector<128x32xf32>
    %cst_20 = arith.constant dense<0xFF800000> : vector<128xf32>
    %49 = vector.multi_reduction <maximumf>, %48, %cst_20 [1] : vector<128x32xf32> to vector<128xf32>
    %50 = vector.shape_cast %49 : vector<128xf32> to vector<128x1xf32>
    %51 = vector.extract_strided_slice %30 {offsets = [0, 64], sizes = [128, 32], strides = [1, 1]} : vector<128x128xf32> to vector<128x32xf32>
    %cst_21 = arith.constant dense<0xFF800000> : vector<128xf32>
    %52 = vector.multi_reduction <maximumf>, %51, %cst_21 [1] : vector<128x32xf32> to vector<128xf32>
    %53 = vector.shape_cast %52 : vector<128xf32> to vector<128x1xf32>
    %54 = vector.extract_strided_slice %31 {offsets = [0, 64], sizes = [128, 32], strides = [1, 1]} : vector<128x128xf32> to vector<128x32xf32>
    %cst_22 = arith.constant dense<0xFF800000> : vector<128xf32>
    %55 = vector.multi_reduction <maximumf>, %54, %cst_22 [1] : vector<128x32xf32> to vector<128xf32>
    %56 = vector.shape_cast %55 : vector<128xf32> to vector<128x1xf32>
    %57 = vector.extract_strided_slice %30 {offsets = [0, 96], sizes = [128, 32], strides = [1, 1]} : vector<128x128xf32> to vector<128x32xf32>
    %cst_23 = arith.constant dense<0xFF800000> : vector<128xf32>
    %58 = vector.multi_reduction <maximumf>, %57, %cst_23 [1] : vector<128x32xf32> to vector<128xf32>
    %59 = vector.shape_cast %58 : vector<128xf32> to vector<128x1xf32>
    %60 = vector.extract_strided_slice %31 {offsets = [0, 96], sizes = [128, 32], strides = [1, 1]} : vector<128x128xf32> to vector<128x32xf32>
    %cst_24 = arith.constant dense<0xFF800000> : vector<128xf32>
    %61 = vector.multi_reduction <maximumf>, %60, %cst_24 [1] : vector<128x32xf32> to vector<128xf32>
    %62 = vector.shape_cast %61 : vector<128xf32> to vector<128x1xf32>
    %63 = tpu.concatenate %41, %47, %53, %59 in 1 : vector<128x1xf32>, vector<128x1xf32>, vector<128x1xf32>, vector<128x1xf32> -> vector<128x4xf32>
    %64 = tpu.concatenate %44, %50, %56, %62 in 1 : vector<128x1xf32>, vector<128x1xf32>, vector<128x1xf32>, vector<128x1xf32> -> vector<128x4xf32>
    %65 = vector.shape_cast %64 : vector<128x4xf32> to vector<16x8x4xf32>
    %cst_25 = arith.constant dense<0xFF800000> : vector<16x4xf32>
    %66 = vector.multi_reduction <maximumf>, %65, %cst_25 [1] : vector<16x8x4xf32> to vector<16x4xf32>
    %67 = vector.shape_cast %66 : vector<16x4xf32> to vector<16x1x4xf32>
    %68 = vector.shape_cast %67 : vector<16x1x4xf32> to vector<16x1x4xf32>
    %69 = vector.broadcast %68 : vector<16x1x4xf32> to vector<16x8x4xf32>
    %70 = vector.shape_cast %69 : vector<16x8x4xf32> to vector<128x4xf32>
    %c0_26 = arith.constant 0 : index
    %c0_27 = arith.constant 0 : index
    %71 = vector.load %arg6[%c0_26, %c0_27] : memref<4x128xf32, #tpu.memory_space<vmem>>, vector<4x128xf32>
    %cst_28 = arith.constant dense<0.000000e+00> : vector<128x128xf32>
    %72 = tpu.matmul %63, %71, %cst_28 {dimension_numbers = #tpu.dot_dimension_numbers<[1], [0], [0], [1], [0, 0, 1, 1], [], []>} : vector<128x4xf32>, vector<4x128xf32>, vector<128x128xf32> -> vector<128x128xf32>
    %c0_29 = arith.constant 0 : index
    %c0_30 = arith.constant 0 : index
    %73 = vector.load %arg6[%c0_29, %c0_30] : memref<4x128xf32, #tpu.memory_space<vmem>>, vector<4x128xf32>
    %cst_31 = arith.constant dense<0.000000e+00> : vector<128x128xf32>
    %74 = tpu.matmul %70, %73, %cst_31 {dimension_numbers = #tpu.dot_dimension_numbers<[1], [0], [0], [1], [0, 0, 1, 1], [], []>} : vector<128x4xf32>, vector<4x128xf32>, vector<128x128xf32> -> vector<128x128xf32>
    %75 = arith.subf %30, %37 : vector<128x128xf32>
    %76 = arith.subf %75, %72 : vector<128x128xf32>
    %77 = math.exp %76 : vector<128x128xf32>
    %cst_32 = arith.constant 9.99999974E-5 : f32
    %78 = vector.broadcast %cst_32 : f32 to vector<128x128xf32>
    %79 = arith.addf %77, %78 : vector<128x128xf32>
    %cst_33 = arith.constant 0.176776692 : f32
    %80 = vector.broadcast %cst_33 : f32 to vector<128x128xf32>
    %81 = arith.mulf %80, %79 : vector<128x128xf32>
    %82 = arith.subf %31, %38 : vector<128x128xf32>
    %83 = arith.subf %82, %74 : vector<128x128xf32>
    %84 = math.exp %83 : vector<128x128xf32>
    %cst_34 = arith.constant 9.99999974E-5 : f32
    %85 = vector.broadcast %cst_34 : f32 to vector<128x128xf32>
    %86 = arith.addf %84, %85 : vector<128x128xf32>
    %cst_35 = arith.constant 0.176776692 : f32
    %87 = vector.broadcast %cst_35 : f32 to vector<128x128xf32>
    %88 = arith.mulf %87, %86 : vector<128x128xf32>
    %89 = vector.shape_cast %81 : vector<128x128xf32> to vector<16x8x128xf32>
    %cst_36 = arith.constant dense<0.000000e+00> : vector<8x128xf32>
    %90 = vector.multi_reduction <add>, %89, %cst_36 [0] : vector<16x8x128xf32> to vector<8x128xf32>
    %cst_37 = arith.constant 1.600000e+01 : f32
    %91 = vector.broadcast %cst_37 : f32 to vector<8x128xf32>
    %92 = arith.divf %90, %91 : vector<8x128xf32>
    %93 = vector.shape_cast %88 : vector<128x128xf32> to vector<16x8x128xf32>
    %cst_38 = arith.constant dense<0.000000e+00> : vector<8x128xf32>
    %94 = vector.multi_reduction <add>, %93, %cst_38 [0] : vector<16x8x128xf32> to vector<8x128xf32>
    %cst_39 = arith.constant 1.600000e+01 : f32
    %95 = vector.broadcast %cst_39 : f32 to vector<8x128xf32>
    %96 = arith.divf %94, %95 : vector<8x128xf32>
    %cst_40 = arith.constant dense<0.000000e+00> : vector<128xf32>
    %97 = vector.multi_reduction <add>, %96, %cst_40 [0] : vector<8x128xf32> to vector<128xf32>
    %98 = vector.shape_cast %97 : vector<128xf32> to vector<1x128xf32>
    %99 = vector.broadcast %98 : vector<1x128xf32> to vector<8x128xf32>
    %100 = arith.mulf %92, %99 : vector<8x128xf32>
    %c0_41 = arith.constant 0 : index
    %c0_42 = arith.constant 0 : index
    %101 = vector.load %arg7[%c0_41, %c0_42] : memref<128x4xf32, #tpu.memory_space<vmem>>, vector<128x4xf32>
    %cst_43 = arith.constant dense<0.000000e+00> : vector<8x4xf32>
    %102 = tpu.matmul %100, %101, %cst_43 {dimension_numbers = #tpu.dot_dimension_numbers<[1], [0], [0], [1], [0, 0, 1, 1], [], []>} : vector<8x128xf32>, vector<128x4xf32>, vector<8x4xf32> -> vector<8x4xf32>
    %cst_44 = arith.constant 1.000000e+00 : f32
    %103 = vector.broadcast %cst_44 : f32 to vector<8x4xf32>
    %104 = arith.divf %103, %102 : vector<8x4xf32>
    %105 = vector.extract_strided_slice %92 {offsets = [0, 0], sizes = [8, 32], strides = [1, 1]} : vector<8x128xf32> to vector<8x32xf32>
    %106 = vector.extract_strided_slice %96 {offsets = [0, 0], sizes = [8, 32], strides = [1, 1]} : vector<8x128xf32> to vector<8x32xf32>
    %cst_45 = arith.constant dense<0.000000e+00> : vector<8x8xf32>
    %107 = tpu.matmul %105, %106, %cst_45 {dimension_numbers = #tpu.dot_dimension_numbers<[1], [1], [0], [0], [0, 0, 1, 0], [], []>} : vector<8x32xf32>, vector<8x32xf32>, vector<8x8xf32> -> vector<8x8xf32>
    %108 = vector.extract_strided_slice %33 {offsets = [0, 0], sizes = [128, 8], strides = [1, 1]} : vector<128x32xf32> to vector<128x8xf32>
    %109 = vector.shape_cast %108 : vector<128x8xf32> to vector<16x8x8xf32>
    %110 = vector.shape_cast %107 : vector<8x8xf32> to vector<1x8x8xf32>
    %111 = vector.shape_cast %110 : vector<1x8x8xf32> to vector<1x8x8xf32>
    %112 = vector.broadcast %111 : vector<1x8x8xf32> to vector<16x8x8xf32>
    %cst_46 = arith.constant dense<0.000000e+00> : vector<16x8x8xf32>
    %113 = tpu.matmul %112, %109, %cst_46 {dimension_numbers = #tpu.dot_dimension_numbers<[2], [1], [1], [2], [0, 0, 0, 1, 1, 2], [0], [0]>} : vector<16x8x8xf32>, vector<16x8x8xf32>, vector<16x8x8xf32> -> vector<16x8x8xf32>
    %114 = vector.extract_strided_slice %104 {offsets = [0, 0], sizes = [8, 1], strides = [1, 1]} : vector<8x4xf32> to vector<8x1xf32>
    %115 = vector.shape_cast %114 : vector<8x1xf32> to vector<1x8x1xf32>
    %116 = vector.broadcast %115 : vector<1x8x1xf32> to vector<16x8x8xf32>
    %117 = arith.mulf %113, %116 : vector<16x8x8xf32>
    %118 = vector.extract_strided_slice %92 {offsets = [0, 32], sizes = [8, 32], strides = [1, 1]} : vector<8x128xf32> to vector<8x32xf32>
    %119 = vector.extract_strided_slice %96 {offsets = [0, 32], sizes = [8, 32], strides = [1, 1]} : vector<8x128xf32> to vector<8x32xf32>
    %cst_47 = arith.constant dense<0.000000e+00> : vector<8x8xf32>
    %120 = tpu.matmul %118, %119, %cst_47 {dimension_numbers = #tpu.dot_dimension_numbers<[1], [1], [0], [0], [0, 0, 1, 0], [], []>} : vector<8x32xf32>, vector<8x32xf32>, vector<8x8xf32> -> vector<8x8xf32>
    %121 = vector.extract_strided_slice %33 {offsets = [0, 8], sizes = [128, 8], strides = [1, 1]} : vector<128x32xf32> to vector<128x8xf32>
    %122 = vector.shape_cast %121 : vector<128x8xf32> to vector<16x8x8xf32>
    %123 = vector.shape_cast %120 : vector<8x8xf32> to vector<1x8x8xf32>
    %124 = vector.shape_cast %123 : vector<1x8x8xf32> to vector<1x8x8xf32>
    %125 = vector.broadcast %124 : vector<1x8x8xf32> to vector<16x8x8xf32>
    %cst_48 = arith.constant dense<0.000000e+00> : vector<16x8x8xf32>
    %126 = tpu.matmul %125, %122, %cst_48 {dimension_numbers = #tpu.dot_dimension_numbers<[2], [1], [1], [2], [0, 0, 0, 1, 1, 2], [0], [0]>} : vector<16x8x8xf32>, vector<16x8x8xf32>, vector<16x8x8xf32> -> vector<16x8x8xf32>
    %127 = vector.extract_strided_slice %104 {offsets = [0, 1], sizes = [8, 1], strides = [1, 1]} : vector<8x4xf32> to vector<8x1xf32>
    %128 = vector.shape_cast %127 : vector<8x1xf32> to vector<1x8x1xf32>
    %129 = vector.broadcast %128 : vector<1x8x1xf32> to vector<16x8x8xf32>
    %130 = arith.mulf %126, %129 : vector<16x8x8xf32>
    %131 = vector.extract_strided_slice %92 {offsets = [0, 64], sizes = [8, 32], strides = [1, 1]} : vector<8x128xf32> to vector<8x32xf32>
    %132 = vector.extract_strided_slice %96 {offsets = [0, 64], sizes = [8, 32], strides = [1, 1]} : vector<8x128xf32> to vector<8x32xf32>
    %cst_49 = arith.constant dense<0.000000e+00> : vector<8x8xf32>
    %133 = tpu.matmul %131, %132, %cst_49 {dimension_numbers = #tpu.dot_dimension_numbers<[1], [1], [0], [0], [0, 0, 1, 0], [], []>} : vector<8x32xf32>, vector<8x32xf32>, vector<8x8xf32> -> vector<8x8xf32>
    %134 = vector.extract_strided_slice %33 {offsets = [0, 16], sizes = [128, 8], strides = [1, 1]} : vector<128x32xf32> to vector<128x8xf32>
    %135 = vector.shape_cast %134 : vector<128x8xf32> to vector<16x8x8xf32>
    %136 = vector.shape_cast %133 : vector<8x8xf32> to vector<1x8x8xf32>
    %137 = vector.shape_cast %136 : vector<1x8x8xf32> to vector<1x8x8xf32>
    %138 = vector.broadcast %137 : vector<1x8x8xf32> to vector<16x8x8xf32>
    %cst_50 = arith.constant dense<0.000000e+00> : vector<16x8x8xf32>
    %139 = tpu.matmul %138, %135, %cst_50 {dimension_numbers = #tpu.dot_dimension_numbers<[2], [1], [1], [2], [0, 0, 0, 1, 1, 2], [0], [0]>} : vector<16x8x8xf32>, vector<16x8x8xf32>, vector<16x8x8xf32> -> vector<16x8x8xf32>
    %140 = vector.extract_strided_slice %104 {offsets = [0, 2], sizes = [8, 1], strides = [1, 1]} : vector<8x4xf32> to vector<8x1xf32>
    %141 = vector.shape_cast %140 : vector<8x1xf32> to vector<1x8x1xf32>
    %142 = vector.broadcast %141 : vector<1x8x1xf32> to vector<16x8x8xf32>
    %143 = arith.mulf %139, %142 : vector<16x8x8xf32>
    %144 = vector.extract_strided_slice %92 {offsets = [0, 96], sizes = [8, 32], strides = [1, 1]} : vector<8x128xf32> to vector<8x32xf32>
    %145 = vector.extract_strided_slice %96 {offsets = [0, 96], sizes = [8, 32], strides = [1, 1]} : vector<8x128xf32> to vector<8x32xf32>
    %cst_51 = arith.constant dense<0.000000e+00> : vector<8x8xf32>
    %146 = tpu.matmul %144, %145, %cst_51 {dimension_numbers = #tpu.dot_dimension_numbers<[1], [1], [0], [0], [0, 0, 1, 0], [], []>} : vector<8x32xf32>, vector<8x32xf32>, vector<8x8xf32> -> vector<8x8xf32>
    %147 = vector.extract_strided_slice %33 {offsets = [0, 24], sizes = [128, 8], strides = [1, 1]} : vector<128x32xf32> to vector<128x8xf32>
    %148 = vector.shape_cast %147 : vector<128x8xf32> to vector<16x8x8xf32>
    %149 = vector.shape_cast %146 : vector<8x8xf32> to vector<1x8x8xf32>
    %150 = vector.shape_cast %149 : vector<1x8x8xf32> to vector<1x8x8xf32>
    %151 = vector.broadcast %150 : vector<1x8x8xf32> to vector<16x8x8xf32>
    %cst_52 = arith.constant dense<0.000000e+00> : vector<16x8x8xf32>
    %152 = tpu.matmul %151, %148, %cst_52 {dimension_numbers = #tpu.dot_dimension_numbers<[2], [1], [1], [2], [0, 0, 0, 1, 1, 2], [0], [0]>} : vector<16x8x8xf32>, vector<16x8x8xf32>, vector<16x8x8xf32> -> vector<16x8x8xf32>
    %153 = vector.extract_strided_slice %104 {offsets = [0, 3], sizes = [8, 1], strides = [1, 1]} : vector<8x4xf32> to vector<8x1xf32>
    %154 = vector.shape_cast %153 : vector<8x1xf32> to vector<1x8x1xf32>
    %155 = vector.broadcast %154 : vector<1x8x1xf32> to vector<16x8x8xf32>
    %156 = arith.mulf %152, %155 : vector<16x8x8xf32>
    %157 = tpu.concatenate %117, %130, %143, %156 in 2 : vector<16x8x8xf32>, vector<16x8x8xf32>, vector<16x8x8xf32>, vector<16x8x8xf32> -> vector<16x8x32xf32>
    %158 = vector.shape_cast %157 : vector<16x8x32xf32> to vector<128x32xf32>
    %159 = arith.addf %0, %158 : vector<128x32xf32>
    %c0_53 = arith.constant 0 : index
    %c0_54 = arith.constant 0 : index
    %160 = vector.load %arg8[%c0_53, %c0_54] : memref<128x32xf32, #tpu.memory_space<vmem>>, vector<128x32xf32>
    tpu.vector_store %arg8[%c0_53, %c0_54], %159 {strides = array<i32>} : memref<128x32xf32, #tpu.memory_space<vmem>>, vector<128x32xf32>,
    return
  }
}

module attributes {stable_mosaic.version = 11 : i64} {
  func.func @ffn_kernel(%arg0: memref<128x32xf32, #tpu.memory_space<vmem>>, %arg1: memref<1x32xf32, #tpu.memory_space<vmem>>, %arg2: memref<1x32xf32, #tpu.memory_space<vmem>>, %arg3: memref<32x32xbf16, #tpu.memory_space<vmem>>, %arg4: memref<1x32xf32, #tpu.memory_space<vmem>>, %arg5: memref<32x32xbf16, #tpu.memory_space<vmem>>, %arg6: memref<1x32xf32, #tpu.memory_space<vmem>>, %arg7: memref<128x32xf32, #tpu.memory_space<vmem>>) attributes {dimension_semantics = [], scalar_prefetch = 0 : i64, scratch_operands = 0 : i64, tpu.core_type = #tpu.core_type<tc>} {
    %c0 = arith.constant 0 : index
    %c0_0 = arith.constant 0 : index
    %0 = vector.load %arg0[%c0, %c0_0] : memref<128x32xf32, #tpu.memory_space<vmem>>, vector<128x32xf32>
    %c0_1 = arith.constant 0 : index
    %c0_2 = arith.constant 0 : index
    %1 = vector.load %arg1[%c0_1, %c0_2] : memref<1x32xf32, #tpu.memory_space<vmem>>, vector<1x32xf32>
    %c0_3 = arith.constant 0 : index
    %c0_4 = arith.constant 0 : index
    %2 = vector.load %arg2[%c0_3, %c0_4] : memref<1x32xf32, #tpu.memory_space<vmem>>, vector<1x32xf32>
    %cst = arith.constant dense<0.000000e+00> : vector<128xf32>
    %3 = vector.multi_reduction <add>, %0, %cst [1] : vector<128x32xf32> to vector<128xf32>
    %4 = vector.shape_cast %3 : vector<128xf32> to vector<128x1xf32>
    %cst_5 = arith.constant 3.200000e+01 : f32
    %5 = vector.broadcast %cst_5 : f32 to vector<128x1xf32>
    %6 = arith.divf %4, %5 : vector<128x1xf32>
    %7 = vector.broadcast %6 : vector<128x1xf32> to vector<128x32xf32>
    %8 = arith.subf %0, %7 : vector<128x32xf32>
    %9 = arith.mulf %8, %8 : vector<128x32xf32>
    %cst_6 = arith.constant dense<0.000000e+00> : vector<128xf32>
    %10 = vector.multi_reduction <add>, %9, %cst_6 [1] : vector<128x32xf32> to vector<128xf32>
    %11 = vector.shape_cast %10 : vector<128xf32> to vector<128x1xf32>
    %cst_7 = arith.constant 3.200000e+01 : f32
    %12 = vector.broadcast %cst_7 : f32 to vector<128x1xf32>
    %13 = arith.divf %11, %12 : vector<128x1xf32>
    %14 = vector.broadcast %6 : vector<128x1xf32> to vector<128x32xf32>
    %15 = arith.subf %0, %14 : vector<128x32xf32>
    %cst_8 = arith.constant 9.99999974E-6 : f32
    %16 = vector.broadcast %cst_8 : f32 to vector<128x1xf32>
    %17 = arith.addf %13, %16 : vector<128x1xf32>
    %18 = math.rsqrt %17 : vector<128x1xf32>
    %19 = vector.broadcast %18 : vector<128x1xf32> to vector<128x32xf32>
    %20 = arith.mulf %15, %19 : vector<128x32xf32>
    %21 = vector.broadcast %1 : vector<1x32xf32> to vector<128x32xf32>
    %22 = arith.mulf %20, %21 : vector<128x32xf32>
    %23 = vector.broadcast %2 : vector<1x32xf32> to vector<128x32xf32>
    %24 = arith.addf %22, %23 : vector<128x32xf32>
    %c0_9 = arith.constant 0 : index
    %c0_10 = arith.constant 0 : index
    %25 = vector.load %arg3[%c0_9, %c0_10] : memref<32x32xbf16, #tpu.memory_space<vmem>>, vector<32x32xbf16>
    %c0_11 = arith.constant 0 : index
    %c0_12 = arith.constant 0 : index
    %26 = vector.load %arg5[%c0_11, %c0_12] : memref<32x32xbf16, #tpu.memory_space<vmem>>, vector<32x32xbf16>
    %27 = arith.truncf %24 : vector<128x32xf32> to vector<128x32xbf16>
    %cst_13 = arith.constant dense<0.000000e+00> : vector<128x32xf32>
    %28 = tpu.matmul %27, %25, %cst_13 {dimension_numbers = #tpu.dot_dimension_numbers<[1], [0], [0], [1], [0, 0, 1, 1], [], []>} : vector<128x32xbf16>, vector<32x32xbf16>, vector<128x32xf32> -> vector<128x32xf32>
    %c0_14 = arith.constant 0 : index
    %c0_15 = arith.constant 0 : index
    %29 = vector.load %arg4[%c0_14, %c0_15] : memref<1x32xf32, #tpu.memory_space<vmem>>, vector<1x32xf32>
    %30 = vector.broadcast %29 : vector<1x32xf32> to vector<128x32xf32>
    %31 = arith.addf %28, %30 : vector<128x32xf32>
    %32 = arith.mulf %31, %31 : vector<128x32xf32>
    %33 = arith.mulf %31, %32 : vector<128x32xf32>
    %cst_16 = arith.constant 4.471500e-02 : f32
    %34 = vector.broadcast %cst_16 : f32 to vector<128x32xf32>
    %35 = arith.mulf %34, %33 : vector<128x32xf32>
    %36 = arith.addf %31, %35 : vector<128x32xf32>
    %cst_17 = arith.constant 0.797884583 : f32
    %37 = vector.broadcast %cst_17 : f32 to vector<128x32xf32>
    %38 = arith.mulf %37, %36 : vector<128x32xf32>
    %39 = math.tanh %38 : vector<128x32xf32>
    %cst_18 = arith.constant 1.000000e+00 : f32
    %40 = vector.broadcast %cst_18 : f32 to vector<128x32xf32>
    %41 = arith.addf %40, %39 : vector<128x32xf32>
    %cst_19 = arith.constant 5.000000e-01 : f32
    %42 = vector.broadcast %cst_19 : f32 to vector<128x32xf32>
    %43 = arith.mulf %42, %41 : vector<128x32xf32>
    %44 = arith.mulf %31, %43 : vector<128x32xf32>
    %45 = arith.truncf %44 : vector<128x32xf32> to vector<128x32xbf16>
    %cst_20 = arith.constant dense<0.000000e+00> : vector<128x32xf32>
    %46 = tpu.matmul %45, %26, %cst_20 {dimension_numbers = #tpu.dot_dimension_numbers<[1], [0], [0], [1], [0, 0, 1, 1], [], []>} : vector<128x32xbf16>, vector<32x32xbf16>, vector<128x32xf32> -> vector<128x32xf32>
    %c0_21 = arith.constant 0 : index
    %c0_22 = arith.constant 0 : index
    %47 = vector.load %arg6[%c0_21, %c0_22] : memref<1x32xf32, #tpu.memory_space<vmem>>, vector<1x32xf32>
    %48 = vector.broadcast %47 : vector<1x32xf32> to vector<128x32xf32>
    %49 = arith.addf %46, %48 : vector<128x32xf32>
    %50 = arith.addf %0, %49 : vector<128x32xf32>
    %c0_23 = arith.constant 0 : index
    %c0_24 = arith.constant 0 : index
    %51 = vector.load %arg7[%c0_23, %c0_24] : memref<128x32xf32, #tpu.memory_space<vmem>>, vector<128x32xf32>
    tpu.vector_store %arg7[%c0_23, %c0_24], %50 {strides = array<i32>} : memref<128x32xf32, #tpu.memory_space<vmem>>, vector<128x32xf32>,
    return
  }
}

</mosaic_0001>

<bundles_post_ra>
// kernel: grn_transformer_forward.5
= control target key start
LH: loop header
LB: loop body
LE: loop exit
PB: predicated region body
PF: predicated region fallthrough
CT: control target
= control target key end

     0   :  { %vm46_vm0 = vcmask 261120   ;;  %s1735_s0 = inlined_call_operand.vmem [shape: f32[128,32], index: 0, kind: input, shape index: {}]   ;;  %s1736_s1 = inlined_call_operand.vmem [shape: f32[1,32], index: 1, kind: input, shape index: {}]   ;;  %s1737_s2 = inlined_call_operand.vmem [shape: f32[1,32], index: 2, kind: input, shape index: {}]   ;;  %s1738_s3 = inlined_call_operand.vmem [shape: bf16[32,32], index: 3, kind: input, shape index: {}]   ;;  %s1739_s4 = inlined_call_operand.vmem [shape: f32[1,32], index: 4, kind: input, shape index: {}]   ;;  %s1740_s5 = inlined_call_operand.vmem [shape: bf16[32,32], index: 5, kind: input, shape index: {}]   ;;  %s1741_s6 = inlined_call_operand.vmem [shape: f32[1,32], index: 6, kind: input, shape index: {}]   ;;  %s1742_s7 = inlined_call_operand.hbm [shape: f32[128,32], index: 7, kind: output, shape index: {}]  }
   0x1   :  { %v36_v0 = vld [vmem:[%s1735_s0 + $0x40] sm:$0xff]  ;;  %v1051_v2 = vld [vmem:[%s1735_s0 + $0x50] sm:$0xff]  ;;  %v37_v6 = vld [vmem:[%s1735_s0 + $0x48] sm:$0xff] }
   0x2   :  { %v1046_v1 = vld [vmem:[%s1735_s0] sm:$0xff]  ;;  %v71_v3 = vsel %vm46_vm0, %v36_v0, 0.0  ;;  %v77_v5 = vsel %vm46_vm0, %v1051_v2, 0.0  ;;  %v29_v7 = vld [vmem:[%s1735_s0 + $0x8] sm:$0xff]  ;;  %v39_v8 = vld [vmem:[%s1735_s0 + $0x58] sm:$0xff] }
   0x3   :  { %v47_v4 = vsel %vm46_vm0, %v1046_v1, 0.0  ;;  %72 = vadd.xlane.f32.xlu0 %v71_v3  ;;  %78 = vadd.xlane.f32.xlu2 %v77_v5 }
   0x4   :  { %48 = vadd.xlane.f32.xlu1 %v47_v4 }
   0x5   :  { %12 = vsyncpa [#allocation3], 0  ;;  %v74_v9 = vsel %vm46_vm0, %v37_v6, 0.0  ;;  %v50_v10 = vsel %vm46_vm0, %v29_v7, 0.0  ;;  %v80_v11 = vsel %vm46_vm0, %v39_v8, 0.0  ;;  %v1073_v12 = vld [vmem:[%s1735_s0 + $0x10] sm:$0xff] }
   0x6   :  { %v1078_v13 = vld [vmem:[%s1735_s0 + $0x18] sm:$0xff]  ;;  %v1083_v14 = vld [vmem:[%s1735_s0 + $0x60] sm:$0xff]  ;;  %v53_v15 = vsel %vm46_vm0, %v1073_v12, 0.0  ;;  %v1094_v18 = vld [vmem:[%s1735_s0 + $0x68] sm:$0xff]  ;;  %v996_v28 = vmov 32.0   ;;  %s997_s22 = smov [#allocation2]  }
   0x7   :  { %v56_v16 = vsel %vm46_vm0, %v1078_v13, 0.0  ;;  %v83_v17 = vsel %vm46_vm0, %v1083_v14, 0.0  ;;  %v1099_v19 = vld [vmem:[%s1735_s0 + $0x20] sm:$0xff]  ;;  %v1104_v20 = vld [vmem:[%s1735_s0 + $0x28] sm:$0xff]  ;;  %v86_v21 = vsel %vm46_vm0, %v1094_v18, 0.0  ;;  %v1115_v24 = vld [vmem:[%s1735_s0 + $0x78] sm:$0xff]  ;;  %888 = vrcp.f32 %v996_v28 }
   0x8   :  { %v59_v22 = vsel %vm46_vm0, %v1099_v19, 0.0  ;;  %v62_v23 = vsel %vm46_vm0, %v1104_v20, 0.0  ;;  %v1120_v25 = vld [vmem:[%s1735_s0 + $0x70] sm:$0xff]  ;;  %v92_v26 = vsel %vm46_vm0, %v1115_v24, 0.0  ;;  %s828_s25 = sshll.u32 %s1742_s7, 4  ;;  %s998_s28 = smov 128   ;;  %s829_s25 = int_to_ptr.hbm [resolvable:$true] %s828_s25 }
   0x9   :  { %v89_v27 = vsel %vm46_vm0, %v1120_v25, 0.0  ;;  %v1140_v48 = vld [vmem:[%s1735_s0 + $0x30] sm:$0xff]  ;;  %s999_s29 = smov 8  }
   0xa   :  { %v65_v53 = vsel %vm46_vm0, %v1140_v48, 0.0 }
   0xb   :  { %75 = vadd.xlane.f32.xlu0 %v74_v9  ;;  %81 = vadd.xlane.f32.xlu2 %v80_v11 }
   0xc   :  { %51 = vadd.xlane.f32.xlu1 %v50_v10 }
   0xd   :  { %v889_v29 = vpop.eup %888 }
   0xe   :  { %v96_v30 = vmul.f32 32.0, %v889_v29  ;;  %vm100_vm1 = vweird.f32 %v889_v29 }
  0x10   :  { %v97_v31 = vsub.f32 1.0, %v96_v30 }
  0x12   :  { %v98_v32 = vmul.f32 %v889_v29, %v97_v31 }
  0x13   :  { %54 = vadd.xlane.f32.xlu0 %v53_v15  ;;  %84 = vadd.xlane.f32.xlu2 %v83_v17 }
  0x14   :  { %57 = vadd.xlane.f32.xlu1 %v56_v16  ;;  %v99_v33 = vadd.f32 %v889_v29, %v98_v32 }
  0x16   :  { %v1126_v34 = vsel %vm100_vm1, %v889_v29, %v99_v33 }
  0x1b   :  { %87 = vadd.xlane.f32.xlu0 %v86_v21  ;;  %63 = vadd.xlane.f32.xlu2 %v62_v23  ;;  %v1188_v21 = vld [vmem:[%s1735_s0 + $0x38] sm:$0xff] }
  0x1c   :  { %60 = vadd.xlane.f32.xlu1 %v59_v22  ;;  %v68_v28 = vsel %vm46_vm0, %v1188_v21, 0.0 }
  0x23   :  { %93 = vadd.xlane.f32.xlu0 %v92_v26  ;;  %90 = vadd.xlane.f32.xlu2 %v89_v27 }
  0x76   :  { %v73_v35 = vpop.xlane.xlu0 %72  ;;  %v79_v38 = vpop.xlane.xlu2 %78 }
  0x77   :  { %v49_v36 = vpop.xlane.xlu1 %48  ;;  %v110_v37 = vmul.f32 %v1126_v34, %v73_v35  ;;  %v112_v49 = vmul.f32 %v1126_v34, %v79_v38 }
  0x78   :  { %v102_v44 = vmul.f32 %v1126_v34, %v49_v36 }
  0x79   :  { %v1129_v39 = vsub.f32 %v36_v0, %v110_v37  ;;  %v1160_v58 = vsub.f32 %v1051_v2, %v112_v49 }
  0x7a   :  { %v1151_v54 = vsub.f32 %v1046_v1, %v102_v44 }
  0x7b   :  { %v142_v40 = vmul.f32 %v1129_v39, %v1129_v39  ;;  %v144_v2 = vmul.f32 %v1160_v58, %v1160_v58 }
  0x7c   :  { %v134_v1 = vmul.f32 %v1151_v54, %v1151_v54 }
  0x7d   :  { %v174_v41 = vsel %vm46_vm0, %v142_v40, 0.0 }
  0x7e   :  { %v76_v42 = vpop.xlane.xlu0 %75  ;;  %175 = vadd.xlane.f32.xlu0 %v174_v41  ;;  %v82_v47 = vpop.xlane.xlu2 %81 }
  0x7f   :  { %v52_v43 = vpop.xlane.xlu1 %51  ;;  %v111_v45 = vmul.f32 %v1126_v34, %v76_v42  ;;  %v113_v50 = vmul.f32 %v1126_v34, %v82_v47 }
  0x80   :  { %v103_v46 = vmul.f32 %v1126_v34, %v52_v43 }
  0x81   :  { %v1144_v51 = vsub.f32 %v37_v6, %v111_v45  ;;  %v1153_v55 = vsub.f32 %v39_v8, %v113_v50  ;;  %v180_v8 = vsel %vm46_vm0, %v144_v2, 0.0 }
  0x82   :  { %v1146_v52 = vsub.f32 %v29_v7, %v103_v46  ;;  %v150_v7 = vsel %vm46_vm0, %v134_v1, 0.0 }
  0x83   :  { %v143_v56 = vmul.f32 %v1144_v51, %v1144_v51  ;;  %v145_v0 = vmul.f32 %v1153_v55, %v1153_v55 }
  0x84   :  { %v135_v57 = vmul.f32 %v1146_v52, %v1146_v52 }
  0x85   :  { %v177_v59 = vsel %vm46_vm0, %v143_v56, 0.0  ;;  %v183_v6 = vsel %vm46_vm0, %v145_v0, 0.0  ;;  %v872_v56 = vld [vmem:[%s1738_s3] sm:$0xff] }
  0x86   :  { %v153_v60 = vsel %vm46_vm0, %v135_v57, 0.0  ;;  %66 = vadd.xlane.f32.xlu0 %v65_v53  ;;  %178 = vadd.xlane.f32.xlu1 %v177_v59  ;;  %v55_v61 = vpop.xlane.xlu0 %54  ;;  %v85_v63 = vpop.xlane.xlu2 %84 }
  0x87   :  { %v58_v62 = vpop.xlane.xlu1 %57  ;;  %154 = vadd.xlane.f32.xlu2 %v153_v60  ;;  %v114_v3 = vmul.f32 %v1126_v34, %v85_v63  ;;  %v104_v15 = vmul.f32 %v1126_v34, %v55_v61 }
  0x88   :  { %v105_v4 = vmul.f32 %v1126_v34, %v58_v62 }
  0x89   :  { %v1173_v5 = vsub.f32 %v1083_v14, %v114_v3  ;;  %v1194_v23 = vsub.f32 %v1073_v12, %v104_v15 }
  0x8a   :  { %v1179_v9 = vsub.f32 %v1078_v13, %v105_v4 }
  0x8b   :  { %v146_v14 = vmul.f32 %v1173_v5, %v1173_v5 }
  0x8c   :  { %v137_v13 = vmul.f32 %v1179_v9, %v1179_v9 }
  0x8d   :  { %v186_v27 = vsel %vm46_vm0, %v146_v14, 0.0 }
  0x8e   :  { %184 = vadd.xlane.f32.xlu0 %v183_v6  ;;  %151 = vadd.xlane.f32.xlu1 %v150_v7  ;;  %v88_v10 = vpop.xlane.xlu0 %87  ;;  %v64_v16 = vpop.xlane.xlu2 %63  ;;  %v159_v29 = vsel %vm46_vm0, %v137_v13, 0.0 }
  0x8f   :  { %v61_v11 = vpop.xlane.xlu1 %60  ;;  %181 = vadd.xlane.f32.xlu2 %v180_v8  ;;  %v107_v17 = vmul.f32 %v1126_v34, %v64_v16  ;;  %v115_v32 = vmul.f32 %v1126_v34, %v88_v10 }
  0x90   :  { %v106_v22 = vmul.f32 %v1126_v34, %v61_v11 }
  0x91   :  { %v1197_v26 = vsub.f32 %v1104_v20, %v107_v17  ;;  %v136_v20 = vmul.f32 %v1194_v23, %v1194_v23 }
  0x92   :  { %v1204_v30 = vsub.f32 %v1099_v19, %v106_v22  ;;  %v1215_v19 = vsub.f32 %v1094_v18, %v115_v32 }
  0x93   :  { %v139_v12 = vmul.f32 %v1197_v26, %v1197_v26  ;;  %v156_v37 = vsel %vm46_vm0, %v136_v20, 0.0 }
  0x94   :  { %v138_v35 = vmul.f32 %v1204_v30, %v1204_v30  ;;  %v147_v43 = vmul.f32 %v1215_v19, %v1215_v19 }
  0x95   :  { %v165_v36 = vsel %vm46_vm0, %v139_v12, 0.0 }
  0x96   :  { %187 = vadd.xlane.f32.xlu0 %v186_v27  ;;  %69 = vadd.xlane.f32.xlu1 %v68_v28  ;;  %v94_v31 = vpop.xlane.xlu0 %93  ;;  %v162_v40 = vsel %vm46_vm0, %v138_v35, 0.0  ;;  %v91_v41 = vpop.xlane.xlu2 %90 }
  0x97   :  { %160 = vadd.xlane.f32.xlu2 %v159_v29  ;;  %v117_v33 = vmul.f32 %v1126_v34, %v94_v31  ;;  %v116_v42 = vmul.f32 %v1126_v34, %v91_v41 }
  0x99   :  { %v1220_v38 = vsub.f32 %v1115_v24, %v117_v33  ;;  %v1229_v44 = vsub.f32 %v1120_v25, %v116_v42  ;;  %v189_v24 = vsel %vm46_vm0, %v147_v43, 0.0  ;;  %v873_v25 = vld [vmem:[%s1738_s3 + $0x8] sm:$0xff] }
  0x9a   :  { %876 = vmatpush.bf16.msra.mxu2 %v873_v25  ;;  %506 = vmatpush.bf16.msra.mxu0 %v873_v25 }
  0x9b   :  { %v149_v18 = vmul.f32 %v1220_v38, %v1220_v38  ;;  %v148_v46 = vmul.f32 %v1229_v44, %v1229_v44 }
  0x9d   :  { %v195_v45 = vsel %vm46_vm0, %v149_v18, 0.0  ;;  %v192_v47 = vsel %vm46_vm0, %v148_v46, 0.0 }
  0x9e   :  { %166 = vadd.xlane.f32.xlu0 %v165_v36  ;;  %157 = vadd.xlane.f32.xlu1 %v156_v37 }
  0x9f   :  { %163 = vadd.xlane.f32.xlu2 %v162_v40  ;;  %877 = vmatpush.bf16.msra.mxu2 %v872_v56 }
  0xa0   :  { %507 = vmatpush.bf16.msra.mxu0 %v872_v56 }
  0xa6   :  { %190 = vadd.xlane.f32.xlu1 %v189_v24 }
  0xa7   :  { %196 = vadd.xlane.f32.xlu2 %v195_v45 }
  0xae   :  { %193 = vadd.xlane.f32.xlu1 %v192_v47 }
  0xf1   :  { %v176_v49 = vpop.xlane.xlu0 %175 }
  0xf2   :  { %v206_v50 = vmul.f32 %v176_v49, %v1126_v34 }
  0xf4   :  { %v1240_v53 = vadd.f32 1e-05, %v206_v50 }
  0xf6   :  { %890 = vrsqrt.f32 %v1240_v53  ;;  %vm316_vm3 = vweird.f32 %v1240_v53 }
  0xf9   :  { %v67_v57 = vpop.xlane.xlu0 %66  ;;  %v179_v59 = vpop.xlane.xlu1 %178 }
  0xfa   :  { %v108_v60 = vmul.f32 %v1126_v34, %v67_v57  ;;  %v155_v61 = vpop.xlane.xlu2 %154  ;;  %v207_v62 = vmul.f32 %v179_v59, %v1126_v34 }
  0xfb   :  { %v199_v63 = vmul.f32 %v155_v61, %v1126_v34 }
  0xfc   :  { %v1249_v0 = vpop.eup %890  ;;  %v1252_v1 = vsub.f32 %v1140_v48, %v108_v60  ;;  %v223_v3 = vadd.f32 1e-05, %v207_v62 }
  0xfd   :  { %v311_v2 = vmul.f32 %v1249_v0, %v1240_v53  ;;  %v1256_v4 = vadd.f32 1e-05, %v199_v63  ;;  %vm317_vm2 = vweird.f32 %v1249_v0 }
  0xfe   :  { %892 = vrsqrt.f32 %v223_v3  ;;  %v140_v6 = vmul.f32 %v1252_v1, %v1252_v1  ;;  %vm326_vm4 = vweird.f32 %v223_v3  ;;  %vm1304_vm6 = vmor %vm316_vm3, %vm317_vm2 }
  0xff   :  { %v312_v7 = vmul.f32 %v1249_v0, %v311_v2  ;;  %894 = vrsqrt.f32 %v1256_v4  ;;  %vm246_vm7 = vweird.f32 %v1256_v4 }
 0x100   :  { %v168_v8 = vsel %vm46_vm0, %v140_v6, 0.0 }
 0x101   :  { %169 = vadd.xlane.f32.xlu0 %v168_v8  ;;  %v185_v10 = vpop.xlane.xlu0 %184  ;;  %v152_v48 = vpop.xlane.xlu1 %151  ;;  %v313_v14 = vmul.f32 0.5, %v312_v7 }
 0x102   :  { %v209_v11 = vmul.f32 %v185_v10, %v1126_v34  ;;  %v182_v15 = vpop.xlane.xlu2 %181  ;;  %v198_v16 = vmul.f32 %v152_v48, %v1126_v34 }
 0x103   :  { %v208_v17 = vmul.f32 %v182_v15, %v1126_v34  ;;  %v314_v12 = vsub.f32 1.5, %v313_v14 }
 0x104   :  { %v1266_v13 = vpop.eup %892  ;;  %v1268_v22 = vadd.f32 1e-05, %v209_v11  ;;  %v1270_v27 = vadd.f32 1e-05, %v198_v16 }
 0x105   :  { %v1272_v28 = vpop.eup %894  ;;  %v321_v29 = vmul.f32 %v1266_v13, %v223_v3  ;;  %v1275_v31 = vadd.f32 1e-05, %v208_v17  ;;  %v315_v18 = vmul.f32 %v1249_v0, %v314_v12  ;;  %vm327_vm5 = vweird.f32 %v1266_v13 }
 0x106   :  { %v241_v32 = vmul.f32 %v1272_v28, %v1256_v4  ;;  %896 = vrsqrt.f32 %v1268_v22  ;;  %vm247_vm8 = vweird.f32 %v1272_v28  ;;  %vm1319_vm9 = vmor %vm326_vm4, %vm327_vm5  ;;  %vm346_vm10 = vweird.f32 %v1268_v22 }
 0x107   :  { %v322_v20 = vmul.f32 %v1266_v13, %v321_v29  ;;  %898 = vrsqrt.f32 %v1275_v31  ;;  %v319_v62 = vsel %vm1304_vm6, %v1249_v0, %v315_v18  ;;  %vm336_vm11 = vweird.f32 %v1275_v31  ;;  %vm1341_vm12 = vmor %vm246_vm7, %vm247_vm8  ;;  %v1351_v29 = vld [vmem:[%s1736_s1] ss:$0 sm:$0xff] }
 0x108   :  { %v242_v33 = vmul.f32 %v1272_v28, %v241_v32  ;;  %900 = vrsqrt.f32 %v1270_v27  ;;  %v398_v11 = vmul.f32 %v319_v62, %v1129_v39  ;;  %vm236_vm13 = vweird.f32 %v1270_v27 }
 0x109   :  { %v323_v35 = vmul.f32 0.5, %v322_v20  ;;  %v188_v36 = vpop.xlane.xlu0 %187  ;;  %v70_v37 = vpop.xlane.xlu1 %69 }
 0x10a   :  { %v243_v40 = vmul.f32 0.5, %v242_v33  ;;  %v210_v41 = vmul.f32 %v188_v36, %v1126_v34  ;;  %v161_v42 = vpop.xlane.xlu2 %160  ;;  %v109_v43 = vmul.f32 %v1126_v34, %v70_v37 }
 0x10b   :  { %v324_v24 = vsub.f32 1.5, %v323_v35  ;;  %v201_v45 = vmul.f32 %v161_v42, %v1126_v34  ;;  %v417_v42 = vmul.f32 %v1351_v29, %v398_v11 }
 0x10c   :  { %v1289_v46 = vpop.eup %896  ;;  %v1293_v47 = vadd.f32 1e-05, %v210_v41  ;;  %v244_v50 = vsub.f32 1.5, %v243_v40  ;;  %v1313_v61 = vsub.f32 %v1188_v21, %v109_v43 }
 0x10d   :  { %v1295_v49 = vpop.eup %898  ;;  %v325_v25 = vmul.f32 %v1266_v13, %v324_v24  ;;  %v341_v56 = vmul.f32 %v1289_v46, %v1268_v22  ;;  %v1300_v57 = vadd.f32 1e-05, %v201_v45  ;;  %vm347_vm15 = vweird.f32 %v1289_v46  ;;  %v1381_v45 = vld [vmem:[%s1737_s2] ss:$0 sm:$0xff] }
 0x10e   :  { %v1302_v59 = vpop.eup %900  ;;  %v331_v53 = vmul.f32 %v1295_v49, %v1275_v31  ;;  %902 = vrsqrt.f32 %v1293_v47  ;;  %v245_v0 = vmul.f32 %v1272_v28, %v244_v50  ;;  %vm337_vm1 = vweird.f32 %v1295_v49  ;;  %vm1393_vm3 = vmor %vm346_vm10, %vm347_vm15 }
 0x10f   :  { %v342_v2 = vmul.f32 %v1289_v46, %v341_v56  ;;  %v231_v6 = vmul.f32 %v1302_v59, %v1270_v27  ;;  %v329_v21 = vsel %vm1319_vm9, %v1266_v13, %v325_v25  ;;  %904 = vrsqrt.f32 %v1300_v57  ;;  %vm1402_vm4 = vmor %vm336_vm11, %vm337_vm1 }
 0x110   :  { %v332_v7 = vmul.f32 %v1295_v49, %v331_v53  ;;  %v141_v13 = vmul.f32 %v1313_v61, %v1313_v61  ;;  %v399_v39 = vmul.f32 %v329_v21, %v1144_v51  ;;  %vm237_vm14 = vweird.f32 %v1302_v59 }
 0x111   :  { %v343_v3 = vmul.f32 0.5, %v342_v2  ;;  %v232_v8 = vmul.f32 %v1302_v59, %v231_v6  ;;  %v167_v10 = vpop.xlane.xlu0 %166  ;;  %v158_v48 = vpop.xlane.xlu1 %157  ;;  %v249_v35 = vsel %vm1341_vm12, %v1272_v28, %v245_v0  ;;  %vm238_vm2 = vmor %vm236_vm13, %vm237_vm14  ;;  %vm266_vm5 = vweird.f32 %v1300_v57 }
 0x112   :  { %v333_v16 = vmul.f32 0.5, %v332_v7  ;;  %v203_v14 = vmul.f32 %v167_v10, %v1126_v34  ;;  %v164_v17 = vpop.xlane.xlu2 %163  ;;  %v200_v12 = vmul.f32 %v158_v48, %v1126_v34  ;;  %v171_v33 = vsel %vm46_vm0, %v141_v13, 0.0 }
 0x113   :  { %v233_v32 = vmul.f32 0.5, %v232_v8  ;;  %v202_v4 = vmul.f32 %v164_v17, %v1126_v34  ;;  %v344_v36 = vsub.f32 1.5, %v343_v3  ;;  %172 = vadd.xlane.f32.xlu1 %v171_v33  ;;  %v418_v24 = vmul.f32 %v1351_v29, %v399_v39 }
 0x114   :  { %v1358_v20 = vadd.f32 1e-05, %v203_v14  ;;  %v334_v37 = vsub.f32 1.5, %v333_v16  ;;  %v1364_v40 = vpop.eup %902  ;;  %v1375_v18 = vadd.f32 1e-05, %v200_v12  ;;  %v391_v50 = vmul.f32 %v249_v35, %v1146_v52 }
 0x115   :  { %v234_v51 = vsub.f32 1.5, %v233_v32  ;;  %v1368_v41 = vadd.f32 1e-05, %v202_v4  ;;  %v1371_v43 = vpop.eup %904  ;;  %v345_v56 = vmul.f32 %v1289_v46, %v344_v36  ;;  %v351_v22 = vmul.f32 %v1364_v40, %v1293_v47 }
 0x116   :  { %906 = vrsqrt.f32 %v1358_v20  ;;  %v261_v25 = vmul.f32 %v1371_v43, %v1300_v57  ;;  %v335_v53 = vmul.f32 %v1295_v49, %v334_v37  ;;  %v437_v21 = vadd.f32 %v1381_v45, %v418_v24 }
 0x117   :  { %v235_v28 = vmul.f32 %v1302_v59, %v234_v51  ;;  %908 = vrsqrt.f32 %v1368_v41  ;;  %v349_v8 = vsel %vm1393_vm3, %v1289_v46, %v345_v56  ;;  %v352_v11 = vmul.f32 %v1364_v40, %v351_v22 }
 0x118   :  { %v262_v2 = vmul.f32 %v1371_v43, %v261_v25  ;;  %910 = vrsqrt.f32 %v1375_v18  ;;  %v339_v10 = vsel %vm1402_vm4, %v1295_v49, %v335_v53  ;;  %v410_v14 = vmul.f32 %v1351_v29, %v391_v50 }
 0x119   :  { %v239_v52 = vsel %vm238_vm2, %v1302_v59, %v235_v28  ;;  %v191_v62 = vpop.xlane.xlu1 %190  ;;  %v436_v59 = vadd.f32 %v1381_v45, %v417_v42  ;;  %vm267_vm6 = vweird.f32 %v1371_v43  ;;  %v400_v39 = vmul.f32 %v339_v10, %v1160_v58 }
 0x11a   :  { %v390_v63 = vmul.f32 %v239_v52, %v1151_v54  ;;  %v197_v6 = vpop.xlane.xlu2 %196  ;;  %v263_v0 = vmul.f32 0.5, %v262_v2  ;;  %v211_v3 = vmul.f32 %v191_v62, %v1126_v34  ;;  %v401_v12 = vmul.f32 %v349_v8, %v1153_v55  ;;  %vm1444_vm7 = vmor %vm266_vm5, %vm267_vm6 }
 0x11b   :  { %v213_v31 = vmul.f32 %v197_v6, %v1126_v34  ;;  %v456_v48 = vpack.c.bf16 %v437_v21, %v436_v59  ;;  %v353_v36 = vmul.f32 0.5, %v352_v11  ;;  %v429_v58 = vadd.f32 %v1381_v45, %v410_v14 }
 0x11c   :  { %v1414_v7 = vpop.eup %906  ;;  %v409_v54 = vmul.f32 %v1351_v29, %v390_v63  ;;  %v264_v15 = vsub.f32 1.5, %v263_v0  ;;  %v1425_v16 = vadd.f32 1e-05, %v211_v3  ;;  %vm256_vm8 = vweird.f32 %v1375_v18 }
 0x11d   :  { %v1428_v17 = vpop.eup %908  ;;  %v281_v46 = vmul.f32 %v1414_v7, %v1358_v20  ;;  %852 = vmatmul.msk.bf16.vlgmr.msra.gmra.mxu2 %vm46_vm0, %v456_v48  ;;  %v1435_v49 = vadd.f32 1e-05, %v213_v31  ;;  %v419_v50 = vmul.f32 %v1351_v29, %v400_v39  ;;  %v420_v60 = vmul.f32 %v1351_v29, %v401_v12 }
 0x11e   :  { %v911_v13 = vpop.eup %910  ;;  %v271_v32 = vmul.f32 %v1428_v17, %v1368_v41  ;;  %v428_v4 = vadd.f32 %v1381_v45, %v409_v54  ;;  %v265_v57 = vmul.f32 %v1371_v43, %v264_v15  ;;  %912 = vrsqrt.f32 %v1425_v16 }
 0x11f   :  { %v251_v33 = vmul.f32 %v911_v13, %v1375_v18  ;;  %v282_v51 = vmul.f32 %v1414_v7, %v281_v46  ;;  %914 = vrsqrt.f32 %v1435_v49  ;;  %vm257_vm9 = vweird.f32 %v911_v13 }
 0x120   :  { %v272_v55 = vmul.f32 %v1428_v17, %v271_v32  ;;  %v452_v28 = vpack.c.bf16 %v429_v58, %v428_v4  ;;  %v269_v25 = vsel %vm1444_vm7, %v1371_v43, %v265_v57  ;;  %v354_v53 = vsub.f32 1.5, %v353_v36  ;;  %vm258_vm12 = vmor %vm256_vm8, %vm257_vm9 }
 0x121   :  { %v194_v35 = vpop.xlane.xlu1 %193  ;;  %v252_v42 = vmul.f32 %v911_v13, %v251_v33  ;;  %vm356_vm10 = vweird.f32 %v1293_v47  ;;  %v283_v62 = vmul.f32 0.5, %v282_v51  ;;  %vm357_vm11 = vweird.f32 %v1364_v40 }
 0x122   :  { %v212_v24 = vmul.f32 %v194_v35, %v1126_v34  ;;  %848 = vmatmul.msk.bf16.vlgmr.msra.gmra.mxu0 %vm46_vm0, %v452_v28  ;;  %v393_v22 = vmul.f32 %v269_v25, %v1179_v9  ;;  %v273_v2 = vmul.f32 0.5, %v272_v55  ;;  %v438_v43 = vadd.f32 %v1381_v45, %v419_v50  ;;  %vm1477_vm13 = vmor %vm356_vm10, %vm357_vm11 }
 0x123   :  { %v253_v56 = vmul.f32 0.5, %v252_v42  ;;  %v439_v31 = vadd.f32 %v1381_v45, %v420_v60  ;;  %v355_v0 = vmul.f32 %v1364_v40, %v354_v53  ;;  %v284_v18 = vsub.f32 1.5, %v283_v62 }
 0x124   :  { %v1461_v52 = vadd.f32 1e-05, %v212_v24  ;;  %v913_v63 = vpop.eup %912  ;;  %vm366_vm14 = vweird.f32 %v1425_v16  ;;  %v412_v48 = vmul.f32 %v1351_v29, %v393_v22  ;;  %v274_v11 = vsub.f32 1.5, %v273_v2 }
 0x125   :  { %v254_v27 = vsub.f32 1.5, %v253_v56  ;;  %v1469_v6 = vpop.eup %914  ;;  %v361_v21 = vmul.f32 %v913_v63, %v1425_v16  ;;  %vm367_vm15 = vweird.f32 %v913_v63  ;;  %v457_v47 = vpack.c.bf16 %v439_v31, %v438_v43 }
 0x126   :  { %916 = vrsqrt.f32 %v1461_v52  ;;  %v381_v10 = vmul.f32 %v1469_v6, %v1435_v49  ;;  %v359_v14 = vsel %vm1477_vm13, %v1364_v40, %v355_v0  ;;  %vm286_vm1 = vweird.f32 %v1358_v20  ;;  %vm368_vm5 = vmor %vm366_vm14, %vm367_vm15 }
 0x127   :  { %v255_v59 = vmul.f32 %v911_v13, %v254_v27  ;;  %v362_v54 = vmul.f32 %v913_v63, %v361_v21  ;;  %vm287_vm2 = vweird.f32 %v1414_v7  ;;  %vm276_vm3 = vweird.f32 %v1368_v41 }
 0x128   :  { %vm277_vm4 = vweird.f32 %v1428_v17  ;;  %v382_v32 = vmul.f32 %v1469_v6, %v381_v10  ;;  %v431_v12 = vadd.f32 %v1381_v45, %v412_v48  ;;  %v402_v57 = vmul.f32 %v359_v14, %v1173_v5  ;;  %vm1505_vm6 = vmor %vm286_vm1, %vm287_vm2 }
 0x129   :  { %v259_v3 = vsel %vm258_vm12, %v911_v13, %v255_v59  ;;  %v363_v15 = vmul.f32 0.5, %v362_v54  ;;  %v285_v13 = vmul.f32 %v1414_v7, %v284_v18  ;;  %v275_v33 = vmul.f32 %v1428_v17, %v274_v11  ;;  %vm278_vm7 = vmor %vm276_vm3, %vm277_vm4 }
 0x12a   :  { %v392_v8 = vmul.f32 %v259_v3, %v1194_v23  ;;  %v383_v51 = vmul.f32 0.5, %v382_v32  ;;  %v421_v55 = vmul.f32 %v1351_v29, %v402_v57  ;;  %vm376_vm8 = vweird.f32 %v1461_v52 }
 0x12b   :  { %v364_v39 = vsub.f32 1.5, %v363_v15  ;;  %v289_v58 = vsel %vm1505_vm6, %v1414_v7, %v285_v13  ;;  %v279_v20 = vsel %vm278_vm7, %v1428_v17, %v275_v33  ;;  %vm386_vm10 = vweird.f32 %v1435_v49 }
 0x12c   :  { %v411_v23 = vmul.f32 %v1351_v29, %v392_v8  ;;  %v917_v46 = vpop.eup %916  ;;  %v395_v50 = vmul.f32 %v289_v58, %v1197_v26  ;;  %v394_v25 = vmul.f32 %v279_v20, %v1204_v30  ;;  %v384_v7 = vsub.f32 1.5, %v383_v51 }
 0x12d   :  { %853 = vmatmul.msk.bf16.gmra.mxu2 %vm46_vm0, %v457_v47  ;;  %v371_v40 = vmul.f32 %v917_v46, %v1461_v52  ;;  %v365_v35 = vmul.f32 %v913_v63, %v364_v39  ;;  %vm377_vm9 = vweird.f32 %v917_v46  ;;  %v440_v56 = vadd.f32 %v1381_v45, %v421_v55 }
 0x12e   :  { %v430_v4 = vadd.f32 %v1381_v45, %v411_v23  ;;  %vm387_vm11 = vweird.f32 %v1469_v6  ;;  %vm378_vm12 = vmor %vm376_vm8, %vm377_vm9  ;;  %v385_v53 = vmul.f32 %v1469_v6, %v384_v7  ;;  %v413_v26 = vmul.f32 %v1351_v29, %v394_v25 }
 0x12f   :  { %v372_v16 = vmul.f32 %v917_v46, %v371_v40  ;;  %v369_v37 = vsel %vm368_vm5, %v913_v63, %v365_v35  ;;  %v414_v52 = vmul.f32 %v1351_v29, %v395_v50  ;;  %vm388_vm13 = vmor %vm386_vm10, %vm387_vm11 }
 0x130   :  { %v453_v36 = vpack.c.bf16 %v431_v12, %v430_v4  ;;  %v403_v5 = vmul.f32 %v369_v37, %v1215_v19  ;;  %v389_v62 = vsel %vm388_vm13, %v1469_v6, %v385_v53  ;;  %v432_v27 = vadd.f32 %v1381_v45, %v413_v26  ;;  %v1547_v12 = vld [vmem:[%s1739_s4] ss:$0 sm:$0xff] }
 0x131   :  { %v373_v42 = vmul.f32 0.5, %v372_v16  ;;  %v433_v49 = vadd.f32 %v1381_v45, %v414_v52  ;;  %v405_v22 = vmul.f32 %v389_v62, %v1220_v38 }
 0x132   :  { %849 = vmatmul.msk.bf16.gmra.mxu0 %vm46_vm0, %v453_v36  ;;  %v422_v24 = vmul.f32 %v1351_v29, %v403_v5  ;;  %v874_v5 = vld [vmem:[%s1740_s5] sm:$0xff] }
 0x133   :  { %v374_v28 = vsub.f32 1.5, %v373_v42  ;;  %v454_v2 = vpack.c.bf16 %v433_v49, %v432_v27  ;;  %v424_v59 = vmul.f32 %v1351_v29, %v405_v22 }
 0x134   :  { %v441_v19 = vadd.f32 %v1381_v45, %v422_v24 }
 0x135   :  { %v375_v17 = vmul.f32 %v917_v46, %v374_v28  ;;  %v443_v31 = vadd.f32 %v1381_v45, %v424_v59 }
 0x136   :  { %v458_v60 = vpack.c.bf16 %v441_v19, %v440_v56 }
 0x137   :  { %v379_v30 = vsel %vm378_vm12, %v917_v46, %v375_v17 }
 0x138   :  { %v404_v63 = vmul.f32 %v379_v30, %v1229_v44 }
 0x13a   :  { %v423_v43 = vmul.f32 %v1351_v29, %v404_v63 }
 0x13c   :  { %v442_v21 = vadd.f32 %v1381_v45, %v423_v43 }
 0x13d   :  { %854 = vmatmul.msk.bf16.gmra.mxu2 %vm46_vm0, %v458_v60 }
 0x13e   :  { %v459_v6 = vpack.c.bf16 %v443_v31, %v442_v21 }
 0x142   :  { %850 = vmatmul.msk.bf16.gmra.mxu0 %vm46_vm0, %v454_v2 }
 0x14d   :  { %855 = vmatmul.msk.bf16.gmra.mxu2 %vm46_vm0, %v459_v6 }
 0x174   :  { %v170_v0 = vpop.xlane.xlu0 %169 }
 0x175   :  { %v204_v9 = vmul.f32 %v170_v0, %v1126_v34 }
 0x177   :  { %v220_v44 = vadd.f32 1e-05, %v204_v9 }
 0x179   :  { %918 = vrsqrt.f32 %v220_v44  ;;  %vm296_vm14 = vweird.f32 %v220_v44 }
 0x17f   :  { %v919_v38 = vpop.eup %918 }
 0x180   :  { %v291_v18 = vmul.f32 %v919_v38, %v220_v44  ;;  %vm297_vm15 = vweird.f32 %v919_v38 }
 0x181   :  { %vm298_vm1 = vmor %vm296_vm14, %vm297_vm15 }
 0x182   :  { %v292_v3 = vmul.f32 %v919_v38, %v291_v18 }
 0x184   :  { %v293_v48 = vmul.f32 0.5, %v292_v3 }
 0x186   :  { %v173_v54 = vpop.xlane.xlu1 %172  ;;  %v294_v11 = vsub.f32 1.5, %v293_v48 }
 0x187   :  { %v205_v8 = vmul.f32 %v173_v54, %v1126_v34 }
 0x188   :  { %v295_v47 = vmul.f32 %v919_v38, %v294_v11 }
 0x189   :  { %v221_v10 = vadd.f32 1e-05, %v205_v8 }
 0x18a   :  { %v299_v46 = vsel %vm298_vm1, %v919_v38, %v295_v47 }
 0x18b   :  { %920 = vrsqrt.f32 %v221_v10  ;;  %v396_v32 = vmul.f32 %v299_v46, %v1252_v1  ;;  %vm306_vm3 = vweird.f32 %v221_v10  ;;  %v875_v1 = vld [vmem:[%s1740_s5 + $0x8] sm:$0xff] }
 0x18c   :  { %878 = vmatpush.bf16.msra.mxu3 %v875_v1  ;;  %747 = vmatpush.bf16.msra.mxu1 %v875_v1 }
 0x18d   :  { %v415_v57 = vmul.f32 %v1351_v29, %v396_v32 }
 0x190   :  { %879 = vmatpush.bf16.msra.mxu3 %v874_v5  ;;  %748 = vmatpush.bf16.msra.mxu1 %v874_v5 }
 0x191   :  { %v921_v15 = vpop.eup %920 }
 0x192   :  { %v301_v14 = vmul.f32 %v921_v15, %v221_v10  ;;  %vm307_vm2 = vweird.f32 %v921_v15 }
 0x193   :  { %vm308_vm4 = vmor %vm306_vm3, %vm307_vm2 }
 0x194   :  { %v302_v23 = vmul.f32 %v921_v15, %v301_v14 }
 0x196   :  { %v303_v13 = vmul.f32 0.5, %v302_v23 }
 0x198   :  { %v304_v39 = vsub.f32 1.5, %v303_v13 }
 0x19a   :  { %v305_v40 = vmul.f32 %v921_v15, %v304_v39 }
 0x19c   :  { %v309_v34 = vsel %vm308_vm4, %v921_v15, %v305_v40 }
 0x19d   :  { %v397_v4 = vmul.f32 %v309_v34, %v1313_v61  ;;  %v434_v61 = vadd.f32 %v1381_v45, %v415_v57 }
 0x19f   :  { %v416_v41 = vmul.f32 %v1351_v29, %v397_v4  ;;  %v509_v16 = vpop.f32.mrf.mxu0 }
 0x1a0   :  { %v529_v33 = vpop.f32.mrf.mxu2  ;;  %v1560_v37 = vadd.f32 %v1547_v12, %v509_v16 }
 0x1a1   :  { %v1555_v35 = vadd.f32 %v1547_v12, %v529_v33  ;;  %v435_v36 = vadd.f32 %v1381_v45, %v416_v41 }
 0x1a2   :  { %v549_v51 = vmul.f32 %v1560_v37, %v1560_v37 }
 0x1a3   :  { %v557_v29 = vmul.f32 %v1555_v35, %v1555_v35  ;;  %v455_v58 = vpack.c.bf16 %v435_v36, %v434_v61 }
 0x1a4   :  { %v565_v45 = vmul.f32 %v549_v51, %v1560_v37 }
 0x1a5   :  { %v573_v42 = vmul.f32 %v557_v29, %v1555_v35  ;;  %851 = vmatmul.msk.bf16.gmra.mxu0 %vm46_vm0, %v455_v58 }
 0x1a6   :  { %v581_v55 = vmul.f32 0.044715, %v565_v45 }
 0x1a7   :  { %v589_v20 = vmul.f32 0.044715, %v573_v42  ;;  %v511_v25 = vpop.f32.mrf.mxu0 }
 0x1a8   :  { %v531_v28 = vpop.f32.mrf.mxu2  ;;  %v597_v7 = vadd.f32 %v581_v55, %v1560_v37  ;;  %v512_v19 = vadd.f32 %v1547_v12, %v511_v25 }
 0x1a9   :  { %v605_v24 = vadd.f32 %v589_v20, %v1555_v35  ;;  %v532_v50 = vadd.f32 %v1547_v12, %v531_v28 }
 0x1aa   :  { %v613_v60 = vmul.f32 0.7978846, %v597_v7  ;;  %v550_v53 = vmul.f32 %v512_v19, %v512_v19 }
 0x1ab   :  { %v621_v56 = vmul.f32 0.7978846, %v605_v24  ;;  %v558_v17 = vmul.f32 %v532_v50, %v532_v50 }
 0x1ac   :  { %v566_v52 = vmul.f32 %v550_v53, %v512_v19 }
 0x1ad   :  { %v574_v26 = vmul.f32 %v558_v17, %v532_v50  ;;  %922 = vtanh.f32 %v621_v56 }
 0x1ae   :  { %924 = vtanh.f32 %v613_v60  ;;  %v582_v62 = vmul.f32 0.044715, %v566_v52 }
 0x1af   :  { %v590_v30 = vmul.f32 0.044715, %v574_v26  ;;  %v514_v22 = vpop.f32.mrf.mxu0 }
 0x1b0   :  { %v534_v27 = vpop.f32.mrf.mxu2  ;;  %v598_v2 = vadd.f32 %v582_v62, %v512_v19  ;;  %v1580_v43 = vadd.f32 %v1547_v12, %v514_v22 }
 0x1b1   :  { %v606_v49 = vadd.f32 %v590_v30, %v532_v50  ;;  %v1577_v63 = vadd.f32 %v1547_v12, %v534_v27 }
 0x1b2   :  { %v614_v31 = vmul.f32 0.7978846, %v598_v2  ;;  %v551_v6 = vmul.f32 %v1580_v43, %v1580_v43 }
 0x1b3   :  { %v622_v59 = vmul.f32 0.7978846, %v606_v49  ;;  %v559_v21 = vmul.f32 %v1577_v63, %v1577_v63  ;;  %v923_v0 = vpop.eup %922 }
 0x1b4   :  { %v925_v44 = vpop.eup %924  ;;  %v567_v38 = vmul.f32 %v551_v6, %v1580_v43  ;;  %v653_v8 = vadd.f32 1.0, %v923_v0 }
 0x1b5   :  { %926 = vtanh.f32 %v622_v59  ;;  %v575_v9 = vmul.f32 %v559_v21, %v1577_v63  ;;  %v645_v15 = vadd.f32 1.0, %v925_v44 }
 0x1b6   :  { %928 = vtanh.f32 %v614_v31  ;;  %v583_v3 = vmul.f32 0.044715, %v567_v38  ;;  %v669_v4 = vmul.f32 0.5, %v653_v8 }
 0x1b7   :  { %v591_v18 = vmul.f32 0.044715, %v575_v9  ;;  %v516_v11 = vpop.f32.mrf.mxu0  ;;  %v661_v33 = vmul.f32 0.5, %v645_v15 }
 0x1b8   :  { %v536_v54 = vpop.f32.mrf.mxu2  ;;  %v599_v47 = vadd.f32 %v583_v3, %v1580_v43  ;;  %v1594_v14 = vadd.f32 %v1547_v12, %v516_v11  ;;  %v685_v51 = vmul.f32 %v669_v4, %v1555_v35 }
 0x1b9   :  { %v607_v10 = vadd.f32 %v591_v18, %v1577_v63  ;;  %v1590_v48 = vadd.f32 %v1547_v12, %v536_v54  ;;  %v677_v55 = vmul.f32 %v661_v33, %v1560_v37 }
 0x1ba   :  { %v615_v32 = vmul.f32 0.7978846, %v599_v47  ;;  %v552_v40 = vmul.f32 %v1594_v14, %v1594_v14 }
 0x1bb   :  { %v927_v23 = vpop.eup %926  ;;  %v623_v46 = vmul.f32 0.7978846, %v607_v10  ;;  %v560_v13 = vmul.f32 %v1590_v48, %v1590_v48 }
 0x1bc   :  { %v929_v39 = vpop.eup %928  ;;  %v654_v34 = vadd.f32 1.0, %v927_v23  ;;  %v568_v1 = vmul.f32 %v552_v40, %v1594_v14 }
 0x1bd   :  { %v576_v57 = vmul.f32 %v560_v13, %v1590_v48  ;;  %v646_v41 = vadd.f32 1.0, %v929_v39  ;;  %930 = vtanh.f32 %v623_v46 }
 0x1be   :  { %v670_v16 = vmul.f32 0.5, %v654_v34  ;;  %932 = vtanh.f32 %v615_v32  ;;  %v584_v29 = vmul.f32 0.044715, %v568_v1 }
 0x1bf   :  { %v592_v61 = vmul.f32 0.044715, %v576_v57  ;;  %v662_v36 = vmul.f32 0.5, %v646_v41  ;;  %v519_v20 = vpop.f32.mrf.mxu0 }
 0x1c0   :  { %v539_v58 = vpop.f32.mrf.mxu2  ;;  %v686_v5 = vmul.f32 %v670_v16, %v532_v50  ;;  %v600_v24 = vadd.f32 %v584_v29, %v1594_v14  ;;  %v1610_v25 = vadd.f32 %v1547_v12, %v519_v20 }
 0x1c1   :  { %v608_v42 = vadd.f32 %v592_v61, %v1590_v48  ;;  %v1605_v45 = vadd.f32 %v1547_v12, %v539_v58  ;;  %v678_v28 = vmul.f32 %v662_v36, %v512_v19 }
 0x1c2   :  { %v697_v7 = vpack.c.bf16 %v686_v5, %v685_v51  ;;  %v616_v17 = vmul.f32 0.7978846, %v600_v24  ;;  %v553_v60 = vmul.f32 %v1610_v25, %v1610_v25 }
 0x1c3   :  { %v624_v56 = vmul.f32 0.7978846, %v608_v42  ;;  %v561_v35 = vmul.f32 %v1605_v45, %v1605_v45  ;;  %v693_v50 = vpack.c.bf16 %v678_v28, %v677_v55  ;;  %v931_v53 = vpop.eup %930 }
 0x1c4   :  { %868 = vmatmul.msk.bf16.vlgmr.msra.gmra.mxu3 %vm46_vm0, %v697_v7  ;;  %v933_v19 = vpop.eup %932  ;;  %v569_v26 = vmul.f32 %v553_v60, %v1610_v25  ;;  %v655_v27 = vadd.f32 1.0, %v931_v53 }
 0x1c5   :  { %934 = vtanh.f32 %v624_v56  ;;  %v577_v37 = vmul.f32 %v561_v35, %v1605_v45  ;;  %864 = vmatmul.msk.bf16.vlgmr.msra.gmra.mxu1 %vm46_vm0, %v693_v50  ;;  %v647_v59 = vadd.f32 1.0, %v933_v19 }
 0x1c6   :  { %936 = vtanh.f32 %v616_v17  ;;  %v585_v30 = vmul.f32 0.044715, %v569_v26  ;;  %v671_v54 = vmul.f32 0.5, %v655_v27 }
 0x1c7   :  { %v593_v52 = vmul.f32 0.044715, %v577_v37  ;;  %v521_v2 = vpop.f32.mrf.mxu0  ;;  %v663_v11 = vmul.f32 0.5, %v647_v59 }
 0x1c8   :  { %v541_v62 = vpop.f32.mrf.mxu2  ;;  %v601_v21 = vadd.f32 %v585_v30, %v1610_v25  ;;  %v522_v31 = vadd.f32 %v1547_v12, %v521_v2  ;;  %v687_v32 = vmul.f32 %v671_v54, %v1577_v63 }
 0x1c9   :  { %v609_v49 = vadd.f32 %v593_v52, %v1605_v45  ;;  %v1622_v22 = vadd.f32 %v1547_v12, %v541_v62  ;;  %v679_v57 = vmul.f32 %v663_v11, %v1580_v43 }
 0x1ca   :  { %v617_v38 = vmul.f32 0.7978846, %v601_v21  ;;  %v554_v18 = vmul.f32 %v522_v31, %v522_v31 }
 0x1cb   :  { %v935_v6 = vpop.eup %934  ;;  %v625_v0 = vmul.f32 0.7978846, %v609_v49  ;;  %v562_v9 = vmul.f32 %v1622_v22, %v1622_v22 }
 0x1cc   :  { %v937_v44 = vpop.eup %936  ;;  %v656_v3 = vadd.f32 1.0, %v935_v6  ;;  %v570_v15 = vmul.f32 %v554_v18, %v522_v31 }
 0x1cd   :  { %v578_v8 = vmul.f32 %v562_v9, %v1622_v22  ;;  %v648_v10 = vadd.f32 1.0, %v937_v44  ;;  %938 = vtanh.f32 %v625_v0 }
 0x1ce   :  { %v672_v47 = vmul.f32 0.5, %v656_v3  ;;  %940 = vtanh.f32 %v617_v38  ;;  %v586_v13 = vmul.f32 0.044715, %v570_v15 }
 0x1cf   :  { %v594_v23 = vmul.f32 0.044715, %v578_v8  ;;  %v664_v46 = vmul.f32 0.5, %v648_v10 }
 0x1d0   :  { %v544_v39 = vpop.f32.mrf.mxu2  ;;  %v688_v40 = vmul.f32 %v672_v47, %v1590_v48  ;;  %v602_v33 = vadd.f32 %v586_v13, %v522_v31 }
 0x1d1   :  { %v610_v34 = vadd.f32 %v594_v23, %v1622_v22  ;;  %v545_v4 = vadd.f32 %v1547_v12, %v544_v39  ;;  %v680_v41 = vmul.f32 %v664_v46, %v1594_v14 }
 0x1d2   :  { %v698_v1 = vpack.c.bf16 %v688_v40, %v687_v32  ;;  %v618_v29 = vmul.f32 0.7978846, %v602_v33  ;;  %v1649_v33 = vld [vmem:[%s1741_s6] ss:$0 sm:$0xff]  ;;  %s826_s6 = sshll.u32 %s997_s22, 4  ;;  %s827_s6 = int_to_ptr.vmem [resolvable:$true] %s826_s6 }
 0x1d3   :  { %v626_v16 = vmul.f32 0.7978846, %v610_v34  ;;  %v563_v61 = vmul.f32 %v545_v4, %v545_v4  ;;  %v694_v36 = vpack.c.bf16 %v680_v41, %v679_v57  ;;  %v939_v58 = vpop.eup %938 }
 0x1d4   :  { %869 = vmatmul.msk.bf16.gmra.mxu3 %vm46_vm0, %v698_v1  ;;  %v941_v48 = vpop.eup %940  ;;  %v657_v43 = vadd.f32 1.0, %v939_v58  ;;  %v954_v58 = vld [vmem:[%s1735_s0] sm:$0xff] }
 0x1d5   :  { %942 = vtanh.f32 %v626_v16  ;;  %v579_v63 = vmul.f32 %v563_v61, %v545_v4  ;;  %865 = vmatmul.msk.bf16.gmra.mxu1 %vm46_vm0, %v694_v36  ;;  %v649_v20 = vadd.f32 1.0, %v941_v48 }
 0x1d6   :  { %944 = vtanh.f32 %v618_v29  ;;  %v673_v35 = vmul.f32 0.5, %v657_v43 }
 0x1d7   :  { %v595_v51 = vmul.f32 0.044715, %v579_v63  ;;  %v665_v60 = vmul.f32 0.5, %v649_v20  ;;  %v956_v20 = vld [vmem:[%s1735_s0 + $0x8] sm:$0xff] }
 0x1d8   :  { %v546_v5 = vpop.f32.mrf.mxu2  ;;  %v689_v26 = vmul.f32 %v673_v35, %v1605_v45 }
 0x1d9   :  { %v611_v42 = vadd.f32 %v595_v51, %v545_v4  ;;  %v547_v14 = vadd.f32 %v1547_v12, %v546_v5  ;;  %v681_v62 = vmul.f32 %v665_v60, %v1610_v25  ;;  %v955_v5 = vld [vmem:[%s1735_s0 + $0x40] sm:$0xff] }
 0x1db   :  { %v943_v55 = vpop.eup %942  ;;  %v627_v28 = vmul.f32 0.7978846, %v611_v42  ;;  %v564_v24 = vmul.f32 %v547_v14, %v547_v14 }
 0x1dc   :  { %v945_v7 = vpop.eup %944  ;;  %v658_v56 = vadd.f32 1.0, %v943_v55 }
 0x1dd   :  { %v580_v50 = vmul.f32 %v564_v24, %v547_v14  ;;  %v650_v17 = vadd.f32 1.0, %v945_v7  ;;  %946 = vtanh.f32 %v627_v28  ;;  %v957_v7 = vld [vmem:[%s1735_s0 + $0x48] sm:$0xff] }
 0x1de   :  { %v674_v53 = vmul.f32 0.5, %v658_v56 }
 0x1df   :  { %v596_v37 = vmul.f32 0.044715, %v580_v50  ;;  %v666_v19 = vmul.f32 0.5, %v650_v17  ;;  %v958_v17 = vld [vmem:[%s1735_s0 + $0x10] sm:$0xff] }
 0x1e0   :  { %v690_v52 = vmul.f32 %v674_v53, %v1622_v22 }
 0x1e1   :  { %v612_v30 = vadd.f32 %v596_v37, %v547_v14  ;;  %v682_v27 = vmul.f32 %v666_v19, %v522_v31  ;;  %v959_v19 = vld [vmem:[%s1735_s0 + $0x50] sm:$0xff] }
 0x1e2   :  { %v699_v49 = vpack.c.bf16 %v690_v52, %v689_v26 }
 0x1e3   :  { %v628_v2 = vmul.f32 0.7978846, %v612_v30  ;;  %v695_v59 = vpack.c.bf16 %v682_v27, %v681_v62  ;;  %v947_v21 = vpop.eup %946  ;;  %v960_v62 = vld [vmem:[%s1735_s0 + $0x18] sm:$0xff] }
 0x1e4   :  { %870 = vmatmul.msk.bf16.gmra.mxu3 %vm46_vm0, %v699_v49  ;;  %v659_v6 = vadd.f32 1.0, %v947_v21 }
 0x1e5   :  { %948 = vtanh.f32 %v628_v2  ;;  %866 = vmatmul.msk.bf16.gmra.mxu1 %vm46_vm0, %v695_v59  ;;  %v961_v59 = vld [vmem:[%s1735_s0 + $0x58] sm:$0xff] }
 0x1e6   :  { %v675_v44 = vmul.f32 0.5, %v659_v6 }
 0x1e8   :  { %v691_v38 = vmul.f32 %v675_v44, %v545_v4 }
 0x1eb   :  { %v949_v0 = vpop.eup %948 }
 0x1ec   :  { %v660_v9 = vadd.f32 1.0, %v949_v0 }
 0x1ee   :  { %v676_v45 = vmul.f32 0.5, %v660_v9  ;;  %v962_v9 = vld [vmem:[%s1735_s0 + $0x20] sm:$0xff] }
 0x1f0   :  { %v692_v22 = vmul.f32 %v676_v45, %v547_v14 }
 0x1f2   :  { %v700_v18 = vpack.c.bf16 %v692_v22, %v691_v38  ;;  %v963_v22 = vld [vmem:[%s1735_s0 + $0x60] sm:$0xff] }
 0x1f4   :  { %871 = vmatmul.msk.bf16.gmra.mxu3 %vm46_vm0, %v700_v18 }
 0x222   :  { %v524_v25 = vpop.f32.mrf.mxu0 }
 0x223   :  { %v525_v31 = vadd.f32 %v1547_v12, %v524_v25 }
 0x225   :  { %v555_v3 = vmul.f32 %v525_v31, %v525_v31 }
 0x227   :  { %v571_v54 = vmul.f32 %v555_v3, %v525_v31  ;;  %v964_v3 = vld [vmem:[%s1735_s0 + $0x28] sm:$0xff] }
 0x229   :  { %v587_v8 = vmul.f32 0.044715, %v571_v54 }
 0x22a   :  { %v526_v10 = vpop.f32.mrf.mxu0 }
 0x22b   :  { %v603_v11 = vadd.f32 %v587_v8, %v525_v31  ;;  %v527_v15 = vadd.f32 %v1547_v12, %v526_v10 }
 0x22d   :  { %v619_v47 = vmul.f32 0.7978846, %v603_v11  ;;  %v556_v23 = vmul.f32 %v527_v15, %v527_v15  ;;  %v965_v11 = vld [vmem:[%s1735_s0 + $0x68] sm:$0xff] }
 0x22f   :  { %v572_v46 = vmul.f32 %v556_v23, %v527_v15  ;;  %950 = vtanh.f32 %v619_v47 }
 0x231   :  { %v588_v13 = vmul.f32 0.044715, %v572_v46  ;;  %v966_v46 = vld [vmem:[%s1735_s0 + $0x70] sm:$0xff] }
 0x233   :  { %v604_v39 = vadd.f32 %v588_v13, %v527_v15 }
 0x235   :  { %v620_v32 = vmul.f32 0.7978846, %v604_v39  ;;  %v951_v40 = vpop.eup %950 }
 0x236   :  { %v651_v34 = vadd.f32 1.0, %v951_v40  ;;  %v967_v40 = vld [vmem:[%s1735_s0 + $0x78] sm:$0xff] }
 0x237   :  { %952 = vtanh.f32 %v620_v32 }
 0x238   :  { %v667_v41 = vmul.f32 0.5, %v651_v34 }
 0x23a   :  { %v683_v16 = vmul.f32 %v667_v41, %v525_v31  ;;  %v968_v41 = vld [vmem:[%s1735_s0 + $0x30] sm:$0xff] }
 0x23d   :  { %v953_v4 = vpop.eup %952 }
 0x23e   :  { %v652_v57 = vadd.f32 1.0, %v953_v4 }
 0x240   :  { %v668_v1 = vmul.f32 0.5, %v652_v57 }
 0x242   :  { %v750_v12 = vpop.f32.mrf.mxu1  ;;  %v684_v61 = vmul.f32 %v668_v1, %v527_v15 }
 0x243   :  { %v751_v36 = vadd.f32 %v1649_v33, %v750_v12 }
 0x244   :  { %v696_v29 = vpack.c.bf16 %v684_v61, %v683_v16  ;;  %v969_v61 = vld [vmem:[%s1735_s0 + $0x38] sm:$0xff] }
 0x245   :  { %v790_v63 = vadd.f32 %v954_v58, %v751_v36 }
 0x246   :  { %867 = vmatmul.msk.bf16.gmra.mxu1 %vm46_vm0, %v696_v29 }
 0x247   :  { %806 = vst.msk [vmem:[#allocation2] sm:$0xff] %vm46_vm0, %v790_v63  ;;  %v770_v48 = vpop.f32.mrf.mxu3 }
 0x248   :  { %v771_v51 = vadd.f32 %v1649_v33, %v770_v48 }
 0x24a   :  { %v798_v43 = vadd.f32 %v955_v5, %v771_v51  ;;  %v752_v42 = vpop.f32.mrf.mxu1 }
 0x24b   :  { %v753_v14 = vadd.f32 %v1649_v33, %v752_v42 }
 0x24c   :  { %814 = vst.msk [vmem:[#allocation2 + $0x40] sm:$0xff] %vm46_vm0, %v798_v43 }
 0x24d   :  { %v791_v55 = vadd.f32 %v956_v20, %v753_v14 }
 0x24f   :  { %807 = vst.msk [vmem:[#allocation2 + $0x8] sm:$0xff] %vm46_vm0, %v791_v55  ;;  %v772_v28 = vpop.f32.mrf.mxu3 }
 0x250   :  { %v773_v24 = vadd.f32 %v1649_v33, %v772_v28 }
 0x252   :  { %v799_v56 = vadd.f32 %v957_v7, %v773_v24  ;;  %v755_v35 = vpop.f32.mrf.mxu1 }
 0x253   :  { %v756_v50 = vadd.f32 %v1649_v33, %v755_v35 }
 0x254   :  { %815 = vst.msk [vmem:[#allocation2 + $0x48] sm:$0xff] %vm46_vm0, %v799_v56 }
 0x255   :  { %v792_v60 = vadd.f32 %v958_v17, %v756_v50 }
 0x257   :  { %808 = vst.msk [vmem:[#allocation2 + $0x10] sm:$0xff] %vm46_vm0, %v792_v60  ;;  %v775_v53 = vpop.f32.mrf.mxu3 }
 0x258   :  { %v776_v37 = vadd.f32 %v1649_v33, %v775_v53 }
 0x25a   :  { %v800_v26 = vadd.f32 %v959_v19, %v776_v37  ;;  %v757_v52 = vpop.f32.mrf.mxu1 }
 0x25b   :  { %v758_v30 = vadd.f32 %v1649_v33, %v757_v52 }
 0x25c   :  { %816 = vst.msk [vmem:[#allocation2 + $0x50] sm:$0xff] %vm46_vm0, %v800_v26 }
 0x25d   :  { %v793_v27 = vadd.f32 %v960_v62, %v758_v30 }
 0x25f   :  { %809 = vst.msk [vmem:[#allocation2 + $0x18] sm:$0xff] %vm46_vm0, %v793_v27  ;;  %v777_v49 = vpop.f32.mrf.mxu3 }
 0x260   :  { %v778_v2 = vadd.f32 %v1649_v33, %v777_v49 }
 0x262   :  { %v801_v21 = vadd.f32 %v961_v59, %v778_v2  ;;  %v760_v6 = vpop.f32.mrf.mxu1 }
 0x263   :  { %v761_v0 = vadd.f32 %v1649_v33, %v760_v6 }
 0x264   :  { %817 = vst.msk [vmem:[#allocation2 + $0x58] sm:$0xff] %vm46_vm0, %v801_v21 }
 0x265   :  { %v794_v44 = vadd.f32 %v962_v9, %v761_v0 }
 0x267   :  { %810 = vst.msk [vmem:[#allocation2 + $0x20] sm:$0xff] %vm46_vm0, %v794_v44  ;;  %v780_v45 = vpop.f32.mrf.mxu3 }
 0x268   :  { %v781_v38 = vadd.f32 %v1649_v33, %v780_v45 }
 0x26a   :  { %v802_v18 = vadd.f32 %v963_v22, %v781_v38  ;;  %v762_v25 = vpop.f32.mrf.mxu1 }
 0x26b   :  { %v763_v31 = vadd.f32 %v1649_v33, %v762_v25 }
 0x26c   :  { %818 = vst.msk [vmem:[#allocation2 + $0x60] sm:$0xff] %vm46_vm0, %v802_v18 }
 0x26d   :  { %v795_v54 = vadd.f32 %v964_v3, %v763_v31 }
 0x26f   :  { %811 = vst.msk [vmem:[#allocation2 + $0x28] sm:$0xff] %vm46_vm0, %v795_v54  ;;  %v782_v8 = vpop.f32.mrf.mxu3 }
 0x270   :  { %v783_v10 = vadd.f32 %v1649_v33, %v782_v8 }
 0x272   :  { %v803_v15 = vadd.f32 %v965_v11, %v783_v10 }
 0x274   :  { %819 = vst.msk [vmem:[#allocation2 + $0x68] sm:$0xff] %vm46_vm0, %v803_v15 }
 0x277   :  { %v785_v47 = vpop.f32.mrf.mxu3 }
 0x278   :  { %v786_v23 = vadd.f32 %v1649_v33, %v785_v47 }
 0x27a   :  { %v804_v13 = vadd.f32 %v966_v46, %v786_v23 }
 0x27c   :  { %820 = vst.msk [vmem:[#allocation2 + $0x70] sm:$0xff] %vm46_vm0, %v804_v13 }
 0x27f   :  { %v787_v39 = vpop.f32.mrf.mxu3 }
 0x280   :  { %v788_v32 = vadd.f32 %v1649_v33, %v787_v39 }
 0x282   :  { %v805_v34 = vadd.f32 %v967_v40, %v788_v32 }
 0x284   :  { %821 = vst.msk [vmem:[#allocation2 + $0x78] sm:$0xff] %vm46_vm0, %v805_v34 }
 0x2c3   :  { %v765_v4 = vpop.f32.mrf.mxu1 }
 0x2c4   :  { %v766_v57 = vadd.f32 %v1649_v33, %v765_v4 }
 0x2c6   :  { %v796_v1 = vadd.f32 %v968_v41, %v766_v57 }
 0x2c8   :  { %812 = vst.msk [vmem:[#allocation2 + $0x30] sm:$0xff] %vm46_vm0, %v796_v1 }
 0x2cb   :  { %v767_v12 = vpop.f32.mrf.mxu1 }
 0x2cc   :  { %v768_v16 = vadd.f32 %v1649_v33, %v767_v12 }
 0x2ce   :  { %v797_v36 = vadd.f32 %v969_v61, %v768_v16 }
 0x2d0   :  { %813 = vst.msk [vmem:[#allocation2 + $0x38] sm:$0xff] %vm46_vm0, %v797_v36 }
 0x2d1   :  { %834 = dma.vmem_to_hbm [thread:$0]  %s827_s6, 2048, %s829_s25, [#allocation3], %s998_s28, %s998_s28, %s999_s29  }
 0x2d2   :  { %994 = dma.done.wait [#allocation3], 2048  }
 0x2d3   :  { %995 = vsyncadd [#allocation3], 4294965248 }
 0x2d4   :  { %839 = vsyncpa [#allocation3], 1 }

// kernel: grn_transformer_forward.4
= control target key start
LH: loop header
LB: loop body
LE: loop exit
PB: predicated region body
PF: predicated region fallthrough
CT: control target
= control target key end

     0   :  { %vm47_vm0 = vcmask 261120   ;;  %v4424_v32 = vmov 32.0   ;;  %s4426_s27 = smov 56   ;;  %s4429_s12 = smov 48   ;;  %s6797_s0 = inlined_call_operand.vmem [shape: f32[128,32], index: 0, kind: input, shape index: {}]   ;;  %s6798_s1 = inlined_call_operand.vmem [shape: f32[1,32], index: 1, kind: input, shape index: {}]   ;;  %s6799_s2 = inlined_call_operand.vmem [shape: f32[1,32], index: 2, kind: input, shape index: {}]   ;;  %s6800_s3 = inlined_call_operand.vmem [shape: f32[32,352], index: 3, kind: input, shape index: {}]   ;;  %s6801_s5 = inlined_call_operand.vmem [shape: f32[64,256], index: 5, kind: input, shape index: {}]   ;;  %s6802_s4 = inlined_call_operand.vmem [shape: f32[1,352], index: 4, kind: input, shape index: {}]   ;;  %s6803_s6 = inlined_call_operand.vmem [shape: f32[4,128], index: 6, kind: input, shape index: {}]   ;;  %s6804_s7 = inlined_call_operand.vmem [shape: f32[128,4], index: 7, kind: input, shape index: {}]   ;;  %s6805_s8 = inlined_call_operand.vmem [shape: f32[128,32], index: 8, kind: output, shape index: {}]  }
   0x1   :  { %v4487_v0 = vld [vmem:[%s6797_s0 + $0x20] sm:$0xff]  ;;  %v31_v1 = vld [vmem:[%s6797_s0 + $0x10] sm:$0xff]  ;;  %v4502_v6 = vld [vmem:[%s6797_s0 + $0x28] sm:$0xff]  ;;  %4306 = vrcp.f32 %v4424_v32  ;;  %s4430_s13 = smov 32   ;;  %s4437_s14 = smov 16  }
   0x2   :  { %v29_v2 = vld [vmem:[%s6797_s0] sm:$0xff]  ;;  %v60_v3 = vsel %vm47_vm0, %v4487_v0, 0.0  ;;  %v54_v4 = vsel %vm47_vm0, %v31_v1, 0.0  ;;  %v4507_v7 = vld [vmem:[%s6797_s0 + $0x18] sm:$0xff]  ;;  %v4512_v8 = vld [vmem:[%s6797_s0 + $0x8] sm:$0xff]  ;;  %v63_v9 = vsel %vm47_vm0, %v4502_v6, 0.0 }
   0x3   :  { %v48_v5 = vsel %vm47_vm0, %v29_v2, 0.0  ;;  %61 = vadd.xlane.f32.xlu2 %v60_v3  ;;  %55 = vadd.xlane.f32.xlu1 %v54_v4  ;;  %v57_v10 = vsel %vm47_vm0, %v4507_v7, 0.0  ;;  %v51_v11 = vsel %vm47_vm0, %v4512_v8, 0.0  ;;  %v4523_v12 = vld [vmem:[%s6797_s0 + $0x40] sm:$0xff]  ;;  %v4528_v13 = vld [vmem:[%s6797_s0 + $0x30] sm:$0xff]  ;;  %v4533_v14 = vld [vmem:[%s6797_s0 + $0x38] sm:$0xff] }
   0x4   :  { %49 = vadd.xlane.f32.xlu0 %v48_v5  ;;  %v72_v15 = vsel %vm47_vm0, %v4523_v12, 0.0  ;;  %v66_v16 = vsel %vm47_vm0, %v4528_v13, 0.0  ;;  %v69_v17 = vsel %vm47_vm0, %v4533_v14, 0.0  ;;  %v4544_v18 = vld [vmem:[%s6797_s0 + $0x48] sm:$0xff]  ;;  %v4549_v19 = vld [vmem:[%s6797_s0 + $0x58] sm:$0xff]  ;;  %v4554_v20 = vld [vmem:[%s6797_s0 + $0x50] sm:$0xff] }
   0x5   :  { %v75_v21 = vsel %vm47_vm0, %v4544_v18, 0.0  ;;  %v81_v22 = vsel %vm47_vm0, %v4549_v19, 0.0  ;;  %v78_v23 = vsel %vm47_vm0, %v4554_v20, 0.0  ;;  %v4565_v24 = vld [vmem:[%s6797_s0 + $0x60] sm:$0xff]  ;;  %v4570_v25 = vld [vmem:[%s6797_s0 + $0x70] sm:$0xff]  ;;  %v4575_v26 = vld [vmem:[%s6797_s0 + $0x68] sm:$0xff] }
   0x6   :  { %v84_v27 = vsel %vm47_vm0, %v4565_v24, 0.0  ;;  %v90_v28 = vsel %vm47_vm0, %v4570_v25, 0.0  ;;  %v87_v29 = vsel %vm47_vm0, %v4575_v26, 0.0  ;;  %v4586_v30 = vld [vmem:[%s6797_s0 + $0x78] sm:$0xff]  ;;  %s4438_s15 = smov 24  }
   0x7   :  { %v93_v31 = vsel %vm47_vm0, %v4586_v30, 0.0  ;;  %v4307_v33 = vpop.eup %4306 }
   0x8   :  { %v97_v34 = vmul.f32 32.0, %v4307_v33  ;;  %vm101_vm1 = vweird.f32 %v4307_v33 }
   0xa   :  { %v98_v35 = vsub.f32 1.0, %v97_v34 }
   0xb   :  { %64 = vadd.xlane.f32.xlu2 %v63_v9  ;;  %58 = vadd.xlane.f32.xlu1 %v57_v10 }
   0xc   :  { %52 = vadd.xlane.f32.xlu0 %v51_v11  ;;  %v99_v36 = vmul.f32 %v4307_v33, %v98_v35 }
   0xe   :  { %v100_v37 = vadd.f32 %v4307_v33, %v99_v36 }
  0x10   :  { %v4590_v38 = vsel %vm101_vm1, %v4307_v33, %v100_v37 }
  0x13   :  { %73 = vadd.xlane.f32.xlu2 %v72_v15  ;;  %67 = vadd.xlane.f32.xlu1 %v66_v16 }
  0x14   :  { %70 = vadd.xlane.f32.xlu0 %v69_v17 }
  0x1b   :  { %76 = vadd.xlane.f32.xlu1 %v75_v21  ;;  %82 = vadd.xlane.f32.xlu2 %v81_v22 }
  0x1c   :  { %79 = vadd.xlane.f32.xlu0 %v78_v23 }
  0x23   :  { %85 = vadd.xlane.f32.xlu1 %v84_v27  ;;  %91 = vadd.xlane.f32.xlu2 %v90_v28 }
  0x24   :  { %88 = vadd.xlane.f32.xlu0 %v87_v29 }
  0x2b   :  { %94 = vadd.xlane.f32.xlu1 %v93_v31 }
  0x76   :  { %v62_v39 = vpop.xlane.xlu2 %61  ;;  %v56_v40 = vpop.xlane.xlu1 %55 }
  0x77   :  { %v105_v41 = vmul.f32 %v4590_v38, %v56_v40  ;;  %v50_v42 = vpop.xlane.xlu0 %49  ;;  %v107_v55 = vmul.f32 %v4590_v38, %v62_v39 }
  0x78   :  { %v103_v43 = vmul.f32 %v4590_v38, %v50_v42 }
  0x79   :  { %v4594_v44 = vsub.f32 %v31_v1, %v105_v41  ;;  %v4622_v62 = vsub.f32 %v4487_v0, %v107_v55 }
  0x7a   :  { %v4596_v45 = vsub.f32 %v29_v2, %v103_v43 }
  0x7b   :  { %v137_v46 = vmul.f32 %v4594_v44, %v4594_v44 }
  0x7c   :  { %v135_v47 = vmul.f32 %v4596_v45, %v4596_v45 }
  0x7d   :  { %v157_v48 = vsel %vm47_vm0, %v137_v46, 0.0 }
  0x7e   :  { %v65_v49 = vpop.xlane.xlu2 %64  ;;  %158 = vadd.xlane.f32.xlu1 %v157_v48  ;;  %v59_v50 = vpop.xlane.xlu1 %58  ;;  %v151_v51 = vsel %vm47_vm0, %v135_v47, 0.0 }
  0x7f   :  { %v108_v52 = vmul.f32 %v4590_v38, %v65_v49  ;;  %v106_v53 = vmul.f32 %v4590_v38, %v59_v50  ;;  %152 = vadd.xlane.f32.xlu0 %v151_v51  ;;  %v53_v54 = vpop.xlane.xlu0 %52 }
  0x80   :  { %v104_v56 = vmul.f32 %v4590_v38, %v53_v54 }
  0x81   :  { %v4609_v57 = vsub.f32 %v4502_v6, %v108_v52  ;;  %v4612_v58 = vsub.f32 %v4507_v7, %v106_v53 }
  0x82   :  { %v4615_v59 = vsub.f32 %v4512_v8, %v104_v56  ;;  %v139_v8 = vmul.f32 %v4622_v62, %v4622_v62 }
  0x83   :  { %v140_v60 = vmul.f32 %v4609_v57, %v4609_v57  ;;  %v138_v61 = vmul.f32 %v4612_v58, %v4612_v58 }
  0x84   :  { %v136_v63 = vmul.f32 %v4615_v59, %v4615_v59  ;;  %v163_v17 = vsel %vm47_vm0, %v139_v8, 0.0  ;;  %v446_v8 = vld [vmem:[%s6800_s3 + $0x8] sm:$0xff] }
  0x85   :  { %v166_v1 = vsel %vm47_vm0, %v140_v60, 0.0  ;;  %v160_v2 = vsel %vm47_vm0, %v138_v61, 0.0 }
  0x86   :  { %v74_v3 = vpop.xlane.xlu2 %73  ;;  %167 = vadd.xlane.f32.xlu1 %v166_v1  ;;  %v68_v4 = vpop.xlane.xlu1 %67  ;;  %v154_v5 = vsel %vm47_vm0, %v136_v63, 0.0  ;;  %v454_v63 = vld [vmem:[%s6800_s3 + $0x48] sm:$0xff]  ;;  %v456_v1 = vld [vmem:[%s6800_s3 + $0x58] sm:$0xff] }
  0x87   :  { %v111_v6 = vmul.f32 %v4590_v38, %v74_v3  ;;  %v109_v7 = vmul.f32 %v4590_v38, %v68_v4  ;;  %161 = vadd.xlane.f32.xlu0 %v160_v2  ;;  %155 = vadd.xlane.f32.xlu2 %v154_v5  ;;  %v71_v0 = vpop.xlane.xlu0 %70  ;;  %v451_v2 = vld [vmem:[%s6800_s3 + $0x30] sm:$0xff]  ;;  %v452_v3 = vld [vmem:[%s6800_s3 + $0x38] sm:$0xff]  ;;  %v453_v4 = vld [vmem:[%s6800_s3 + $0x40] sm:$0xff] }
  0x88   :  { %v110_v9 = vmul.f32 %v4590_v38, %v71_v0  ;;  %525 = vmatpush.msra.mxu0 %v454_v63  ;;  %655 = vmatpush.msra.mxu2 %v456_v1  ;;  %v448_v5 = vld [vmem:[%s6800_s3 + $0x18] sm:$0xff]  ;;  %v445_v0 = vld [vmem:[%s6800_s3] sm:$0xff] }
  0x89   :  { %v4635_v10 = vsub.f32 %v4523_v12, %v111_v6  ;;  %v4638_v11 = vsub.f32 %v4528_v13, %v109_v7  ;;  %v449_v6 = vld [vmem:[%s6800_s3 + $0x20] sm:$0xff]  ;;  %v450_v7 = vld [vmem:[%s6800_s3 + $0x28] sm:$0xff] }
  0x8a   :  { %v4646_v21 = vsub.f32 %v4533_v14, %v110_v9  ;;  %526 = vmatpush.msra.mxu0 %v451_v2  ;;  %656 = vmatpush.msra.mxu2 %v453_v4  ;;  %v447_v9 = vld [vmem:[%s6800_s3 + $0x10] sm:$0xff] }
  0x8b   :  { %v143_v15 = vmul.f32 %v4635_v10, %v4635_v10  ;;  %v141_v16 = vmul.f32 %v4638_v11, %v4638_v11 }
  0x8c   :  { %v142_v31 = vmul.f32 %v4646_v21, %v4646_v21  ;;  %527 = vmatpush.msra.mxu0 %v448_v5  ;;  %657 = vmatpush.msra.mxu2 %v450_v7 }
  0x8d   :  { %v175_v22 = vsel %vm47_vm0, %v143_v15, 0.0  ;;  %v169_v23 = vsel %vm47_vm0, %v141_v16, 0.0 }
  0x8e   :  { %176 = vadd.xlane.f32.xlu1 %v175_v22  ;;  %v77_v12 = vpop.xlane.xlu1 %76  ;;  %v83_v27 = vpop.xlane.xlu2 %82  ;;  %v172_v35 = vsel %vm47_vm0, %v142_v31, 0.0  ;;  %528 = vmatpush.msra.mxu0 %v445_v0 }
  0x8f   :  { %v112_v13 = vmul.f32 %v4590_v38, %v77_v12  ;;  %170 = vadd.xlane.f32.xlu0 %v169_v23  ;;  %164 = vadd.xlane.f32.xlu2 %v163_v17  ;;  %v80_v28 = vpop.xlane.xlu0 %79  ;;  %v114_v29 = vmul.f32 %v4590_v38, %v83_v27 }
  0x90   :  { %v113_v14 = vmul.f32 %v4590_v38, %v80_v28  ;;  %658 = vmatpush.msra.mxu2 %v447_v9 }
  0x91   :  { %v4656_v32 = vsub.f32 %v4544_v18, %v112_v13  ;;  %v4661_v34 = vsub.f32 %v4549_v19, %v114_v29 }
  0x92   :  { %v4665_v36 = vsub.f32 %v4554_v20, %v113_v14 }
  0x93   :  { %v144_v33 = vmul.f32 %v4656_v32, %v4656_v32  ;;  %v146_v19 = vmul.f32 %v4661_v34, %v4661_v34 }
  0x94   :  { %v145_v43 = vmul.f32 %v4665_v36, %v4665_v36 }
  0x95   :  { %v178_v37 = vsel %vm47_vm0, %v144_v33, 0.0  ;;  %v184_v49 = vsel %vm47_vm0, %v146_v19, 0.0 }
  0x96   :  { %v86_v39 = vpop.xlane.xlu1 %85  ;;  %v92_v40 = vpop.xlane.xlu2 %91  ;;  %v181_v50 = vsel %vm47_vm0, %v145_v43, 0.0 }
  0x97   :  { %v115_v41 = vmul.f32 %v4590_v38, %v86_v39  ;;  %179 = vadd.xlane.f32.xlu0 %v178_v37  ;;  %173 = vadd.xlane.f32.xlu2 %v172_v35  ;;  %v89_v18 = vpop.xlane.xlu0 %88  ;;  %v117_v42 = vmul.f32 %v4590_v38, %v92_v40 }
  0x98   :  { %v116_v20 = vmul.f32 %v4590_v38, %v89_v18 }
  0x99   :  { %v4676_v46 = vsub.f32 %v4565_v24, %v115_v41  ;;  %v4681_v48 = vsub.f32 %v4570_v25, %v117_v42 }
  0x9a   :  { %v4686_v51 = vsub.f32 %v4575_v26, %v116_v20 }
  0x9b   :  { %v147_v47 = vmul.f32 %v4676_v46, %v4676_v46  ;;  %v149_v54 = vmul.f32 %v4681_v48, %v4681_v48 }
  0x9c   :  { %v148_v25 = vmul.f32 %v4686_v51, %v4686_v51 }
  0x9d   :  { %v187_v52 = vsel %vm47_vm0, %v147_v47, 0.0  ;;  %v193_v56 = vsel %vm47_vm0, %v149_v54, 0.0 }
  0x9e   :  { %188 = vadd.xlane.f32.xlu1 %v187_v52  ;;  %v95_v53 = vpop.xlane.xlu1 %94  ;;  %v190_v60 = vsel %vm47_vm0, %v148_v25, 0.0 }
  0x9f   :  { %v118_v24 = vmul.f32 %v4590_v38, %v95_v53  ;;  %185 = vadd.xlane.f32.xlu0 %v184_v49  ;;  %182 = vadd.xlane.f32.xlu2 %v181_v50 }
  0xa1   :  { %v4695_v55 = vsub.f32 %v4586_v30, %v118_v24  ;;  %v455_v30 = vld [vmem:[%s6800_s3 + $0x50] sm:$0xff] }
  0xa2   :  { %590 = vmatpush.msra.mxu1 %v455_v30 }
  0xa3   :  { %v150_v26 = vmul.f32 %v4695_v55, %v4695_v55 }
  0xa4   :  { %591 = vmatpush.msra.mxu1 %v452_v3 }
  0xa5   :  { %v196_v61 = vsel %vm47_vm0, %v150_v26, 0.0 }
  0xa6   :  { %197 = vadd.xlane.f32.xlu1 %v196_v61  ;;  %592 = vmatpush.msra.mxu1 %v449_v6  ;;  %v4787_v6 = vld [vmem:[%s6798_s1] ss:$0 sm:$0xff] }
  0xa7   :  { %194 = vadd.xlane.f32.xlu0 %v193_v56  ;;  %191 = vadd.xlane.f32.xlu2 %v190_v60 }
  0xa8   :  { %593 = vmatpush.msra.mxu1 %v446_v8 }
  0xf1   :  { %v159_v15 = vpop.xlane.xlu1 %158 }
  0xf2   :  { %v201_v16 = vmul.f32 %v159_v15, %v4590_v38  ;;  %v153_v17 = vpop.xlane.xlu0 %152 }
  0xf3   :  { %v199_v22 = vmul.f32 %v153_v17, %v4590_v38  ;;  %v4797_v17 = vld [vmem:[%s6799_s2] ss:$0 sm:$0xff] }
  0xf4   :  { %v4740_v23 = vadd.f32 1e-05, %v201_v16 }
  0xf5   :  { %v215_v12 = vadd.f32 1e-05, %v199_v22 }
  0xf6   :  { %4308 = vrsqrt.f32 %v4740_v23  ;;  %vm257_vm5 = vweird.f32 %v4740_v23 }
  0xf7   :  { %4310 = vrsqrt.f32 %v215_v12  ;;  %vm237_vm3 = vweird.f32 %v215_v12 }
  0xf9   :  { %v168_v27 = vpop.xlane.xlu1 %167 }
  0xfa   :  { %v204_v13 = vmul.f32 %v168_v27, %v4590_v38  ;;  %v156_v28 = vpop.xlane.xlu2 %155  ;;  %v162_v29 = vpop.xlane.xlu0 %161 }
  0xfb   :  { %v200_v31 = vmul.f32 %v156_v28, %v4590_v38  ;;  %v202_v14 = vmul.f32 %v162_v29, %v4590_v38 }
  0xfc   :  { %v4746_v33 = vpop.eup %4308  ;;  %v4748_v35 = vadd.f32 1e-05, %v204_v13 }
  0xfd   :  { %v4311_v37 = vpop.eup %4310  ;;  %v252_v39 = vmul.f32 %v4746_v33, %v4740_v23  ;;  %v4752_v40 = vadd.f32 1e-05, %v200_v31  ;;  %v4754_v41 = vadd.f32 1e-05, %v202_v14  ;;  %vm258_vm6 = vweird.f32 %v4746_v33 }
  0xfe   :  { %v232_v18 = vmul.f32 %v4311_v37, %v215_v12  ;;  %4312 = vrsqrt.f32 %v4748_v35  ;;  %vm238_vm2 = vweird.f32 %v4311_v37  ;;  %vm4812_vm9 = vmor %vm257_vm5, %vm258_vm6  ;;  %vm287_vm15 = vweird.f32 %v4748_v35 }
  0xff   :  { %4314 = vrsqrt.f32 %v4752_v40  ;;  %v253_v42 = vmul.f32 %v4746_v33, %v252_v39  ;;  %vm239_vm4 = vmor %vm237_vm3, %vm238_vm2  ;;  %vm247_vm7 = vweird.f32 %v4752_v40  ;;  %vm267_vm11 = vweird.f32 %v4754_v41 }
 0x100   :  { %v233_v19 = vmul.f32 %v4311_v37, %v232_v18  ;;  %4316 = vrsqrt.f32 %v4754_v41 }
 0x101   :  { %v177_v43 = vpop.xlane.xlu1 %176  ;;  %v254_v24 = vmul.f32 0.5, %v253_v42 }
 0x102   :  { %v234_v20 = vmul.f32 0.5, %v233_v19  ;;  %v207_v47 = vmul.f32 %v177_v43, %v4590_v38  ;;  %v165_v49 = vpop.xlane.xlu2 %164  ;;  %v171_v50 = vpop.xlane.xlu0 %170 }
 0x103   :  { %v203_v52 = vmul.f32 %v165_v49, %v4590_v38  ;;  %v205_v26 = vmul.f32 %v171_v50, %v4590_v38  ;;  %v255_v3 = vsub.f32 1.5, %v254_v24 }
 0x104   :  { %v4762_v53 = vpop.eup %4312  ;;  %v235_v54 = vsub.f32 1.5, %v234_v20  ;;  %v4764_v25 = vadd.f32 1e-05, %v207_v47 }
 0x105   :  { %v4767_v56 = vpop.eup %4314  ;;  %v4769_v60 = vadd.f32 1e-05, %v203_v52  ;;  %v282_v1 = vmul.f32 %v4762_v53, %v4748_v35  ;;  %v4782_v5 = vadd.f32 1e-05, %v205_v26  ;;  %v256_v28 = vmul.f32 %v4746_v33, %v255_v3 }
 0x106   :  { %v4771_v61 = vpop.eup %4316  ;;  %v236_v63 = vmul.f32 %v4311_v37, %v235_v54  ;;  %v242_v30 = vmul.f32 %v4767_v56, %v4752_v40  ;;  %4318 = vrsqrt.f32 %v4764_v25  ;;  %vm248_vm8 = vweird.f32 %v4767_v56 }
 0x107   :  { %v262_v2 = vmul.f32 %v4771_v61, %v4754_v41  ;;  %4320 = vrsqrt.f32 %v4769_v60  ;;  %v283_v22 = vmul.f32 %v4762_v53, %v282_v1  ;;  %vm4828_vm10 = vmor %vm247_vm7, %vm248_vm8  ;;  %vm268_vm12 = vweird.f32 %v4771_v61 }
 0x108   :  { %v243_v4 = vmul.f32 %v4767_v56, %v242_v30  ;;  %v240_v0 = vsel %vm239_vm4, %v4311_v37, %v236_v63  ;;  %4322 = vrsqrt.f32 %v4782_v5  ;;  %v260_v50 = vsel %vm4812_vm9, %v4746_v33, %v256_v28  ;;  %vm4878_vm1 = vmor %vm267_vm11, %vm268_vm12 }
 0x109   :  { %v263_v7 = vmul.f32 %v4771_v61, %v262_v2  ;;  %v391_v16 = vmul.f32 %v240_v0, %v4596_v45  ;;  %v284_v20 = vmul.f32 0.5, %v283_v22  ;;  %vm277_vm13 = vweird.f32 %v4769_v60 }
 0x10a   :  { %v244_v8 = vmul.f32 0.5, %v243_v4  ;;  %v174_v9 = vpop.xlane.xlu2 %173  ;;  %v180_v15 = vpop.xlane.xlu0 %179  ;;  %vm288_vm2 = vweird.f32 %v4762_v53  ;;  %vm317_vm4 = vweird.f32 %v4764_v25  ;;  %vm297_vm6 = vweird.f32 %v4782_v5 }
 0x10b   :  { %v206_v12 = vmul.f32 %v174_v9, %v4590_v38  ;;  %v208_v27 = vmul.f32 %v180_v15, %v4590_v38  ;;  %v410_v45 = vmul.f32 %v4787_v6, %v391_v16  ;;  %v264_v14 = vmul.f32 0.5, %v263_v7 }
 0x10c   :  { %v4803_v13 = vpop.eup %4318  ;;  %v245_v29 = vsub.f32 1.5, %v244_v8  ;;  %v285_v2 = vsub.f32 1.5, %v284_v20  ;;  %v393_v7 = vmul.f32 %v260_v50, %v4594_v44 }
 0x10d   :  { %v312_v37 = vmul.f32 %v4803_v13, %v4764_v25  ;;  %v4818_v39 = vpop.eup %4320  ;;  %v4821_v42 = vadd.f32 1e-05, %v206_v12  ;;  %v4823_v19 = vadd.f32 1e-05, %v208_v27  ;;  %v429_v43 = vadd.f32 %v4797_v17, %v410_v45 }
 0x10e   :  { %v246_v18 = vmul.f32 %v4767_v56, %v245_v29  ;;  %v272_v47 = vmul.f32 %v4818_v39, %v4769_v60  ;;  %v4835_v49 = vpop.eup %4322  ;;  %v265_v52 = vsub.f32 1.5, %v264_v14  ;;  %vm278_vm14 = vweird.f32 %v4818_v39 }
 0x10f   :  { %4324 = vrsqrt.f32 %v4821_v42  ;;  %4008 = vmatmul.msk.f32.vlgmr.msra.gmra.mxu0 %vm47_vm0, %v429_v43  ;;  %4024 = vmatmul.msk.f32.vlgmr.msra.gmra.mxu1 %vm47_vm0, %v429_v43  ;;  %v292_v54 = vmul.f32 %v4835_v49, %v4782_v5  ;;  %v313_v63 = vmul.f32 %v4803_v13, %v312_v37  ;;  %vm4888_vm3 = vmor %vm277_vm13, %vm278_vm14  ;;  %v412_v41 = vmul.f32 %v4787_v6, %v393_v7 }
 0x110   :  { %v250_v40 = vsel %vm4828_vm10, %v4767_v56, %v246_v18  ;;  %v273_v24 = vmul.f32 %v4818_v39, %v272_v47  ;;  %4040 = vmatmul.msk.f32.vlgmr.msra.gmra.mxu2 %vm47_vm0, %v429_v43  ;;  %4326 = vrsqrt.f32 %v4823_v19  ;;  %v266_v16 = vmul.f32 %v4771_v61, %v265_v52  ;;  %vm4950_vm10 = vmor %vm287_vm15, %vm288_vm2 }
 0x111   :  { %v189_v26 = vpop.xlane.xlu1 %188  ;;  %v392_v33 = vmul.f32 %v250_v40, %v4615_v59  ;;  %v293_v0 = vmul.f32 %v4835_v49, %v292_v54  ;;  %v314_v27 = vmul.f32 0.5, %v313_v63  ;;  %v4897_v18 = vmul.f32 %v4762_v53, %v285_v2 }
 0x112   :  { %v211_v56 = vmul.f32 %v189_v26, %v4590_v38  ;;  %v183_v30 = vpop.xlane.xlu2 %182  ;;  %v186_v1 = vpop.xlane.xlu0 %185  ;;  %v274_v3 = vmul.f32 0.5, %v273_v24  ;;  %vm318_vm5 = vweird.f32 %v4803_v13  ;;  %v270_v52 = vsel %vm4878_vm1, %v4771_v61, %v266_v16 }
 0x113   :  { %v209_v4 = vmul.f32 %v183_v30, %v4590_v38  ;;  %v210_v9 = vmul.f32 %v186_v1, %v4590_v38  ;;  %v411_v15 = vmul.f32 %v4787_v6, %v392_v33  ;;  %v294_v37 = vmul.f32 0.5, %v293_v0  ;;  %vm4984_vm15 = vmor %vm317_vm4, %vm318_vm5 }
 0x114   :  { %v4859_v8 = vadd.f32 1e-05, %v211_v56  ;;  %v275_v22 = vsub.f32 1.5, %v274_v3  ;;  %v315_v23 = vsub.f32 1.5, %v314_v27  ;;  %vm298_vm7 = vweird.f32 %v4835_v49 }
 0x115   :  { %v4865_v59 = vadd.f32 1e-05, %v209_v4  ;;  %v4867_v12 = vpop.eup %4324  ;;  %v4870_v44 = vadd.f32 1e-05, %v210_v9  ;;  %v430_v28 = vadd.f32 %v4797_v17, %v411_v15  ;;  %v295_v30 = vsub.f32 1.5, %v294_v37 }
 0x116   :  { %4328 = vrsqrt.f32 %v4859_v8  ;;  %v276_v45 = vmul.f32 %v4818_v39, %v275_v22  ;;  %v4883_v31 = vpop.eup %4326  ;;  %v302_v60 = vmul.f32 %v4867_v12, %v4821_v42  ;;  %vm327_vm8 = vweird.f32 %v4823_v19 }
 0x117   :  { %4330 = vrsqrt.f32 %v4865_v59  ;;  %4009 = vmatmul.msk.f32.gmra.mxu0 %vm47_vm0, %v430_v28  ;;  %4025 = vmatmul.msk.f32.gmra.mxu1 %vm47_vm0, %v430_v28  ;;  %v322_v43 = vmul.f32 %v4883_v31, %v4823_v19  ;;  %v431_v61 = vadd.f32 %v4797_v17, %v412_v41  ;;  %v394_v3 = vmul.f32 %v270_v52, %v4612_v58 }
 0x118   :  { %4041 = vmatmul.msk.f32.gmra.mxu2 %vm47_vm0, %v430_v28  ;;  %4332 = vrsqrt.f32 %v4870_v44  ;;  %v280_v63 = vsel %vm4888_vm3, %v4818_v39, %v276_v45  ;;  %v303_v33 = vmul.f32 %v4867_v12, %v302_v60  ;;  %v4938_v9 = vmul.f32 %v4803_v13, %v315_v23 }
 0x119   :  { %v198_v20 = vpop.xlane.xlu1 %197  ;;  %v323_v24 = vmul.f32 %v4883_v31, %v322_v43  ;;  %v395_v0 = vmul.f32 %v280_v63, %v4622_v62  ;;  %vm337_vm9 = vweird.f32 %v4865_v59  ;;  %v4955_v62 = vmul.f32 %v4835_v49, %v295_v30 }
 0x11a   :  { %v214_v47 = vmul.f32 %v198_v20, %v4590_v38  ;;  %v192_v40 = vpop.xlane.xlu2 %191  ;;  %v195_v50 = vpop.xlane.xlu0 %194  ;;  %vm328_vm11 = vweird.f32 %v4883_v31  ;;  %vm357_vm12 = vweird.f32 %v4859_v8  ;;  %vm347_vm13 = vweird.f32 %v4870_v44 }
 0x11b   :  { %v212_v54 = vmul.f32 %v192_v40, %v4590_v38  ;;  %v213_v26 = vmul.f32 %v195_v50, %v4590_v38  ;;  %v324_v2 = vmul.f32 0.5, %v323_v24  ;;  %v4967_v45 = vmul.f32 0.5, %v303_v33  ;;  %vm5012_vm5 = vmor %vm327_vm8, %vm328_vm11 }
 0x11c   :  { %v4918_v56 = vpop.eup %4328  ;;  %v4922_v1 = vadd.f32 1e-05, %v214_v47  ;;  %v413_v14 = vmul.f32 %v4787_v6, %v394_v3  ;;  %v414_v37 = vmul.f32 %v4787_v6, %v395_v0  ;;  %v290_v43 = vsel %vm4950_vm10, %v4762_v53, %v4897_v18  ;;  %vm4995_vm10 = vmor %vm297_vm6, %vm298_vm7 }
 0x11d   :  { %v352_v38 = vmul.f32 %v4918_v56, %v4859_v8  ;;  %v4929_v39 = vpop.eup %4330  ;;  %v4932_v4 = vadd.f32 1e-05, %v212_v54  ;;  %v4934_v7 = vadd.f32 1e-05, %v213_v26  ;;  %v325_v35 = vsub.f32 1.5, %v324_v2 }
 0x11e   :  { %4334 = vrsqrt.f32 %v4922_v1  ;;  %v332_v16 = vmul.f32 %v4929_v39, %v4865_v59  ;;  %v4944_v58 = vpop.eup %4332  ;;  %vm358_vm14 = vweird.f32 %v4918_v56  ;;  %vm338_vm1 = vweird.f32 %v4929_v39  ;;  %v735_v59 = vld [vmem:[%s6801_s5 + $0x58] sm:$0xff] }
 0x11f   :  { %v353_v15 = vmul.f32 %v4918_v56, %v352_v38  ;;  %4336 = vrsqrt.f32 %v4932_v4  ;;  %4010 = vmatmul.msk.f32.gmra.mxu0 %vm47_vm0, %v431_v61  ;;  %4026 = vmatmul.msk.f32.gmra.mxu1 %vm47_vm0, %v431_v61  ;;  %v342_v29 = vmul.f32 %v4944_v58, %v4870_v44  ;;  %vm387_vm2 = vweird.f32 %v4922_v1  ;;  %vm5029_vm6 = vmor %vm337_vm9, %vm338_vm1  ;;  %v728_v44 = vld [vmem:[%s6801_s5 + $0x20] sm:$0xff] }
 0x120   :  { %v333_v28 = vmul.f32 %v4929_v39, %v332_v16  ;;  %4042 = vmatmul.msk.f32.gmra.mxu2 %vm47_vm0, %v431_v61  ;;  %4338 = vrsqrt.f32 %v4934_v7  ;;  %vm367_vm3 = vweird.f32 %v4932_v4  ;;  %v326_v25 = vmul.f32 %v4883_v31, %v325_v35 }
 0x121   :  { %v354_v27 = vmul.f32 0.5, %v353_v15  ;;  %v343_v60 = vmul.f32 %v4944_v58, %v342_v29  ;;  %vm348_vm4 = vweird.f32 %v4944_v58  ;;  %v432_v24 = vadd.f32 %v4797_v17, %v413_v14 }
 0x122   :  { %v334_v41 = vmul.f32 0.5, %v333_v28  ;;  %v433_v54 = vadd.f32 %v4797_v17, %v414_v37  ;;  %v396_v5 = vmul.f32 %v290_v43, %v4609_v57  ;;  %v320_v33 = vsel %vm4984_vm15, %v4803_v13, %v4938_v9  ;;  %vm5045_vm8 = vmor %vm347_vm13, %vm348_vm4 }
 0x123   :  { %v355_v47 = vsub.f32 1.5, %v354_v27  ;;  %v344_v40 = vmul.f32 0.5, %v343_v60  ;;  %vm377_vm7 = vweird.f32 %v4934_v7  ;;  %v300_v13 = vsel %vm4995_vm10, %v4835_v49, %v4955_v62  ;;  %vm5059_vm13 = vmor %vm357_vm12, %vm358_vm14 }
 0x124   :  { %v4978_v20 = vpop.eup %4334  ;;  %v335_v18 = vsub.f32 1.5, %v334_v41  ;;  %v399_v49 = vmul.f32 %v320_v33, %v4635_v10  ;;  %v330_v35 = vsel %vm5012_vm5, %v4883_v31, %v326_v25  ;;  %vm1112_vm4 = vcmask 785920  }
 0x125   :  { %v382_v50 = vmul.f32 %v4978_v20, %v4922_v1  ;;  %v5002_v52 = vpop.eup %4336  ;;  %v345_v63 = vsub.f32 1.5, %v344_v40  ;;  %v356_v2 = vmul.f32 %v4918_v56, %v355_v47  ;;  %vm388_vm9 = vweird.f32 %v4978_v20 }
 0x126   :  { %v362_v61 = vmul.f32 %v5002_v52, %v4932_v4  ;;  %v4339_v57 = vpop.eup %4338  ;;  %v336_v19 = vmul.f32 %v4929_v39, %v335_v18  ;;  %vm368_vm11 = vweird.f32 %v5002_v52  ;;  %v418_v27 = vmul.f32 %v4787_v6, %v399_v49  ;;  %vm5077_vm12 = vmor %vm387_vm2, %vm388_vm9  ;;  %v731_v49 = vld [vmem:[%s6801_s5 + $0x38] sm:$0xff] }
 0x127   :  { %v383_v30 = vmul.f32 %v4978_v20, %v382_v50  ;;  %4011 = vmatmul.msk.f32.gmra.mxu0 %vm47_vm0, %v432_v24  ;;  %4027 = vmatmul.msk.f32.gmra.mxu1 %vm47_vm0, %v432_v24  ;;  %v346_v3 = vmul.f32 %v4944_v58, %v345_v63  ;;  %v372_v15 = vmul.f32 %v4339_v57, %v4934_v7  ;;  %vm378_vm15 = vweird.f32 %v4339_v57  ;;  %vm5086_vm14 = vmor %vm367_vm3, %vm368_vm11 }
 0x128   :  { %v363_v9 = vmul.f32 %v5002_v52, %v362_v61  ;;  %4043 = vmatmul.msk.f32.gmra.mxu2 %vm47_vm0, %v432_v24  ;;  %v400_v28 = vmul.f32 %v330_v35, %v4656_v32  ;;  %v340_v10 = vsel %vm5029_vm6, %v4929_v39, %v336_v19  ;;  %v360_v60 = vsel %vm5059_vm13, %v4918_v56, %v356_v2  ;;  %vm5102_vm1 = vmor %vm377_vm7, %vm378_vm15  ;;  %v724_v35 = vld [vmem:[%s6801_s5] sm:$0xff] }
 0x129   :  { %v384_v0 = vmul.f32 0.5, %v383_v30  ;;  %v373_v62 = vmul.f32 %v4339_v57, %v372_v15  ;;  %v350_v8 = vsel %vm5045_vm8, %v4944_v58, %v346_v3  ;;  %v401_v32 = vmul.f32 %v340_v10, %v4665_v36  ;;  %v734_v3 = vld [vmem:[%s6801_s5 + $0x50] sm:$0xff] }
 0x12a   :  { %v364_v22 = vmul.f32 0.5, %v363_v9  ;;  %v437_v58 = vadd.f32 %v4797_v17, %v418_v27  ;;  %v419_v1 = vmul.f32 %v4787_v6, %v400_v28  ;;  %v402_v41 = vmul.f32 %v350_v8, %v4661_v34  ;;  %v733_v9 = vld [vmem:[%s6801_s5 + $0x48] sm:$0xff]  ;;  %v730_v15 = vld [vmem:[%s6801_s5 + $0x30] sm:$0xff]  ;;  %v457_v28 = vld [vmem:[%s6802_s4] sm:$0x7] }
 0x12b   :  { %v385_v16 = vsub.f32 1.5, %v384_v0  ;;  %v374_v37 = vmul.f32 0.5, %v373_v62  ;;  %v420_v23 = vmul.f32 %v4787_v6, %v401_v32  ;;  %v403_v4 = vmul.f32 %v360_v60, %v4676_v46  ;;  %v732_v0 = vld [vmem:[%s6801_s5 + $0x40] sm:$0xff]  ;;  %v727_v62 = vld [vmem:[%s6801_s5 + $0x18] sm:$0xff]  ;;  %v725_v27 = vld [vmem:[%s6801_s5 + $0x8] sm:$0xff] }
 0x12c   :  { %v365_v31 = vsub.f32 1.5, %v364_v22  ;;  %v438_v34 = vadd.f32 %v4797_v17, %v419_v1  ;;  %v421_v56 = vmul.f32 %v4787_v6, %v402_v41  ;;  %v415_v40 = vmul.f32 %v4787_v6, %v396_v5  ;;  %v726_v22 = vld [vmem:[%s6801_s5 + $0x10] sm:$0xff] }
 0x12d   :  { %v386_v29 = vmul.f32 %v4978_v20, %v385_v16  ;;  %v375_v43 = vsub.f32 1.5, %v374_v37  ;;  %v439_v7 = vadd.f32 %v4797_v17, %v420_v23  ;;  %v422_v25 = vmul.f32 %v4787_v6, %v403_v4  ;;  %v729_v16 = vld [vmem:[%s6801_s5 + $0x28] sm:$0xff] }
 0x12e   :  { %v366_v36 = vmul.f32 %v5002_v52, %v365_v31  ;;  %v440_v50 = vadd.f32 %v4797_v17, %v421_v56  ;;  %vm307_vm2 = vweird.f32 %v4821_v42  ;;  %vm308_vm3 = vweird.f32 %v4867_v12 }
 0x12f   :  { %4012 = vmatmul.msk.f32.gmra.mxu0 %vm47_vm0, %v433_v54  ;;  %4028 = vmatmul.msk.f32.gmra.mxu1 %vm47_vm0, %v433_v54  ;;  %v390_v53 = vsel %vm5077_vm12, %v4978_v20, %v386_v29  ;;  %v376_v46 = vmul.f32 %v4339_v57, %v375_v43  ;;  %v305_v20 = vsub.f32 1.5, %v4967_v45  ;;  %vm309_vm10 = vmor %vm307_vm2, %vm308_vm3  ;;  %v5244_v10 = vperm.slane %v457_v28, 1 }
 0x130   :  { %4044 = vmatmul.msk.f32.gmra.mxu2 %vm47_vm0, %v433_v54  ;;  %v370_v18 = vsel %vm5086_vm14, %v5002_v52, %v366_v36  ;;  %v406_v26 = vmul.f32 %v390_v53, %v4695_v55  ;;  %v441_v54 = vadd.f32 %v4797_v17, %v422_v25  ;;  %v434_v55 = vadd.f32 %v4797_v17, %v415_v40 }
 0x131   :  { %v404_v24 = vmul.f32 %v370_v18, %v4686_v51  ;;  %v380_v63 = vsel %vm5102_vm1, %v4339_v57, %v376_v46  ;;  %v397_v51 = vmul.f32 %v300_v13, %v4638_v11  ;;  %vm1015_vm5 = vcmask 523520  }
 0x132   :  { %v405_v61 = vmul.f32 %v380_v63, %v4681_v48  ;;  %v425_v52 = vmul.f32 %v4787_v6, %v406_v26  ;;  %v306_v48 = vmul.f32 %v4867_v12, %v305_v20  ;;  %v5255_v32 = vperm.slane %v457_v28, 0 }
 0x133   :  { %v423_v30 = vmul.f32 %v4787_v6, %v404_v24  ;;  %v416_v11 = vmul.f32 %v4787_v6, %v397_v51  ;;  %v5257_v39 = vperm.slane %v457_v28, 2  ;;  %vm740_vm6 = vcmask 523264  }
 0x134   :  { %v424_v5 = vmul.f32 %v4787_v6, %v405_v61  ;;  %v5139_v33 = vadd.f32 %v4797_v17, %v425_v52  ;;  %v310_v57 = vsel %vm309_vm10, %v4867_v12, %v306_v48  ;;  %v737_v12 = vld [vmem:[%s6801_s5 + $0x68] sm:$0xff]  ;;  %vm1209_vm7 = vcmask 1048320  }
 0x135   :  { %v5135_v45 = vadd.f32 %v4797_v17, %v423_v30  ;;  %v435_v2 = vadd.f32 %v4797_v17, %v416_v11  ;;  %v398_v19 = vmul.f32 %v310_v57, %v4646_v21  ;;  %v738_v21 = vld [vmem:[%s6801_s5 + $0x70] sm:$0xff]  ;;  %vm1567_vm8 = vcmask 1043456  }
 0x136   :  { %v5145_v42 = vadd.f32 %v4797_v17, %v424_v5  ;;  %797 = vmatpush.msra.mxu3 %v738_v21  ;;  %vm1306_vm9 = vcmask 7168   ;;  %vm1323_vm11 = vcmask 15360   ;;  %vm1340_vm15 = vcmask 23552  }
 0x137   :  { %4013 = vmatmul.msk.f32.gmra.mxu0 %vm47_vm0, %v434_v55  ;;  %4029 = vmatmul.msk.f32.gmra.mxu1 %vm47_vm0, %v434_v55  ;;  %v417_v38 = vmul.f32 %v4787_v6, %v398_v19  ;;  %v739_v6 = vld [vmem:[%s6801_s5 + $0x78] sm:$0xff]  ;;  %vm1405_vm13 = vcmask 31744   ;;  %vm2068_vm14 = vcmask 64512  }
 0x138   :  { %4045 = vmatmul.msk.f32.gmra.mxu2 %vm47_vm0, %v434_v55  ;;  %862 = vmatpush.msrb.mxu0 %v739_v6 }
 0x139   :  { %v436_v13 = vadd.f32 %v4797_v17, %v417_v38  ;;  %v736_v17 = vld [vmem:[%s6801_s5 + $0x60] sm:$0xff] }
 0x13a   :  { %798 = vmatpush.msra.mxu3 %v736_v17  ;;  %863 = vmatpush.msrb.mxu0 %v737_v12 }
 0x13c   :  { %799 = vmatpush.msra.mxu3 %v734_v3  ;;  %864 = vmatpush.msrb.mxu0 %v735_v59 }
 0x13e   :  { %800 = vmatpush.msra.mxu3 %v732_v0  ;;  %865 = vmatpush.msrb.mxu0 %v733_v9 }
 0x13f   :  { %4014 = vmatmul.msk.f32.gmra.mxu0 %vm47_vm0, %v435_v2  ;;  %4030 = vmatmul.msk.f32.gmra.mxu1 %vm47_vm0, %v435_v2 }
 0x140   :  { %4046 = vmatmul.msk.f32.gmra.mxu2 %vm47_vm0, %v435_v2  ;;  %801 = vmatpush.msra.mxu3 %v730_v15 }
 0x141   :  { %866 = vmatpush.msrb.mxu0 %v731_v49 }
 0x142   :  { %802 = vmatpush.msra.mxu3 %v728_v44 }
 0x143   :  { %867 = vmatpush.msrb.mxu0 %v729_v16 }
 0x144   :  { %803 = vmatpush.msra.mxu3 %v726_v22 }
 0x145   :  { %868 = vmatpush.msrb.mxu0 %v727_v62 }
 0x146   :  { %804 = vmatpush.msra.mxu3 %v724_v35 }
 0x147   :  { %4015 = vmatmul.msk.f32.gmra.mxu0 %vm47_vm0, %v436_v13  ;;  %4031 = vmatmul.msk.f32.gmra.mxu1 %vm47_vm0, %v436_v13 }
 0x148   :  { %4047 = vmatmul.msk.f32.gmra.mxu2 %vm47_vm0, %v436_v13  ;;  %869 = vmatpush.msrb.mxu0 %v725_v27 }
 0x14f   :  { %4016 = vmatmul.msk.f32.gmra.mxu0 %vm47_vm0, %v437_v58  ;;  %4032 = vmatmul.msk.f32.gmra.mxu1 %vm47_vm0, %v437_v58 }
 0x150   :  { %4048 = vmatmul.msk.f32.gmra.mxu2 %vm47_vm0, %v437_v58 }
 0x157   :  { %4017 = vmatmul.msk.f32.gmra.mxu0 %vm47_vm0, %v438_v34  ;;  %4033 = vmatmul.msk.f32.gmra.mxu1 %vm47_vm0, %v438_v34 }
 0x158   :  { %4049 = vmatmul.msk.f32.gmra.mxu2 %vm47_vm0, %v438_v34 }
 0x15f   :  { %4018 = vmatmul.msk.f32.gmra.mxu0 %vm47_vm0, %v439_v7  ;;  %4034 = vmatmul.msk.f32.gmra.mxu1 %vm47_vm0, %v439_v7 }
 0x160   :  { %4050 = vmatmul.msk.f32.gmra.mxu2 %vm47_vm0, %v439_v7 }
 0x167   :  { %4019 = vmatmul.msk.f32.gmra.mxu0 %vm47_vm0, %v440_v50  ;;  %4035 = vmatmul.msk.f32.gmra.mxu1 %vm47_vm0, %v440_v50 }
 0x168   :  { %4051 = vmatmul.msk.f32.gmra.mxu2 %vm47_vm0, %v440_v50 }
 0x16f   :  { %4020 = vmatmul.msk.f32.gmra.mxu0 %vm47_vm0, %v441_v54  ;;  %4036 = vmatmul.msk.f32.gmra.mxu1 %vm47_vm0, %v441_v54 }
 0x170   :  { %4052 = vmatmul.msk.f32.gmra.mxu2 %vm47_vm0, %v441_v54 }
 0x177   :  { %4021 = vmatmul.msk.f32.gmra.mxu0 %vm47_vm0, %v5135_v45  ;;  %4037 = vmatmul.msk.f32.gmra.mxu1 %vm47_vm0, %v5135_v45 }
 0x178   :  { %4053 = vmatmul.msk.f32.gmra.mxu2 %vm47_vm0, %v5135_v45 }
 0x17f   :  { %4022 = vmatmul.msk.f32.gmra.mxu0 %vm47_vm0, %v5145_v42  ;;  %4038 = vmatmul.msk.f32.gmra.mxu1 %vm47_vm0, %v5145_v42 }
 0x180   :  { %4054 = vmatmul.msk.f32.gmra.mxu2 %vm47_vm0, %v5145_v42 }
 0x187   :  { %4023 = vmatmul.msk.f32.gmra.mxu0 %vm47_vm0, %v5139_v33  ;;  %4039 = vmatmul.msk.f32.gmra.mxu1 %vm47_vm0, %v5139_v33 }
 0x188   :  { %4055 = vmatmul.msk.f32.gmra.mxu2 %vm47_vm0, %v5139_v33 }
 0x18c   :  { %v595_v8 = vpop.f32.mrf.mxu1  ;;  %v530_v58 = vpop.f32.mrf.mxu0 }
 0x18d   :  { %v5247_v29 = vadd.f32 %v595_v8, %v5244_v10  ;;  %v5260_v41 = vadd.f32 %v530_v58, %v5255_v32 }
 0x18f   :  { %v1161_v14 = vsel %vm1112_vm4, %v5247_v29, -inf  ;;  %v1064_v31 = vsel %vm1015_vm5, %v5247_v29, -inf  ;;  %v967_v37 = vsel %vm47_vm0, %v5247_v29, -inf  ;;  %v1258_v43 = vsel %vm1209_vm7, %v5247_v29, -inf }
 0x190   :  { %1162 = vmax.xlane.f32.xlu1 %v1161_v14  ;;  %1065 = vmax.xlane.f32.xlu0 %v1064_v31  ;;  %v1016_v23 = vsel %vm1015_vm5, %v5260_v41, -inf  ;;  %v919_v47 = vsel %vm47_vm0, %v5260_v41, -inf  ;;  %v1113_v25 = vsel %vm1112_vm4, %v5260_v41, -inf  ;;  %v1210_v40 = vsel %vm1209_vm7, %v5260_v41, -inf }
 0x191   :  { %968 = vmax.xlane.f32.xlu2 %v967_v37 }
 0x193   :  { %v660_v1 = vpop.f32.mrf.mxu2 }
 0x194   :  { %v5263_v60 = vadd.f32 %v660_v1, %v5257_v39  ;;  %v598_v4 = vpop.f32.mrf.mxu1  ;;  %v533_v18 = vpop.f32.mrf.mxu0 }
 0x195   :  { %v5276_v56 = vadd.f32 %v598_v4, %v5244_v10  ;;  %v5292_v24 = vadd.f32 %v533_v18, %v5255_v32 }
 0x196   :  { %6879 = vst [vmem:[#allocation2_spill] sm:$0xff] %v5263_v60  ;;  %v708_v36 = vmul.f32 %v5263_v60, %v5263_v60 }
 0x197   :  { %v1164_v7 = vsel %vm1112_vm4, %v5276_v56, -inf  ;;  %v922_v54 = vsel %vm47_vm0, %v5292_v24, -inf  ;;  %v1067_v63 = vsel %vm1015_vm5, %v5276_v56, -inf  ;;  %v970_v61 = vsel %vm47_vm0, %v5276_v56, -inf }
 0x198   :  { %4056 = vmatmul.msk.f32.vlgmr.msra.gmra.mxu3 %vm740_vm6, %v708_v36  ;;  %4072 = vmatmul.msk.f32.vlgmr.msrb.gmra.mxu0 %vm740_vm6, %v708_v36  ;;  %v1213_v5 = vsel %vm1209_vm7, %v5292_v24, -inf  ;;  %v1261_v48 = vsel %vm1209_vm7, %v5276_v56, -inf  ;;  %v1019_v13 = vsel %vm1015_vm5, %v5292_v24, -inf  ;;  %v1116_v0 = vsel %vm1112_vm4, %v5292_v24, -inf }
 0x199   :  { %1259 = vmax.xlane.f32.xlu2 %v1258_v43  ;;  %1017 = vmax.xlane.f32.xlu1 %v1016_v23 }
 0x19a   :  { %920 = vmax.xlane.f32.xlu0 %v919_v47 }
 0x19b   :  { %v663_v34 = vpop.f32.mrf.mxu2 }
 0x19c   :  { %v5279_v53 = vadd.f32 %v663_v34, %v5257_v39  ;;  %v601_v30 = vpop.f32.mrf.mxu1  ;;  %v536_v38 = vpop.f32.mrf.mxu0 }
 0x19d   :  { %v5308_v51 = vadd.f32 %v601_v30, %v5244_v10  ;;  %v5337_v6 = vadd.f32 %v536_v38, %v5255_v32 }
 0x19e   :  { %6880 = vst [vmem:[#allocation3_spill] sm:$0xff] %v5279_v53  ;;  %v709_v46 = vmul.f32 %v5279_v53, %v5279_v53 }
 0x19f   :  { %v973_v33 = vsel %vm47_vm0, %v5308_v51, -inf  ;;  %v1070_v2 = vsel %vm1015_vm5, %v5308_v51, -inf  ;;  %v1264_v19 = vsel %vm1209_vm7, %v5308_v51, -inf  ;;  %v1022_v3 = vsel %vm1015_vm5, %v5337_v6, -inf }
 0x1a0   :  { %4057 = vmatmul.msk.f32.gmra.mxu3 %vm740_vm6, %v709_v46  ;;  %4073 = vmatmul.msk.f32.gmra.mxu0 %vm740_vm6, %v709_v46  ;;  %v925_v59 = vsel %vm47_vm0, %v5337_v6, -inf  ;;  %v1119_v44 = vsel %vm1112_vm4, %v5337_v6, -inf  ;;  %v1216_v16 = vsel %vm1209_vm7, %v5337_v6, -inf  ;;  %v1167_v62 = vsel %vm1112_vm4, %v5308_v51, -inf }
 0x1a1   :  { %1165 = vmax.xlane.f32.xlu2 %v1164_v7  ;;  %1114 = vmax.xlane.f32.xlu1 %v1113_v25 }
 0x1a2   :  { %1211 = vmax.xlane.f32.xlu0 %v1210_v40 }
 0x1a3   :  { %v666_v50 = vpop.f32.mrf.mxu2 }
 0x1a4   :  { %v5295_v26 = vadd.f32 %v666_v50, %v5257_v39  ;;  %v604_v22 = vpop.f32.mrf.mxu1  ;;  %v539_v37 = vpop.f32.mrf.mxu0 }
 0x1a5   :  { %v5366_v27 = vadd.f32 %v604_v22, %v5244_v10  ;;  %v5382_v36 = vadd.f32 %v539_v37, %v5255_v32 }
 0x1a6   :  { %6881 = vst [vmem:[#allocation4_spill] sm:$0xff] %v5295_v26  ;;  %v710_v20 = vmul.f32 %v5295_v26, %v5295_v26 }
 0x1a7   :  { %v1170_v14 = vsel %vm1112_vm4, %v5366_v27, -inf  ;;  %v976_v31 = vsel %vm47_vm0, %v5366_v27, -inf  ;;  %v1073_v58 = vsel %vm1015_vm5, %v5366_v27, -inf  ;;  %v1267_v4 = vsel %vm1209_vm7, %v5366_v27, -inf }
 0x1a8   :  { %4058 = vmatmul.msk.f32.gmra.mxu3 %vm740_vm6, %v710_v20  ;;  %4074 = vmatmul.msk.f32.gmra.mxu0 %vm740_vm6, %v710_v20  ;;  %v1025_v47 = vsel %vm1015_vm5, %v5382_v36, -inf  ;;  %v928_v46 = vsel %vm47_vm0, %v5382_v36, -inf  ;;  %v1122_v20 = vsel %vm1112_vm4, %v5382_v36, -inf }
 0x1a9   :  { %923 = vmax.xlane.f32.xlu2 %v922_v54  ;;  %1068 = vmax.xlane.f32.xlu1 %v1067_v63  ;;  %v1219_v54 = vsel %vm1209_vm7, %v5382_v36, -inf }
 0x1aa   :  { %971 = vmax.xlane.f32.xlu0 %v970_v61 }
 0x1ab   :  { %v669_v52 = vpop.f32.mrf.mxu2 }
 0x1ac   :  { %v5311_v55 = vadd.f32 %v669_v52, %v5257_v39  ;;  %v607_v34 = vpop.f32.mrf.mxu1 }
 0x1ad   :  { %v5398_v25 = vadd.f32 %v607_v34, %v5244_v10 }
 0x1ae   :  { %6882 = vst [vmem:[#allocation5_spill] sm:$0xff] %v5311_v55  ;;  %v711_v45 = vmul.f32 %v5311_v55, %v5311_v55 }
 0x1af   :  { %v979_v50 = vsel %vm47_vm0, %v5398_v25, -inf  ;;  %v1173_v52 = vsel %vm1112_vm4, %v5398_v25, -inf }
 0x1b0   :  { %4059 = vmatmul.msk.f32.gmra.mxu3 %vm740_vm6, %v711_v45  ;;  %4075 = vmatmul.msk.f32.gmra.mxu0 %vm740_vm6, %v711_v45  ;;  %v1270_v45 = vsel %vm1209_vm7, %v5398_v25, -inf }
 0x1b1   :  { %1214 = vmax.xlane.f32.xlu2 %v1213_v5  ;;  %974 = vmax.xlane.f32.xlu1 %v973_v33  ;;  %v542_v5 = vpop.f32.mrf.mxu0 }
 0x1b2   :  { %1262 = vmax.xlane.f32.xlu0 %v1261_v48  ;;  %v1076_v48 = vsel %vm1015_vm5, %v5398_v25, -inf }
 0x1b3   :  { %v672_v42 = vpop.f32.mrf.mxu2 }
 0x1b4   :  { %v5324_v11 = vadd.f32 %v672_v42, %v5257_v39  ;;  %v610_v33 = vpop.f32.mrf.mxu1 }
 0x1b6   :  { %6883 = vst [vmem:[#allocation6_spill] sm:$0xff] %v5324_v11  ;;  %v712_v57 = vmul.f32 %v5324_v11, %v5324_v11 }
 0x1b8   :  { %4060 = vmatmul.msk.f32.gmra.mxu3 %vm740_vm6, %v712_v57  ;;  %4076 = vmatmul.msk.f32.gmra.mxu0 %vm740_vm6, %v712_v57  ;;  %v5427_v57 = vadd.f32 %v542_v5, %v5255_v32 }
 0x1b9   :  { %1071 = vmax.xlane.f32.xlu2 %v1070_v2  ;;  %1265 = vmax.xlane.f32.xlu1 %v1264_v19  ;;  %v5430_v2 = vadd.f32 %v610_v33, %v5244_v10 }
 0x1ba   :  { %1020 = vmax.xlane.f32.xlu0 %v1019_v13  ;;  %v931_v13 = vsel %vm47_vm0, %v5427_v57, -inf  ;;  %v1125_v22 = vsel %vm1112_vm4, %v5427_v57, -inf }
 0x1bb   :  { %v675_v21 = vpop.f32.mrf.mxu2 }
 0x1bc   :  { %v5340_v17 = vadd.f32 %v675_v21, %v5257_v39  ;;  %v982_v21 = vsel %vm47_vm0, %v5430_v2, -inf }
 0x1be   :  { %6884 = vst [vmem:[#allocation7_spill] sm:$0xff] %v5340_v17  ;;  %v713_v12 = vmul.f32 %v5340_v17, %v5340_v17 }
 0x1c0   :  { %4061 = vmatmul.msk.f32.gmra.mxu3 %vm740_vm6, %v713_v12  ;;  %4077 = vmatmul.msk.f32.gmra.mxu0 %vm740_vm6, %v713_v12  ;;  %v1028_v12 = vsel %vm1015_vm5, %v5427_v57, -inf }
 0x1c1   :  { %1023 = vmax.xlane.f32.xlu2 %v1022_v3  ;;  %926 = vmax.xlane.f32.xlu1 %v925_v59 }
 0x1c2   :  { %1117 = vmax.xlane.f32.xlu0 %v1116_v0 }
 0x1c3   :  { %v678_v9 = vpop.f32.mrf.mxu2 }
 0x1c4   :  { %v5353_v15 = vadd.f32 %v678_v9, %v5257_v39  ;;  %v1518_v9 = vld [vmem:[%s6803_s6] sm:$0xf]  ;;  %s4425_s6 = smov 64  }
 0x1c5   :  { %4088 = vmatpush.msk.msrb.mxu1 %vm1567_vm8, %v1518_v9  ;;  %4105 = vmatpush.msk.msrb.mxu2 %vm1567_vm8, %v1518_v9 }
 0x1c6   :  { %6885 = vst [vmem:[#allocation8_spill] sm:$0xff] %v5353_v15  ;;  %v714_v49 = vmul.f32 %v5353_v15, %v5353_v15 }
 0x1c8   :  { %4062 = vmatmul.msk.f32.gmra.mxu3 %vm740_vm6, %v714_v49  ;;  %4078 = vmatmul.msk.f32.gmra.mxu0 %vm740_vm6, %v714_v49  ;;  %v1222_v49 = vsel %vm1209_vm7, %v5427_v57, -inf }
 0x1c9   :  { %1120 = vmax.xlane.f32.xlu2 %v1119_v44  ;;  %1217 = vmax.xlane.f32.xlu1 %v1216_v16  ;;  %v1176_v44 = vsel %vm1112_vm4, %v5430_v2, -inf  ;;  %v545_v16 = vpop.f32.mrf.mxu0 }
 0x1ca   :  { %1168 = vmax.xlane.f32.xlu0 %v1167_v62 }
 0x1cb   :  { %v681_v35 = vpop.f32.mrf.mxu2 }
 0x1cc   :  { %v5369_v28 = vadd.f32 %v681_v35, %v5257_v39  ;;  %v5462_v35 = vadd.f32 %v545_v16, %v5255_v32 }
 0x1ce   :  { %6886 = vst [vmem:[#allocation9_spill] sm:$0xff] %v5369_v28  ;;  %v715_v8 = vmul.f32 %v5369_v28, %v5369_v28  ;;  %v934_v37 = vsel %vm47_vm0, %v5462_v35, -inf }
 0x1d0   :  { %4063 = vmatmul.msk.f32.gmra.mxu3 %vm740_vm6, %v715_v8  ;;  %4079 = vmatmul.msk.f32.gmra.mxu0 %vm740_vm6, %v715_v8 }
 0x1d1   :  { %1171 = vmax.xlane.f32.xlu1 %v1170_v14  ;;  %977 = vmax.xlane.f32.xlu2 %v976_v31  ;;  %v1079_v31 = vsel %vm1015_vm5, %v5430_v2, -inf }
 0x1d2   :  { %1074 = vmax.xlane.f32.xlu0 %v1073_v58  ;;  %v1273_v58 = vsel %vm1209_vm7, %v5430_v2, -inf }
 0x1d3   :  { %v684_v1 = vpop.f32.mrf.mxu2 }
 0x1d4   :  { %v5385_v43 = vadd.f32 %v684_v1, %v5257_v39  ;;  %v613_v1 = vpop.f32.mrf.mxu1 }
 0x1d6   :  { %6887 = vst [vmem:[#allocation10_spill] sm:$0xff] %v5385_v43  ;;  %v716_v23 = vmul.f32 %v5385_v43, %v5385_v43 }
 0x1d8   :  { %4064 = vmatmul.msk.f32.gmra.mxu3 %vm740_vm6, %v716_v23  ;;  %4080 = vmatmul.msk.f32.gmra.mxu0 %vm740_vm6, %v716_v23 }
 0x1d9   :  { %1268 = vmax.xlane.f32.xlu2 %v1267_v4  ;;  %1026 = vmax.xlane.f32.xlu1 %v1025_v47 }
 0x1da   :  { %929 = vmax.xlane.f32.xlu0 %v928_v46 }
 0x1db   :  { %v687_v7 = vpop.f32.mrf.mxu2 }
 0x1dc   :  { %v5401_v18 = vadd.f32 %v687_v7, %v5257_v39  ;;  %v5481_v7 = vadd.f32 %v613_v1, %v5244_v10 }
 0x1de   :  { %6888 = vst [vmem:[#allocation11_spill] sm:$0xff] %v5401_v18  ;;  %v717_v40 = vmul.f32 %v5401_v18, %v5401_v18 }
 0x1e0   :  { %4065 = vmatmul.msk.f32.gmra.mxu3 %vm740_vm6, %v717_v40  ;;  %4081 = vmatmul.msk.f32.gmra.mxu0 %vm740_vm6, %v717_v40  ;;  %v548_v40 = vpop.f32.mrf.mxu0 }
 0x1e1   :  { %980 = vmax.xlane.f32.xlu2 %v979_v50  ;;  %1123 = vmax.xlane.f32.xlu1 %v1122_v20  ;;  %v1031_v20 = vsel %vm1015_vm5, %v5462_v35, -inf  ;;  %v5511_v16 = vadd.f32 %v548_v40, %v5255_v32 }
 0x1e2   :  { %1220 = vmax.xlane.f32.xlu0 %v1219_v54  ;;  %v1225_v54 = vsel %vm1209_vm7, %v5462_v35, -inf }
 0x1e3   :  { %v690_v63 = vpop.f32.mrf.mxu2  ;;  %v937_v40 = vsel %vm47_vm0, %v5511_v16, -inf }
 0x1e4   :  { %v5414_v30 = vadd.f32 %v690_v63, %v5257_v39 }
 0x1e6   :  { %6889 = vst [vmem:[#allocation12_spill] sm:$0xff] %v5414_v30  ;;  %v718_v61 = vmul.f32 %v5414_v30, %v5414_v30 }
 0x1e8   :  { %4066 = vmatmul.msk.f32.gmra.mxu3 %vm740_vm6, %v718_v61  ;;  %4082 = vmatmul.msk.f32.gmra.mxu0 %vm740_vm6, %v718_v61  ;;  %v985_v61 = vsel %vm47_vm0, %v5481_v7, -inf }
 0x1e9   :  { %1174 = vmax.xlane.f32.xlu2 %v1173_v52  ;;  %1271 = vmax.xlane.f32.xlu1 %v1270_v45 }
 0x1ea   :  { %1077 = vmax.xlane.f32.xlu0 %v1076_v48 }
 0x1eb   :  { %v693_v42 = vpop.f32.mrf.mxu2 }
 0x1ec   :  { %v5433_v19 = vadd.f32 %v693_v42, %v5257_v39 }
 0x1ee   :  { %6890 = vst [vmem:[#allocation13_spill] sm:$0xff] %v5433_v19  ;;  %v719_v38 = vmul.f32 %v5433_v19, %v5433_v19 }
 0x1f0   :  { %4067 = vmatmul.msk.f32.gmra.mxu3 %vm740_vm6, %v719_v38  ;;  %4083 = vmatmul.msk.f32.gmra.mxu0 %vm740_vm6, %v719_v38 }
 0x1f1   :  { %932 = vmax.xlane.f32.xlu2 %v931_v13  ;;  %983 = vmax.xlane.f32.xlu1 %v982_v21 }
 0x1f2   :  { %1029 = vmax.xlane.f32.xlu0 %v1028_v12 }
 0x1f3   :  { %v696_v3 = vpop.f32.mrf.mxu2 }
 0x1f4   :  { %v5446_v59 = vadd.f32 %v696_v3, %v5257_v39  ;;  %v551_v3 = vpop.f32.mrf.mxu0 }
 0x1f6   :  { %6891 = vst [vmem:[#allocation14_spill] sm:$0xff] %v5446_v59  ;;  %v720_v0 = vmul.f32 %v5446_v59, %v5446_v59 }
 0x1f8   :  { %4068 = vmatmul.msk.f32.gmra.mxu3 %vm740_vm6, %v720_v0  ;;  %4084 = vmatmul.msk.f32.gmra.mxu0 %vm740_vm6, %v720_v0  ;;  %v1082_v0 = vsel %vm1015_vm5, %v5481_v7, -inf }
 0x1f9   :  { %1223 = vmax.xlane.f32.xlu2 %v1222_v49  ;;  %1177 = vmax.xlane.f32.xlu1 %v1176_v44  ;;  %v1179_v49 = vsel %vm1112_vm4, %v5481_v7, -inf }
 0x1fa   :  { %1126 = vmax.xlane.f32.xlu0 %v1125_v22 }
 0x1fb   :  { %v699_v62 = vpop.f32.mrf.mxu2 }
 0x1fc   :  { %v5465_v8 = vadd.f32 %v699_v62, %v5257_v39 }
 0x1fe   :  { %6892 = vst [vmem:[#allocation15_spill] sm:$0xff] %v5465_v8  ;;  %v721_v14 = vmul.f32 %v5465_v8, %v5465_v8 }
 0x200   :  { %4069 = vmatmul.msk.f32.gmra.mxu3 %vm740_vm6, %v721_v14  ;;  %4085 = vmatmul.msk.f32.gmra.mxu0 %vm740_vm6, %v721_v14 }
 0x201   :  { %1080 = vmax.xlane.f32.xlu2 %v1079_v31  ;;  %935 = vmax.xlane.f32.xlu1 %v934_v37 }
 0x202   :  { %1274 = vmax.xlane.f32.xlu0 %v1273_v58 }
 0x203   :  { %v702_v23 = vpop.f32.mrf.mxu2  ;;  %v1163_v4 = vpop.xlane.xlu1 %1162 }
 0x204   :  { %v5478_v47 = vadd.f32 %v702_v23, %v5257_v39  ;;  %v969_v34 = vpop.xlane.xlu2 %968  ;;  %v1066_v46 = vpop.xlane.xlu0 %1065 }
 0x205   :  { %v1357_v63 = vsel %vm1306_vm9, %v969_v34, %v1066_v46  ;;  %v1034_v34 = vsel %vm1015_vm5, %v5511_v16, -inf  ;;  %v616_v46 = vpop.f32.mrf.mxu1 }
 0x206   :  { %6893 = vst [vmem:[#allocation16_spill] sm:$0xff] %v5478_v47  ;;  %v722_v50 = vmul.f32 %v5478_v47, %v5478_v47  ;;  %v1373_v33 = vsel %vm1323_vm11, %v1357_v63, %v1163_v4  ;;  %v1276_v4 = vsel %vm1209_vm7, %v5481_v7, -inf }
 0x208   :  { %4070 = vmatmul.msk.f32.gmra.mxu3 %vm740_vm6, %v722_v50  ;;  %4086 = vmatmul.msk.f32.gmra.mxu0 %vm740_vm6, %v722_v50 }
 0x209   :  { %1032 = vmax.xlane.f32.xlu2 %v1031_v20  ;;  %1226 = vmax.xlane.f32.xlu1 %v1225_v54  ;;  %v5525_v20 = vadd.f32 %v616_v46, %v5244_v10 }
 0x20a   :  { %986 = vmax.xlane.f32.xlu0 %v985_v61 }
 0x20b   :  { %v705_v52 = vpop.f32.mrf.mxu2 }
 0x20c   :  { %v5495_v45 = vadd.f32 %v705_v52, %v5257_v39  ;;  %v1260_v5 = vpop.xlane.xlu2 %1259  ;;  %v1018_v48 = vpop.xlane.xlu1 %1017  ;;  %v1128_v39 = vsel %vm1112_vm4, %v5462_v35, -inf  ;;  %v988_v52 = vsel %vm47_vm0, %v5525_v20, -inf }
 0x20d   :  { %v1389_v42 = vsel %vm1340_vm15, %v1373_v33, %v1260_v5  ;;  %v921_v38 = vpop.xlane.xlu0 %920  ;;  %v1131_v5 = vsel %vm1112_vm4, %v5511_v16, -inf  ;;  %v1228_v33 = vsel %vm1209_vm7, %v5511_v16, -inf }
 0x20e   :  { %6894 = vst [vmem:[#allocation17_spill] sm:$0xff] %v5495_v45  ;;  %v1406_v13 = vsel %vm1405_vm13, %v1389_v42, -inf  ;;  %v723_v21 = vmul.f32 %v5495_v45, %v5495_v45  ;;  %v1307_v22 = vsel %vm1306_vm9, %v921_v38, %v1018_v48 }
 0x20f   :  { %v1407_v12 = vrot.slane %v1406_v13, 4 }
 0x210   :  { %4071 = vmatmul.msk.f32.gmra.mxu3 %vm740_vm6, %v723_v21  ;;  %4087 = vmatmul.msk.f32.gmra.mxu0 %vm740_vm6, %v723_v21 }
 0x211   :  { %v1408_v9 = vmax.f32 %v1406_v13, %v1407_v12  ;;  %1129 = vmax.xlane.f32.xlu2 %v1128_v39  ;;  %1083 = vmax.xlane.f32.xlu1 %v1082_v0 }
 0x212   :  { %1180 = vmax.xlane.f32.xlu0 %v1179_v49  ;;  %v1279_v49 = vsel %vm1209_vm7, %v5525_v20, -inf }
 0x213   :  { %v1409_v44 = vrot.slane %v1408_v9, 2 }
 0x214   :  { %v1166_v62 = vpop.xlane.xlu2 %1165  ;;  %v1115_v14 = vpop.xlane.xlu1 %1114 }
 0x215   :  { %v1410_v31 = vmax.f32 %v1408_v9, %v1409_v44  ;;  %v1324_v37 = vsel %vm1323_vm11, %v1307_v22, %v1115_v14  ;;  %v1212_v58 = vpop.xlane.xlu0 %1211  ;;  %v1182_v9 = vsel %vm1112_vm4, %v5525_v20, -inf  ;;  %v619_v44 = vpop.f32.mrf.mxu1  ;;  %v1085_v22 = vsel %vm1015_vm5, %v5525_v20, -inf }
 0x216   :  { %v1341_v1 = vsel %vm1340_vm15, %v1324_v37, %v1212_v58 }
 0x217   :  { %v1411_v23 = vrot.slane %v1410_v31, 1  ;;  %4089 = vmatmul.msk.f32.vlgmr.msrb.gmra.mxu1 %vm1405_vm13, %v1341_v1 }
 0x219   :  { %1277 = vmax.xlane.f32.xlu2 %v1276_v4  ;;  %1035 = vmax.xlane.f32.xlu1 %v1034_v34  ;;  %v1412_v50 = vmax.f32 %v1410_v31, %v1411_v23  ;;  %v5547_v31 = vadd.f32 %v619_v44, %v5244_v10 }
 0x21a   :  { %938 = vmax.xlane.f32.xlu0 %v937_v40 }
 0x21b   :  { %4106 = vmatmul.msk.f32.vlgmr.msrb.gmra.mxu2 %vm1405_vm13, %v1412_v50  ;;  %v991_v46 = vsel %vm47_vm0, %v5547_v31, -inf }
 0x21c   :  { %v924_v54 = vpop.xlane.xlu2 %923  ;;  %v1069_v63 = vpop.xlane.xlu1 %1068 }
 0x21d   :  { %v972_v61 = vpop.xlane.xlu0 %971 }
 0x21e   :  { %v1358_v48 = vsel %vm1306_vm9, %v972_v61, %v1069_v63 }
 0x21f   :  { %v1374_v13 = vsel %vm1323_vm11, %v1358_v48, %v1166_v62  ;;  %v5544_v62 = vadd.f32 %v551_v3, %v5255_v32 }
 0x221   :  { %989 = vmax.xlane.f32.xlu2 %v988_v52  ;;  %1132 = vmax.xlane.f32.xlu1 %v1131_v5  ;;  %v940_v34 = vsel %vm47_vm0, %v5544_v62, -inf  ;;  %v1037_v3 = vsel %vm1015_vm5, %v5544_v62, -inf }
 0x222   :  { %1229 = vmax.xlane.f32.xlu0 %v1228_v33 }
 0x224   :  { %v1215_v42 = vpop.xlane.xlu2 %1214  ;;  %v975_v38 = vpop.xlane.xlu1 %974 }
 0x225   :  { %v1263_v21 = vpop.xlane.xlu0 %1262 }
 0x226   :  { %v1390_v12 = vsel %vm1340_vm15, %v1374_v13, %v1263_v21  ;;  %v1231_v13 = vsel %vm1209_vm7, %v5544_v62, -inf  ;;  %v1185_v21 = vsel %vm1112_vm4, %v5547_v31, -inf }
 0x227   :  { %v1413_v39 = vsel %vm1405_vm13, %v1390_v12, -inf  ;;  %v554_v12 = vpop.f32.mrf.mxu0 }
 0x228   :  { %v1414_v0 = vrot.slane %v1413_v39, 4 }
 0x229   :  { %1183 = vmax.xlane.f32.xlu2 %v1182_v9  ;;  %1280 = vmax.xlane.f32.xlu1 %v1279_v49 }
 0x22a   :  { %v1415_v14 = vmax.f32 %v1413_v39, %v1414_v0  ;;  %1086 = vmax.xlane.f32.xlu0 %v1085_v22  ;;  %v1134_v39 = vsel %vm1112_vm4, %v5544_v62, -inf }
 0x22c   :  { %v1416_v37 = vrot.slane %v1415_v14, 2  ;;  %v1072_v58 = vpop.xlane.xlu2 %1071  ;;  %v1266_v1 = vpop.xlane.xlu1 %1265 }
 0x22d   :  { %v1021_v23 = vpop.xlane.xlu0 %1020  ;;  %v1359_v49 = vsel %vm1306_vm9, %v975_v38, %v1072_v58  ;;  %v1282_v58 = vsel %vm1209_vm7, %v5547_v31, -inf }
 0x22e   :  { %v1417_v4 = vmax.f32 %v1415_v14, %v1416_v37  ;;  %v1308_v52 = vsel %vm1306_vm9, %v924_v54, %v1021_v23  ;;  %v5567_v54 = vadd.f32 %v554_v12, %v5255_v32 }
 0x230   :  { %v1418_v40 = vrot.slane %v1417_v4, 1 }
 0x231   :  { %941 = vmax.xlane.f32.xlu2 %v940_v34  ;;  %992 = vmax.xlane.f32.xlu1 %v991_v46  ;;  %v1088_v34 = vsel %vm1015_vm5, %v5547_v31, -inf  ;;  %v943_v46 = vsel %vm47_vm0, %v5567_v54, -inf }
 0x232   :  { %1038 = vmax.xlane.f32.xlu0 %v1037_v3  ;;  %v1419_v50 = vmax.f32 %v1417_v4, %v1418_v40  ;;  %v622_v40 = vpop.f32.mrf.mxu1 }
 0x234   :  { %4107 = vmatmul.msk.f32.gmra.mxu2 %vm1405_vm13, %v1419_v50  ;;  %v1024_v63 = vpop.xlane.xlu2 %1023  ;;  %v927_v61 = vpop.xlane.xlu1 %926 }
 0x235   :  { %v1118_v5 = vpop.xlane.xlu0 %1117 }
 0x236   :  { %v1325_v33 = vsel %vm1323_vm11, %v1308_v52, %v1118_v5 }
 0x237   :  { %v1342_v48 = vsel %vm1340_vm15, %v1325_v33, %v1215_v42  ;;  %v1309_v42 = vsel %vm1306_vm9, %v927_v61, %v1024_v63  ;;  %v5584_v63 = vadd.f32 %v622_v40, %v5244_v10  ;;  %v1040_v33 = vsel %vm1015_vm5, %v5567_v54, -inf }
 0x238   :  { %4090 = vmatmul.msk.f32.gmra.mxu1 %vm1405_vm13, %v1342_v48  ;;  %v1234_v48 = vsel %vm1209_vm7, %v5567_v54, -inf }
 0x239   :  { %1232 = vmax.xlane.f32.xlu2 %v1231_v13  ;;  %1186 = vmax.xlane.f32.xlu1 %v1185_v21  ;;  %v994_v21 = vsel %vm47_vm0, %v5584_v63, -inf }
 0x23a   :  { %1135 = vmax.xlane.f32.xlu0 %v1134_v39 }
 0x23c   :  { %v1121_v0 = vpop.xlane.xlu2 %1120  ;;  %v1218_v9 = vpop.xlane.xlu1 %1217 }
 0x23d   :  { %v1326_v44 = vsel %vm1323_vm11, %v1309_v42, %v1121_v0  ;;  %v1169_v22 = vpop.xlane.xlu0 %1168 }
 0x23e   :  { %v1375_v14 = vsel %vm1323_vm11, %v1359_v49, %v1169_v22  ;;  %v1343_v37 = vsel %vm1340_vm15, %v1326_v44, %v1218_v9 }
 0x23f   :  { %v1391_v23 = vsel %vm1340_vm15, %v1375_v14, %v1266_v1 }
 0x240   :  { %v1420_v4 = vsel %vm1405_vm13, %v1391_v23, -inf  ;;  %4091 = vmatmul.msk.f32.gmra.mxu1 %vm1405_vm13, %v1343_v37  ;;  %v1137_v37 = vsel %vm1112_vm4, %v5567_v54, -inf  ;;  %v1091_v23 = vsel %vm1015_vm5, %v5584_v63, -inf }
 0x241   :  { %v1421_v38 = vrot.slane %v1420_v4, 4  ;;  %1089 = vmax.xlane.f32.xlu2 %v1088_v34  ;;  %944 = vmax.xlane.f32.xlu1 %v943_v46  ;;  %v1188_v46 = vsel %vm1112_vm4, %v5584_v63, -inf }
 0x242   :  { %1283 = vmax.xlane.f32.xlu0 %v1282_v58 }
 0x243   :  { %v1422_v3 = vmax.f32 %v1420_v4, %v1421_v38  ;;  %v557_v4 = vpop.f32.mrf.mxu0 }
 0x244   :  { %v1172_v1 = vpop.xlane.xlu1 %1171  ;;  %v978_v50 = vpop.xlane.xlu2 %977  ;;  %v5604_v58 = vadd.f32 %v557_v4, %v5255_v32 }
 0x245   :  { %v1075_v61 = vpop.xlane.xlu0 %1074  ;;  %v1423_v52 = vrot.slane %v1422_v3, 2 }
 0x246   :  { %v1360_v13 = vsel %vm1306_vm9, %v978_v50, %v1075_v61 }
 0x247   :  { %v1424_v5 = vmax.f32 %v1422_v3, %v1423_v52  ;;  %v1376_v0 = vsel %vm1323_vm11, %v1360_v13, %v1172_v1  ;;  %v1043_v13 = vsel %vm1015_vm5, %v5604_v58, -inf }
 0x249   :  { %1041 = vmax.xlane.f32.xlu2 %v1040_v33  ;;  %1235 = vmax.xlane.f32.xlu1 %v1234_v48  ;;  %v1425_v12 = vrot.slane %v1424_v5, 1  ;;  %v1285_v48 = vsel %vm1209_vm7, %v5584_v63, -inf }
 0x24a   :  { %995 = vmax.xlane.f32.xlu0 %v994_v21  ;;  %v625_v21 = vpop.f32.mrf.mxu1 }
 0x24b   :  { %v1426_v39 = vmax.f32 %v1424_v5, %v1425_v12  ;;  %v946_v12 = vsel %vm47_vm0, %v5604_v58, -inf }
 0x24c   :  { %v1269_v42 = vpop.xlane.xlu2 %1268  ;;  %v1027_v9 = vpop.xlane.xlu1 %1026 }
 0x24d   :  { %v1392_v49 = vsel %vm1340_vm15, %v1376_v0, %v1269_v42  ;;  %4108 = vmatmul.msk.f32.gmra.mxu2 %vm1405_vm13, %v1426_v39  ;;  %v930_v44 = vpop.xlane.xlu0 %929  ;;  %v5618_v42 = vadd.f32 %v625_v21, %v5244_v10 }
 0x24e   :  { %v1427_v22 = vsel %vm1405_vm13, %v1392_v49, -inf  ;;  %v1310_v40 = vsel %vm1306_vm9, %v930_v44, %v1027_v9 }
 0x24f   :  { %v1428_v14 = vrot.slane %v1427_v22, 4 }
 0x251   :  { %v1429_v34 = vmax.f32 %v1427_v22, %v1428_v14  ;;  %1138 = vmax.xlane.f32.xlu2 %v1137_v37  ;;  %1092 = vmax.xlane.f32.xlu1 %v1091_v23  ;;  %v997_v37 = vsel %vm47_vm0, %v5618_v42, -inf  ;;  %v1140_v23 = vsel %vm1112_vm4, %v5604_v58, -inf }
 0x252   :  { %1189 = vmax.xlane.f32.xlu0 %v1188_v46 }
 0x253   :  { %v1430_v38 = vrot.slane %v1429_v34, 2 }
 0x254   :  { %v981_v3 = vpop.xlane.xlu2 %980  ;;  %v1124_v1 = vpop.xlane.xlu1 %1123 }
 0x255   :  { %v1431_v50 = vmax.f32 %v1429_v34, %v1430_v38  ;;  %v1327_v61 = vsel %vm1323_vm11, %v1310_v40, %v1124_v1  ;;  %v1221_v52 = vpop.xlane.xlu0 %1220  ;;  %v1237_v34 = vsel %vm1209_vm7, %v5604_v58, -inf }
 0x256   :  { %v1344_v5 = vsel %vm1340_vm15, %v1327_v61, %v1221_v52  ;;  %v1191_v61 = vsel %vm1112_vm4, %v5618_v42, -inf  ;;  %v1288_v52 = vsel %vm1209_vm7, %v5618_v42, -inf }
 0x257   :  { %4092 = vmatmul.msk.f32.gmra.mxu1 %vm1405_vm13, %v1344_v5  ;;  %v1432_v33 = vrot.slane %v1431_v50, 1 }
 0x259   :  { %1286 = vmax.xlane.f32.xlu2 %v1285_v48  ;;  %1044 = vmax.xlane.f32.xlu1 %v1043_v13  ;;  %v1433_v39 = vmax.f32 %v1431_v50, %v1432_v33  ;;  %v560_v33 = vpop.f32.mrf.mxu0  ;;  %v628_v48 = vpop.f32.mrf.mxu1  ;;  %v1094_v13 = vsel %vm1015_vm5, %v5618_v42, -inf }
 0x25a   :  { %947 = vmax.xlane.f32.xlu0 %v946_v12  ;;  %v5637_v12 = vadd.f32 %v560_v33, %v5255_v32 }
 0x25b   :  { %4109 = vmatmul.msk.f32.gmra.mxu2 %vm1405_vm13, %v1433_v39  ;;  %v5640_v39 = vadd.f32 %v628_v48, %v5244_v10 }
 0x25c   :  { %v1175_v0 = vpop.xlane.xlu2 %1174  ;;  %v1272_v9 = vpop.xlane.xlu1 %1271 }
 0x25d   :  { %v1078_v49 = vpop.xlane.xlu0 %1077  ;;  %6895 = vst [vmem:[#allocation18_spill] sm:$0xff] %v5640_v39  ;;  %v1194_v33 = vsel %vm1112_vm4, %v5640_v39, -inf }
 0x25e   :  { %v1361_v44 = vsel %vm1306_vm9, %v981_v3, %v1078_v49 }
 0x25f   :  { %v1377_v22 = vsel %vm1323_vm11, %v1361_v44, %v1175_v0 }
 0x260   :  { %v1393_v14 = vsel %vm1340_vm15, %v1377_v22, %v1272_v9 }
 0x261   :  { %v1434_v4 = vsel %vm1405_vm13, %v1393_v14, -inf  ;;  %998 = vmax.xlane.f32.xlu2 %v997_v37  ;;  %1141 = vmax.xlane.f32.xlu1 %v1140_v23  ;;  %v949_v23 = vsel %vm47_vm0, %v5637_v12, -inf  ;;  %v563_v48 = vpop.f32.mrf.mxu0 }
 0x262   :  { %v1435_v46 = vrot.slane %v1434_v4, 4  ;;  %1238 = vmax.xlane.f32.xlu0 %v1237_v34  ;;  %v1046_v34 = vsel %vm1015_vm5, %v5637_v12, -inf }
 0x264   :  { %v933_v38 = vpop.xlane.xlu2 %932  ;;  %v984_v40 = vpop.xlane.xlu1 %983  ;;  %v1436_v3 = vmax.f32 %v1434_v4, %v1435_v46  ;;  %v1000_v4 = vsel %vm47_vm0, %v5640_v39, -inf }
 0x265   :  { %v1030_v1 = vpop.xlane.xlu0 %1029 }
 0x266   :  { %v1437_v50 = vrot.slane %v1436_v3, 2  ;;  %v1311_v44 = vsel %vm1306_vm9, %v933_v38, %v1030_v1 }
 0x268   :  { %v1438_v5 = vmax.f32 %v1436_v3, %v1437_v50 }
 0x269   :  { %1192 = vmax.xlane.f32.xlu2 %v1191_v61  ;;  %1289 = vmax.xlane.f32.xlu1 %v1288_v52 }
 0x26a   :  { %1095 = vmax.xlane.f32.xlu0 %v1094_v13  ;;  %v1439_v21 = vrot.slane %v1438_v5, 1 }
 0x26c   :  { %v1224_v0 = vpop.xlane.xlu2 %1223  ;;  %v1178_v9 = vpop.xlane.xlu1 %1177  ;;  %v1440_v49 = vmax.f32 %v1438_v5, %v1439_v21  ;;  %v1240_v5 = vsel %vm1209_vm7, %v5637_v12, -inf  ;;  %v1143_v21 = vsel %vm1112_vm4, %v5637_v12, -inf }
 0x26d   :  { %v1127_v22 = vpop.xlane.xlu0 %1126 }
 0x26e   :  { %v1328_v14 = vsel %vm1323_vm11, %v1311_v44, %v1127_v22  ;;  %4110 = vmatmul.msk.f32.gmra.mxu2 %vm1405_vm13, %v1440_v49 }
 0x26f   :  { %v1345_v37 = vsel %vm1340_vm15, %v1328_v14, %v1224_v0  ;;  %v5664_v0 = vadd.f32 %v563_v48, %v5255_v32 }
 0x270   :  { %4093 = vmatmul.msk.f32.gmra.mxu1 %vm1405_vm13, %v1345_v37  ;;  %v1097_v37 = vsel %vm1015_vm5, %v5640_v39, -inf }
 0x271   :  { %950 = vmax.xlane.f32.xlu2 %v949_v23  ;;  %1001 = vmax.xlane.f32.xlu1 %v1000_v4  ;;  %6896 = vst [vmem:[#allocation19_spill] sm:$0xff] %v5664_v0  ;;  %v952_v23 = vsel %vm47_vm0, %v5664_v0, -inf  ;;  %v1291_v4 = vsel %vm1209_vm7, %v5640_v39, -inf }
 0x272   :  { %1047 = vmax.xlane.f32.xlu0 %v1046_v34 }
 0x274   :  { %v1081_v46 = vpop.xlane.xlu2 %1080  ;;  %v936_v38 = vpop.xlane.xlu1 %935 }
 0x275   :  { %v1362_v3 = vsel %vm1306_vm9, %v984_v40, %v1081_v46  ;;  %v1275_v1 = vpop.xlane.xlu0 %1274  ;;  %v631_v46 = vpop.f32.mrf.mxu1 }
 0x276   :  { %v1378_v50 = vsel %vm1323_vm11, %v1362_v3, %v1178_v9 }
 0x277   :  { %v1394_v61 = vsel %vm1340_vm15, %v1378_v50, %v1275_v1 }
 0x278   :  { %v1441_v52 = vsel %vm1405_vm13, %v1394_v61, -inf }
 0x279   :  { %v1442_v13 = vrot.slane %v1441_v52, 4  ;;  %1241 = vmax.xlane.f32.xlu2 %v1240_v5  ;;  %1195 = vmax.xlane.f32.xlu1 %v1194_v33 }
 0x27a   :  { %1144 = vmax.xlane.f32.xlu0 %v1143_v21 }
 0x27b   :  { %v1443_v40 = vmax.f32 %v1441_v52, %v1442_v13  ;;  %v5674_v52 = vadd.f32 %v631_v46, %v5244_v10  ;;  %v1049_v13 = vsel %vm1015_vm5, %v5664_v0, -inf  ;;  %v566_v46 = vpop.f32.mrf.mxu0 }
 0x27c   :  { %v1033_v9 = vpop.xlane.xlu2 %1032  ;;  %v1227_v49 = vpop.xlane.xlu1 %1226 }
 0x27d   :  { %v1444_v44 = vrot.slane %v1443_v40, 2  ;;  %v987_v22 = vpop.xlane.xlu0 %986  ;;  %v1312_v1 = vsel %vm1306_vm9, %v936_v38, %v1033_v9  ;;  %6897 = vst [vmem:[#allocation20_spill] sm:$0xff] %v5674_v52  ;;  %v1243_v38 = vsel %vm1209_vm7, %v5664_v0, -inf }
 0x27f   :  { %v1445_v14 = vmax.f32 %v1443_v40, %v1444_v44  ;;  %v1003_v40 = vsel %vm47_vm0, %v5674_v52, -inf }
 0x281   :  { %1098 = vmax.xlane.f32.xlu2 %v1097_v37  ;;  %953 = vmax.xlane.f32.xlu1 %v952_v23  ;;  %v1446_v34 = vrot.slane %v1445_v14, 1 }
 0x282   :  { %1292 = vmax.xlane.f32.xlu0 %v1291_v4 }
 0x283   :  { %v1447_v3 = vmax.f32 %v1445_v14, %v1446_v34  ;;  %v1146_v34 = vsel %vm1112_vm4, %v5664_v0, -inf }
 0x284   :  { %v1130_v50 = vpop.xlane.xlu2 %1129  ;;  %v1084_v61 = vpop.xlane.xlu1 %1083 }
 0x285   :  { %v1329_v5 = vsel %vm1323_vm11, %v1312_v1, %v1130_v50  ;;  %v1181_v33 = vpop.xlane.xlu0 %1180  ;;  %4111 = vmatmul.msk.f32.gmra.mxu2 %vm1405_vm13, %v1447_v3  ;;  %v1363_v21 = vsel %vm1306_vm9, %v987_v22, %v1084_v61  ;;  %v1100_v22 = vsel %vm1015_vm5, %v5674_v52, -inf  ;;  %v1197_v1 = vsel %vm1112_vm4, %v5674_v52, -inf }
 0x286   :  { %v1346_v48 = vsel %vm1340_vm15, %v1329_v5, %v1227_v49  ;;  %v1379_v9 = vsel %vm1323_vm11, %v1363_v21, %v1181_v33  ;;  %v5697_v61 = vadd.f32 %v566_v46, %v5255_v32 }
 0x287   :  { %4094 = vmatmul.msk.f32.gmra.mxu1 %vm1405_vm13, %v1346_v48 }
 0x288   :  { %6898 = vst [vmem:[#allocation21_spill] sm:$0xff] %v5697_v61 }
 0x289   :  { %1050 = vmax.xlane.f32.xlu2 %v1049_v13  ;;  %1244 = vmax.xlane.f32.xlu1 %v1243_v38 }
 0x28a   :  { %1004 = vmax.xlane.f32.xlu0 %v1003_v40 }
 0x28c   :  { %v1278_v44 = vpop.xlane.xlu2 %1277  ;;  %v1036_v49 = vpop.xlane.xlu1 %1035 }
 0x28d   :  { %v1395_v14 = vsel %vm1340_vm15, %v1379_v9, %v1278_v44  ;;  %v939_v37 = vpop.xlane.xlu0 %938  ;;  %v634_v9 = vpop.f32.mrf.mxu1 }
 0x28e   :  { %v1448_v23 = vsel %vm1405_vm13, %v1395_v14, -inf  ;;  %v1313_v5 = vsel %vm1306_vm9, %v939_v37, %v1036_v49  ;;  %v1294_v14 = vsel %vm1209_vm7, %v5674_v52, -inf  ;;  %v955_v49 = vsel %vm47_vm0, %v5697_v61, -inf }
 0x28f   :  { %v1449_v4 = vrot.slane %v1448_v23, 4 }
 0x291   :  { %v1450_v3 = vmax.f32 %v1448_v23, %v1449_v4  ;;  %1147 = vmax.xlane.f32.xlu2 %v1146_v34  ;;  %1101 = vmax.xlane.f32.xlu1 %v1100_v22  ;;  %v1052_v23 = vsel %vm1015_vm5, %v5697_v61, -inf  ;;  %v5711_v4 = vadd.f32 %v634_v9, %v5244_v10 }
 0x292   :  { %1198 = vmax.xlane.f32.xlu0 %v1197_v1 }
 0x293   :  { %v1451_v50 = vrot.slane %v1450_v3, 2  ;;  %6899 = vst [vmem:[#allocation22_spill] sm:$0xff] %v5711_v4 }
 0x294   :  { %v990_v33 = vpop.xlane.xlu2 %989  ;;  %v1133_v48 = vpop.xlane.xlu1 %1132 }
 0x295   :  { %v1452_v13 = vmax.f32 %v1450_v3, %v1451_v50  ;;  %v1330_v38 = vsel %vm1323_vm11, %v1313_v5, %v1133_v48  ;;  %v1230_v21 = vpop.xlane.xlu0 %1229  ;;  %v1149_v5 = vsel %vm1112_vm4, %v5697_v61, -inf  ;;  %v1297_v48 = vsel %vm1209_vm7, %v5711_v4, -inf }
 0x296   :  { %v1347_v40 = vsel %vm1340_vm15, %v1330_v38, %v1230_v21  ;;  %v1246_v21 = vsel %vm1209_vm7, %v5697_v61, -inf  ;;  %v1995_v61 = vld [vmem:[%s6804_s7 + $0x40] sm:$0xff] }
 0x297   :  { %4095 = vmatmul.msk.f32.gmra.mxu1 %vm1405_vm13, %v1347_v40  ;;  %v1453_v44 = vrot.slane %v1452_v13, 1 }
 0x299   :  { %1295 = vmax.xlane.f32.xlu2 %v1294_v14  ;;  %1053 = vmax.xlane.f32.xlu1 %v1052_v23  ;;  %v1454_v37 = vmax.f32 %v1452_v13, %v1453_v44  ;;  %v637_v13 = vpop.f32.mrf.mxu1 }
 0x29a   :  { %956 = vmax.xlane.f32.xlu0 %v955_v49 }
 0x29b   :  { %4112 = vmatmul.msk.f32.gmra.mxu2 %vm1405_vm13, %v1454_v37  ;;  %v1006_v37 = vsel %vm47_vm0, %v5711_v4, -inf }
 0x29c   :  { %v1184_v34 = vpop.xlane.xlu2 %1183  ;;  %v1281_v22 = vpop.xlane.xlu1 %1280 }
 0x29d   :  { %v1087_v46 = vpop.xlane.xlu0 %1086 }
 0x29e   :  { %v1364_v3 = vsel %vm1306_vm9, %v990_v33, %v1087_v46  ;;  %v5724_v33 = vadd.f32 %v637_v13, %v5244_v10  ;;  %v1103_v46 = vsel %vm1015_vm5, %v5711_v4, -inf }
 0x29f   :  { %v1380_v1 = vsel %vm1323_vm11, %v1364_v3, %v1184_v34 }
 0x2a0   :  { %v1396_v50 = vsel %vm1340_vm15, %v1380_v1, %v1281_v22  ;;  %6900 = vst [vmem:[#allocation23_spill] sm:$0xff] %v5724_v33  ;;  %v1009_v34 = vsel %vm47_vm0, %v5724_v33, -inf }
 0x2a1   :  { %v1455_v38 = vsel %vm1405_vm13, %v1396_v50, -inf  ;;  %1150 = vmax.xlane.f32.xlu2 %v1149_v5  ;;  %1298 = vmax.xlane.f32.xlu1 %v1297_v48 }
 0x2a2   :  { %v1456_v40 = vrot.slane %v1455_v38, 4  ;;  %1247 = vmax.xlane.f32.xlu0 %v1246_v21 }
 0x2a4   :  { %v942_v9 = vpop.xlane.xlu2 %941  ;;  %v993_v44 = vpop.xlane.xlu1 %992  ;;  %v1457_v14 = vmax.f32 %v1455_v38, %v1456_v40  ;;  %v1200_v40 = vsel %vm1112_vm4, %v5711_v4, -inf  ;;  %v1996_v4 = vld [vmem:[%s6804_s7 + $0x48] sm:$0xff] }
 0x2a5   :  { %v1039_v23 = vpop.xlane.xlu0 %1038 }
 0x2a6   :  { %v1458_v49 = vrot.slane %v1457_v14, 2  ;;  %v1314_v48 = vsel %vm1306_vm9, %v942_v9, %v1039_v23  ;;  %v1300_v9 = vsel %vm1209_vm7, %v5724_v33, -inf }
 0x2a8   :  { %v1459_v22 = vmax.f32 %v1457_v14, %v1458_v49  ;;  %v1203_v14 = vsel %vm1112_vm4, %v5724_v33, -inf  ;;  %v640_v49 = vpop.f32.mrf.mxu1 }
 0x2a9   :  { %1007 = vmax.xlane.f32.xlu2 %v1006_v37  ;;  %1010 = vmax.xlane.f32.xlu1 %v1009_v34  ;;  %v5744_v23 = vadd.f32 %v640_v49, %v5244_v10 }
 0x2aa   :  { %1104 = vmax.xlane.f32.xlu0 %v1103_v46  ;;  %v1460_v3 = vrot.slane %v1459_v22, 1 }
 0x2ab   :  { %6901 = vst [vmem:[#allocation24_spill] sm:$0xff] %v5744_v23 }
 0x2ac   :  { %v1233_v1 = vpop.xlane.xlu2 %1232  ;;  %v1187_v50 = vpop.xlane.xlu1 %1186  ;;  %v1461_v5 = vmax.f32 %v1459_v22, %v1460_v3 }
 0x2ad   :  { %v1136_v13 = vpop.xlane.xlu0 %1135 }
 0x2ae   :  { %v1331_v38 = vsel %vm1323_vm11, %v1314_v48, %v1136_v13  ;;  %4113 = vmatmul.msk.f32.gmra.mxu2 %vm1405_vm13, %v1461_v5  ;;  %v1106_v48 = vsel %vm1015_vm5, %v5724_v33, -inf  ;;  %v1109_v13 = vsel %vm1015_vm5, %v5744_v23, -inf }
 0x2af   :  { %v1348_v21 = vsel %vm1340_vm15, %v1331_v38, %v1233_v1  ;;  %v569_v38 = vpop.f32.mrf.mxu0 }
 0x2b0   :  { %4096 = vmatmul.msk.f32.gmra.mxu1 %vm1405_vm13, %v1348_v21  ;;  %v1012_v21 = vsel %vm47_vm0, %v5744_v23, -inf }
 0x2b1   :  { %1201 = vmax.xlane.f32.xlu2 %v1200_v40  ;;  %1204 = vmax.xlane.f32.xlu1 %v1203_v14 }
 0x2b2   :  { %1301 = vmax.xlane.f32.xlu0 %v1300_v9 }
 0x2b4   :  { %v1090_v37 = vpop.xlane.xlu2 %1089  ;;  %v945_v34 = vpop.xlane.xlu1 %944 }
 0x2b5   :  { %v1365_v22 = vsel %vm1306_vm9, %v993_v44, %v1090_v37  ;;  %v1284_v46 = vpop.xlane.xlu0 %1283 }
 0x2b6   :  { %v1381_v3 = vsel %vm1323_vm11, %v1365_v22, %v1187_v50  ;;  %v5757_v50 = vadd.f32 %v569_v38, %v5255_v32  ;;  %v1303_v22 = vsel %vm1209_vm7, %v5744_v23, -inf }
 0x2b7   :  { %v1397_v1 = vsel %vm1340_vm15, %v1381_v3, %v1284_v46 }
 0x2b8   :  { %v1462_v5 = vsel %vm1405_vm13, %v1397_v1, -inf  ;;  %6902 = vst [vmem:[#allocation25_spill] sm:$0xff] %v5757_v50  ;;  %v958_v46 = vsel %vm47_vm0, %v5757_v50, -inf  ;;  %v1206_v1 = vsel %vm1112_vm4, %v5744_v23, -inf }
 0x2b9   :  { %v1463_v10 = vrot.slane %v1462_v5, 4  ;;  %1107 = vmax.xlane.f32.xlu2 %v1106_v48  ;;  %1110 = vmax.xlane.f32.xlu1 %v1109_v13 }
 0x2ba   :  { %1013 = vmax.xlane.f32.xlu0 %v1012_v21 }
 0x2bb   :  { %v1464_v44 = vmax.f32 %v1462_v5, %v1463_v10 }
 0x2bc   :  { %v1042_v40 = vpop.xlane.xlu2 %1041  ;;  %v1236_v14 = vpop.xlane.xlu1 %1235 }
 0x2bd   :  { %v1465_v49 = vrot.slane %v1464_v44, 2  ;;  %v996_v9 = vpop.xlane.xlu0 %995  ;;  %v1315_v48 = vsel %vm1306_vm9, %v945_v34, %v1042_v40  ;;  %v1152_v40 = vsel %vm1112_vm4, %v5757_v50, -inf }
 0x2bf   :  { %v1466_v37 = vmax.f32 %v1464_v44, %v1465_v49  ;;  %v572_v49 = vpop.f32.mrf.mxu0 }
 0x2c1   :  { %v1467_v3 = vrot.slane %v1466_v37, 1  ;;  %1304 = vmax.xlane.f32.xlu2 %v1303_v22  ;;  %959 = vmax.xlane.f32.xlu1 %v958_v46  ;;  %v1055_v22 = vsel %vm1015_vm5, %v5757_v50, -inf  ;;  %v5778_v46 = vadd.f32 %v572_v49, %v5255_v32 }
 0x2c2   :  { %1207 = vmax.xlane.f32.xlu0 %v1206_v1 }
 0x2c3   :  { %v1468_v5 = vmax.f32 %v1466_v37, %v1467_v3  ;;  %v1249_v37 = vsel %vm1209_vm7, %v5757_v50, -inf  ;;  %6903 = vst [vmem:[#allocation26_spill] sm:$0xff] %v5778_v46 }
 0x2c4   :  { %v1139_v13 = vpop.xlane.xlu2 %1138  ;;  %v1093_v38 = vpop.xlane.xlu1 %1092 }
 0x2c5   :  { %v1332_v10 = vsel %vm1323_vm11, %v1315_v48, %v1139_v13  ;;  %v1190_v21 = vpop.xlane.xlu0 %1189  ;;  %4114 = vmatmul.msk.f32.gmra.mxu2 %vm1405_vm13, %v1468_v5  ;;  %v1366_v34 = vsel %vm1306_vm9, %v996_v9, %v1093_v38  ;;  %v1155_v9 = vsel %vm1112_vm4, %v5778_v46, -inf  ;;  %v961_v38 = vsel %vm47_vm0, %v5778_v46, -inf }
 0x2c6   :  { %v1349_v44 = vsel %vm1340_vm15, %v1332_v10, %v1236_v14  ;;  %v1382_v14 = vsel %vm1323_vm11, %v1366_v34, %v1190_v21  ;;  %v1058_v21 = vsel %vm1015_vm5, %v5778_v46, -inf }
 0x2c7   :  { %4097 = vmatmul.msk.f32.gmra.mxu1 %vm1405_vm13, %v1349_v44  ;;  %v575_v44 = vpop.f32.mrf.mxu0 }
 0x2c9   :  { %1056 = vmax.xlane.f32.xlu2 %v1055_v22  ;;  %1250 = vmax.xlane.f32.xlu1 %v1249_v37  ;;  %v5790_v37 = vadd.f32 %v575_v44, %v5255_v32  ;;  %v1252_v32 = vsel %vm1209_vm7, %v5778_v46, -inf }
 0x2ca   :  { %1153 = vmax.xlane.f32.xlu0 %v1152_v40 }
 0x2cb   :  { %6904 = vst [vmem:[#allocation27_spill] sm:$0xff] %v5790_v37 }
 0x2cc   :  { %v1287_v3 = vpop.xlane.xlu2 %1286  ;;  %v1045_v1 = vpop.xlane.xlu1 %1044 }
 0x2cd   :  { %v1398_v5 = vsel %vm1340_vm15, %v1382_v14, %v1287_v3  ;;  %v948_v48 = vpop.xlane.xlu0 %947 }
 0x2ce   :  { %v1469_v13 = vsel %vm1405_vm13, %v1398_v5, -inf  ;;  %v1316_v34 = vsel %vm1306_vm9, %v948_v48, %v1045_v1  ;;  %v964_v1 = vsel %vm47_vm0, %v5790_v37, -inf }
 0x2cf   :  { %v1470_v10 = vrot.slane %v1469_v13, 4 }
 0x2d1   :  { %v1471_v22 = vmax.f32 %v1469_v13, %v1470_v10  ;;  %1156 = vmax.xlane.f32.xlu1 %v1155_v9  ;;  %962 = vmax.xlane.f32.xlu2 %v961_v38  ;;  %v1061_v9 = vsel %vm1015_vm5, %v5790_v37, -inf  ;;  %vm3955_vm5 = vcmask 195584  }
 0x2d2   :  { %1059 = vmax.xlane.f32.xlu0 %v1058_v21 }
 0x2d3   :  { %v1472_v49 = vrot.slane %v1471_v22, 2 }
 0x2d4   :  { %v999_v40 = vpop.xlane.xlu2 %998  ;;  %v1142_v14 = vpop.xlane.xlu1 %1141 }
 0x2d5   :  { %v1473_v3 = vmax.f32 %v1471_v22, %v1472_v49  ;;  %v1333_v5 = vsel %vm1323_vm11, %v1316_v34, %v1142_v14  ;;  %v1239_v45 = vpop.xlane.xlu0 %1238  ;;  %v1158_v34 = vsel %vm1112_vm4, %v5790_v37, -inf  ;;  %vm3938_vm4 = vcmask 130048  }
 0x2d6   :  { %v1350_v13 = vsel %vm1340_vm15, %v1333_v5, %v1239_v45 }
 0x2d7   :  { %v1474_v10 = vrot.slane %v1473_v3, 1  ;;  %4098 = vmatmul.msk.f32.gmra.mxu1 %vm1405_vm13, %v1350_v13 }
 0x2d9   :  { %1062 = vmax.xlane.f32.xlu1 %v1061_v9  ;;  %1253 = vmax.xlane.f32.xlu2 %v1252_v32  ;;  %v1475_v48 = vmax.f32 %v1473_v3, %v1474_v10  ;;  %v1255_v3 = vsel %vm1209_vm7, %v5790_v37, -inf }
 0x2da   :  { %965 = vmax.xlane.f32.xlu0 %v964_v1 }
 0x2db   :  { %4115 = vmatmul.msk.f32.gmra.mxu2 %vm1405_vm13, %v1475_v48 }
 0x2dc   :  { %v1193_v38 = vpop.xlane.xlu2 %1192  ;;  %v1290_v45 = vpop.xlane.xlu1 %1289 }
 0x2dd   :  { %v1096_v44 = vpop.xlane.xlu0 %1095 }
 0x2de   :  { %v1367_v22 = vsel %vm1306_vm9, %v999_v40, %v1096_v44 }
 0x2df   :  { %v1383_v21 = vsel %vm1323_vm11, %v1367_v22, %v1193_v38 }
 0x2e0   :  { %v1399_v49 = vsel %vm1340_vm15, %v1383_v21, %v1290_v45 }
 0x2e1   :  { %v1476_v14 = vsel %vm1405_vm13, %v1399_v49, -inf  ;;  %1159 = vmax.xlane.f32.xlu2 %v1158_v34 }
 0x2e2   :  { %v1477_v5 = vrot.slane %v1476_v14, 4  ;;  %1256 = vmax.xlane.f32.xlu0 %v1255_v3 }
 0x2e4   :  { %v1478_v13 = vmax.f32 %v1476_v14, %v1477_v5  ;;  %v951_v10 = vpop.xlane.xlu2 %950  ;;  %v1002_v9 = vpop.xlane.xlu1 %1001 }
 0x2e5   :  { %v1048_v32 = vpop.xlane.xlu0 %1047 }
 0x2e6   :  { %v1479_v40 = vrot.slane %v1478_v13, 2  ;;  %v1317_v22 = vsel %vm1306_vm9, %v951_v10, %v1048_v32 }
 0x2e8   :  { %v1480_v1 = vmax.f32 %v1478_v13, %v1479_v40 }
 0x2ea   :  { %v1481_v48 = vrot.slane %v1480_v1, 1 }
 0x2ec   :  { %v1242_v38 = vpop.xlane.xlu2 %1241  ;;  %v1196_v45 = vpop.xlane.xlu1 %1195  ;;  %v1482_v44 = vmax.f32 %v1480_v1, %v1481_v48 }
 0x2ed   :  { %v1145_v21 = vpop.xlane.xlu0 %1144 }
 0x2ee   :  { %v1334_v49 = vsel %vm1323_vm11, %v1317_v22, %v1145_v21  ;;  %4116 = vmatmul.msk.f32.gmra.mxu2 %vm1405_vm13, %v1482_v44 }
 0x2ef   :  { %v1351_v34 = vsel %vm1340_vm15, %v1334_v49, %v1242_v38 }
 0x2f0   :  { %4099 = vmatmul.msk.f32.gmra.mxu1 %vm1405_vm13, %v1351_v34 }
 0x2f2   :  { %2065 = vrot.lane.b32.xlu1 %v5263_v60, %s4425_s6 }
 0x2f4   :  { %v1099_v14 = vpop.xlane.xlu2 %1098  ;;  %v954_v3 = vpop.xlane.xlu1 %953 }
 0x2f5   :  { %v1368_v5 = vsel %vm1306_vm9, %v1002_v9, %v1099_v14  ;;  %v1293_v13 = vpop.xlane.xlu0 %1292 }
 0x2f6   :  { %v1384_v10 = vsel %vm1323_vm11, %v1368_v5, %v1196_v45  ;;  %2117 = vrot.lane.b32.xlu0 %v5295_v26, %s4425_s6 }
 0x2f7   :  { %v1400_v32 = vsel %vm1340_vm15, %v1384_v10, %v1293_v13 }
 0x2f8   :  { %v1483_v40 = vsel %vm1405_vm13, %v1400_v32, -inf }
 0x2f9   :  { %v1484_v1 = vrot.slane %v1483_v40, 4  ;;  %2093 = vrot.lane.b32.xlu2 %v5279_v53, %s4425_s6 }
 0x2fa   :  { %2165 = vrot.lane.b32.xlu1 %v5324_v11, %s4425_s6 }
 0x2fb   :  { %v1485_v48 = vmax.f32 %v1483_v40, %v1484_v1 }
 0x2fc   :  { %v1051_v38 = vpop.xlane.xlu2 %1050  ;;  %v1245_v9 = vpop.xlane.xlu1 %1244 }
 0x2fd   :  { %v1486_v44 = vrot.slane %v1485_v48, 2  ;;  %v1005_v22 = vpop.xlane.xlu0 %1004  ;;  %v1318_v34 = vsel %vm1306_vm9, %v954_v3, %v1051_v38 }
 0x2fe   :  { %2189 = vrot.lane.b32.xlu0 %v5340_v17, %s4425_s6 }
 0x2ff   :  { %v1487_v45 = vmax.f32 %v1485_v48, %v1486_v44 }
 0x301   :  { %v1488_v21 = vrot.slane %v1487_v45, 1  ;;  %2141 = vrot.lane.b32.xlu2 %v5311_v55, %s4425_s6 }
 0x302   :  { %2237 = vrot.lane.b32.xlu1 %v5369_v28, %s4425_s6 }
 0x303   :  { %v1489_v49 = vmax.f32 %v1487_v45, %v1488_v21 }
 0x304   :  { %v1148_v14 = vpop.xlane.xlu2 %1147  ;;  %v1102_v5 = vpop.xlane.xlu1 %1101 }
 0x305   :  { %v1335_v13 = vsel %vm1323_vm11, %v1318_v34, %v1148_v14  ;;  %v1199_v10 = vpop.xlane.xlu0 %1198  ;;  %4117 = vmatmul.msk.f32.gmra.mxu2 %vm1405_vm13, %v1489_v49  ;;  %v1369_v40 = vsel %vm1306_vm9, %v1005_v22, %v1102_v5 }
 0x306   :  { %2261 = vrot.lane.b32.xlu0 %v5385_v43, %s4425_s6  ;;  %v1352_v32 = vsel %vm1340_vm15, %v1335_v13, %v1245_v9  ;;  %v1385_v3 = vsel %vm1323_vm11, %v1369_v40, %v1199_v10 }
 0x307   :  { %4100 = vmatmul.msk.f32.gmra.mxu1 %vm1405_vm13, %v1352_v32 }
 0x309   :  { %2213 = vrot.lane.b32.xlu2 %v5353_v15, %s4425_s6 }
 0x30a   :  { %2309 = vrot.lane.b32.xlu1 %v5414_v30, %s4425_s6 }
 0x30c   :  { %v1296_v1 = vpop.xlane.xlu2 %1295  ;;  %v1054_v48 = vpop.xlane.xlu1 %1053 }
 0x30d   :  { %v1401_v38 = vsel %vm1340_vm15, %v1385_v3, %v1296_v1  ;;  %v957_v44 = vpop.xlane.xlu0 %956 }
 0x30e   :  { %v1490_v45 = vsel %vm1405_vm13, %v1401_v38, -inf  ;;  %2333 = vrot.lane.b32.xlu0 %v5433_v19, %s4425_s6  ;;  %v1319_v49 = vsel %vm1306_vm9, %v957_v44, %v1054_v48  ;;  %v5862_v44 = vpop.f32.mrf.mxu0 }
 0x30f   :  { %v1491_v9 = vrot.slane %v1490_v45, 4 }
 0x311   :  { %v1492_v22 = vmax.f32 %v1490_v45, %v1491_v9  ;;  %2285 = vrot.lane.b32.xlu2 %v5401_v18, %s4425_s6 }
 0x313   :  { %v1493_v21 = vrot.slane %v1492_v22, 2 }
 0x314   :  { %v1151_v34 = vpop.xlane.xlu2 %1150  ;;  %v1299_v14 = vpop.xlane.xlu1 %1298 }
 0x315   :  { %v1494_v5 = vmax.f32 %v1492_v22, %v1493_v21  ;;  %v1336_v13 = vsel %vm1323_vm11, %v1319_v49, %v1151_v34  ;;  %v1248_v10 = vpop.xlane.xlu0 %1247 }
 0x316   :  { %v1353_v32 = vsel %vm1340_vm15, %v1336_v13, %v1248_v10  ;;  %v5868_v13 = vpop.f32.mrf.mxu3 }
 0x317   :  { %v1495_v40 = vrot.slane %v1494_v5, 1  ;;  %4101 = vmatmul.msk.f32.gmra.mxu1 %vm1405_vm13, %v1353_v32 }
 0x319   :  { %2357 = vrot.lane.b32.xlu2 %v5446_v59, %s4425_s6  ;;  %v1496_v3 = vmax.f32 %v1494_v5, %v1495_v40 }
 0x31b   :  { %4118 = vmatmul.msk.f32.gmra.mxu2 %vm1405_vm13, %v1496_v3 }
 0x31c   :  { %v1008_v1 = vpop.xlane.xlu2 %1007  ;;  %v1011_v38 = vpop.xlane.xlu1 %1010 }
 0x31d   :  { %v1105_v48 = vpop.xlane.xlu0 %1104 }
 0x31e   :  { %v1370_v45 = vsel %vm1306_vm9, %v1008_v1, %v1105_v48  ;;  %v5872_v48 = vpop.f32.mrf.mxu0  ;;  %v5878_v26 = vpop.f32.mrf.mxu3 }
 0x321   :  { %2381 = vrot.lane.b32.xlu2 %v5465_v8, %s4425_s6 }
 0x324   :  { %v1202_v9 = vpop.xlane.xlu2 %1201  ;;  %v1205_v22 = vpop.xlane.xlu1 %1204 }
 0x325   :  { %v1386_v21 = vsel %vm1323_vm11, %v1370_v45, %v1202_v9  ;;  %v1302_v49 = vpop.xlane.xlu0 %1301 }
 0x326   :  { %v1402_v34 = vsel %vm1340_vm15, %v1386_v21, %v1299_v14 }
 0x327   :  { %v1497_v5 = vsel %vm1405_vm13, %v1402_v34, -inf }
 0x328   :  { %v1498_v10 = vrot.slane %v1497_v5, 4 }
 0x329   :  { %2688 = vrot.lane.b32.xlu2 %v5385_v43, %s4426_s27 }
 0x32a   :  { %v1499_v32 = vmax.f32 %v1497_v5, %v1498_v10 }
 0x32c   :  { %v1500_v40 = vrot.slane %v1499_v32, 2  ;;  %v1108_v3 = vpop.xlane.xlu2 %1107  ;;  %v1111_v1 = vpop.xlane.xlu1 %1110 }
 0x32d   :  { %v1371_v45 = vsel %vm1306_vm9, %v1011_v38, %v1108_v3  ;;  %v1014_v9 = vpop.xlane.xlu0 %1013 }
 0x32e   :  { %v1501_v28 = vmax.f32 %v1499_v32, %v1500_v40  ;;  %v1387_v14 = vsel %vm1323_vm11, %v1371_v45, %v1205_v22  ;;  %v1372_v38 = vsel %vm1306_vm9, %v1014_v9, %v1111_v1  ;;  %v5883_v40 = vpop.f32.mrf.mxu0 }
 0x32f   :  { %v1403_v21 = vsel %vm1340_vm15, %v1387_v14, %v1302_v49 }
 0x330   :  { %v1504_v34 = vsel %vm1405_vm13, %v1403_v21, -inf  ;;  %v1502_v15 = vrot.slane %v1501_v28, 1  ;;  %v5887_v21 = vpop.f32.mrf.mxu3 }
 0x331   :  { %v1505_v55 = vrot.slane %v1504_v34, 4 }
 0x332   :  { %v1503_v5 = vmax.f32 %v1501_v28, %v1502_v15 }
 0x333   :  { %v1506_v10 = vmax.f32 %v1504_v34, %v1505_v55 }
 0x334   :  { %v1305_v43 = vpop.xlane.xlu2 %1304  ;;  %v960_v19 = vpop.xlane.xlu1 %959  ;;  %4119 = vmatmul.msk.f32.gmra.mxu2 %vm1405_vm13, %v1503_v5 }
 0x335   :  { %v1507_v30 = vrot.slane %v1506_v10, 2  ;;  %v1208_v32 = vpop.xlane.xlu0 %1207 }
 0x336   :  { %v1388_v22 = vsel %vm1323_vm11, %v1372_v38, %v1208_v32 }
 0x337   :  { %v1404_v49 = vsel %vm1340_vm15, %v1388_v22, %v1305_v43  ;;  %v1508_v3 = vmax.f32 %v1506_v10, %v1507_v30  ;;  %v5894_v10 = vpop.f32.mrf.mxu0 }
 0x338   :  { %v1511_v45 = vsel %vm1405_vm13, %v1404_v49, -inf }
 0x339   :  { %v1512_v14 = vrot.slane %v1511_v45, 4  ;;  %v1509_v15 = vrot.slane %v1508_v3, 1 }
 0x33b   :  { %v1513_v55 = vmax.f32 %v1511_v45, %v1512_v14  ;;  %v1510_v28 = vmax.f32 %v1508_v3, %v1509_v15 }
 0x33c   :  { %v1057_v34 = vpop.xlane.xlu2 %1056  ;;  %v1251_v9 = vpop.xlane.xlu1 %1250 }
 0x33d   :  { %v1514_v5 = vrot.slane %v1513_v55, 2  ;;  %v1320_v1 = vsel %vm1306_vm9, %v960_v19, %v1057_v34  ;;  %v1154_v8 = vpop.xlane.xlu0 %1153  ;;  %4120 = vmatmul.msk.f32.gmra.mxu2 %vm1405_vm13, %v1510_v28  ;;  %v5897_v19 = vpop.f32.mrf.mxu3 }
 0x33e   :  { %v1337_v38 = vsel %vm1323_vm11, %v1320_v1, %v1154_v8  ;;  %v5908_v1 = vpop.f32.mrf.mxu2 }
 0x33f   :  { %v1515_v43 = vmax.f32 %v1513_v55, %v1514_v5  ;;  %v1354_v30 = vsel %vm1340_vm15, %v1337_v38, %v1251_v9  ;;  %v5900_v15 = vpop.f32.mrf.mxu0  ;;  %v2002_v5 = vld [vmem:[%s6804_s7 + $0x78] sm:$0xff] }
 0x340   :  { %4102 = vmatmul.msk.f32.gmra.mxu1 %vm1405_vm13, %v1354_v30  ;;  %2003 = vmatpush.msrb.mxu3 %v2002_v5 }
 0x341   :  { %v1516_v32 = vrot.slane %v1515_v43, 1 }
 0x343   :  { %v1517_v22 = vmax.f32 %v1515_v43, %v1516_v32 }
 0x344   :  { %v963_v49 = vpop.xlane.xlu2 %962  ;;  %v1157_v45 = vpop.xlane.xlu1 %1156 }
 0x345   :  { %v1060_v3 = vpop.xlane.xlu0 %1059  ;;  %4121 = vmatmul.msk.f32.gmra.mxu2 %vm1405_vm13, %v1517_v22  ;;  %v5910_v9 = vpop.f32.mrf.mxu3 }
 0x346   :  { %v1321_v14 = vsel %vm1306_vm9, %v963_v49, %v1060_v3 }
 0x347   :  { %v1338_v55 = vsel %vm1323_vm11, %v1321_v14, %v1157_v45  ;;  %v5913_v32 = vpop.f32.mrf.mxu0  ;;  %v5917_v45 = vpop.f32.mrf.mxu2 }
 0x348   :  { %v1588_v14 = vpop.f32.mrf.mxu1 }
 0x34c   :  { %v1254_v8 = vpop.xlane.xlu2 %1253  ;;  %v1063_v38 = vpop.xlane.xlu1 %1062 }
 0x34d   :  { %v1355_v28 = vsel %vm1340_vm15, %v1338_v55, %v1254_v8  ;;  %v966_v34 = vpop.xlane.xlu0 %965  ;;  %v5920_v8 = vpop.f32.mrf.mxu3 }
 0x34e   :  { %4103 = vmatmul.msk.f32.gmra.mxu1 %vm1405_vm13, %v1355_v28  ;;  %v1322_v43 = vsel %vm1306_vm9, %v966_v34, %v1063_v38  ;;  %v2001_v38 = vld [vmem:[%s6804_s7 + $0x70] sm:$0xff] }
 0x34f   :  { %v5924_v28 = vpop.f32.mrf.mxu0  ;;  %v5926_v34 = vpop.f32.mrf.mxu2  ;;  %2004 = vmatpush.msrb.mxu3 %v2001_v38 }
 0x350   :  { %v1591_v5 = vpop.f32.mrf.mxu1 }
 0x354   :  { %v1160_v30 = vpop.xlane.xlu2 %1159 }
 0x355   :  { %v1339_v22 = vsel %vm1323_vm11, %v1322_v43, %v1160_v30  ;;  %v1257_v49 = vpop.xlane.xlu0 %1256  ;;  %v2000_v43 = vld [vmem:[%s6804_s7 + $0x68] sm:$0xff]  ;;  %v1999_v30 = vld [vmem:[%s6804_s7 + $0x60] sm:$0xff] }
 0x356   :  { %v1356_v3 = vsel %vm1340_vm15, %v1339_v22, %v1257_v49  ;;  %v5937_v22 = vpop.f32.mrf.mxu3  ;;  %2005 = vmatpush.msrb.mxu3 %v2000_v43 }
 0x357   :  { %4104 = vmatmul.msk.f32.gmra.mxu1 %vm1405_vm13, %v1356_v3  ;;  %v5941_v3 = vpop.f32.mrf.mxu2  ;;  %v5943_v53 = vpop.f32.mrf.mxu0 }
 0x358   :  { %2006 = vmatpush.msrb.mxu3 %v1999_v30  ;;  %v1594_v18 = vpop.f32.mrf.mxu1  ;;  %v1998_v30 = vld [vmem:[%s6804_s7 + $0x58] sm:$0xff] }
 0x35a   :  { %2007 = vmatpush.msrb.mxu3 %v1998_v30 }
 0x35c   :  { %v5922_v55 = vpop.permute.xlu2 %2093 }
 0x35d   :  { %6905 = vst [vmem:[#allocation28_spill] sm:$0xff] %v5922_v55 }
 0x35e   :  { %v5947_v55 = vpop.f32.mrf.mxu3 }
 0x35f   :  { %v5949_v38 = vpop.f32.mrf.mxu2  ;;  %v5951_v11 = vpop.f32.mrf.mxu0 }
 0x360   :  { %v5953_v17 = vpop.f32.mrf.mxu1 }
 0x361   :  { %6908 = vst [vmem:[#allocation31_spill] sm:$0xff] %v5953_v17  ;;  %v1749_v17 = vsub.f32 %v5260_v41, %v5868_v13 }
 0x364   :  { %v5939_v49 = vpop.permute.xlu2 %2141 }
 0x365   :  { %6906 = vst [vmem:[#allocation29_spill] sm:$0xff] %v5939_v49 }
 0x366   :  { %v5959_v43 = vpop.f32.mrf.mxu3 }
 0x367   :  { %v5957_v49 = vpop.f32.mrf.mxu2  ;;  %v5971_v23 = vpop.f32.mrf.mxu0 }
 0x368   :  { %v5967_v60 = vpop.f32.mrf.mxu1 }
 0x369   :  { %6910 = vst [vmem:[#allocation33_spill] sm:$0xff] %v5967_v60 }
 0x36c   :  { %v5945_v47 = vpop.permute.xlu2 %2213 }
 0x36d   :  { %6907 = vst [vmem:[#allocation30_spill] sm:$0xff] %v5945_v47  ;;  %v1997_v47 = vld [vmem:[%s6804_s7 + $0x50] sm:$0xff] }
 0x36e   :  { %2008 = vmatpush.msrb.mxu3 %v1997_v47  ;;  %v5975_v46 = vpop.f32.mrf.mxu3 }
 0x36f   :  { %v5982_v30 = vpop.f32.mrf.mxu0 }
 0x370   :  { %v5977_v33 = vpop.f32.mrf.mxu1  ;;  %2009 = vmatpush.msrb.mxu3 %v1996_v4  ;;  %v1993_v4 = vld [vmem:[%s6804_s7 + $0x30] sm:$0xff] }
 0x371   :  { %6912 = vst [vmem:[#allocation35_spill] sm:$0xff] %v5977_v33  ;;  %v1994_v33 = vld [vmem:[%s6804_s7 + $0x38] sm:$0xff] }
 0x372   :  { %2010 = vmatpush.msrb.mxu3 %v1995_v61  ;;  %v1845_v61 = vsub.f32 %v5247_v29, %v5862_v44  ;;  %v1847_v29 = vsub.f32 %v5308_v51, %v5883_v40 }
 0x374   :  { %v5955_v59 = vpop.permute.xlu2 %2285  ;;  %2011 = vmatpush.msrb.mxu3 %v1994_v33  ;;  %v1750_v33 = vsub.f32 %v5292_v24, %v5878_v26 }
 0x375   :  { %6909 = vst [vmem:[#allocation32_spill] sm:$0xff] %v5955_v59  ;;  %v5973_v59 = vpop.f32.mrf.mxu2 }
 0x376   :  { %v5988_v60 = vpop.f32.mrf.mxu3  ;;  %2012 = vmatpush.msrb.mxu3 %v1993_v4  ;;  %v1846_v4 = vsub.f32 %v5276_v56, %v5872_v48  ;;  %v1766_v41 = vsub.f32 %v1750_v33, %v1591_v5  ;;  %v1863_v56 = vsub.f32 %v1847_v29, %v5926_v34  ;;  %v1848_v48 = vsub.f32 %v5366_v27, %v5894_v10  ;;  %v1992_v34 = vld [vmem:[%s6804_s7 + $0x28] sm:$0xff]  ;;  %v6921_v33 = vld [vmem:[#allocation18_spill] sm:$0xff] }
 0x377   :  { %v1752_v27 = vsub.f32 %v5382_v36, %v5897_v19  ;;  %v1850_v10 = vsub.f32 %v5430_v2, %v5913_v32  ;;  %v1754_v5 = vsub.f32 %v5462_v35, %v5920_v8  ;;  %v1852_v32 = vsub.f32 %v5525_v20, %v5943_v53 }
 0x378   :  { %v1862_v44 = vsub.f32 %v1846_v4, %v5917_v45  ;;  %v1864_v45 = vsub.f32 %v1848_v48, %v5941_v3  ;;  %v1851_v3 = vsub.f32 %v5481_v7, %v5924_v28  ;;  %2013 = vmatpush.msrb.mxu3 %v1992_v34  ;;  %v1756_v35 = vsub.f32 %v5544_v62, %v5947_v55  ;;  %v6926_v48 = vld [vmem:[#allocation21_spill] sm:$0xff]  ;;  %v1989_v55 = vld [vmem:[%s6804_s7 + $0x10] sm:$0xff] }
 0x379   :  { %v1866_v19 = vsub.f32 %v1850_v10, %v5957_v49  ;;  %v1853_v7 = vsub.f32 %v5547_v31, %v5951_v11  ;;  %v1757_v8 = vsub.f32 %v5567_v54, %v5959_v43  ;;  %v1758_v49 = vsub.f32 %v5604_v58, %v5975_v46 }
 0x37a   :  { %v1883_v36 = vmul.f32 1.442695, %v1864_v45  ;;  %v1855_v53 = vsub.f32 %v5618_v42, %v5982_v30  ;;  %v1867_v20 = vsub.f32 %v1851_v3, %v5973_v59  ;;  %v1759_v31 = vsub.f32 %v5637_v12, %v5988_v60  ;;  %v6924_v59 = vld [vmem:[#allocation19_spill] sm:$0xff] }
 0x37c   :  { %v5969_v37 = vpop.permute.xlu2 %2357 }
 0x37d   :  { %6911 = vst [vmem:[#allocation34_spill] sm:$0xff] %v5969_v37  ;;  %v5984_v47 = vpop.f32.mrf.mxu2  ;;  %v5986_v37 = vpop.f32.mrf.mxu1 }
 0x37e   :  { %6913 = vst [vmem:[#allocation36_spill] sm:$0xff] %v5984_v47  ;;  %v6005_v0 = vpop.f32.mrf.mxu3 }
 0x37f   :  { %6914 = vst [vmem:[#allocation37_spill] sm:$0xff] %v5986_v37 }
 0x384   :  { %v2382_v50 = vpop.permute.xlu2 %2381 }
 0x385   :  { %2399 = vmatpush.msra.mxu0 %v2382_v50  ;;  %v5996_v52 = vpop.f32.mrf.mxu2  ;;  %v6001_v50 = vpop.f32.mrf.mxu0 }
 0x386   :  { %6915 = vst [vmem:[#allocation38_spill] sm:$0xff] %v5996_v52  ;;  %v6003_v37 = vpop.f32.mrf.mxu1 }
 0x387   :  { %6916 = vst [vmem:[#allocation39_spill] sm:$0xff] %v6001_v50  ;;  %v1765_v50 = vsub.f32 %v1749_v17, %v1588_v14 }
 0x388   :  { %6917 = vst [vmem:[#allocation40_spill] sm:$0xff] %v6003_v37  ;;  %v1861_v37 = vsub.f32 %v1845_v61, %v5908_v1  ;;  %v1783_v1 = vmul.f32 1.442695, %v1766_v41  ;;  %v6922_v41 = vld [vmem:[#allocation31_spill] sm:$0xff] }
 0x389   :  { %v1781_v24 = vmul.f32 1.442695, %v1765_v50  ;;  %v1768_v29 = vsub.f32 %v1752_v27, %v6922_v41  ;;  %v1889_v27 = vmul.f32 1.442695, %v1867_v20 }
 0x38a   :  { %v1877_v17 = vmul.f32 1.442695, %v1861_v37 }
 0x38b   :  { %4340 = vpow2.f32 %v1781_v24  ;;  %v6923_v24 = vld [vmem:[#allocation36_spill] sm:$0xff] }
 0x38c   :  { %4342 = vpow2.f32 %v1877_v17  ;;  %v1868_v42 = vsub.f32 %v1852_v32, %v6923_v24  ;;  %v6925_v17 = vld [vmem:[#allocation20_spill] sm:$0xff]  ;;  %v1787_v32 = vmul.f32 1.442695, %v1768_v29  ;;  %v6933_v29 = vld [vmem:[#allocation35_spill] sm:$0xff] }
 0x38d   :  { %v6007_v47 = vpop.f32.mrf.mxu2  ;;  %v6013_v52 = vpop.f32.mrf.mxu0  ;;  %4344 = vpow2.f32 %v1783_v1  ;;  %v6928_v10 = vld [vmem:[#allocation38_spill] sm:$0xff] }
 0x38e   :  { %6918 = vst [vmem:[#allocation41_spill] sm:$0xff] %v6007_v47  ;;  %v6015_v39 = vpop.f32.mrf.mxu1  ;;  %v1751_v47 = vsub.f32 %v5337_v6, %v5887_v21  ;;  %v1849_v6 = vsub.f32 %v5398_v25, %v5900_v15  ;;  %v1879_v21 = vmul.f32 1.442695, %v1862_v44  ;;  %v1753_v25 = vsub.f32 %v5427_v57, %v5910_v9  ;;  %v6920_v61 = vld [vmem:[#allocation39_spill] sm:$0xff] }
 0x38f   :  { %6919 = vst [vmem:[#allocation42_spill] sm:$0xff] %v6015_v39  ;;  %v6029_v39 = vpop.f32.mrf.mxu3  ;;  %v1755_v57 = vsub.f32 %v5511_v16, %v5937_v22  ;;  %v1856_v4 = vsub.f32 %v6921_v33, %v6920_v61  ;;  %v1887_v44 = vmul.f32 1.442695, %v1866_v19  ;;  %v1869_v34 = vsub.f32 %v1853_v7, %v6928_v10  ;;  %v6930_v19 = vld [vmem:[#allocation25_spill] sm:$0xff]  ;;  %v6932_v33 = vld [vmem:[#allocation23_spill] sm:$0xff] }
 0x390   :  { %v1767_v26 = vsub.f32 %v1751_v47, %v1594_v18  ;;  %v1881_v18 = vmul.f32 1.442695, %v1863_v56  ;;  %v1865_v37 = vsub.f32 %v1849_v6, %v5949_v38  ;;  %4346 = vpow2.f32 %v1879_v21  ;;  %v6927_v6 = vld [vmem:[#allocation33_spill] sm:$0xff] }
 0x391   :  { %v4341_v9 = vpop.eup %4340  ;;  %v1854_v47 = vsub.f32 %v5584_v63, %v5971_v23  ;;  %v1857_v56 = vsub.f32 %v6925_v17, %v6013_v52  ;;  %v1761_v1 = vsub.f32 %v6926_v48, %v6029_v39  ;;  %v1769_v21 = vsub.f32 %v1753_v25, %v6927_v6  ;;  %v1991_v25 = vld [vmem:[%s6804_s7 + $0x20] sm:$0xff]  ;;  %v6938_v48 = vld [vmem:[#allocation24_spill] sm:$0xff] }
 0x392   :  { %v1785_v40 = vmul.f32 1.442695, %v1767_v26  ;;  %v1885_v2 = vmul.f32 1.442695, %v1865_v37  ;;  %v4343_v38 = vpop.eup %4342  ;;  %v1813_v23 = vadd.f32 0.0001, %v4341_v9  ;;  %v1760_v26 = vsub.f32 %v6924_v59, %v6005_v0  ;;  %2014 = vmatpush.msrb.mxu3 %v1991_v25 }
 0x393   :  { %v4345_v11 = vpop.eup %4344  ;;  %v1789_v17 = vmul.f32 1.442695, %v1769_v21  ;;  %v1770_v10 = vsub.f32 %v1754_v5, %v6933_v29 }
 0x394   :  { %4348 = vpow2.f32 %v1785_v40  ;;  %v1814_v37 = vadd.f32 0.0001, %v4345_v11  ;;  %v1829_v61 = vmul.f32 0.17677669, %v1813_v23 }
 0x395   :  { %v6027_v13 = vpop.f32.mrf.mxu2  ;;  %v6039_v14 = vpop.f32.mrf.mxu0  ;;  %4350 = vpow2.f32 %v1881_v18  ;;  %v1909_v18 = vadd.f32 0.0001, %v4343_v38  ;;  %v1891_v38 = vmul.f32 1.442695, %v1868_v42  ;;  %v6931_v11 = vld [vmem:[#allocation41_spill] sm:$0xff] }
 0x396   :  { %v6036_v51 = vpop.f32.mrf.mxu1  ;;  %4352 = vpow2.f32 %v1883_v36  ;;  %v4347_v63 = vpop.eup %4346  ;;  %v6929_v36 = vld [vmem:[#allocation22_spill] sm:$0xff]  ;;  %v1870_v20 = vsub.f32 %v1854_v47, %v6931_v11  ;;  %v6934_v42 = vld [vmem:[#allocation37_spill] sm:$0xff] }
 0x397   :  { %v6068_v28 = vpop.f32.mrf.mxu3  ;;  %4354 = vpow2.f32 %v1885_v2  ;;  %v1858_v2 = vsub.f32 %v6929_v36, %v6039_v14  ;;  %v1910_v9 = vadd.f32 0.0001, %v4347_v63  ;;  %v1925_v63 = vmul.f32 0.17677669, %v1909_v18  ;;  %v6935_v11 = vld [vmem:[#allocation26_spill] sm:$0xff] }
 0x398   :  { %4356 = vpow2.f32 %v1887_v44  ;;  %v1893_v36 = vmul.f32 1.442695, %v1869_v34  ;;  %v1830_v44 = vmul.f32 0.17677669, %v1814_v37  ;;  %v1895_v21 = vmul.f32 1.442695, %v1870_v20 }
 0x399   :  { %4358 = vpow2.f32 %v1889_v27  ;;  %v1926_v47 = vmul.f32 0.17677669, %v1910_v9  ;;  %v1871_v18 = vsub.f32 %v1855_v53, %v6027_v13  ;;  %v1791_v9 = vmul.f32 1.442695, %v1770_v10 }
 0x39a   :  { %v4349_v30 = vpop.eup %4348  ;;  %4360 = vpow2.f32 %v1787_v32  ;;  %v1941_v16 = vadd.f32 %v1830_v44, %v1829_v61  ;;  %v6937_v44 = vld [vmem:[#allocation42_spill] sm:$0xff] }
 0x39b   :  { %v4351_v40 = vpop.eup %4350  ;;  %v1815_v14 = vadd.f32 0.0001, %v4349_v30  ;;  %v1771_v30 = vsub.f32 %v1755_v57, %v6934_v42  ;;  %4362 = vpow2.f32 %v1891_v38  ;;  %v1964_v22 = vadd.f32 %v1926_v47, %v1925_v63  ;;  %v6936_v38 = vld [vmem:[#allocation40_spill] sm:$0xff] }
 0x39c   :  { %v4353_v7 = vpop.eup %4352  ;;  %v1911_v24 = vadd.f32 0.0001, %v4351_v40  ;;  %4364 = vpow2.f32 %v1789_v17  ;;  %v1772_v13 = vsub.f32 %v1756_v35, %v6936_v38  ;;  %v1773_v47 = vsub.f32 %v1757_v8, %v6937_v44 }
 0x39d   :  { %v6048_v15 = vpop.f32.mrf.mxu2  ;;  %v6092_v45 = vpop.f32.mrf.mxu0  ;;  %v1912_v40 = vadd.f32 0.0001, %v4353_v7  ;;  %v1831_v5 = vmul.f32 0.17677669, %v1815_v14  ;;  %4366 = vpow2.f32 %v1893_v36  ;;  %v1793_v57 = vmul.f32 1.442695, %v1771_v30 }
 0x39e   :  { %v6077_v50 = vpop.f32.mrf.mxu1  ;;  %v1859_v41 = vsub.f32 %v6932_v33, %v6092_v45  ;;  %v4355_v6 = vpop.eup %4354  ;;  %v1927_v27 = vmul.f32 0.17677669, %v1911_v24  ;;  %v1872_v32 = vsub.f32 %v1856_v4, %v6048_v15  ;;  %4368 = vpow2.f32 %v1895_v21  ;;  %v1990_v15 = vld [vmem:[%s6804_s7 + $0x18] sm:$0xff] }
 0x39f   :  { %v6108_v23 = vpop.f32.mrf.mxu3  ;;  %v1913_v34 = vadd.f32 0.0001, %v4355_v6  ;;  %v4357_v25 = vpop.eup %4356  ;;  %v1928_v20 = vmul.f32 0.17677669, %v1912_v40  ;;  %v1897_v7 = vmul.f32 1.442695, %v1871_v18  ;;  %v1942_v17 = vadd.f32 %v1941_v16, %v1831_v5  ;;  %2015 = vmatpush.msrb.mxu3 %v1990_v15 }
 0x3a0   :  { %v1763_v37 = vsub.f32 %v6935_v11, %v6108_v23  ;;  %v4359_v53 = vpop.eup %4358  ;;  %v1965_v6 = vadd.f32 %v1964_v22, %v1927_v27  ;;  %v1914_v36 = vadd.f32 0.0001, %v4357_v25  ;;  %4370 = vpow2.f32 %v1791_v9  ;;  %v1987_v15 = vld [vmem:[%s6804_s7] sm:$0xff] }
 0x3a1   :  { %v4361_v24 = vpop.eup %4360  ;;  %v1929_v10 = vmul.f32 0.17677669, %v1913_v34  ;;  %v1899_v61 = vmul.f32 1.442695, %v1872_v32  ;;  %4372 = vpow2.f32 %v1793_v57  ;;  %2016 = vmatpush.msrb.mxu3 %v1989_v55  ;;  %v1774_v5 = vsub.f32 %v1758_v49, %v6036_v51 }
 0x3a2   :  { %v4363_v4 = vpop.eup %4362  ;;  %v1816_v30 = vadd.f32 0.0001, %v4361_v24  ;;  %v1966_v40 = vadd.f32 %v1965_v6, %v1928_v20  ;;  %4374 = vpow2.f32 %v1897_v7  ;;  %v4427_v27 = vmov 16.0  }
 0x3a3   :  { %v4365_v35 = vpop.eup %4364  ;;  %v1916_v18 = vadd.f32 0.0001, %v4363_v4  ;;  %4376 = vrcp.f32 %v4427_v27  ;;  %v1797_v8 = vmul.f32 1.442695, %v1773_v47  ;;  %v1775_v58 = vsub.f32 %v1759_v31, %v6077_v50 }
 0x3a4   :  { %v4367_v42 = vpop.eup %4366  ;;  %v1817_v25 = vadd.f32 0.0001, %v4365_v35  ;;  %v1967_v9 = vadd.f32 %v1966_v40, %v1929_v10  ;;  %4378 = vpow2.f32 %v1899_v61  ;;  %v1832_v22 = vmul.f32 0.17677669, %v1816_v30 }
 0x3a5   :  { %v1737_v3 = vpop.f32.mrf.mxu2  ;;  %v4369_v34 = vpop.eup %4368  ;;  %v1917_v32 = vadd.f32 0.0001, %v4367_v42  ;;  %v1932_v57 = vmul.f32 0.17677669, %v1916_v18  ;;  %v1799_v38 = vmul.f32 1.442695, %v1774_v5  ;;  %v6939_v4 = vsub.f32 %v6930_v19, %v6068_v28 }
 0x3a6   :  { %v6106_v52 = vpop.f32.mrf.mxu1  ;;  %v1873_v14 = vsub.f32 %v1857_v56, %v1737_v3  ;;  %v1915_v56 = vadd.f32 0.0001, %v4359_v53  ;;  %v1795_v3 = vmul.f32 1.442695, %v1772_v13  ;;  %v4371_v16 = vpop.eup %4370  ;;  %v1918_v13 = vadd.f32 0.0001, %v4369_v34 }
 0x3a7   :  { %v4373_v51 = vpop.eup %4372  ;;  %v1833_v20 = vmul.f32 0.17677669, %v1817_v25  ;;  %v1776_v7 = vsub.f32 %v1760_v26, %v6106_v52  ;;  %v916_v31 = vpop.f32.mrf.mxu0  ;;  %v1933_v33 = vmul.f32 0.17677669, %v1917_v32  ;;  %v1943_v24 = vadd.f32 %v1942_v17, %v1832_v22 }
 0x3a8   :  { %v1901_v21 = vmul.f32 1.442695, %v1873_v14  ;;  %v1931_v43 = vmul.f32 0.17677669, %v1915_v56  ;;  %4380 = vpow2.f32 %v1795_v3  ;;  %v4375_v53 = vpop.eup %4374  ;;  %v1818_v6 = vadd.f32 0.0001, %v4371_v16 }
 0x3a9   :  { %v6147_v50 = vpop.eup %4376  ;;  %v1801_v10 = vmul.f32 1.442695, %v1775_v58  ;;  %v1934_v26 = vmul.f32 0.17677669, %v1918_v13  ;;  %v1919_v52 = vadd.f32 0.0001, %v4375_v53  ;;  %v851_v53 = vpop.f32.mrf.mxu3 }
 0x3aa   :  { %4382 = vpow2.f32 %v1901_v21  ;;  %v4379_v14 = vpop.eup %4378  ;;  %v1803_v17 = vmul.f32 1.442695, %v1776_v7  ;;  %v1834_v47 = vmul.f32 0.17677669, %v1818_v6  ;;  %v1819_v42 = vadd.f32 0.0001, %v4373_v51 }
 0x3ab   :  { %v1920_v35 = vadd.f32 0.0001, %v4379_v14  ;;  %v1935_v18 = vmul.f32 0.17677669, %v1919_v52  ;;  %vm1961_vm12 = vweird.f32 %v6147_v50 }
 0x3ae   :  { %v1624_v63 = vpop.f32.mrf.mxu1  ;;  %v4381_v0 = vpop.eup %4380 }
 0x3af   :  { %v1820_v21 = vadd.f32 0.0001, %v4381_v0 }
 0x3b0   :  { %v4383_v39 = vpop.eup %4382 }
 0x3b1   :  { %v1921_v28 = vadd.f32 0.0001, %v4383_v39 }
 0x3b3   :  { %v1937_v58 = vmul.f32 0.17677669, %v1921_v28 }
 0x3b7   :  { %v1740_v29 = vpop.f32.mrf.mxu2 }
 0x3b8   :  { %v1874_v62 = vsub.f32 %v1858_v2, %v1740_v29  ;;  %v1930_v2 = vmul.f32 0.17677669, %v1914_v36  ;;  %v1988_v36 = vld [vmem:[%s6804_s7 + $0x8] sm:$0xff]  ;;  %s4428_s7 = smov 96  }
 0x3b9   :  { %2017 = vmatpush.msrb.mxu3 %v1988_v36 }
 0x3ba   :  { %v1903_v54 = vmul.f32 1.442695, %v1874_v62  ;;  %v1968_v49 = vadd.f32 %v1967_v9, %v1930_v2  ;;  %v1944_v62 = vadd.f32 %v1943_v24, %v1833_v20 }
 0x3bb   :  { %2018 = vmatpush.msrb.mxu3 %v1987_v15 }
 0x3bc   :  { %4384 = vpow2.f32 %v1903_v54  ;;  %v1969_v45 = vadd.f32 %v1968_v49, %v1931_v43  ;;  %v1936_v54 = vmul.f32 0.17677669, %v1920_v35  ;;  %v1945_v32 = vadd.f32 %v1944_v62, %v1834_v47 }
 0x3bd   :  { %v1627_v60 = vpop.f32.mrf.mxu1  ;;  %4386 = vpow2.f32 %v1797_v8 }
 0x3be   :  { %v1970_v59 = vadd.f32 %v1969_v45, %v1932_v57  ;;  %v1778_v61 = vsub.f32 %v6939_v4, %v1627_v60  ;;  %v1836_v57 = vmul.f32 0.17677669, %v1820_v21 }
 0x3c0   :  { %v1743_v29 = vpop.f32.mrf.mxu2  ;;  %v1971_v55 = vadd.f32 %v1970_v59, %v1933_v33  ;;  %v1807_v5 = vmul.f32 1.442695, %v1778_v61 }
 0x3c1   :  { %v1875_v46 = vsub.f32 %v1859_v41, %v1743_v29  ;;  %v1777_v41 = vsub.f32 %v1761_v1, %v1624_v63  ;;  %v1860_v1 = vsub.f32 %v6938_v48, %v916_v31  ;;  %v1957_v63 = vmul.f32 16.0, %v6147_v50 }
 0x3c2   :  { %v4385_v44 = vpop.eup %4384  ;;  %v1972_v2 = vadd.f32 %v1971_v55, %v1934_v26  ;;  %v1835_v29 = vmul.f32 0.17677669, %v1819_v42 }
 0x3c3   :  { %v1905_v12 = vmul.f32 1.442695, %v1875_v46  ;;  %v1805_v56 = vmul.f32 1.442695, %v1777_v41  ;;  %v4387_v40 = vpop.eup %4386  ;;  %v1958_v34 = vsub.f32 1.0, %v1957_v63  ;;  %v6940_v41 = vld [vmem:[#allocation27_spill] sm:$0xff] }
 0x3c4   :  { %v1922_v43 = vadd.f32 0.0001, %v4385_v44  ;;  %v1821_v16 = vadd.f32 0.0001, %v4387_v40  ;;  %v1973_v22 = vadd.f32 %v1972_v2, %v1935_v18  ;;  %v1946_v23 = vadd.f32 %v1945_v32, %v1835_v29 }
 0x3c5   :  { %4388 = vpow2.f32 %v1905_v12  ;;  %v1959_v13 = vmul.f32 %v6147_v50, %v1958_v34  ;;  %v1764_v14 = vsub.f32 %v6940_v41, %v851_v53  ;;  %v6948_v53 = vld [vmem:[#allocation3_spill] sm:$0xff] }
 0x3c6   :  { %4390 = vpow2.f32 %v1799_v38  ;;  %v1974_v20 = vadd.f32 %v1973_v22, %v1936_v54  ;;  %v1938_v7 = vmul.f32 0.17677669, %v1922_v43  ;;  %v1837_v11 = vmul.f32 0.17677669, %v1821_v16 }
 0x3c7   :  { %4392 = vpow2.f32 %v1801_v10  ;;  %v1947_v24 = vadd.f32 %v1946_v23, %v1836_v57  ;;  %v1960_v10 = vadd.f32 %v6147_v50, %v1959_v13  ;;  %v6945_v57 = vld [vmem:[#allocation28_spill] sm:$0xff]  ;;  %v6947_v13 = vld [vmem:[#allocation11_spill] sm:$0xff]  ;;  %v6952_v23 = vld [vmem:[#allocation13_spill] sm:$0xff] }
 0x3c8   :  { %v1746_v3 = vpop.f32.mrf.mxu2  ;;  %4394 = vpow2.f32 %v1803_v17  ;;  %v1975_v31 = vadd.f32 %v1974_v20, %v1937_v58  ;;  %v2066_v58 = vpop.permute.xlu1 %2065  ;;  %v6949_v20 = vld [vmem:[#allocation17_spill] sm:$0xff] }
 0x3c9   :  { %v1876_v30 = vsub.f32 %v1860_v1, %v1746_v3  ;;  %4396 = vpow2.f32 %v1805_v56  ;;  %v1948_v15 = vadd.f32 %v1947_v24, %v1837_v11  ;;  %v1962_v63 = vsel %vm1961_vm12, %v6147_v50, %v1960_v10  ;;  %v6956_v24 = vld [vmem:[#allocation8_spill] sm:$0xff] }
 0x3ca   :  { %v1976_v59 = vadd.f32 %v1975_v31, %v1938_v7  ;;  %v6950_v7 = vld [vmem:[#allocation15_spill] sm:$0xff]  ;;  %v6955_v31 = vld [vmem:[#allocation5_spill] sm:$0xff] }
 0x3cb   :  { %v4389_v19 = vpop.eup %4388  ;;  %v1907_v27 = vmul.f32 1.442695, %v1876_v30  ;;  %v1630_v25 = vpop.f32.mrf.mxu1 }
 0x3cc   :  { %v4391_v9 = vpop.eup %4390  ;;  %v1779_v8 = vsub.f32 %v1763_v37, %v1630_v25  ;;  %v1923_v46 = vadd.f32 0.0001, %v4389_v19 }
 0x3cd   :  { %4398 = vpow2.f32 %v1907_v27  ;;  %v4393_v49 = vpop.eup %4392  ;;  %v1822_v38 = vadd.f32 0.0001, %v4391_v9 }
 0x3ce   :  { %v1809_v51 = vmul.f32 1.442695, %v1779_v8  ;;  %4400 = vpow2.f32 %v1807_v5  ;;  %v4395_v60 = vpop.eup %4394  ;;  %v1823_v12 = vadd.f32 0.0001, %v4393_v49  ;;  %v1939_v45 = vmul.f32 0.17677669, %v1923_v46 }
 0x3cf   :  { %v4397_v37 = vpop.eup %4396  ;;  %v1838_v6 = vmul.f32 0.17677669, %v1822_v38  ;;  %v1824_v0 = vadd.f32 0.0001, %v4395_v60  ;;  %v6941_v8 = vld [vmem:[#allocation2_spill] sm:$0xff]  ;;  %v6946_v38 = vld [vmem:[#allocation16_spill] sm:$0xff] }
 0x3d0   :  { %4402 = vpow2.f32 %v1809_v51  ;;  %v1839_v48 = vmul.f32 0.17677669, %v1823_v12  ;;  %v1825_v1 = vadd.f32 0.0001, %v4397_v37  ;;  %v1977_v17 = vadd.f32 %v1976_v59, %v1939_v45  ;;  %v6942_v46 = vld [vmem:[#allocation14_spill] sm:$0xff]  ;;  %v6943_v51 = vld [vmem:[#allocation7_spill] sm:$0xff] }
 0x3d1   :  { %v1949_v55 = vadd.f32 %v1948_v15, %v1838_v6  ;;  %v1840_v35 = vmul.f32 0.17677669, %v1824_v0  ;;  %v6944_v49 = vld [vmem:[#allocation6_spill] sm:$0xff]  ;;  %v6951_v60 = vld [vmem:[#allocation12_spill] sm:$0xff]  ;;  %v4224_v41 = vpack.i.bf16 %v6949_v20, %v6946_v38  ;;  %v6957_v6 = vld [vmem:[#allocation9_spill] sm:$0xff]  ;;  %v2118_v15 = vpop.permute.xlu0 %2117 }
 0x3d2   :  { %v1841_v47 = vmul.f32 0.17677669, %v1825_v1  ;;  %v4219_v11 = vpack.i.bf16 %v6952_v23, %v6951_v60  ;;  %v6953_v37 = vld [vmem:[#allocation10_spill] sm:$0xff]  ;;  %v6954_v12 = vld [vmem:[#allocation4_spill] sm:$0xff]  ;;  %v4214_v10 = vpack.i.bf16 %v6957_v6, %v6956_v24 }
 0x3d3   :  { %v4399_v33 = vpop.eup %4398  ;;  %v1950_v44 = vadd.f32 %v1949_v55, %v1839_v48  ;;  %v4209_v45 = vpack.i.bf16 %v6955_v31, %v6954_v12  ;;  %v4229_v0 = vpack.i.bf16 %v6954_v12, %v6948_v53  ;;  %v4279_v59 = vpack.i.bf16 %v6947_v13, %v6953_v37  ;;  %v6236_v48 = vpop.permute.xlu2 %2688  ;;  %v6960_v12 = vld [vmem:[#allocation32_spill] sm:$0xff] }
 0x3d4   :  { %v1924_v26 = vadd.f32 0.0001, %v4399_v33  ;;  %v1633_v52 = vpop.f32.mrf.mxu1  ;;  %v4401_v36 = vpop.eup %4400  ;;  %v4234_v33 = vpack.i.bf16 %v6943_v51, %v6955_v31  ;;  %v6961_v31 = vld [vmem:[#allocation34_spill] sm:$0xff] }
 0x3d5   :  { %v1780_v39 = vsub.f32 %v1764_v14, %v1633_v52  ;;  %v1826_v56 = vadd.f32 0.0001, %v4401_v36  ;;  %v1951_v40 = vadd.f32 %v1950_v44, %v1840_v35  ;;  %v4249_v14 = vpack.i.bf16 %v6950_v7, %v6952_v23  ;;  %v6230_v52 = vpop.permute.xlu1 %2165 }
 0x3d6   :  { %v1940_v4 = vmul.f32 0.17677669, %v1924_v26  ;;  %v4403_v61 = vpop.eup %4402  ;;  %v4244_v26 = vpack.i.bf16 %v6951_v60, %v6947_v13  ;;  %v4269_v36 = vpack.i.bf16 %v6943_v51, %v6944_v49 }
 0x3d7   :  { %v1811_v62 = vmul.f32 1.442695, %v1780_v39  ;;  %v1827_v30 = vadd.f32 0.0001, %v4403_v61  ;;  %v1842_v21 = vmul.f32 0.17677669, %v1826_v56  ;;  %v1952_v18 = vadd.f32 %v1951_v40, %v1841_v47 }
 0x3d8   :  { %v1978_v3 = vadd.f32 %v1977_v17, %v1940_v4  ;;  %v4259_v39 = vpack.i.bf16 %v6948_v53, %v6941_v8  ;;  %v4433_v40 = vmov 1  }
 0x3d9   :  { %4404 = vpow2.f32 %v1811_v62  ;;  %v1843_v28 = vmul.f32 0.17677669, %v1827_v30  ;;  %v1953_v5 = vadd.f32 %v1952_v18, %v1842_v21  ;;  %v6240_v17 = vpop.permute.xlu0 %2189  ;;  %v4432_v30 = vmov 2   ;;  %4300 = vset.pattern.permute.xlu0 %v4433_v40 }
 0x3da   :  { %v1979_v42 = vmul.f32 %v1978_v3, %v1962_v63  ;;  %4301 = vset.pattern.permute.xlu2 %v4432_v30  ;;  %v4434_v21 = vmov 0  }
 0x3db   :  { %v1954_v25 = vadd.f32 %v1953_v5, %v1843_v28  ;;  %4299 = vset.pattern.permute.xlu1 %v4434_v21 }
 0x3dc   :  { %2475 = vrot.lane.b32.xlu1 %v1979_v42, %s4428_s7  ;;  %4122 = vmatpush.xpose.msk.msra.mxu3 %vm47_vm0, %v1979_v42  ;;  %v1980_v2 = vrot.slane %v1979_v42, 4 }
 0x3dd   :  { %v6238_v1 = vpop.permute.xlu1 %2237 }
 0x3de   :  { %v1981_v50 = vadd.f32 %v1980_v2, %v1979_v42 }
 0x3df   :  { %v4405_v19 = vpop.eup %4404 }
 0x3e0   :  { %v1828_v27 = vadd.f32 0.0001, %v4405_v19  ;;  %v1982_v34 = vrot.slane %v1981_v50, 2 }
 0x3e1   :  { %v6248_v62 = vpop.permute.xlu0 %2261 }
 0x3e2   :  { %v1844_v9 = vmul.f32 0.17677669, %v1828_v27  ;;  %v1983_v54 = vadd.f32 %v1982_v34, %v1981_v50 }
 0x3e4   :  { %v1955_v43 = vadd.f32 %v1954_v25, %v1844_v9  ;;  %2501 = vrot.lane.b32.xlu1 %v6941_v8, %s4426_s27  ;;  %v1984_v32 = vrot.slane %v1983_v54, 1 }
 0x3e5   :  { %v6244_v61 = vpop.permute.xlu1 %2309 }
 0x3e6   :  { %v1963_v29 = vmul.f32 %v1962_v63, %v1955_v43  ;;  %v1985_v16 = vadd.f32 %v1984_v32, %v1983_v54  ;;  %v4289_v63 = vpack.i.bf16 %v6950_v7, %v6942_v46 }
 0x3e8   :  { %2892 = vrot.lane.b32.xlu2 %v1963_v29, %s4425_s6  ;;  %2473 = vrot.lane.b32.xlu0 %v1963_v29, %s4428_s7  ;;  %v1986_v22 = vmul.f32 %v1985_v16, %v1963_v29 }
 0x3e9   :  { %v6252_v56 = vpop.permute.xlu0 %2333 }
 0x3ea   :  { %2019 = vmatmul.f32.vlgmr.msrb.gmra.mxu3 %v1986_v22 }
 0x3eb   :  { %2087 = vmatpush.msrb.mxu3 %v2066_v58 }
 0x3ec   :  { %2780 = vrot.lane.b32.xlu1 %v6942_v46, %s4426_s27 }
 0x3f0   :  { %2619 = vrot.lane.b32.xlu2 %v6943_v51, %s4426_s27  ;;  %2596 = vrot.lane.b32.xlu0 %v6944_v49, %s4426_s27 }
 0x3f2   :  { %4123 = vmatmul.msk.f32.vlgmr.msra.gmra.mxu3 %vm47_vm0, %v1963_v29 }
 0x3f3   :  { %2111 = vmatpush.msra.mxu3 %v6945_v57 }
 0x3f4   :  { %2405 = vrot.lane.b32.xlu1 %v6946_v38, %s4425_s6  ;;  %v6958_v38 = vld [vmem:[#allocation29_spill] sm:$0xff] }
 0x3f8   :  { %2920 = vrot.lane.b32.xlu2 %v6941_v8, %s4429_s12  ;;  %2894 = vrot.lane.b32.xlu0 %v1979_v42, %s4425_s6 }
 0x3fc   :  { %2711 = vrot.lane.b32.xlu1 %v6947_v13, %s4426_s27 }
 0x400   :  { %3199 = vrot.lane.b32.xlu2 %v6942_v46, %s4429_s12  ;;  %2527 = vrot.lane.b32.xlu0 %v6948_v53, %s4426_s27 }
 0x404   :  { %3015 = vrot.lane.b32.xlu1 %v6944_v49, %s4429_s12 }
 0x408   :  { %2429 = vrot.lane.b32.xlu2 %v6949_v20, %s4425_s6  ;;  %2803 = vrot.lane.b32.xlu0 %v6950_v7, %s4426_s27  ;;  %s4431_s6 = smov 40   ;;  %v4435_v7 = vmov 3  }
 0x40c   :  { %3313 = vrot.lane.b32.xlu1 %v1979_v42, %s4430_s13 }
 0x410   :  { %4220 = vrot.lane.b32.xlu2 %v4219_v11, %s4426_s27  ;;  %3107 = vrot.lane.b32.xlu0 %v6953_v37, %s4429_s12  ;;  %v6959_v37 = vld [vmem:[#allocation30_spill] sm:$0xff] }
 0x414   :  { %4210 = vrot.lane.b32.xlu1 %v4209_v45, %s4426_s27 }
 0x418   :  { %4235 = vrot.lane.b32.xlu2 %v4234_v33, %s4429_s12  ;;  %3311 = vrot.lane.b32.xlu0 %v1963_v29, %s4430_s13 }
 0x41c   :  { %4225 = vrot.lane.b32.xlu1 %v4224_v41, %s4426_s27 }
 0x420   :  { %4250 = vrot.lane.b32.xlu2 %v4249_v14, %s4429_s12  ;;  %4215 = vrot.lane.b32.xlu0 %v4214_v10, %s4426_s27  ;;  %s4436_s27 = smov 8  }
 0x424   :  { %4240 = vrot.lane.b32.xlu1 %v4214_v10, %s4429_s12 }
 0x428   :  { %4265 = vrot.lane.b32.xlu2 %v4209_v45, %s4431_s6  ;;  %4230 = vrot.lane.b32.xlu0 %v4229_v0, %s4429_s12 }
 0x42c   :  { %4255 = vrot.lane.b32.xlu1 %v4224_v41, %s4429_s12 }
 0x430   :  { %4280 = vrot.lane.b32.xlu2 %v4279_v59, %s4431_s6  ;;  %4245 = vrot.lane.b32.xlu0 %v4244_v26, %s4429_s12 }
 0x434   :  { %4270 = vrot.lane.b32.xlu1 %v4269_v36, %s4431_s6 }
 0x438   :  { %4295 = vrot.lane.b32.xlu2 %v4224_v41, %s4431_s6  ;;  %4260 = vrot.lane.b32.xlu0 %v4259_v39, %s4431_s6 }
 0x43c   :  { %4285 = vrot.lane.b32.xlu1 %v4219_v11, %s4431_s6 }
 0x440   :  { %4275 = vrot.lane.b32.xlu0 %v4214_v10, %s4431_s6 }
 0x442   :  { %v6242_v4 = vpop.permute.xlu2 %2892 }
 0x448   :  { %4290 = vrot.lane.b32.xlu0 %v4289_v63, %s4431_s6 }
 0x44a   :  { %v2620_v55 = vpop.permute.xlu2 %2619 }
 0x44e   :  { %v6250_v35 = vpop.permute.xlu1 %2475 }
 0x452   :  { %v6254_v3 = vpop.permute.xlu2 %2920 }
 0x456   :  { %v2502_v44 = vpop.permute.xlu1 %2501 }
 0x457   :  { %2522 = vmatpush.msrb.mxu0 %v2502_v44 }
 0x45a   :  { %v6256_v47 = vpop.permute.xlu2 %3199  ;;  %v6258_v42 = vpop.permute.xlu0 %2473 }
 0x45e   :  { %v6260_v2 = vpop.permute.xlu1 %2780 }
 0x462   :  { %v2430_v18 = vpop.permute.xlu2 %2429  ;;  %v2597_v28 = vpop.permute.xlu0 %2596 }
 0x463   :  { %2447 = vmatpush.msra.mxu2 %v2430_v18 }
 0x466   :  { %v2406_v50 = vpop.permute.xlu1 %2405 }
 0x467   :  { %2423 = vmatpush.msra.mxu1 %v2406_v50 }
 0x46a   :  { %v6262_v19 = vpop.permute.xlu0 %2894 }
 0x46d   :  { %v2020_v5 = vpop.f32.mrf.mxu3 }
 0x46e   :  { %4406 = vrcp.f32 %v2020_v5  ;;  %v6264_v27 = vpop.permute.xlu1 %2711  ;;  %v2034_v32 = vand.u32 2147483648, %v2020_v5  ;;  %v2032_v16 = vand.u32 2147483647, %v2020_v5  ;;  %vm2028_vm2 = vweird.f32 %v2020_v5 }
 0x470   :  { %v2035_v46 = vor.u32 1.1754944e-38, %v2034_v32  ;;  %vm2033_vm10 = vcmp.eq.f32.partialorder %v2032_v16, 8.507059e+37 }
 0x472   :  { %v2528_v34 = vpop.permute.xlu0 %2527 }
 0x473   :  { %2545 = vmatpush.msrb.mxu1 %v2528_v34 }
 0x474   :  { %v4407_v25 = vpop.eup %4406 }
 0x475   :  { %v2024_v9 = vmul.f32 %v4407_v25, %v2020_v5  ;;  %v2061_v54 = vpop.f32.mrf.mxu3  ;;  %vm2029_vm1 = vweird.f32 %v4407_v25 }
 0x476   :  { %v6266_v43 = vpop.permute.xlu1 %3015  ;;  %4124 = vmatmul.msk.f32.vlgmr.msrb.gmra.mxu3 %vm2068_vm14, %v2061_v54  ;;  %4137 = vmatmul.msk.f32.vlgmr.msra.gmra.mxu0 %vm2068_vm14, %v2061_v54  ;;  %vm2030_vm3 = vmor %vm2028_vm2, %vm2029_vm1 }
 0x477   :  { %v2025_v8 = vsub.f32 1.0, %v2024_v9  ;;  %2135 = vmatpush.msrb.mxu3 %v2118_v15  ;;  %4138 = vmatmul.msk.f32.vlgmr.msra.gmra.mxu1 %vm2068_vm14, %v2061_v54 }
 0x478   :  { %4139 = vmatmul.msk.f32.vlgmr.msra.gmra.mxu2 %vm2068_vm14, %v2061_v54  ;;  %2614 = vmatpush.msra.mxu0 %v2597_v28 }
 0x479   :  { %2637 = vmatpush.msra.mxu1 %v2620_v55  ;;  %v2026_v29 = vmul.f32 %v4407_v25, %v2025_v8 }
 0x47a   :  { %v6272_v22 = vpop.permute.xlu0 %2803 }
 0x47b   :  { %v2027_v58 = vadd.f32 %v4407_v25, %v2026_v29 }
 0x47d   :  { %v2031_v51 = vsel %vm2030_vm3, %v4407_v25, %v2027_v58 }
 0x47e   :  { %v6274_v49 = vpop.permute.xlu1 %3313  ;;  %4125 = vmatmul.msk.f32.vlgmr.msra.gmra.mxu3 %vm2068_vm14, %v2061_v54  ;;  %v2036_v57 = vsel %vm2033_vm10, %v2035_v46, %v2031_v51 }
 0x47f   :  { %2159 = vmatpush.msra.mxu3 %v6958_v38  ;;  %3292 = vperm.xlu2 %4301, %v2036_v57  }
 0x480   :  { %2873 = vperm.xlu0 %4300, %v2036_v57   ;;  %2454 = vperm.xlu1 %4299, %v2036_v57  }
 0x482   :  { %v6278_v13 = vpop.permute.xlu0 %3107 }
 0x486   :  { %v4211_v53 = vpop.permute.xlu1 %4210  ;;  %4126 = vmatmul.msk.f32.vlgmr.msrb.gmra.mxu3 %vm2068_vm14, %v2061_v54 }
 0x487   :  { %v4212_v20 = vunpack.i.l.bf16 %v4211_v53  ;;  %2183 = vmatpush.msrb.mxu3 %v6230_v52  ;;  %v4213_v45 = vunpack.i.h.bf16 %v4211_v53 }
 0x488   :  { %4302 = vset.pattern.permute.xlu1 %v4435_v7  ;;  %4303 = vset.pattern.permute.xlu0 %v4435_v7 }
 0x489   :  { %3711 = vperm.xlu1 %4302, %v2036_v57   ;;  %2568 = vmatpush.msrb.mxu2 %v4212_v20 }
 0x48a   :  { %v6282_v60 = vpop.permute.xlu0 %3311 }
 0x48e   :  { %4127 = vmatmul.msk.f32.vlgmr.msra.gmra.mxu3 %vm2068_vm14, %v2061_v54  ;;  %v4226_v55 = vpop.permute.xlu1 %4225 }
 0x48f   :  { %2207 = vmatpush.msra.mxu3 %v6240_v17  ;;  %v4221_v17 = vpop.permute.xlu2 %4220 }
 0x490   :  { %v4223_v63 = vunpack.i.h.bf16 %v4221_v17 }
 0x492   :  { %v4216_v23 = vpop.permute.xlu0 %4215 }
 0x493   :  { %v4217_v11 = vunpack.i.l.bf16 %v4216_v23  ;;  %v4218_v33 = vunpack.i.h.bf16 %v4216_v23 }
 0x495   :  { %2660 = vmatpush.msra.mxu2 %v4217_v11 }
 0x496   :  { %4128 = vmatmul.msk.f32.vlgmr.msrb.gmra.mxu3 %vm2068_vm14, %v2061_v54  ;;  %v4241_v40 = vpop.permute.xlu1 %4240 }
 0x497   :  { %2231 = vmatpush.msrb.mxu3 %v6959_v37  ;;  %v4236_v30 = vpop.permute.xlu2 %4235  ;;  %v4242_v18 = vunpack.i.l.bf16 %v4241_v40 }
 0x498   :  { %v4237_v21 = vunpack.i.l.bf16 %v4236_v30 }
 0x49e   :  { %4129 = vmatmul.msk.f32.vlgmr.msra.gmra.mxu3 %vm2068_vm14, %v2061_v54 }
 0x49f   :  { %2255 = vmatpush.msra.mxu3 %v6238_v1 }
 0x4a6   :  { %4130 = vmatmul.msk.f32.vlgmr.msrb.gmra.mxu3 %vm2068_vm14, %v2061_v54 }
 0x4a7   :  { %2279 = vmatpush.msrb.mxu3 %v6248_v62  ;;  %v4222_v62 = vunpack.i.l.bf16 %v4221_v17  ;;  %v4251_v17 = vpop.permute.xlu2 %4250 }
 0x4ae   :  { %4131 = vmatmul.msk.f32.vlgmr.msra.gmra.mxu3 %vm2068_vm14, %v2061_v54 }
 0x4af   :  { %2303 = vmatpush.msra.mxu3 %v6960_v12 }
 0x4b6   :  { %4132 = vmatmul.msk.f32.vlgmr.msrb.gmra.mxu3 %vm2068_vm14, %v2061_v54 }
 0x4b7   :  { %2327 = vmatpush.msrb.mxu3 %v6244_v61 }
 0x4be   :  { %4133 = vmatmul.msk.f32.vlgmr.msra.gmra.mxu3 %vm2068_vm14, %v2061_v54 }
 0x4bf   :  { %2351 = vmatpush.msra.mxu3 %v6252_v56  ;;  %v4227_v56 = vunpack.i.l.bf16 %v4226_v55 }
 0x4c6   :  { %4134 = vmatmul.msk.f32.vlgmr.msrb.gmra.mxu3 %vm2068_vm14, %v2061_v54 }
 0x4c7   :  { %2375 = vmatpush.msrb.mxu3 %v6961_v31 }
 0x4ce   :  { %4135 = vmatmul.msk.f32.vlgmr.msra.gmra.mxu3 %vm2068_vm14, %v2061_v54 }
 0x4cf   :  { %4140 = vmatpush.xpose.msk.msra.mxu3 %vm47_vm0, %v6250_v35  ;;  %v4228_v35 = vunpack.i.h.bf16 %v4226_v55 }
 0x4d6   :  { %4136 = vmatmul.msk.f32.vlgmr.msrb.gmra.mxu3 %vm2068_vm14, %v2061_v54 }
 0x4d7   :  { %2591 = vmatpush.msrb.mxu3 %v4213_v45 }
 0x4de   :  { %4141 = vmatmul.msk.f32.vlgmr.msra.gmra.mxu3 %vm47_vm0, %v6258_v42 }
 0x4df   :  { %2683 = vmatpush.msra.mxu3 %v4218_v33 }
 0x4f4   :  { %v6366_v34 = vpop.f32.mrf.mxu1 }
 0x4f9   :  { %v6306_v41 = vpop.f32.mrf.mxu3 }
 0x4fb   :  { %v6370_v9 = vpop.f32.mrf.mxu2 }
 0x501   :  { %v6308_v14 = vpop.f32.mrf.mxu3 }
 0x509   :  { %v6310_v24 = vpop.f32.mrf.mxu3 }
 0x511   :  { %v6312_v6 = vpop.f32.mrf.mxu3 }
 0x519   :  { %v6314_v10 = vpop.f32.mrf.mxu3 }
 0x521   :  { %v6316_v0 = vpop.f32.mrf.mxu3 }
 0x529   :  { %v6318_v59 = vpop.f32.mrf.mxu3 }
 0x531   :  { %v6320_v26 = vpop.f32.mrf.mxu3 }
 0x539   :  { %v6322_v52 = vpop.f32.mrf.mxu3 }
 0x541   :  { %v6324_v36 = vpop.f32.mrf.mxu3 }
 0x549   :  { %v6326_v15 = vpop.f32.mrf.mxu3 }
 0x551   :  { %v6328_v39 = vpop.f32.mrf.mxu3 }
 0x559   :  { %v6330_v1 = vpop.f32.mrf.mxu3 }
 0x561   :  { %v2498_v61 = vpop.f32.mrf.mxu3 }
 0x562   :  { %4142 = vmatmul.msk.f32.vlgmr.msrb.gmra.mxu0 %vm2068_vm14, %v2498_v61  ;;  %4143 = vmatmul.msk.f32.vlgmr.msrb.gmra.mxu1 %vm2068_vm14, %v2498_v61 }
 0x563   :  { %4144 = vmatmul.msk.f32.vlgmr.msrb.gmra.mxu2 %vm2068_vm14, %v2498_v61  ;;  %4145 = vmatmul.msk.f32.vlgmr.msrb.gmra.mxu3 %vm2068_vm14, %v2498_v61 }
 0x564   :  { %2706 = vmatpush.msrb.mxu0 %v6236_v48  ;;  %2729 = vmatpush.msrb.mxu1 %v6264_v27  ;;  %v4231_v48 = vpop.permute.xlu0 %4230  ;;  %v6364_v27 = vpop.f32.mrf.mxu0 }
 0x565   :  { %2752 = vmatpush.msrb.mxu2 %v4222_v62  ;;  %2775 = vmatpush.msrb.mxu3 %v4223_v63  ;;  %v4233_v44 = vunpack.i.h.bf16 %v4231_v48  ;;  %v4232_v42 = vunpack.i.l.bf16 %v4231_v48  ;;  %v4252_v62 = vunpack.i.l.bf16 %v4251_v17 }
 0x56a   :  { %4146 = vmatmul.msk.f32.vlgmr.msra.gmra.mxu0 %vm2068_vm14, %v2498_v61  ;;  %4147 = vmatmul.msk.f32.vlgmr.msra.gmra.mxu1 %vm2068_vm14, %v2498_v61 }
 0x56b   :  { %4148 = vmatmul.msk.f32.vlgmr.msra.gmra.mxu2 %vm2068_vm14, %v2498_v61  ;;  %4149 = vmatmul.msk.f32.vlgmr.msra.gmra.mxu3 %vm2068_vm14, %v2498_v61 }
 0x56c   :  { %2798 = vmatpush.msra.mxu0 %v6260_v2  ;;  %2821 = vmatpush.msra.mxu1 %v6272_v22  ;;  %v4238_v2 = vunpack.i.h.bf16 %v4236_v30  ;;  %v4246_v28 = vpop.permute.xlu0 %4245  ;;  %v4256_v30 = vpop.permute.xlu1 %4255 }
 0x56d   :  { %2844 = vmatpush.msra.mxu2 %v4227_v56  ;;  %2867 = vmatpush.msra.mxu3 %v4228_v35  ;;  %v4248_v55 = vunpack.i.h.bf16 %v4246_v28  ;;  %v4247_v48 = vunpack.i.l.bf16 %v4246_v28 }
 0x572   :  { %4150 = vmatmul.msk.f32.vlgmr.msrb.gmra.mxu0 %vm2068_vm14, %v2498_v61  ;;  %4151 = vmatmul.msk.f32.vlgmr.msrb.gmra.mxu1 %vm2068_vm14, %v2498_v61 }
 0x573   :  { %4152 = vmatmul.msk.f32.vlgmr.msrb.gmra.mxu2 %vm2068_vm14, %v2498_v61  ;;  %4153 = vmatmul.msk.f32.vlgmr.msrb.gmra.mxu3 %vm2068_vm14, %v2498_v61 }
 0x574   :  { %4158 = vmatpush.xpose.msk.msrb.mxu0 %vm47_vm0, %v6262_v19  ;;  %2941 = vmatpush.msrb.mxu1 %v6254_v3  ;;  %v4243_v3 = vunpack.i.h.bf16 %v4241_v40  ;;  %v6358_v50 = vpop.permute.xlu0 %4260 }
 0x575   :  { %2964 = vmatpush.msrb.mxu2 %v4232_v42  ;;  %2987 = vmatpush.msrb.mxu3 %v4233_v44 }
 0x57a   :  { %4154 = vmatmul.msk.f32.vlgmr.msra.gmra.mxu0 %vm2068_vm14, %v2498_v61  ;;  %4155 = vmatmul.msk.f32.vlgmr.msra.gmra.mxu1 %vm2068_vm14, %v2498_v61 }
 0x57b   :  { %4156 = vmatmul.msk.f32.vlgmr.msra.gmra.mxu2 %vm2068_vm14, %v2498_v61  ;;  %4157 = vmatmul.msk.f32.vlgmr.msra.gmra.mxu3 %vm2068_vm14, %v2498_v61 }
 0x57c   :  { %3010 = vmatpush.msra.mxu0 %v4237_v21  ;;  %3033 = vmatpush.msra.mxu1 %v6266_v43  ;;  %v6360_v19 = vpop.permute.xlu0 %4275 }
 0x57d   :  { %3056 = vmatpush.msra.mxu2 %v4238_v2  ;;  %3079 = vmatpush.msra.mxu3 %v4242_v18  ;;  %v4257_v2 = vunpack.i.l.bf16 %v4256_v30 }
 0x582   :  { %4159 = vmatmul.msk.f32.vlgmr.msrb.gmra.mxu0 %vm47_vm0, %v6242_v4 }
 0x583   :  { %3102 = vmatpush.msrb.mxu0 %v4243_v3  ;;  %v4253_v3 = vunpack.i.h.bf16 %v4251_v17 }
 0x584   :  { %v6362_v5 = vpop.permute.xlu0 %4290 }
 0x58c   :  { %v6368_v25 = vpop.permute.xlu0 %2873 }
 0x5df   :  { %v2524_v54 = vpop.f32.mrf.mxu0  ;;  %v2547_v43 = vpop.f32.mrf.mxu1 }
 0x5e0   :  { %v2876_v4 = vmul.f32 %v6368_v25, %v2524_v54  ;;  %v2877_v8 = vmul.f32 %v6368_v25, %v2547_v43  ;;  %v4266_v54 = vpop.permute.xlu2 %4265 }
 0x5e1   :  { %v4267_v43 = vunpack.i.l.bf16 %v4266_v54 }
 0x5e2   :  { %3748 = vrot.lane.b32.xlu1 %v2877_v8, %s4436_s27  ;;  %3746 = vrot.lane.b32.xlu2 %v2876_v4, %s4436_s27  ;;  %v4263_v4 = vunpack.i.h.bf16 %v6358_v50  ;;  %v4268_v8 = vunpack.i.h.bf16 %v4266_v54 }
 0x5e6   :  { %v2570_v32 = vpop.f32.mrf.mxu2  ;;  %v2593_v29 = vpop.f32.mrf.mxu3 }
 0x5e7   :  { %v2878_v16 = vmul.f32 %v6368_v25, %v2570_v32  ;;  %v2616_v22 = vpop.f32.mrf.mxu0  ;;  %v2879_v58 = vmul.f32 %v6368_v25, %v2593_v29  ;;  %v2639_v51 = vpop.f32.mrf.mxu1  ;;  %v4277_v29 = vunpack.i.l.bf16 %v6360_v19 }
 0x5e8   :  { %v2880_v46 = vmul.f32 %v6368_v25, %v2616_v22  ;;  %v2881_v53 = vmul.f32 %v6368_v25, %v2639_v51 }
 0x5e9   :  { %3750 = vrot.lane.b32.xlu0 %v2878_v16, %s4436_s27  ;;  %v6430_v16 = vpop.permute.xlu2 %4280 }
 0x5ea   :  { %3754 = vrot.lane.b32.xlu1 %v2880_v46, %s4436_s27  ;;  %3752 = vrot.lane.b32.xlu2 %v2879_v58, %s4436_s27 }
 0x5ee   :  { %v2662_v57 = vpop.f32.mrf.mxu2  ;;  %v2685_v38 = vpop.f32.mrf.mxu3 }
 0x5ef   :  { %v2708_v20 = vpop.f32.mrf.mxu0  ;;  %v2882_v7 = vmul.f32 %v6368_v25, %v2662_v57  ;;  %v2883_v23 = vmul.f32 %v6368_v25, %v2685_v38  ;;  %v2731_v11 = vpop.f32.mrf.mxu1 }
 0x5f0   :  { %v2884_v12 = vmul.f32 %v6368_v25, %v2708_v20  ;;  %v2885_v45 = vmul.f32 %v6368_v25, %v2731_v11 }
 0x5f1   :  { %3756 = vrot.lane.b32.xlu0 %v2881_v53, %s4436_s27  ;;  %v6432_v22 = vpop.permute.xlu2 %4295 }
 0x5f2   :  { %3760 = vrot.lane.b32.xlu1 %v2883_v23, %s4436_s27  ;;  %3758 = vrot.lane.b32.xlu2 %v2882_v7, %s4436_s27 }
 0x5f6   :  { %v2754_v37 = vpop.f32.mrf.mxu2  ;;  %v2777_v61 = vpop.f32.mrf.mxu3 }
 0x5f7   :  { %v2800_v31 = vpop.f32.mrf.mxu0  ;;  %v2886_v33 = vmul.f32 %v6368_v25, %v2754_v37  ;;  %v2823_v35 = vpop.f32.mrf.mxu1  ;;  %v2887_v56 = vmul.f32 %v6368_v25, %v2777_v61 }
 0x5f8   :  { %v2888_v44 = vmul.f32 %v6368_v25, %v2800_v31  ;;  %v2889_v42 = vmul.f32 %v6368_v25, %v2823_v35 }
 0x5f9   :  { %3762 = vrot.lane.b32.xlu0 %v2884_v12, %s4436_s27  ;;  %v6434_v58 = vpop.permute.xlu2 %3292 }
 0x5fa   :  { %3764 = vrot.lane.b32.xlu2 %v2885_v45, %s4436_s27  ;;  %3766 = vrot.lane.b32.xlu1 %v2886_v33, %s4436_s27 }
 0x5fe   :  { %v2846_v40 = vpop.f32.mrf.mxu2  ;;  %v2869_v21 = vpop.f32.mrf.mxu3 }
 0x5ff   :  { %v2917_v63 = vpop.f32.mrf.mxu0  ;;  %v2890_v18 = vmul.f32 %v6368_v25, %v2846_v40  ;;  %v2891_v28 = vmul.f32 %v6368_v25, %v2869_v21  ;;  %v4271_v25 = vpop.permute.xlu1 %4270 }
 0x600   :  { %4160 = vmatmul.msk.f32.vlgmr.msrb.gmra.mxu1 %vm2068_vm14, %v2917_v63  ;;  %4162 = vmatmul.msk.f32.vlgmr.msrb.gmra.mxu3 %vm2068_vm14, %v2917_v63  ;;  %v4273_v32 = vunpack.i.h.bf16 %v4271_v25 }
 0x601   :  { %4163 = vmatmul.msk.f32.vlgmr.msra.gmra.mxu0 %vm2068_vm14, %v2917_v63  ;;  %3125 = vmatpush.msrb.mxu1 %v6278_v13  ;;  %v4258_v13 = vunpack.i.h.bf16 %v4256_v30 }
 0x602   :  { %3171 = vmatpush.msrb.mxu3 %v4248_v55  ;;  %3194 = vmatpush.msra.mxu0 %v4252_v62 }
 0x603   :  { %3768 = vrot.lane.b32.xlu0 %v2887_v56, %s4436_s27  ;;  %4161 = vmatmul.msk.f32.vlgmr.msrb.gmra.mxu2 %vm2068_vm14, %v2917_v63 }
 0x604   :  { %3148 = vmatpush.msrb.mxu2 %v4247_v48  ;;  %3770 = vrot.lane.b32.xlu2 %v2888_v44, %s4436_s27 }
 0x605   :  { %3772 = vrot.lane.b32.xlu1 %v2889_v42, %s4436_s27 }
 0x607   :  { %v6436_v46 = vpop.permute.xlu1 %4285 }
 0x608   :  { %4164 = vmatmul.msk.f32.vlgmr.msra.gmra.mxu1 %vm2068_vm14, %v2917_v63  ;;  %4166 = vmatmul.msk.f32.vlgmr.msra.gmra.mxu3 %vm2068_vm14, %v2917_v63 }
 0x609   :  { %4167 = vmatmul.msk.f32.vlgmr.msrb.gmra.mxu0 %vm2068_vm14, %v2917_v63  ;;  %3217 = vmatpush.msra.mxu1 %v6256_v47  ;;  %v4262_v47 = vunpack.i.l.bf16 %v6358_v50  ;;  %v4278_v50 = vunpack.i.h.bf16 %v6360_v19 }
 0x60a   :  { %3263 = vmatpush.msra.mxu3 %v4257_v2  ;;  %3286 = vmatpush.msrb.mxu0 %v4258_v13 }
 0x60b   :  { %4165 = vmatmul.msk.f32.vlgmr.msra.gmra.mxu2 %vm2068_vm14, %v2917_v63  ;;  %3774 = vrot.lane.b32.xlu0 %v2890_v18, %s4436_s27 }
 0x60c   :  { %3240 = vmatpush.msra.mxu2 %v4253_v3  ;;  %3776 = vrot.lane.b32.xlu2 %v2891_v28, %s4436_s27 }
 0x60f   :  { %v6440_v57 = vpop.permute.xlu1 %2454 }
 0x610   :  { %4168 = vmatmul.msk.f32.vlgmr.msrb.gmra.mxu1 %vm2068_vm14, %v2917_v63  ;;  %4170 = vmatmul.msk.f32.vlgmr.msrb.gmra.mxu3 %vm2068_vm14, %v2917_v63  ;;  %v2460_v38 = vmul.f32 %v6440_v57, %v6312_v6  ;;  %v2466_v11 = vmul.f32 %v6440_v57, %v6324_v36  ;;  %v2459_v31 = vmul.f32 %v6440_v57, %v6310_v24 }
 0x611   :  { %4171 = vmatmul.msk.f32.vlgmr.msra.gmra.mxu0 %vm2068_vm14, %v2917_v63  ;;  %4176 = vmatpush.xpose.msk.msrb.mxu1 %vm47_vm0, %v6274_v49  ;;  %v4272_v49 = vunpack.i.l.bf16 %v4271_v25  ;;  %v2469_v36 = vmul.f32 %v6440_v57, %v6330_v1  ;;  %v2462_v24 = vmul.f32 %v6440_v57, %v6316_v0  ;;  %v2465_v56 = vmul.f32 %v6440_v57, %v6322_v52 }
 0x612   :  { %3383 = vmatpush.msrb.mxu3 %v4263_v4  ;;  %3406 = vmatpush.msra.mxu0 %v4267_v43  ;;  %v2467_v1 = vmul.f32 %v6440_v57, %v6326_v15  ;;  %v2468_v0 = vmul.f32 %v6440_v57, %v6328_v39 }
 0x613   :  { %4169 = vmatmul.msk.f32.vlgmr.msrb.gmra.mxu2 %vm2068_vm14, %v2917_v63 }
 0x614   :  { %3360 = vmatpush.msrb.mxu2 %v4262_v47 }
 0x617   :  { %v6449_v20 = vpop.permute.xlu1 %3711 }
 0x618   :  { %4172 = vmatmul.msk.f32.vlgmr.msra.gmra.mxu1 %vm2068_vm14, %v2917_v63  ;;  %4174 = vmatmul.msk.f32.vlgmr.msra.gmra.mxu3 %vm2068_vm14, %v2917_v63 }
 0x619   :  { %4175 = vmatmul.msk.f32.vlgmr.msrb.gmra.mxu0 %vm2068_vm14, %v2917_v63  ;;  %3429 = vmatpush.msra.mxu1 %v4268_v8 }
 0x61a   :  { %3475 = vmatpush.msra.mxu3 %v4273_v32  ;;  %3498 = vmatpush.msrb.mxu0 %v4277_v29 }
 0x61b   :  { %4173 = vmatmul.msk.f32.vlgmr.msra.gmra.mxu2 %vm2068_vm14, %v2917_v63 }
 0x61c   :  { %3452 = vmatpush.msra.mxu2 %v4272_v49 }
 0x620   :  { %4177 = vmatmul.msk.f32.vlgmr.msrb.gmra.mxu1 %vm47_vm0, %v6282_v60  ;;  %v2463_v60 = vmul.f32 %v6440_v57, %v6318_v59  ;;  %v2461_v59 = vmul.f32 %v6440_v57, %v6314_v10 }
 0x621   :  { %3521 = vmatpush.msrb.mxu1 %v4278_v50 }
 0x63c   :  { %v6438_v51 = vpop.permute.xlu2 %3746 }
 0x644   :  { %v3753_v19 = vpop.permute.xlu2 %3752 }
 0x645   :  { %v6445_v53 = vsel %vm2068_vm14, %v2460_v38, %v3753_v19 }
 0x64c   :  { %v3759_v7 = vpop.permute.xlu2 %3758 }
 0x64d   :  { %v6452_v23 = vsel %vm2068_vm14, %v2463_v60, %v3759_v7 }
 0x654   :  { %v6456_v37 = vpop.permute.xlu1 %3748  ;;  %v3765_v12 = vpop.permute.xlu2 %3764 }
 0x655   :  { %v6459_v6 = vsel %vm2068_vm14, %v2466_v11, %v3765_v12 }
 0x65b   :  { %v3751_v45 = vpop.permute.xlu0 %3750 }
 0x65c   :  { %v6466_v33 = vsel %vm2068_vm14, %v2459_v31, %v3751_v45  ;;  %v3755_v17 = vpop.permute.xlu1 %3754  ;;  %v4283_v31 = vunpack.i.h.bf16 %v6430_v16  ;;  %v4288_v45 = vunpack.i.h.bf16 %v6436_v46 }
 0x65d   :  { %v6471_v61 = vsel %vm2068_vm14, %v2461_v59, %v3755_v17  ;;  %v4282_v59 = vunpack.i.l.bf16 %v6430_v16  ;;  %v4287_v17 = vunpack.i.l.bf16 %v6436_v46 }
 0x65e   :  { %v3771_v63 = vpop.permute.xlu2 %3770 }
 0x65f   :  { %v6474_v62 = vsel %vm2068_vm14, %v2469_v36, %v3771_v63 }
 0x663   :  { %v3757_v55 = vpop.permute.xlu0 %3756 }
 0x664   :  { %v6479_v10 = vsel %vm2068_vm14, %v2462_v24, %v3757_v55  ;;  %v6481_v35 = vpop.permute.xlu1 %3760  ;;  %v4293_v55 = vunpack.i.h.bf16 %v6362_v5 }
 0x66b   :  { %v3763_v48 = vpop.permute.xlu0 %3762 }
 0x66c   :  { %v6488_v44 = vsel %vm2068_vm14, %v2465_v56, %v3763_v48  ;;  %v3767_v42 = vpop.permute.xlu1 %3766  ;;  %v4292_v56 = vunpack.i.l.bf16 %v6362_v5  ;;  %v4298_v48 = vunpack.i.h.bf16 %v6432_v22 }
 0x66d   :  { %v6491_v30 = vsel %vm2068_vm14, %v2467_v1, %v3767_v42  ;;  %v4297_v42 = vunpack.i.l.bf16 %v6432_v22  ;;  %v6554_v22 = vpop.permute.xlu2 %3776 }
 0x675   :  { %v3769_v40 = vpop.permute.xlu0 %3768 }
 0x676   :  { %v6496_v21 = vsel %vm2068_vm14, %v2468_v0, %v3769_v40 }
 0x67d   :  { %v2943_v13 = vpop.f32.mrf.mxu1 }
 0x67e   :  { %v3295_v52 = vmul.f32 %v6434_v58, %v2943_v13  ;;  %v3012_v15 = vpop.f32.mrf.mxu0 }
 0x67f   :  { %v3298_v28 = vmul.f32 %v6434_v58, %v3012_v15 }
 0x680   :  { %3810 = vrot.lane.b32.xlu1 %v3295_v52, %s4437_s14 }
 0x683   :  { %v2989_v2 = vpop.f32.mrf.mxu3 }
 0x684   :  { %v3297_v18 = vmul.f32 %v6434_v58, %v2989_v2 }
 0x685   :  { %v3035_v3 = vpop.f32.mrf.mxu1 }
 0x686   :  { %v2966_v54 = vpop.f32.mrf.mxu2  ;;  %3814 = vrot.lane.b32.xlu2 %v3297_v18, %s4437_s14  ;;  %v3299_v8 = vmul.f32 %v6434_v58, %v3035_v3  ;;  %v3104_v29 = vpop.f32.mrf.mxu0 }
 0x687   :  { %v3296_v39 = vmul.f32 %v6434_v58, %v2966_v54  ;;  %v3302_v38 = vmul.f32 %v6434_v58, %v3104_v29 }
 0x688   :  { %3816 = vrot.lane.b32.xlu1 %v3298_v28, %s4437_s14 }
 0x689   :  { %3812 = vrot.lane.b32.xlu0 %v3296_v39, %s4437_s14 }
 0x68b   :  { %v3081_v43 = vpop.f32.mrf.mxu3 }
 0x68c   :  { %v3301_v25 = vmul.f32 %v6434_v58, %v3081_v43 }
 0x68d   :  { %v3127_v4 = vpop.f32.mrf.mxu1 }
 0x68e   :  { %v3058_v47 = vpop.f32.mrf.mxu2  ;;  %v3303_v19 = vmul.f32 %v6434_v58, %v3127_v4  ;;  %v3196_v11 = vpop.f32.mrf.mxu0 }
 0x68f   :  { %v3300_v32 = vmul.f32 %v6434_v58, %v3058_v47  ;;  %v3306_v36 = vmul.f32 %v6434_v58, %v3196_v11 }
 0x690   :  { %3822 = vrot.lane.b32.xlu1 %v3301_v25, %s4437_s14 }
 0x691   :  { %3820 = vrot.lane.b32.xlu2 %v3300_v32, %s4437_s14  ;;  %3818 = vrot.lane.b32.xlu0 %v3299_v8, %s4437_s14 }
 0x693   :  { %v3173_v7 = vpop.f32.mrf.mxu3 }
 0x694   :  { %v3305_v63 = vmul.f32 %v6434_v58, %v3173_v7 }
 0x695   :  { %v3219_v49 = vpop.f32.mrf.mxu1 }
 0x696   :  { %v3150_v50 = vpop.f32.mrf.mxu2  ;;  %v3307_v16 = vmul.f32 %v6434_v58, %v3219_v49  ;;  %v3288_v1 = vpop.f32.mrf.mxu0 }
 0x697   :  { %v3304_v60 = vmul.f32 %v6434_v58, %v3150_v50  ;;  %v3310_v5 = vmul.f32 %v6434_v58, %v3288_v1 }
 0x699   :  { %3826 = vrot.lane.b32.xlu2 %v3303_v19, %s4437_s14  ;;  %3824 = vrot.lane.b32.xlu0 %v3302_v38, %s4437_s14 }
 0x69a   :  { %3828 = vrot.lane.b32.xlu1 %v3304_v60, %s4437_s14 }
 0x69b   :  { %v3265_v24 = vpop.f32.mrf.mxu3 }
 0x69c   :  { %v3309_v40 = vmul.f32 %v6434_v58, %v3265_v24 }
 0x69d   :  { %v3336_v12 = vpop.f32.mrf.mxu1 }
 0x69e   :  { %4178 = vmatmul.msk.f32.vlgmr.msrb.gmra.mxu2 %vm2068_vm14, %v3336_v12  ;;  %4179 = vmatmul.msk.f32.vlgmr.msrb.gmra.mxu3 %vm2068_vm14, %v3336_v12  ;;  %v3242_v46 = vpop.f32.mrf.mxu2 }
 0x69f   :  { %4180 = vmatmul.msk.f32.vlgmr.msra.gmra.mxu0 %vm2068_vm14, %v3336_v12  ;;  %4181 = vmatmul.msk.f32.vlgmr.msra.gmra.mxu1 %vm2068_vm14, %v3336_v12  ;;  %v3308_v0 = vmul.f32 %v6434_v58, %v3242_v46 }
 0x6a0   :  { %3544 = vmatpush.msrb.mxu2 %v4282_v59  ;;  %3567 = vmatpush.msrb.mxu3 %v4283_v31 }
 0x6a1   :  { %3590 = vmatpush.msra.mxu0 %v4287_v17  ;;  %3613 = vmatpush.msra.mxu1 %v4288_v45 }
 0x6a2   :  { %3832 = vrot.lane.b32.xlu2 %v3306_v36, %s4437_s14  ;;  %3830 = vrot.lane.b32.xlu0 %v3305_v63, %s4437_s14 }
 0x6a3   :  { %3834 = vrot.lane.b32.xlu1 %v3307_v16, %s4437_s14 }
 0x6a6   :  { %4182 = vmatmul.msk.f32.vlgmr.msra.gmra.mxu2 %vm2068_vm14, %v3336_v12  ;;  %4183 = vmatmul.msk.f32.vlgmr.msra.gmra.mxu3 %vm2068_vm14, %v3336_v12 }
 0x6a7   :  { %4184 = vmatmul.msk.f32.vlgmr.msrb.gmra.mxu0 %vm2068_vm14, %v3336_v12  ;;  %4185 = vmatmul.msk.f32.vlgmr.msrb.gmra.mxu1 %vm2068_vm14, %v3336_v12 }
 0x6a8   :  { %3636 = vmatpush.msra.mxu2 %v4292_v56  ;;  %3659 = vmatpush.msra.mxu3 %v4293_v55  ;;  %v6596_v56 = vpop.permute.xlu1 %3772 }
 0x6a9   :  { %3682 = vmatpush.msrb.mxu0 %v4297_v42  ;;  %3705 = vmatpush.msrb.mxu1 %v4298_v48  ;;  %v6598_v48 = vpop.permute.xlu0 %3774 }
 0x6aa   :  { %3838 = vrot.lane.b32.xlu2 %v3309_v40, %s4437_s14  ;;  %3836 = vrot.lane.b32.xlu0 %v3308_v0, %s4437_s14 }
 0x6ab   :  { %3840 = vrot.lane.b32.xlu1 %v3310_v5, %s4437_s14 }
 0x6ae   :  { %4186 = vmatmul.msk.f32.vlgmr.msrb.gmra.mxu2 %vm2068_vm14, %v3336_v12  ;;  %4187 = vmatmul.msk.f32.vlgmr.msrb.gmra.mxu3 %vm2068_vm14, %v3336_v12 }
 0x6af   :  { %4188 = vmatmul.msk.f32.vlgmr.msra.gmra.mxu0 %vm2068_vm14, %v3336_v12  ;;  %4189 = vmatmul.msk.f32.vlgmr.msra.gmra.mxu1 %vm2068_vm14, %v3336_v12 }
 0x6b6   :  { %4190 = vmatmul.msk.f32.vlgmr.msra.gmra.mxu2 %vm2068_vm14, %v3336_v12  ;;  %4191 = vmatmul.msk.f32.vlgmr.msra.gmra.mxu3 %vm2068_vm14, %v3336_v12 }
 0x6b7   :  { %4192 = vmatmul.msk.f32.vlgmr.msrb.gmra.mxu0 %vm2068_vm14, %v3336_v12  ;;  %4193 = vmatmul.msk.f32.vlgmr.msrb.gmra.mxu1 %vm2068_vm14, %v3336_v12 }
 0x6e0   :  { %v6556_v58 = vpop.permute.xlu2 %3814 }
 0x6eb   :  { %v6558_v13 = vpop.permute.xlu2 %3820 }
 0x6f2   :  { %v3811_v1 = vpop.permute.xlu1 %3810 }
 0x6f3   :  { %v3827_v52 = vpop.permute.xlu2 %3826 }
 0x6f4   :  { %v6562_v15 = vsel %vm3938_vm4, %v6488_v44, %v3827_v52 }
 0x6fa   :  { %v3817_v42 = vpop.permute.xlu1 %3816 }
 0x6fb   :  { %v3813_v0 = vpop.permute.xlu0 %3812 }
 0x6fc   :  { %v6602_v5 = vpop.permute.xlu2 %3832 }
 0x702   :  { %v6600_v40 = vpop.permute.xlu1 %3822 }
 0x703   :  { %v3819_v52 = vpop.permute.xlu0 %3818 }
 0x71c   :  { %v3408_v2 = vpop.f32.mrf.mxu0  ;;  %v3431_v3 = vpop.f32.mrf.mxu1 }
 0x71d   :  { %v3716_v18 = vmul.f32 %v6449_v20, %v3408_v2  ;;  %v3717_v28 = vmul.f32 %v6449_v20, %v3431_v3  ;;  %v6604_v2 = vpop.permute.xlu1 %3828  ;;  %v3825_v3 = vpop.permute.xlu0 %3824 }
 0x71f   :  { %3878 = vrot.lane.b32.xlu1 %v3716_v18, %s4438_s15  ;;  %3880 = vrot.lane.b32.xlu0 %v3717_v28, %s4438_s15  ;;  %v6606_v18 = vpop.permute.xlu2 %3838 }
 0x721   :  { %v3362_v54 = vpop.f32.mrf.mxu2  ;;  %v3385_v39 = vpop.f32.mrf.mxu3 }
 0x722   :  { %v3715_v43 = vmul.f32 %v6449_v20, %v3385_v39  ;;  %v3714_v44 = vmul.f32 %v6449_v20, %v3362_v54 }
 0x724   :  { %3876 = vrot.lane.b32.xlu2 %v3715_v43, %s4438_s15  ;;  %v3523_v4 = vpop.f32.mrf.mxu1  ;;  %v3500_v29 = vpop.f32.mrf.mxu0 }
 0x725   :  { %v3721_v8 = vmul.f32 %v6449_v20, %v3523_v4  ;;  %v3720_v49 = vmul.f32 %v6449_v20, %v3500_v29  ;;  %v6613_v43 = vpop.permute.xlu1 %3834 }
 0x727   :  { %3874 = vrot.lane.b32.xlu0 %v3714_v44, %s4438_s15  ;;  %v3831_v44 = vpop.permute.xlu0 %3830 }
 0x729   :  { %v3454_v47 = vpop.f32.mrf.mxu2  ;;  %v3477_v25 = vpop.f32.mrf.mxu3 }
 0x72a   :  { %v3719_v32 = vmul.f32 %v6449_v20, %v3477_v25  ;;  %v3718_v19 = vmul.f32 %v6449_v20, %v3454_v47  ;;  %v4408_v47 = vld [vmem:[%s6797_s0 + $0x8] sm:$0xff] }
 0x72c   :  { %3888 = vrot.lane.b32.xlu2 %v3721_v8, %s4438_s15  ;;  %3884 = vrot.lane.b32.xlu1 %v3719_v32, %s4438_s15  ;;  %v3615_v50 = vpop.f32.mrf.mxu1  ;;  %v3592_v11 = vpop.f32.mrf.mxu0 }
 0x72d   :  { %v3725_v60 = vmul.f32 %v6449_v20, %v3615_v50  ;;  %v3724_v31 = vmul.f32 %v6449_v20, %v3592_v11 }
 0x72f   :  { %3886 = vrot.lane.b32.xlu0 %v3720_v49, %s4438_s15  ;;  %v4409_v49 = vld [vmem:[%s6797_s0 + $0x38] sm:$0xff] }
 0x731   :  { %v3546_v38 = vpop.f32.mrf.mxu2  ;;  %v3569_v7 = vpop.f32.mrf.mxu3 }
 0x732   :  { %v3723_v12 = vmul.f32 %v6449_v20, %v3569_v7  ;;  %v3722_v59 = vmul.f32 %v6449_v20, %v3546_v38  ;;  %v6632_v38 = vpop.permute.xlu1 %3840  ;;  %v4410_v7 = vld [vmem:[%s6797_s0 + $0x20] sm:$0xff] }
 0x734   :  { %3896 = vrot.lane.b32.xlu1 %v3725_v60, %s4438_s15  ;;  %3882 = vrot.lane.b32.xlu2 %v3718_v19, %s4438_s15  ;;  %v3684_v36 = vpop.f32.mrf.mxu0  ;;  %v3707_v24 = vpop.f32.mrf.mxu1 }
 0x735   :  { %v3728_v16 = vmul.f32 %v6449_v20, %v3684_v36  ;;  %v3729_v55 = vmul.f32 %v6449_v20, %v3707_v24  ;;  %v3837_v19 = vpop.permute.xlu0 %3836 }
 0x737   :  { %3892 = vrot.lane.b32.xlu0 %v3723_v12, %s4438_s15  ;;  %v3941_v12 = vsel %vm3938_vm4, %v6466_v33, %v6556_v58  ;;  %v4412_v33 = vld [vmem:[%s6797_s0 + $0x18] sm:$0xff]  ;;  %v3949_v58 = vsel %vm3938_vm4, %v6491_v30, %v3831_v44 }
 0x739   :  { %v3638_v45 = vpop.f32.mrf.mxu2  ;;  %v3661_v63 = vpop.f32.mrf.mxu3 }
 0x73a   :  { %v3726_v17 = vmul.f32 %v6449_v20, %v3638_v45  ;;  %v3727_v46 = vmul.f32 %v6449_v20, %v3661_v63  ;;  %v2458_v20 = vmul.f32 %v6440_v57, %v6308_v14  ;;  %v2464_v14 = vmul.f32 %v6440_v57, %v6320_v26 }
 0x73b   :  { %v3943_v26 = vsel %vm3938_vm4, %v6471_v61, %v3819_v52 }
 0x73c   :  { %3894 = vrot.lane.b32.xlu2 %v3724_v31, %s4438_s15  ;;  %3890 = vrot.lane.b32.xlu1 %v3722_v59, %s4438_s15  ;;  %v3923_v28 = vsel %vm2068_vm14, %v2458_v20, %v6456_v37  ;;  %v3929_v37 = vsel %vm2068_vm14, %v2464_v14, %v6481_v35  ;;  %v3942_v59 = vsel %vm3938_vm4, %v6445_v53, %v3817_v42  ;;  %v4414_v20 = vld [vmem:[%s6797_s0] sm:$0xff] }
 0x73d   :  { %v3940_v54 = vsel %vm3938_vm4, %v3923_v28, %v3813_v0  ;;  %v3946_v8 = vsel %vm3938_vm4, %v3929_v37, %v3825_v3 }
 0x73f   :  { %3898 = vrot.lane.b32.xlu0 %v3726_v17, %s4438_s15  ;;  %v4411_v17 = vld [vmem:[%s6797_s0 + $0x10] sm:$0xff] }
 0x744   :  { %3900 = vrot.lane.b32.xlu2 %v3727_v46, %s4438_s15  ;;  %3902 = vrot.lane.b32.xlu1 %v3728_v16, %s4438_s15  ;;  %v2457_v46 = vmul.f32 %v6440_v57, %v6306_v41  ;;  %v2470_v41 = vmul.f32 %v6440_v57, %v6364_v27 }
 0x746   :  { %v3922_v0 = vsel %vm2068_vm14, %v2457_v46, %v6438_v51  ;;  %v3935_v51 = vsel %vm2068_vm14, %v2470_v41, %v6596_v56  ;;  %v4415_v56 = vld [vmem:[%s6797_s0 + $0x28] sm:$0xff] }
 0x747   :  { %3904 = vrot.lane.b32.xlu0 %v3729_v55, %s4438_s15  ;;  %v4413_v55 = vld [vmem:[%s6797_s0 + $0x50] sm:$0xff]  ;;  %v3939_v30 = vsel %vm3938_vm4, %v3922_v0, %v3811_v1  ;;  %v3944_v1 = vsel %vm3938_vm4, %v6479_v10, %v6558_v13  ;;  %v4416_v10 = vld [vmem:[%s6797_s0 + $0x68] sm:$0xff] }
 0x77e   :  { %v3877_v39 = vpop.permute.xlu2 %3876 }
 0x77f   :  { %v3957_v4 = vsel %vm3955_vm5, %v3940_v54, %v3877_v39  ;;  %v3952_v54 = vsel %vm3938_vm4, %v3935_v51, %v3837_v19  ;;  %v3948_v19 = vsel %vm3938_vm4, %v6459_v6, %v6604_v2  ;;  %v4420_v2 = vld [vmem:[%s6797_s0 + $0x40] sm:$0xff] }
 0x780   :  { %v3973_v25 = vadd.f32 %v4408_v47, %v3957_v4 }
 0x782   :  { %3989 = vst.msk [vmem:[%s6805_s8 + $0x8] sm:$0xff] %vm47_vm0, %v3973_v25  ;;  %v3945_v25 = vsel %vm3938_vm4, %v6452_v23, %v6600_v40  ;;  %v3950_v23 = vsel %vm3938_vm4, %v6496_v21, %v6602_v5 }
 0x786   :  { %v3889_v32 = vpop.permute.xlu2 %3888 }
 0x787   :  { %v3963_v29 = vsel %vm3955_vm5, %v3946_v8, %v3889_v32  ;;  %v4417_v8 = vld [vmem:[%s6797_s0 + $0x30] sm:$0xff] }
 0x788   :  { %v3979_v50 = vadd.f32 %v4409_v49, %v3963_v29  ;;  %v4418_v49 = vld [vmem:[%s6797_s0 + $0x58] sm:$0xff] }
 0x78a   :  { %3995 = vst.msk [vmem:[%s6805_s8 + $0x38] sm:$0xff] %vm47_vm0, %v3979_v50 }
 0x78e   :  { %v3883_v35 = vpop.permute.xlu2 %3882 }
 0x78f   :  { %v3960_v60 = vsel %vm3955_vm5, %v3943_v26, %v3883_v35  ;;  %v4419_v26 = vld [vmem:[%s6797_s0 + $0x48] sm:$0xff] }
 0x790   :  { %v3976_v11 = vadd.f32 %v4410_v7, %v3960_v60 }
 0x791   :  { %v3879_v31 = vpop.permute.xlu1 %3878  ;;  %v3881_v45 = vpop.permute.xlu0 %3880 }
 0x792   :  { %3992 = vst.msk [vmem:[%s6805_s8 + $0x20] sm:$0xff] %vm47_vm0, %v3976_v11  ;;  %v3958_v61 = vsel %vm3955_vm5, %v3941_v12, %v3879_v31  ;;  %v3959_v63 = vsel %vm3955_vm5, %v3942_v59, %v3881_v45  ;;  %v3951_v11 = vsel %vm3938_vm4, %v6474_v62, %v6613_v43  ;;  %v2471_v31 = vmul.f32 %v6440_v57, %v6366_v34  ;;  %v4421_v59 = vld [vmem:[%s6797_s0 + $0x60] sm:$0xff] }
 0x793   :  { %v3974_v36 = vadd.f32 %v4411_v17, %v3958_v61  ;;  %v3975_v53 = vadd.f32 %v4412_v33, %v3959_v63  ;;  %v2472_v34 = vmul.f32 %v6440_v57, %v6370_v9  ;;  %v4423_v57 = vld [vmem:[%s6797_s0 + $0x78] sm:$0xff] }
 0x794   :  { %v3936_v45 = vsel %vm2068_vm14, %v2471_v31, %v6598_v48 }
 0x795   :  { %3990 = vst.msk [vmem:[%s6805_s8 + $0x10] sm:$0xff] %vm47_vm0, %v3974_v36  ;;  %v3953_v62 = vsel %vm3938_vm4, %v3936_v45, %v6606_v18  ;;  %v4422_v36 = vld [vmem:[%s6797_s0 + $0x70] sm:$0xff]  ;;  %v3937_v48 = vsel %vm2068_vm14, %v2472_v34, %v6554_v22 }
 0x796   :  { %3991 = vst.msk [vmem:[%s6805_s8 + $0x18] sm:$0xff] %vm47_vm0, %v3975_v53  ;;  %v3895_v16 = vpop.permute.xlu2 %3894  ;;  %v3954_v18 = vsel %vm3938_vm4, %v3937_v48, %v6632_v38 }
 0x797   :  { %v3966_v24 = vsel %vm3955_vm5, %v3949_v58, %v3895_v16 }
 0x798   :  { %v3982_v42 = vadd.f32 %v4413_v55, %v3966_v24 }
 0x799   :  { %v3875_v52 = vpop.permute.xlu0 %3874 }
 0x79a   :  { %3998 = vst.msk [vmem:[%s6805_s8 + $0x50] sm:$0xff] %vm47_vm0, %v3982_v42  ;;  %v3956_v3 = vsel %vm3955_vm5, %v3939_v30, %v3875_v52 }
 0x79b   :  { %v3972_v28 = vadd.f32 %v4414_v20, %v3956_v3 }
 0x79d   :  { %3988 = vst.msk [vmem:[%s6805_s8] sm:$0xff] %vm47_vm0, %v3972_v28 }
 0x79e   :  { %v3885_v27 = vpop.permute.xlu1 %3884  ;;  %v3901_v39 = vpop.permute.xlu2 %3900 }
 0x79f   :  { %v3961_v4 = vsel %vm3955_vm5, %v3944_v1, %v3885_v27  ;;  %v3969_v44 = vsel %vm3955_vm5, %v3952_v54, %v3901_v39 }
 0x7a0   :  { %v3977_v47 = vadd.f32 %v4415_v56, %v3961_v4  ;;  %v3985_v13 = vadd.f32 %v4416_v10, %v3969_v44 }
 0x7a1   :  { %v3887_v14 = vpop.permute.xlu0 %3886 }
 0x7a2   :  { %3993 = vst.msk [vmem:[%s6805_s8 + $0x28] sm:$0xff] %vm47_vm0, %v3977_v47  ;;  %v3962_v37 = vsel %vm3955_vm5, %v3945_v25, %v3887_v14 }
 0x7a3   :  { %4001 = vst.msk [vmem:[%s6805_s8 + $0x68] sm:$0xff] %vm47_vm0, %v3985_v13  ;;  %v3978_v32 = vadd.f32 %v4417_v8, %v3962_v37 }
 0x7a5   :  { %3994 = vst.msk [vmem:[%s6805_s8 + $0x30] sm:$0xff] %vm47_vm0, %v3978_v32 }
 0x7a6   :  { %v3897_v40 = vpop.permute.xlu1 %3896 }
 0x7a7   :  { %v3967_v29 = vsel %vm3955_vm5, %v3950_v23, %v3897_v40 }
 0x7a8   :  { %v3983_v50 = vadd.f32 %v4418_v49, %v3967_v29 }
 0x7a9   :  { %v3893_v21 = vpop.permute.xlu0 %3892 }
 0x7aa   :  { %3999 = vst.msk [vmem:[%s6805_s8 + $0x58] sm:$0xff] %vm47_vm0, %v3983_v50  ;;  %v3965_v5 = vsel %vm3955_vm5, %v3948_v19, %v3893_v21 }
 0x7ab   :  { %v3981_v35 = vadd.f32 %v4419_v26, %v3965_v5 }
 0x7ad   :  { %3997 = vst.msk [vmem:[%s6805_s8 + $0x48] sm:$0xff] %vm47_vm0, %v3981_v35 }
 0x7ae   :  { %v3891_v60 = vpop.permute.xlu1 %3890 }
 0x7af   :  { %v3964_v6 = vsel %vm3955_vm5, %v6562_v15, %v3891_v60 }
 0x7b0   :  { %v3980_v7 = vadd.f32 %v4420_v2, %v3964_v6 }
 0x7b1   :  { %v3899_v12 = vpop.permute.xlu0 %3898 }
 0x7b2   :  { %3996 = vst.msk [vmem:[%s6805_s8 + $0x40] sm:$0xff] %vm47_vm0, %v3980_v7  ;;  %v3968_v15 = vsel %vm3955_vm5, %v3951_v11, %v3899_v12 }
 0x7b3   :  { %v3984_v61 = vadd.f32 %v4421_v59, %v3968_v15 }
 0x7b5   :  { %4000 = vst.msk [vmem:[%s6805_s8 + $0x60] sm:$0xff] %vm47_vm0, %v3984_v61 }
 0x7b6   :  { %v3903_v43 = vpop.permute.xlu1 %3902 }
 0x7b7   :  { %v3970_v17 = vsel %vm3955_vm5, %v3953_v62, %v3903_v43 }
 0x7b8   :  { %v3986_v63 = vadd.f32 %v4422_v36, %v3970_v17 }
 0x7b9   :  { %v3905_v33 = vpop.permute.xlu0 %3904 }
 0x7ba   :  { %4002 = vst.msk [vmem:[%s6805_s8 + $0x70] sm:$0xff] %vm47_vm0, %v3986_v63  ;;  %v3971_v9 = vsel %vm3955_vm5, %v3954_v18, %v3905_v33 }
 0x7bb   :  { %v3987_v53 = vadd.f32 %v4423_v57, %v3971_v9 }
 0x7bd   :  { %4003 = vst.msk [vmem:[%s6805_s8 + $0x78] sm:$0xff] %vm47_vm0, %v3987_v53 }

// kernel: grn_transformer_forward.3
= control target key start
LH: loop header
LB: loop body
LE: loop exit
PB: predicated region body
PF: predicated region fallthrough
CT: control target
= control target key end

     0   :  { %15 = vsyncpa [#allocation3], 0  ;;  %s5458_s12 = smov [#allocation2]   ;;  %s5459_s14 = smov 384   ;;  %s8642_s0 = inlined_call_operand.vmem [shape: f32[128,32], index: 0, kind: input, shape index: {}]   ;;  %s8643_s1 = inlined_call_operand.vmem [shape: f32[1,32], index: 1, kind: input, shape index: {}]   ;;  %s8644_s2 = inlined_call_operand.vmem [shape: f32[1,32], index: 2, kind: input, shape index: {}]   ;;  %s8645_s3 = inlined_call_operand.hbm [shape: f32[32,352], index: 3, kind: input, shape index: {}]   ;;  %s8646_s4 = inlined_call_operand.vmem [shape: f32[1,352], index: 4, kind: input, shape index: {}]   ;;  %s8647_s5 = inlined_call_operand.vmem [shape: f32[64,256], index: 5, kind: input, shape index: {}]   ;;  %s8648_s6 = inlined_call_operand.vmem [shape: f32[4,128], index: 6, kind: input, shape index: {}]   ;;  %s8649_s7 = inlined_call_operand.vmem [shape: f32[128,4], index: 7, kind: input, shape index: {}]   ;;  %s8650_s8 = inlined_call_operand.vmem [shape: f32[128,32], index: 8, kind: output, shape index: {0}]   ;;  %s8651_s9 = inlined_call_operand.vmem [shape: f32[16,64], index: 9, kind: output, shape index: {1}]  }
   0x1   :  { %s26_s11 = sshll.u32 %s8645_s3, 4  ;;  %s28_s13 = sshll.u32 %s5458_s12, 4  ;;  %s27_s11 = int_to_ptr.hbm [resolvable:$true] %s26_s11  ;;  %s29_s13 = int_to_ptr.vmem [resolvable:$true] %s28_s13 }
   0x2   :  { %s5460_s15 = smov 24  }
   0x3   :  { %34 = dma.hbm_to_vmem [thread:$0]  %s27_s11, 1536, %s29_s13, [#allocation3], %s5459_s14, %s5459_s14, %s5460_s15  }
   0x4   :  { %5456 = dma.done.wait [#allocation3], 1536  }
   0x5   :  { %5457 = vsyncadd [#allocation3], 4294965760  ;;  %vm65_vm0 = vcmask 261120   ;;  %v5531_v0 = vld [vmem:[%s8642_s0 + $0x20] sm:$0xff]  ;;  %v49_v1 = vld [vmem:[%s8642_s0 + $0x10] sm:$0xff]  ;;  %v5461_v32 = vmov 32.0  }
   0x6   :  { %v47_v2 = vld [vmem:[%s8642_s0] sm:$0xff]  ;;  %v78_v3 = vsel %vm65_vm0, %v5531_v0, 0.0  ;;  %v72_v4 = vsel %vm65_vm0, %v49_v1, 0.0  ;;  %v5546_v6 = vld [vmem:[%s8642_s0 + $0x28] sm:$0xff]  ;;  %v5551_v7 = vld [vmem:[%s8642_s0 + $0x18] sm:$0xff]  ;;  %5314 = vrcp.f32 %v5461_v32  ;;  %s5463_s23 = smov 96  }
   0x7   :  { %v66_v5 = vsel %vm65_vm0, %v47_v2, 0.0  ;;  %79 = vadd.xlane.f32.xlu2 %v78_v3  ;;  %73 = vadd.xlane.f32.xlu1 %v72_v4  ;;  %v5556_v8 = vld [vmem:[%s8642_s0 + $0x8] sm:$0xff]  ;;  %v81_v9 = vsel %vm65_vm0, %v5546_v6, 0.0  ;;  %v75_v10 = vsel %vm65_vm0, %v5551_v7, 0.0  ;;  %v5567_v12 = vld [vmem:[%s8642_s0 + $0x40] sm:$0xff]  ;;  %v5572_v13 = vld [vmem:[%s8642_s0 + $0x30] sm:$0xff] }
   0x8   :  { %67 = vadd.xlane.f32.xlu0 %v66_v5  ;;  %v69_v11 = vsel %vm65_vm0, %v5556_v8, 0.0  ;;  %v5577_v14 = vld [vmem:[%s8642_s0 + $0x38] sm:$0xff]  ;;  %v90_v15 = vsel %vm65_vm0, %v5567_v12, 0.0  ;;  %v84_v16 = vsel %vm65_vm0, %v5572_v13, 0.0  ;;  %v5588_v18 = vld [vmem:[%s8642_s0 + $0x48] sm:$0xff]  ;;  %v5598_v20 = vld [vmem:[%s8642_s0 + $0x50] sm:$0xff] }
   0x9   :  { %v87_v17 = vsel %vm65_vm0, %v5577_v14, 0.0  ;;  %v5593_v19 = vld [vmem:[%s8642_s0 + $0x58] sm:$0xff]  ;;  %v93_v21 = vsel %vm65_vm0, %v5588_v18, 0.0  ;;  %v96_v23 = vsel %vm65_vm0, %v5598_v20, 0.0  ;;  %v5609_v24 = vld [vmem:[%s8642_s0 + $0x60] sm:$0xff]  ;;  %v5614_v25 = vld [vmem:[%s8642_s0 + $0x70] sm:$0xff] }
   0xa   :  { %v99_v22 = vsel %vm65_vm0, %v5593_v19, 0.0  ;;  %v5619_v26 = vld [vmem:[%s8642_s0 + $0x68] sm:$0xff]  ;;  %v102_v27 = vsel %vm65_vm0, %v5609_v24, 0.0  ;;  %v108_v28 = vsel %vm65_vm0, %v5614_v25, 0.0  ;;  %v5630_v30 = vld [vmem:[%s8642_s0 + $0x78] sm:$0xff]  ;;  %s5464_s24 = smov 56  }
   0xb   :  { %v105_v29 = vsel %vm65_vm0, %v5619_v26, 0.0  ;;  %v111_v31 = vsel %vm65_vm0, %v5630_v30, 0.0  ;;  %s5465_s25 = smov 48   ;;  %s5466_s26 = smov 32  }
   0xc   :  { %v5315_v33 = vpop.eup %5314  ;;  %s5468_s27 = smov 40   ;;  %s5472_s28 = smov 16  }
   0xd   :  { %v115_v34 = vmul.f32 32.0, %v5315_v33  ;;  %vm119_vm1 = vweird.f32 %v5315_v33  ;;  %s5473_s29 = smov 8  }
   0xf   :  { %82 = vadd.xlane.f32.xlu2 %v81_v9  ;;  %76 = vadd.xlane.f32.xlu1 %v75_v10  ;;  %v116_v35 = vsub.f32 1.0, %v115_v34 }
  0x10   :  { %70 = vadd.xlane.f32.xlu0 %v69_v11 }
  0x11   :  { %v117_v36 = vmul.f32 %v5315_v33, %v116_v35 }
  0x13   :  { %v118_v37 = vadd.f32 %v5315_v33, %v117_v36 }
  0x15   :  { %v5634_v38 = vsel %vm119_vm1, %v5315_v33, %v118_v37 }
  0x17   :  { %91 = vadd.xlane.f32.xlu2 %v90_v15  ;;  %85 = vadd.xlane.f32.xlu1 %v84_v16 }
  0x18   :  { %88 = vadd.xlane.f32.xlu0 %v87_v17 }
  0x1f   :  { %94 = vadd.xlane.f32.xlu1 %v93_v21  ;;  %100 = vadd.xlane.f32.xlu2 %v99_v22 }
  0x20   :  { %97 = vadd.xlane.f32.xlu0 %v96_v23 }
  0x27   :  { %103 = vadd.xlane.f32.xlu1 %v102_v27  ;;  %109 = vadd.xlane.f32.xlu2 %v108_v28 }
  0x28   :  { %106 = vadd.xlane.f32.xlu0 %v105_v29 }
  0x2f   :  { %112 = vadd.xlane.f32.xlu1 %v111_v31 }
  0x7a   :  { %v80_v39 = vpop.xlane.xlu2 %79  ;;  %v74_v40 = vpop.xlane.xlu1 %73 }
  0x7b   :  { %v123_v41 = vmul.f32 %v5634_v38, %v74_v40  ;;  %v68_v42 = vpop.xlane.xlu0 %67  ;;  %v125_v55 = vmul.f32 %v5634_v38, %v80_v39 }
  0x7c   :  { %v121_v43 = vmul.f32 %v5634_v38, %v68_v42 }
  0x7d   :  { %v5638_v44 = vsub.f32 %v49_v1, %v123_v41  ;;  %v5666_v62 = vsub.f32 %v5531_v0, %v125_v55 }
  0x7e   :  { %v5640_v45 = vsub.f32 %v47_v2, %v121_v43 }
  0x7f   :  { %v155_v46 = vmul.f32 %v5638_v44, %v5638_v44 }
  0x80   :  { %v153_v47 = vmul.f32 %v5640_v45, %v5640_v45 }
  0x81   :  { %v175_v48 = vsel %vm65_vm0, %v155_v46, 0.0 }
  0x82   :  { %v83_v49 = vpop.xlane.xlu2 %82  ;;  %176 = vadd.xlane.f32.xlu1 %v175_v48  ;;  %v77_v50 = vpop.xlane.xlu1 %76  ;;  %v169_v51 = vsel %vm65_vm0, %v153_v47, 0.0 }
  0x83   :  { %v126_v52 = vmul.f32 %v5634_v38, %v83_v49  ;;  %v124_v53 = vmul.f32 %v5634_v38, %v77_v50  ;;  %170 = vadd.xlane.f32.xlu0 %v169_v51  ;;  %v71_v54 = vpop.xlane.xlu0 %70 }
  0x84   :  { %v122_v56 = vmul.f32 %v5634_v38, %v71_v54 }
  0x85   :  { %v5653_v57 = vsub.f32 %v5546_v6, %v126_v52  ;;  %v5656_v58 = vsub.f32 %v5551_v7, %v124_v53 }
  0x86   :  { %v5659_v59 = vsub.f32 %v5556_v8, %v122_v56  ;;  %v157_v8 = vmul.f32 %v5666_v62, %v5666_v62 }
  0x87   :  { %v158_v60 = vmul.f32 %v5653_v57, %v5653_v57  ;;  %v156_v61 = vmul.f32 %v5656_v58, %v5656_v58 }
  0x88   :  { %v154_v63 = vmul.f32 %v5659_v59, %v5659_v59  ;;  %v181_v17 = vsel %vm65_vm0, %v157_v8, 0.0  ;;  %v464_v8 = vld [vmem:[#allocation2 + $0x8] sm:$0xff] }
  0x89   :  { %v184_v1 = vsel %vm65_vm0, %v158_v60, 0.0  ;;  %v178_v2 = vsel %vm65_vm0, %v156_v61, 0.0 }
  0x8a   :  { %v92_v3 = vpop.xlane.xlu2 %91  ;;  %185 = vadd.xlane.f32.xlu1 %v184_v1  ;;  %v86_v4 = vpop.xlane.xlu1 %85  ;;  %v172_v5 = vsel %vm65_vm0, %v154_v63, 0.0  ;;  %v472_v63 = vld [vmem:[#allocation2 + $0x48] sm:$0xff]  ;;  %v473_v1 = vld [vmem:[#allocation2 + $0x50] sm:$0xff] }
  0x8b   :  { %v129_v6 = vmul.f32 %v5634_v38, %v92_v3  ;;  %v127_v7 = vmul.f32 %v5634_v38, %v86_v4  ;;  %179 = vadd.xlane.f32.xlu0 %v178_v2  ;;  %173 = vadd.xlane.f32.xlu2 %v172_v5  ;;  %v89_v0 = vpop.xlane.xlu0 %88  ;;  %v474_v2 = vld [vmem:[#allocation2 + $0x58] sm:$0xff]  ;;  %v471_v4 = vld [vmem:[#allocation2 + $0x40] sm:$0xff] }
  0x8c   :  { %v128_v9 = vmul.f32 %v5634_v38, %v89_v0  ;;  %543 = vmatpush.msra.mxu0 %v472_v63  ;;  %608 = vmatpush.msra.mxu1 %v473_v1  ;;  %v470_v3 = vld [vmem:[#allocation2 + $0x38] sm:$0xff]  ;;  %v463_v0 = vld [vmem:[#allocation2] sm:$0xff] }
  0x8d   :  { %v5679_v10 = vsub.f32 %v5567_v12, %v129_v6  ;;  %v5682_v11 = vsub.f32 %v5572_v13, %v127_v7  ;;  %673 = vmatpush.msra.mxu2 %v474_v2  ;;  %v466_v5 = vld [vmem:[#allocation2 + $0x18] sm:$0xff]  ;;  %v467_v6 = vld [vmem:[#allocation2 + $0x20] sm:$0xff]  ;;  %v468_v7 = vld [vmem:[#allocation2 + $0x28] sm:$0xff] }
  0x8e   :  { %v5690_v21 = vsub.f32 %v5577_v14, %v128_v9  ;;  %609 = vmatpush.msra.mxu1 %v470_v3  ;;  %v465_v9 = vld [vmem:[#allocation2 + $0x10] sm:$0xff] }
  0x8f   :  { %v161_v15 = vmul.f32 %v5679_v10, %v5679_v10  ;;  %v159_v16 = vmul.f32 %v5682_v11, %v5682_v11  ;;  %674 = vmatpush.msra.mxu2 %v471_v4 }
  0x90   :  { %v160_v31 = vmul.f32 %v5690_v21, %v5690_v21  ;;  %610 = vmatpush.msra.mxu1 %v467_v6  ;;  %v5795_v6 = vld [vmem:[%s8643_s1] ss:$0 sm:$0xff] }
  0x91   :  { %v193_v22 = vsel %vm65_vm0, %v161_v15, 0.0  ;;  %v187_v23 = vsel %vm65_vm0, %v159_v16, 0.0  ;;  %675 = vmatpush.msra.mxu2 %v468_v7 }
  0x92   :  { %194 = vadd.xlane.f32.xlu1 %v193_v22  ;;  %v95_v12 = vpop.xlane.xlu1 %94  ;;  %v101_v27 = vpop.xlane.xlu2 %100  ;;  %v190_v35 = vsel %vm65_vm0, %v160_v31, 0.0  ;;  %611 = vmatpush.msra.mxu1 %v464_v8 }
  0x93   :  { %v130_v13 = vmul.f32 %v5634_v38, %v95_v12  ;;  %188 = vadd.xlane.f32.xlu0 %v187_v23  ;;  %182 = vadd.xlane.f32.xlu2 %v181_v17  ;;  %v98_v28 = vpop.xlane.xlu0 %97  ;;  %v132_v29 = vmul.f32 %v5634_v38, %v101_v27 }
  0x94   :  { %v131_v14 = vmul.f32 %v5634_v38, %v98_v28  ;;  %676 = vmatpush.msra.mxu2 %v465_v9 }
  0x95   :  { %v5700_v32 = vsub.f32 %v5588_v18, %v130_v13  ;;  %v5705_v34 = vsub.f32 %v5593_v19, %v132_v29 }
  0x96   :  { %v5709_v36 = vsub.f32 %v5598_v20, %v131_v14 }
  0x97   :  { %v162_v33 = vmul.f32 %v5700_v32, %v5700_v32  ;;  %v164_v19 = vmul.f32 %v5705_v34, %v5705_v34 }
  0x98   :  { %v163_v43 = vmul.f32 %v5709_v36, %v5709_v36 }
  0x99   :  { %v196_v37 = vsel %vm65_vm0, %v162_v33, 0.0  ;;  %v202_v49 = vsel %vm65_vm0, %v164_v19, 0.0 }
  0x9a   :  { %v104_v39 = vpop.xlane.xlu1 %103  ;;  %v110_v40 = vpop.xlane.xlu2 %109  ;;  %v199_v50 = vsel %vm65_vm0, %v163_v43, 0.0 }
  0x9b   :  { %v133_v41 = vmul.f32 %v5634_v38, %v104_v39  ;;  %197 = vadd.xlane.f32.xlu0 %v196_v37  ;;  %191 = vadd.xlane.f32.xlu2 %v190_v35  ;;  %v107_v18 = vpop.xlane.xlu0 %106  ;;  %v135_v42 = vmul.f32 %v5634_v38, %v110_v40 }
  0x9c   :  { %v134_v20 = vmul.f32 %v5634_v38, %v107_v18 }
  0x9d   :  { %v5720_v46 = vsub.f32 %v5609_v24, %v133_v41  ;;  %v5725_v48 = vsub.f32 %v5614_v25, %v135_v42 }
  0x9e   :  { %v5730_v51 = vsub.f32 %v5619_v26, %v134_v20 }
  0x9f   :  { %v165_v47 = vmul.f32 %v5720_v46, %v5720_v46  ;;  %v167_v54 = vmul.f32 %v5725_v48, %v5725_v48 }
  0xa0   :  { %v166_v25 = vmul.f32 %v5730_v51, %v5730_v51 }
  0xa1   :  { %v205_v52 = vsel %vm65_vm0, %v165_v47, 0.0  ;;  %v211_v56 = vsel %vm65_vm0, %v167_v54, 0.0 }
  0xa2   :  { %206 = vadd.xlane.f32.xlu1 %v205_v52  ;;  %v113_v53 = vpop.xlane.xlu1 %112  ;;  %v208_v60 = vsel %vm65_vm0, %v166_v25, 0.0 }
  0xa3   :  { %v136_v24 = vmul.f32 %v5634_v38, %v113_v53  ;;  %203 = vadd.xlane.f32.xlu0 %v202_v49  ;;  %200 = vadd.xlane.f32.xlu2 %v199_v50 }
  0xa5   :  { %v5739_v55 = vsub.f32 %v5630_v30, %v136_v24  ;;  %v469_v30 = vld [vmem:[#allocation2 + $0x30] sm:$0xff] }
  0xa6   :  { %544 = vmatpush.msra.mxu0 %v469_v30 }
  0xa7   :  { %v168_v26 = vmul.f32 %v5739_v55, %v5739_v55 }
  0xa8   :  { %545 = vmatpush.msra.mxu0 %v466_v5 }
  0xa9   :  { %v214_v61 = vsel %vm65_vm0, %v168_v26, 0.0 }
  0xaa   :  { %215 = vadd.xlane.f32.xlu1 %v214_v61  ;;  %546 = vmatpush.msra.mxu0 %v463_v0 }
  0xab   :  { %212 = vadd.xlane.f32.xlu0 %v211_v56  ;;  %209 = vadd.xlane.f32.xlu2 %v208_v60 }
  0xf5   :  { %v177_v15 = vpop.xlane.xlu1 %176 }
  0xf6   :  { %v219_v16 = vmul.f32 %v177_v15, %v5634_v38  ;;  %v171_v17 = vpop.xlane.xlu0 %170 }
  0xf7   :  { %v217_v22 = vmul.f32 %v171_v17, %v5634_v38  ;;  %v5805_v17 = vld [vmem:[%s8644_s2] ss:$0 sm:$0xff] }
  0xf8   :  { %v5748_v23 = vadd.f32 1e-05, %v219_v16 }
  0xf9   :  { %v233_v12 = vadd.f32 1e-05, %v217_v22 }
  0xfa   :  { %5316 = vrsqrt.f32 %v5748_v23  ;;  %vm275_vm5 = vweird.f32 %v5748_v23 }
  0xfb   :  { %5318 = vrsqrt.f32 %v233_v12  ;;  %vm255_vm3 = vweird.f32 %v233_v12 }
  0xfd   :  { %v186_v27 = vpop.xlane.xlu1 %185 }
  0xfe   :  { %v222_v13 = vmul.f32 %v186_v27, %v5634_v38  ;;  %v174_v28 = vpop.xlane.xlu2 %173  ;;  %v180_v29 = vpop.xlane.xlu0 %179 }
  0xff   :  { %v218_v31 = vmul.f32 %v174_v28, %v5634_v38  ;;  %v220_v14 = vmul.f32 %v180_v29, %v5634_v38 }
 0x100   :  { %v5754_v33 = vpop.eup %5316  ;;  %v5756_v35 = vadd.f32 1e-05, %v222_v13 }
 0x101   :  { %v5319_v37 = vpop.eup %5318  ;;  %v270_v39 = vmul.f32 %v5754_v33, %v5748_v23  ;;  %v5760_v40 = vadd.f32 1e-05, %v218_v31  ;;  %v5762_v41 = vadd.f32 1e-05, %v220_v14  ;;  %vm276_vm6 = vweird.f32 %v5754_v33 }
 0x102   :  { %v250_v18 = vmul.f32 %v5319_v37, %v233_v12  ;;  %5320 = vrsqrt.f32 %v5756_v35  ;;  %vm256_vm2 = vweird.f32 %v5319_v37  ;;  %vm5820_vm9 = vmor %vm275_vm5, %vm276_vm6  ;;  %vm305_vm15 = vweird.f32 %v5756_v35 }
 0x103   :  { %5322 = vrsqrt.f32 %v5760_v40  ;;  %v271_v42 = vmul.f32 %v5754_v33, %v270_v39  ;;  %vm257_vm4 = vmor %vm255_vm3, %vm256_vm2  ;;  %vm265_vm7 = vweird.f32 %v5760_v40  ;;  %vm285_vm11 = vweird.f32 %v5762_v41 }
 0x104   :  { %v251_v19 = vmul.f32 %v5319_v37, %v250_v18  ;;  %5324 = vrsqrt.f32 %v5762_v41 }
 0x105   :  { %v195_v43 = vpop.xlane.xlu1 %194  ;;  %v272_v24 = vmul.f32 0.5, %v271_v42 }
 0x106   :  { %v252_v20 = vmul.f32 0.5, %v251_v19  ;;  %v225_v47 = vmul.f32 %v195_v43, %v5634_v38  ;;  %v183_v49 = vpop.xlane.xlu2 %182  ;;  %v189_v50 = vpop.xlane.xlu0 %188 }
 0x107   :  { %v221_v52 = vmul.f32 %v183_v49, %v5634_v38  ;;  %v223_v26 = vmul.f32 %v189_v50, %v5634_v38  ;;  %v273_v3 = vsub.f32 1.5, %v272_v24 }
 0x108   :  { %v5770_v53 = vpop.eup %5320  ;;  %v253_v54 = vsub.f32 1.5, %v252_v20  ;;  %v5772_v25 = vadd.f32 1e-05, %v225_v47 }
 0x109   :  { %v5775_v56 = vpop.eup %5322  ;;  %v5777_v60 = vadd.f32 1e-05, %v221_v52  ;;  %v300_v2 = vmul.f32 %v5770_v53, %v5756_v35  ;;  %v5790_v5 = vadd.f32 1e-05, %v223_v26  ;;  %v274_v28 = vmul.f32 %v5754_v33, %v273_v3 }
 0x10a   :  { %v5779_v61 = vpop.eup %5324  ;;  %v254_v63 = vmul.f32 %v5319_v37, %v253_v54  ;;  %v260_v1 = vmul.f32 %v5775_v56, %v5760_v40  ;;  %5326 = vrsqrt.f32 %v5772_v25  ;;  %vm266_vm8 = vweird.f32 %v5775_v56 }
 0x10b   :  { %v280_v30 = vmul.f32 %v5779_v61, %v5762_v41  ;;  %5328 = vrsqrt.f32 %v5777_v60  ;;  %v301_v22 = vmul.f32 %v5770_v53, %v300_v2  ;;  %vm5836_vm10 = vmor %vm265_vm7, %vm266_vm8  ;;  %vm286_vm12 = vweird.f32 %v5779_v61 }
 0x10c   :  { %v261_v4 = vmul.f32 %v5775_v56, %v260_v1  ;;  %v258_v0 = vsel %vm257_vm4, %v5319_v37, %v254_v63  ;;  %5330 = vrsqrt.f32 %v5790_v5  ;;  %v278_v50 = vsel %vm5820_vm9, %v5754_v33, %v274_v28  ;;  %vm5886_vm1 = vmor %vm285_vm11, %vm286_vm12 }
 0x10d   :  { %v281_v7 = vmul.f32 %v5779_v61, %v280_v30  ;;  %v409_v16 = vmul.f32 %v258_v0, %v5640_v45  ;;  %v302_v20 = vmul.f32 0.5, %v301_v22  ;;  %vm295_vm13 = vweird.f32 %v5777_v60 }
 0x10e   :  { %v262_v8 = vmul.f32 0.5, %v261_v4  ;;  %v192_v9 = vpop.xlane.xlu2 %191  ;;  %v198_v15 = vpop.xlane.xlu0 %197  ;;  %vm306_vm2 = vweird.f32 %v5770_v53  ;;  %vm335_vm4 = vweird.f32 %v5772_v25  ;;  %vm315_vm6 = vweird.f32 %v5790_v5 }
 0x10f   :  { %v224_v12 = vmul.f32 %v192_v9, %v5634_v38  ;;  %v226_v27 = vmul.f32 %v198_v15, %v5634_v38  ;;  %v428_v45 = vmul.f32 %v5795_v6, %v409_v16  ;;  %v282_v14 = vmul.f32 0.5, %v281_v7 }
 0x110   :  { %v5811_v13 = vpop.eup %5326  ;;  %v263_v29 = vsub.f32 1.5, %v262_v8  ;;  %v303_v30 = vsub.f32 1.5, %v302_v20  ;;  %v411_v7 = vmul.f32 %v278_v50, %v5638_v44 }
 0x111   :  { %v330_v37 = vmul.f32 %v5811_v13, %v5772_v25  ;;  %v5826_v39 = vpop.eup %5328  ;;  %v5829_v42 = vadd.f32 1e-05, %v224_v12  ;;  %v5831_v19 = vadd.f32 1e-05, %v226_v27  ;;  %v447_v43 = vadd.f32 %v5805_v17, %v428_v45 }
 0x112   :  { %v264_v18 = vmul.f32 %v5775_v56, %v263_v29  ;;  %v290_v47 = vmul.f32 %v5826_v39, %v5777_v60  ;;  %v5843_v49 = vpop.eup %5330  ;;  %v283_v52 = vsub.f32 1.5, %v282_v14  ;;  %vm296_vm14 = vweird.f32 %v5826_v39 }
 0x113   :  { %5332 = vrsqrt.f32 %v5829_v42  ;;  %4821 = vmatmul.msk.f32.vlgmr.msra.gmra.mxu0 %vm65_vm0, %v447_v43  ;;  %4837 = vmatmul.msk.f32.vlgmr.msra.gmra.mxu1 %vm65_vm0, %v447_v43  ;;  %v310_v54 = vmul.f32 %v5843_v49, %v5790_v5  ;;  %v331_v63 = vmul.f32 %v5811_v13, %v330_v37  ;;  %vm5896_vm3 = vmor %vm295_vm13, %vm296_vm14  ;;  %v430_v41 = vmul.f32 %v5795_v6, %v411_v7 }
 0x114   :  { %v268_v40 = vsel %vm5836_vm10, %v5775_v56, %v264_v18  ;;  %v291_v24 = vmul.f32 %v5826_v39, %v290_v47  ;;  %4853 = vmatmul.msk.f32.vlgmr.msra.gmra.mxu2 %vm65_vm0, %v447_v43  ;;  %5334 = vrsqrt.f32 %v5831_v19  ;;  %v284_v16 = vmul.f32 %v5779_v61, %v283_v52  ;;  %vm5958_vm10 = vmor %vm305_vm15, %vm306_vm2 }
 0x115   :  { %v207_v26 = vpop.xlane.xlu1 %206  ;;  %v410_v33 = vmul.f32 %v268_v40, %v5659_v59  ;;  %v311_v0 = vmul.f32 %v5843_v49, %v310_v54  ;;  %v332_v27 = vmul.f32 0.5, %v331_v63  ;;  %v5905_v18 = vmul.f32 %v5770_v53, %v303_v30 }
 0x116   :  { %v229_v56 = vmul.f32 %v207_v26, %v5634_v38  ;;  %v201_v1 = vpop.xlane.xlu2 %200  ;;  %v204_v2 = vpop.xlane.xlu0 %203  ;;  %v292_v3 = vmul.f32 0.5, %v291_v24  ;;  %vm336_vm5 = vweird.f32 %v5811_v13  ;;  %v288_v52 = vsel %vm5886_vm1, %v5779_v61, %v284_v16 }
 0x117   :  { %v227_v4 = vmul.f32 %v201_v1, %v5634_v38  ;;  %v228_v9 = vmul.f32 %v204_v2, %v5634_v38  ;;  %v429_v15 = vmul.f32 %v5795_v6, %v410_v33  ;;  %v312_v37 = vmul.f32 0.5, %v311_v0  ;;  %vm5992_vm15 = vmor %vm335_vm4, %vm336_vm5 }
 0x118   :  { %v5867_v8 = vadd.f32 1e-05, %v229_v56  ;;  %v293_v22 = vsub.f32 1.5, %v292_v3  ;;  %v333_v23 = vsub.f32 1.5, %v332_v27  ;;  %vm316_vm7 = vweird.f32 %v5843_v49 }
 0x119   :  { %v5873_v59 = vadd.f32 1e-05, %v227_v4  ;;  %v5875_v12 = vpop.eup %5332  ;;  %v5878_v44 = vadd.f32 1e-05, %v228_v9  ;;  %v448_v28 = vadd.f32 %v5805_v17, %v429_v15  ;;  %v313_v1 = vsub.f32 1.5, %v312_v37 }
 0x11a   :  { %5336 = vrsqrt.f32 %v5867_v8  ;;  %v294_v45 = vmul.f32 %v5826_v39, %v293_v22  ;;  %v5891_v31 = vpop.eup %5334  ;;  %v320_v60 = vmul.f32 %v5875_v12, %v5829_v42  ;;  %vm345_vm8 = vweird.f32 %v5831_v19 }
 0x11b   :  { %5338 = vrsqrt.f32 %v5873_v59  ;;  %4822 = vmatmul.msk.f32.gmra.mxu0 %vm65_vm0, %v448_v28  ;;  %4838 = vmatmul.msk.f32.gmra.mxu1 %vm65_vm0, %v448_v28  ;;  %v340_v43 = vmul.f32 %v5891_v31, %v5831_v19  ;;  %v449_v61 = vadd.f32 %v5805_v17, %v430_v41  ;;  %v412_v3 = vmul.f32 %v288_v52, %v5656_v58 }
 0x11c   :  { %4854 = vmatmul.msk.f32.gmra.mxu2 %vm65_vm0, %v448_v28  ;;  %5340 = vrsqrt.f32 %v5878_v44  ;;  %v298_v63 = vsel %vm5896_vm3, %v5826_v39, %v294_v45  ;;  %v321_v33 = vmul.f32 %v5875_v12, %v320_v60  ;;  %v5946_v9 = vmul.f32 %v5811_v13, %v333_v23 }
 0x11d   :  { %v216_v20 = vpop.xlane.xlu1 %215  ;;  %v341_v24 = vmul.f32 %v5891_v31, %v340_v43  ;;  %v413_v0 = vmul.f32 %v298_v63, %v5666_v62  ;;  %vm355_vm9 = vweird.f32 %v5873_v59  ;;  %v5963_v62 = vmul.f32 %v5843_v49, %v313_v1 }
 0x11e   :  { %v232_v47 = vmul.f32 %v216_v20, %v5634_v38  ;;  %v210_v40 = vpop.xlane.xlu2 %209  ;;  %v213_v50 = vpop.xlane.xlu0 %212  ;;  %vm346_vm11 = vweird.f32 %v5891_v31  ;;  %vm375_vm12 = vweird.f32 %v5867_v8  ;;  %vm365_vm13 = vweird.f32 %v5878_v44 }
 0x11f   :  { %v230_v54 = vmul.f32 %v210_v40, %v5634_v38  ;;  %v231_v26 = vmul.f32 %v213_v50, %v5634_v38  ;;  %v342_v30 = vmul.f32 0.5, %v341_v24  ;;  %v5975_v45 = vmul.f32 0.5, %v321_v33  ;;  %vm6020_vm5 = vmor %vm345_vm8, %vm346_vm11 }
 0x120   :  { %v5926_v56 = vpop.eup %5336  ;;  %v5930_v2 = vadd.f32 1e-05, %v232_v47  ;;  %v431_v14 = vmul.f32 %v5795_v6, %v412_v3  ;;  %v432_v37 = vmul.f32 %v5795_v6, %v413_v0  ;;  %v308_v43 = vsel %vm5958_vm10, %v5770_v53, %v5905_v18  ;;  %vm6003_vm10 = vmor %vm315_vm6, %vm316_vm7 }
 0x121   :  { %v370_v38 = vmul.f32 %v5926_v56, %v5867_v8  ;;  %v5937_v39 = vpop.eup %5338  ;;  %v5940_v4 = vadd.f32 1e-05, %v230_v54  ;;  %v5942_v7 = vadd.f32 1e-05, %v231_v26  ;;  %v343_v35 = vsub.f32 1.5, %v342_v30 }
 0x122   :  { %5342 = vrsqrt.f32 %v5930_v2  ;;  %v350_v16 = vmul.f32 %v5937_v39, %v5873_v59  ;;  %v5952_v58 = vpop.eup %5340  ;;  %vm376_vm14 = vweird.f32 %v5926_v56  ;;  %vm356_vm1 = vweird.f32 %v5937_v39  ;;  %v753_v59 = vld [vmem:[%s8647_s5 + $0x58] sm:$0xff] }
 0x123   :  { %v371_v15 = vmul.f32 %v5926_v56, %v370_v38  ;;  %5344 = vrsqrt.f32 %v5940_v4  ;;  %4823 = vmatmul.msk.f32.gmra.mxu0 %vm65_vm0, %v449_v61  ;;  %4839 = vmatmul.msk.f32.gmra.mxu1 %vm65_vm0, %v449_v61  ;;  %v360_v29 = vmul.f32 %v5952_v58, %v5878_v44  ;;  %vm405_vm2 = vweird.f32 %v5930_v2  ;;  %vm6037_vm6 = vmor %vm355_vm9, %vm356_vm1  ;;  %v746_v44 = vld [vmem:[%s8647_s5 + $0x20] sm:$0xff] }
 0x124   :  { %v351_v28 = vmul.f32 %v5937_v39, %v350_v16  ;;  %4855 = vmatmul.msk.f32.gmra.mxu2 %vm65_vm0, %v449_v61  ;;  %5346 = vrsqrt.f32 %v5942_v7  ;;  %vm385_vm3 = vweird.f32 %v5940_v4  ;;  %v344_v25 = vmul.f32 %v5891_v31, %v343_v35 }
 0x125   :  { %v372_v27 = vmul.f32 0.5, %v371_v15  ;;  %v361_v60 = vmul.f32 %v5952_v58, %v360_v29  ;;  %vm366_vm4 = vweird.f32 %v5952_v58  ;;  %v450_v24 = vadd.f32 %v5805_v17, %v431_v14 }
 0x126   :  { %v352_v41 = vmul.f32 0.5, %v351_v28  ;;  %v451_v54 = vadd.f32 %v5805_v17, %v432_v37  ;;  %v414_v5 = vmul.f32 %v308_v43, %v5653_v57  ;;  %v338_v33 = vsel %vm5992_vm15, %v5811_v13, %v5946_v9  ;;  %vm6053_vm8 = vmor %vm365_vm13, %vm366_vm4 }
 0x127   :  { %v373_v47 = vsub.f32 1.5, %v372_v27  ;;  %v362_v40 = vmul.f32 0.5, %v361_v60  ;;  %vm395_vm7 = vweird.f32 %v5942_v7  ;;  %v318_v13 = vsel %vm6003_vm10, %v5843_v49, %v5963_v62  ;;  %vm6067_vm13 = vmor %vm375_vm12, %vm376_vm14 }
 0x128   :  { %v5986_v20 = vpop.eup %5342  ;;  %v353_v18 = vsub.f32 1.5, %v352_v41  ;;  %v417_v49 = vmul.f32 %v338_v33, %v5679_v10  ;;  %v348_v35 = vsel %vm6020_vm5, %v5891_v31, %v344_v25  ;;  %vm1130_vm4 = vcmask 785920  }
 0x129   :  { %v400_v50 = vmul.f32 %v5986_v20, %v5930_v2  ;;  %v6010_v52 = vpop.eup %5344  ;;  %v363_v63 = vsub.f32 1.5, %v362_v40  ;;  %v374_v30 = vmul.f32 %v5926_v56, %v373_v47  ;;  %vm406_vm9 = vweird.f32 %v5986_v20 }
 0x12a   :  { %v380_v61 = vmul.f32 %v6010_v52, %v5940_v4  ;;  %v5347_v57 = vpop.eup %5346  ;;  %v354_v19 = vmul.f32 %v5937_v39, %v353_v18  ;;  %vm386_vm11 = vweird.f32 %v6010_v52  ;;  %v436_v27 = vmul.f32 %v5795_v6, %v417_v49  ;;  %vm6085_vm12 = vmor %vm405_vm2, %vm406_vm9  ;;  %v749_v49 = vld [vmem:[%s8647_s5 + $0x38] sm:$0xff] }
 0x12b   :  { %v401_v1 = vmul.f32 %v5986_v20, %v400_v50  ;;  %4824 = vmatmul.msk.f32.gmra.mxu0 %vm65_vm0, %v450_v24  ;;  %4840 = vmatmul.msk.f32.gmra.mxu1 %vm65_vm0, %v450_v24  ;;  %v364_v3 = vmul.f32 %v5952_v58, %v363_v63  ;;  %v390_v15 = vmul.f32 %v5347_v57, %v5942_v7  ;;  %vm396_vm15 = vweird.f32 %v5347_v57  ;;  %vm6094_vm14 = vmor %vm385_vm3, %vm386_vm11 }
 0x12c   :  { %v381_v9 = vmul.f32 %v6010_v52, %v380_v61  ;;  %4856 = vmatmul.msk.f32.gmra.mxu2 %vm65_vm0, %v450_v24  ;;  %v418_v28 = vmul.f32 %v348_v35, %v5700_v32  ;;  %v358_v10 = vsel %vm6037_vm6, %v5937_v39, %v354_v19  ;;  %v378_v60 = vsel %vm6067_vm13, %v5926_v56, %v374_v30  ;;  %vm6110_vm1 = vmor %vm395_vm7, %vm396_vm15  ;;  %v742_v35 = vld [vmem:[%s8647_s5] sm:$0xff] }
 0x12d   :  { %v402_v0 = vmul.f32 0.5, %v401_v1  ;;  %v391_v62 = vmul.f32 %v5347_v57, %v390_v15  ;;  %v368_v8 = vsel %vm6053_vm8, %v5952_v58, %v364_v3  ;;  %v419_v32 = vmul.f32 %v358_v10, %v5709_v36  ;;  %v752_v3 = vld [vmem:[%s8647_s5 + $0x50] sm:$0xff] }
 0x12e   :  { %v382_v22 = vmul.f32 0.5, %v381_v9  ;;  %v455_v58 = vadd.f32 %v5805_v17, %v436_v27  ;;  %v437_v2 = vmul.f32 %v5795_v6, %v418_v28  ;;  %v420_v41 = vmul.f32 %v368_v8, %v5705_v34  ;;  %v751_v9 = vld [vmem:[%s8647_s5 + $0x48] sm:$0xff]  ;;  %v748_v15 = vld [vmem:[%s8647_s5 + $0x30] sm:$0xff]  ;;  %v475_v28 = vld [vmem:[%s8646_s4] sm:$0x7] }
 0x12f   :  { %v403_v16 = vsub.f32 1.5, %v402_v0  ;;  %v392_v37 = vmul.f32 0.5, %v391_v62  ;;  %v438_v23 = vmul.f32 %v5795_v6, %v419_v32  ;;  %v421_v4 = vmul.f32 %v378_v60, %v5720_v46  ;;  %v750_v0 = vld [vmem:[%s8647_s5 + $0x40] sm:$0xff]  ;;  %v745_v62 = vld [vmem:[%s8647_s5 + $0x18] sm:$0xff]  ;;  %v743_v27 = vld [vmem:[%s8647_s5 + $0x8] sm:$0xff] }
 0x130   :  { %v383_v31 = vsub.f32 1.5, %v382_v22  ;;  %v456_v34 = vadd.f32 %v5805_v17, %v437_v2  ;;  %v439_v56 = vmul.f32 %v5795_v6, %v420_v41  ;;  %v433_v40 = vmul.f32 %v5795_v6, %v414_v5  ;;  %v744_v22 = vld [vmem:[%s8647_s5 + $0x10] sm:$0xff] }
 0x131   :  { %v404_v29 = vmul.f32 %v5986_v20, %v403_v16  ;;  %v393_v43 = vsub.f32 1.5, %v392_v37  ;;  %v457_v7 = vadd.f32 %v5805_v17, %v438_v23  ;;  %v440_v25 = vmul.f32 %v5795_v6, %v421_v4  ;;  %v747_v16 = vld [vmem:[%s8647_s5 + $0x28] sm:$0xff] }
 0x132   :  { %v384_v36 = vmul.f32 %v6010_v52, %v383_v31  ;;  %v458_v50 = vadd.f32 %v5805_v17, %v439_v56  ;;  %vm325_vm2 = vweird.f32 %v5829_v42  ;;  %vm326_vm3 = vweird.f32 %v5875_v12 }
 0x133   :  { %4825 = vmatmul.msk.f32.gmra.mxu0 %vm65_vm0, %v451_v54  ;;  %4841 = vmatmul.msk.f32.gmra.mxu1 %vm65_vm0, %v451_v54  ;;  %v408_v53 = vsel %vm6085_vm12, %v5986_v20, %v404_v29  ;;  %v394_v46 = vmul.f32 %v5347_v57, %v393_v43  ;;  %v323_v20 = vsub.f32 1.5, %v5975_v45  ;;  %vm327_vm10 = vmor %vm325_vm2, %vm326_vm3  ;;  %v6252_v10 = vperm.slane %v475_v28, 1 }
 0x134   :  { %4857 = vmatmul.msk.f32.gmra.mxu2 %vm65_vm0, %v451_v54  ;;  %v388_v18 = vsel %vm6094_vm14, %v6010_v52, %v384_v36  ;;  %v424_v26 = vmul.f32 %v408_v53, %v5739_v55  ;;  %v459_v54 = vadd.f32 %v5805_v17, %v440_v25  ;;  %v452_v55 = vadd.f32 %v5805_v17, %v433_v40 }
 0x135   :  { %v422_v24 = vmul.f32 %v388_v18, %v5730_v51  ;;  %v398_v63 = vsel %vm6110_vm1, %v5347_v57, %v394_v46  ;;  %v415_v51 = vmul.f32 %v318_v13, %v5682_v11  ;;  %vm1033_vm5 = vcmask 523520  }
 0x136   :  { %v423_v61 = vmul.f32 %v398_v63, %v5725_v48  ;;  %v443_v52 = vmul.f32 %v5795_v6, %v424_v26  ;;  %v324_v48 = vmul.f32 %v5875_v12, %v323_v20  ;;  %v6263_v32 = vperm.slane %v475_v28, 0 }
 0x137   :  { %v441_v1 = vmul.f32 %v5795_v6, %v422_v24  ;;  %v434_v11 = vmul.f32 %v5795_v6, %v415_v51  ;;  %v6265_v39 = vperm.slane %v475_v28, 2  ;;  %vm758_vm6 = vcmask 523264  }
 0x138   :  { %v442_v5 = vmul.f32 %v5795_v6, %v423_v61  ;;  %v6147_v33 = vadd.f32 %v5805_v17, %v443_v52  ;;  %v328_v57 = vsel %vm327_vm10, %v5875_v12, %v324_v48  ;;  %v755_v12 = vld [vmem:[%s8647_s5 + $0x68] sm:$0xff]  ;;  %vm1227_vm7 = vcmask 1048320  }
 0x139   :  { %v6143_v45 = vadd.f32 %v5805_v17, %v441_v1  ;;  %v453_v30 = vadd.f32 %v5805_v17, %v434_v11  ;;  %v416_v19 = vmul.f32 %v328_v57, %v5690_v21  ;;  %v756_v21 = vld [vmem:[%s8647_s5 + $0x70] sm:$0xff]  ;;  %vm1553_vm8 = vcmask 1043456  }
 0x13a   :  { %v6153_v42 = vadd.f32 %v5805_v17, %v442_v5  ;;  %815 = vmatpush.msra.mxu3 %v756_v21  ;;  %vm1324_vm9 = vcmask 7168   ;;  %vm1341_vm11 = vcmask 15360   ;;  %vm1358_vm15 = vcmask 23552  }
 0x13b   :  { %4826 = vmatmul.msk.f32.gmra.mxu0 %vm65_vm0, %v452_v55  ;;  %4842 = vmatmul.msk.f32.gmra.mxu1 %vm65_vm0, %v452_v55  ;;  %v435_v38 = vmul.f32 %v5795_v6, %v416_v19  ;;  %v757_v6 = vld [vmem:[%s8647_s5 + $0x78] sm:$0xff]  ;;  %vm1423_vm13 = vcmask 31744   ;;  %vm2388_vm12 = vcmask 130048  }
 0x13c   :  { %4858 = vmatmul.msk.f32.gmra.mxu2 %vm65_vm0, %v452_v55  ;;  %880 = vmatpush.msrb.mxu0 %v757_v6 }
 0x13d   :  { %v454_v13 = vadd.f32 %v5805_v17, %v435_v38  ;;  %v754_v17 = vld [vmem:[%s8647_s5 + $0x60] sm:$0xff] }
 0x13e   :  { %816 = vmatpush.msra.mxu3 %v754_v17  ;;  %881 = vmatpush.msrb.mxu0 %v755_v12 }
 0x140   :  { %817 = vmatpush.msra.mxu3 %v752_v3  ;;  %882 = vmatpush.msrb.mxu0 %v753_v59 }
 0x142   :  { %818 = vmatpush.msra.mxu3 %v750_v0  ;;  %883 = vmatpush.msrb.mxu0 %v751_v9 }
 0x143   :  { %4827 = vmatmul.msk.f32.gmra.mxu0 %vm65_vm0, %v453_v30  ;;  %4843 = vmatmul.msk.f32.gmra.mxu1 %vm65_vm0, %v453_v30 }
 0x144   :  { %4859 = vmatmul.msk.f32.gmra.mxu2 %vm65_vm0, %v453_v30  ;;  %819 = vmatpush.msra.mxu3 %v748_v15 }
 0x145   :  { %884 = vmatpush.msrb.mxu0 %v749_v49 }
 0x146   :  { %820 = vmatpush.msra.mxu3 %v746_v44 }
 0x147   :  { %885 = vmatpush.msrb.mxu0 %v747_v16 }
 0x148   :  { %821 = vmatpush.msra.mxu3 %v744_v22 }
 0x149   :  { %886 = vmatpush.msrb.mxu0 %v745_v62 }
 0x14a   :  { %822 = vmatpush.msra.mxu3 %v742_v35 }
 0x14b   :  { %4828 = vmatmul.msk.f32.gmra.mxu0 %vm65_vm0, %v454_v13  ;;  %4844 = vmatmul.msk.f32.gmra.mxu1 %vm65_vm0, %v454_v13 }
 0x14c   :  { %4860 = vmatmul.msk.f32.gmra.mxu2 %vm65_vm0, %v454_v13  ;;  %887 = vmatpush.msrb.mxu0 %v743_v27 }
 0x153   :  { %4829 = vmatmul.msk.f32.gmra.mxu0 %vm65_vm0, %v455_v58  ;;  %4845 = vmatmul.msk.f32.gmra.mxu1 %vm65_vm0, %v455_v58 }
 0x154   :  { %4861 = vmatmul.msk.f32.gmra.mxu2 %vm65_vm0, %v455_v58 }
 0x15b   :  { %4830 = vmatmul.msk.f32.gmra.mxu0 %vm65_vm0, %v456_v34  ;;  %4846 = vmatmul.msk.f32.gmra.mxu1 %vm65_vm0, %v456_v34 }
 0x15c   :  { %4862 = vmatmul.msk.f32.gmra.mxu2 %vm65_vm0, %v456_v34 }
 0x163   :  { %4831 = vmatmul.msk.f32.gmra.mxu0 %vm65_vm0, %v457_v7  ;;  %4847 = vmatmul.msk.f32.gmra.mxu1 %vm65_vm0, %v457_v7 }
 0x164   :  { %4863 = vmatmul.msk.f32.gmra.mxu2 %vm65_vm0, %v457_v7 }
 0x16b   :  { %4832 = vmatmul.msk.f32.gmra.mxu0 %vm65_vm0, %v458_v50  ;;  %4848 = vmatmul.msk.f32.gmra.mxu1 %vm65_vm0, %v458_v50 }
 0x16c   :  { %4864 = vmatmul.msk.f32.gmra.mxu2 %vm65_vm0, %v458_v50 }
 0x173   :  { %4833 = vmatmul.msk.f32.gmra.mxu0 %vm65_vm0, %v459_v54  ;;  %4849 = vmatmul.msk.f32.gmra.mxu1 %vm65_vm0, %v459_v54 }
 0x174   :  { %4865 = vmatmul.msk.f32.gmra.mxu2 %vm65_vm0, %v459_v54 }
 0x17b   :  { %4834 = vmatmul.msk.f32.gmra.mxu0 %vm65_vm0, %v6143_v45  ;;  %4850 = vmatmul.msk.f32.gmra.mxu1 %vm65_vm0, %v6143_v45 }
 0x17c   :  { %4866 = vmatmul.msk.f32.gmra.mxu2 %vm65_vm0, %v6143_v45 }
 0x183   :  { %4835 = vmatmul.msk.f32.gmra.mxu0 %vm65_vm0, %v6153_v42  ;;  %4851 = vmatmul.msk.f32.gmra.mxu1 %vm65_vm0, %v6153_v42 }
 0x184   :  { %4867 = vmatmul.msk.f32.gmra.mxu2 %vm65_vm0, %v6153_v42 }
 0x18b   :  { %4836 = vmatmul.msk.f32.gmra.mxu0 %vm65_vm0, %v6147_v33  ;;  %4852 = vmatmul.msk.f32.gmra.mxu1 %vm65_vm0, %v6147_v33 }
 0x18c   :  { %4868 = vmatmul.msk.f32.gmra.mxu2 %vm65_vm0, %v6147_v33 }
 0x190   :  { %v613_v8 = vpop.f32.mrf.mxu1  ;;  %v548_v58 = vpop.f32.mrf.mxu0 }
 0x191   :  { %v6255_v29 = vadd.f32 %v613_v8, %v6252_v10  ;;  %v6268_v41 = vadd.f32 %v548_v58, %v6263_v32 }
 0x193   :  { %v1179_v14 = vsel %vm1130_vm4, %v6255_v29, -inf  ;;  %v1082_v31 = vsel %vm1033_vm5, %v6255_v29, -inf  ;;  %v985_v37 = vsel %vm65_vm0, %v6255_v29, -inf  ;;  %v1276_v43 = vsel %vm1227_vm7, %v6255_v29, -inf }
 0x194   :  { %1180 = vmax.xlane.f32.xlu0 %v1179_v14  ;;  %1083 = vmax.xlane.f32.xlu1 %v1082_v31  ;;  %v1131_v23 = vsel %vm1130_vm4, %v6268_v41, -inf  ;;  %v1034_v47 = vsel %vm1033_vm5, %v6268_v41, -inf  ;;  %v937_v25 = vsel %vm65_vm0, %v6268_v41, -inf  ;;  %v1228_v1 = vsel %vm1227_vm7, %v6268_v41, -inf }
 0x195   :  { %986 = vmax.xlane.f32.xlu2 %v985_v37 }
 0x197   :  { %v678_v2 = vpop.f32.mrf.mxu2 }
 0x198   :  { %v6271_v60 = vadd.f32 %v678_v2, %v6265_v39  ;;  %v616_v4 = vpop.f32.mrf.mxu1  ;;  %v551_v18 = vpop.f32.mrf.mxu0 }
 0x199   :  { %v6284_v56 = vadd.f32 %v616_v4, %v6252_v10  ;;  %v6300_v24 = vadd.f32 %v551_v18, %v6263_v32 }
 0x19a   :  { %8707 = vst [vmem:[#allocation5_spill] sm:$0xff] %v6271_v60  ;;  %v726_v36 = vmul.f32 %v6271_v60, %v6271_v60 }
 0x19b   :  { %v1182_v7 = vsel %vm1130_vm4, %v6284_v56, -inf  ;;  %v988_v40 = vsel %vm65_vm0, %v6284_v56, -inf  ;;  %v1134_v63 = vsel %vm1130_vm4, %v6300_v24, -inf  ;;  %v1279_v52 = vsel %vm1227_vm7, %v6284_v56, -inf }
 0x19c   :  { %4869 = vmatmul.msk.f32.vlgmr.msra.gmra.mxu3 %vm758_vm6, %v726_v36  ;;  %4885 = vmatmul.msk.f32.vlgmr.msrb.gmra.mxu0 %vm758_vm6, %v726_v36  ;;  %v1085_v42 = vsel %vm1033_vm5, %v6284_v56, -inf  ;;  %v1037_v11 = vsel %vm1033_vm5, %v6300_v24, -inf  ;;  %v940_v21 = vsel %vm65_vm0, %v6300_v24, -inf  ;;  %v1231_v49 = vsel %vm1227_vm7, %v6300_v24, -inf }
 0x19d   :  { %1277 = vmax.xlane.f32.xlu2 %v1276_v43  ;;  %1132 = vmax.xlane.f32.xlu1 %v1131_v23 }
 0x19e   :  { %1035 = vmax.xlane.f32.xlu0 %v1034_v47 }
 0x19f   :  { %v681_v34 = vpop.f32.mrf.mxu2 }
 0x1a0   :  { %v6287_v53 = vadd.f32 %v681_v34, %v6265_v39  ;;  %v619_v61 = vpop.f32.mrf.mxu1  ;;  %v554_v6 = vpop.f32.mrf.mxu0 }
 0x1a1   :  { %v6318_v55 = vadd.f32 %v619_v61, %v6252_v10  ;;  %v6353_v3 = vadd.f32 %v554_v6, %v6263_v32 }
 0x1a2   :  { %8708 = vst [vmem:[#allocation6_spill] sm:$0xff] %v6287_v53  ;;  %v727_v46 = vmul.f32 %v6287_v53, %v6287_v53 }
 0x1a3   :  { %v991_v48 = vsel %vm65_vm0, %v6318_v55, -inf  ;;  %v1282_v13 = vsel %vm1227_vm7, %v6318_v55, -inf  ;;  %v1088_v17 = vsel %vm1033_vm5, %v6318_v55, -inf  ;;  %v1040_v15 = vsel %vm1033_vm5, %v6353_v3, -inf }
 0x1a4   :  { %4870 = vmatmul.msk.f32.gmra.mxu3 %vm758_vm6, %v727_v46  ;;  %4886 = vmatmul.msk.f32.gmra.mxu0 %vm758_vm6, %v727_v46  ;;  %v943_v16 = vsel %vm65_vm0, %v6353_v3, -inf  ;;  %v1185_v8 = vsel %vm1130_vm4, %v6318_v55, -inf  ;;  %v1234_v37 = vsel %vm1227_vm7, %v6353_v3, -inf  ;;  %v1137_v47 = vsel %vm1130_vm4, %v6353_v3, -inf }
 0x1a5   :  { %1183 = vmax.xlane.f32.xlu1 %v1182_v7  ;;  %938 = vmax.xlane.f32.xlu2 %v937_v25 }
 0x1a6   :  { %989 = vmax.xlane.f32.xlu0 %v988_v40 }
 0x1a7   :  { %v684_v50 = vpop.f32.mrf.mxu2 }
 0x1a8   :  { %v6303_v26 = vadd.f32 %v684_v50, %v6265_v39  ;;  %v622_v44 = vpop.f32.mrf.mxu1  ;;  %v557_v31 = vpop.f32.mrf.mxu0 }
 0x1a9   :  { %v6373_v62 = vadd.f32 %v622_v44, %v6252_v10  ;;  %v6395_v36 = vadd.f32 %v557_v31, %v6263_v32 }
 0x1aa   :  { %8709 = vst [vmem:[#allocation7_spill] sm:$0xff] %v6303_v26  ;;  %v728_v20 = vmul.f32 %v6303_v26, %v6303_v26 }
 0x1ab   :  { %v1091_v14 = vsel %vm1033_vm5, %v6373_v62, -inf  ;;  %v1043_v34 = vsel %vm1033_vm5, %v6395_v36, -inf  ;;  %v1188_v7 = vsel %vm1130_vm4, %v6373_v62, -inf }
 0x1ac   :  { %4871 = vmatmul.msk.f32.gmra.mxu3 %vm758_vm6, %v728_v20  ;;  %4887 = vmatmul.msk.f32.gmra.mxu0 %vm758_vm6, %v728_v20 }
 0x1ad   :  { %1135 = vmax.xlane.f32.xlu1 %v1134_v63  ;;  %1229 = vmax.xlane.f32.xlu2 %v1228_v1  ;;  %v994_v63 = vsel %vm65_vm0, %v6373_v62, -inf }
 0x1ae   :  { %1280 = vmax.xlane.f32.xlu0 %v1279_v52  ;;  %v946_v52 = vsel %vm65_vm0, %v6395_v36, -inf }
 0x1af   :  { %v687_v51 = vpop.f32.mrf.mxu2 }
 0x1b0   :  { %v6321_v45 = vadd.f32 %v687_v51, %v6265_v39  ;;  %v625_v46 = vpop.f32.mrf.mxu1  ;;  %v560_v61 = vpop.f32.mrf.mxu0 }
 0x1b1   :  { %v6417_v40 = vadd.f32 %v625_v46, %v6252_v10 }
 0x1b2   :  { %8710 = vst [vmem:[#allocation8_spill] sm:$0xff] %v6321_v45  ;;  %v729_v5 = vmul.f32 %v6321_v45, %v6321_v45  ;;  %v6327_v33 = vpack.i.bf16 %v6321_v45, %v6271_v60 }
 0x1b3   :  { %v1191_v1 = vsel %vm1130_vm4, %v6417_v40, -inf }
 0x1b4   :  { %4872 = vmatmul.msk.f32.gmra.mxu3 %vm758_vm6, %v729_v5  ;;  %4888 = vmatmul.msk.f32.gmra.mxu0 %vm758_vm6, %v729_v5  ;;  %v6433_v5 = vadd.f32 %v560_v61, %v6263_v32 }
 0x1b5   :  { %992 = vmax.xlane.f32.xlu1 %v991_v48  ;;  %1086 = vmax.xlane.f32.xlu2 %v1085_v42 }
 0x1b6   :  { %1038 = vmax.xlane.f32.xlu0 %v1037_v11  ;;  %v1285_v11 = vsel %vm1227_vm7, %v6373_v62, -inf  ;;  %v1046_v46 = vsel %vm1033_vm5, %v6433_v5, -inf }
 0x1b7   :  { %v690_v30 = vpop.f32.mrf.mxu2 }
 0x1b8   :  { %v6340_v19 = vadd.f32 %v690_v30, %v6265_v39  ;;  %v949_v30 = vsel %vm65_vm0, %v6433_v5, -inf }
 0x1ba   :  { %8711 = vst [vmem:[#allocation9_spill] sm:$0xff] %v6340_v19  ;;  %v730_v38 = vmul.f32 %v6340_v19, %v6340_v19 }
 0x1bc   :  { %4873 = vmatmul.msk.f32.gmra.mxu3 %vm758_vm6, %v730_v38  ;;  %4889 = vmatmul.msk.f32.gmra.mxu0 %vm758_vm6, %v730_v38  ;;  %v1237_v38 = vsel %vm1227_vm7, %v6395_v36, -inf }
 0x1bd   :  { %1283 = vmax.xlane.f32.xlu1 %v1282_v13  ;;  %941 = vmax.xlane.f32.xlu2 %v940_v21 }
 0x1be   :  { %1089 = vmax.xlane.f32.xlu0 %v1088_v17 }
 0x1bf   :  { %v693_v12 = vpop.f32.mrf.mxu2 }
 0x1c0   :  { %v6356_v59 = vadd.f32 %v693_v12, %v6265_v39  ;;  %v1140_v12 = vsel %vm1130_vm4, %v6395_v36, -inf }
 0x1c2   :  { %8712 = vst [vmem:[#allocation10_spill] sm:$0xff] %v6356_v59  ;;  %v731_v0 = vmul.f32 %v6356_v59, %v6356_v59  ;;  %v6362_v9 = vpack.i.bf16 %v6287_v53, %v6356_v59 }
 0x1c4   :  { %4874 = vmatmul.msk.f32.gmra.mxu3 %vm758_vm6, %v731_v0  ;;  %4890 = vmatmul.msk.f32.gmra.mxu0 %vm758_vm6, %v731_v0  ;;  %v1240_v0 = vsel %vm1227_vm7, %v6433_v5, -inf }
 0x1c5   :  { %1041 = vmax.xlane.f32.xlu1 %v1040_v15  ;;  %1232 = vmax.xlane.f32.xlu2 %v1231_v49  ;;  %v628_v15 = vpop.f32.mrf.mxu1  ;;  %v997_v49 = vsel %vm65_vm0, %v6417_v40, -inf }
 0x1c6   :  { %944 = vmax.xlane.f32.xlu0 %v943_v16  ;;  %v6464_v16 = vadd.f32 %v628_v15, %v6252_v10 }
 0x1c7   :  { %v696_v22 = vpop.f32.mrf.mxu2 }
 0x1c8   :  { %v6376_v35 = vadd.f32 %v696_v22, %v6265_v39  ;;  %v1000_v31 = vsel %vm65_vm0, %v6464_v16, -inf }
 0x1ca   :  { %8713 = vst [vmem:[#allocation11_spill] sm:$0xff] %v6376_v35  ;;  %v732_v27 = vmul.f32 %v6376_v35, %v6376_v35  ;;  %v6382_v28 = vpack.i.bf16 %v6303_v26, %v6376_v35 }
 0x1cc   :  { %4875 = vmatmul.msk.f32.gmra.mxu3 %vm758_vm6, %v732_v27  ;;  %4891 = vmatmul.msk.f32.gmra.mxu0 %vm758_vm6, %v732_v27 }
 0x1cd   :  { %1186 = vmax.xlane.f32.xlu2 %v1185_v8  ;;  %1092 = vmax.xlane.f32.xlu1 %v1091_v14  ;;  %v1094_v14 = vsel %vm1033_vm5, %v6417_v40, -inf }
 0x1ce   :  { %1235 = vmax.xlane.f32.xlu0 %v1234_v37  ;;  %v1288_v37 = vsel %vm1227_vm7, %v6417_v40, -inf }
 0x1cf   :  { %v699_v2 = vpop.f32.mrf.mxu2 }
 0x1d0   :  { %v6398_v43 = vadd.f32 %v699_v2, %v6265_v39 }
 0x1d2   :  { %8714 = vst [vmem:[#allocation12_spill] sm:$0xff] %v6398_v43  ;;  %v733_v23 = vmul.f32 %v6398_v43, %v6398_v43  ;;  %v6404_v4 = vpack.i.bf16 %v6398_v43, %v6340_v19 }
 0x1d4   :  { %4876 = vmatmul.msk.f32.gmra.mxu3 %vm758_vm6, %v733_v23  ;;  %4892 = vmatmul.msk.f32.gmra.mxu0 %vm758_vm6, %v733_v23 }
 0x1d5   :  { %1138 = vmax.xlane.f32.xlu2 %v1137_v47  ;;  %1044 = vmax.xlane.f32.xlu1 %v1043_v34 }
 0x1d6   :  { %1189 = vmax.xlane.f32.xlu0 %v1188_v7  ;;  %v1291_v7 = vsel %vm1227_vm7, %v6464_v16, -inf }
 0x1d7   :  { %v702_v18 = vpop.f32.mrf.mxu2 }
 0x1d8   :  { %v6420_v50 = vadd.f32 %v702_v18, %v6265_v39  ;;  %v563_v18 = vpop.f32.mrf.mxu0 }
 0x1da   :  { %8715 = vst [vmem:[#allocation13_spill] sm:$0xff] %v6420_v50  ;;  %v734_v20 = vmul.f32 %v6420_v50, %v6420_v50 }
 0x1dc   :  { %4877 = vmatmul.msk.f32.gmra.mxu3 %vm758_vm6, %v734_v20  ;;  %4893 = vmatmul.msk.f32.gmra.mxu0 %vm758_vm6, %v734_v20  ;;  %v1143_v20 = vsel %vm1130_vm4, %v6433_v5, -inf }
 0x1dd   :  { %995 = vmax.xlane.f32.xlu2 %v994_v63  ;;  %1192 = vmax.xlane.f32.xlu1 %v1191_v1  ;;  %v6499_v1 = vadd.f32 %v563_v18, %v6263_v32 }
 0x1de   :  { %947 = vmax.xlane.f32.xlu0 %v946_v52 }
 0x1df   :  { %v705_v51 = vpop.f32.mrf.mxu2 }
 0x1e0   :  { %v6436_v48 = vadd.f32 %v705_v51, %v6265_v39  ;;  %v1504_v51 = vld [vmem:[%s8648_s6] sm:$0xf] }
 0x1e1   :  { %4901 = vmatpush.msk.msrb.mxu1 %vm1553_vm8, %v1504_v51  ;;  %4918 = vmatpush.msk.msrb.mxu2 %vm1553_vm8, %v1504_v51  ;;  %vm4703_vm8 = vcmask 64512  }
 0x1e2   :  { %8716 = vst [vmem:[#allocation14_spill] sm:$0xff] %v6436_v48  ;;  %v735_v42 = vmul.f32 %v6436_v48, %v6436_v48 }
 0x1e4   :  { %4878 = vmatmul.msk.f32.gmra.mxu3 %vm758_vm6, %v735_v42  ;;  %4894 = vmatmul.msk.f32.gmra.mxu0 %vm758_vm6, %v735_v42 }
 0x1e5   :  { %1286 = vmax.xlane.f32.xlu2 %v1285_v11  ;;  %950 = vmax.xlane.f32.xlu1 %v949_v30  ;;  %v1194_v11 = vsel %vm1130_vm4, %v6464_v16, -inf  ;;  %v952_v30 = vsel %vm65_vm0, %v6499_v1, -inf }
 0x1e6   :  { %1238 = vmax.xlane.f32.xlu0 %v1237_v38  ;;  %v1097_v38 = vsel %vm1033_vm5, %v6464_v16, -inf }
 0x1e7   :  { %v708_v13 = vpop.f32.mrf.mxu2 }
 0x1e8   :  { %v6449_v21 = vadd.f32 %v708_v13, %v6265_v39 }
 0x1ea   :  { %8717 = vst [vmem:[#allocation15_spill] sm:$0xff] %v6449_v21  ;;  %v736_v6 = vmul.f32 %v6449_v21, %v6449_v21 }
 0x1ec   :  { %4879 = vmatmul.msk.f32.gmra.mxu3 %vm758_vm6, %v736_v6  ;;  %4895 = vmatmul.msk.f32.gmra.mxu0 %vm758_vm6, %v736_v6 }
 0x1ed   :  { %1141 = vmax.xlane.f32.xlu2 %v1140_v12  ;;  %1241 = vmax.xlane.f32.xlu1 %v1240_v0 }
 0x1ee   :  { %998 = vmax.xlane.f32.xlu0 %v997_v49  ;;  %v566_v49 = vpop.f32.mrf.mxu0 }
 0x1ef   :  { %v711_v44 = vpop.f32.mrf.mxu2 }
 0x1f0   :  { %v6467_v22 = vadd.f32 %v711_v44, %v6265_v39 }
 0x1f2   :  { %8718 = vst [vmem:[#allocation16_spill] sm:$0xff] %v6467_v22  ;;  %v737_v27 = vmul.f32 %v6467_v22, %v6467_v22  ;;  %v6473_v8 = vpack.i.bf16 %v6467_v22, %v6420_v50 }
 0x1f4   :  { %4880 = vmatmul.msk.f32.gmra.mxu3 %vm758_vm6, %v737_v27  ;;  %4896 = vmatmul.msk.f32.gmra.mxu0 %vm758_vm6, %v737_v27 }
 0x1f5   :  { %1095 = vmax.xlane.f32.xlu2 %v1094_v14  ;;  %1001 = vmax.xlane.f32.xlu1 %v1000_v31  ;;  %v1049_v31 = vsel %vm1033_vm5, %v6499_v1, -inf }
 0x1f6   :  { %1289 = vmax.xlane.f32.xlu0 %v1288_v37  ;;  %v1243_v37 = vsel %vm1227_vm7, %v6499_v1, -inf }
 0x1f7   :  { %v714_v23 = vpop.f32.mrf.mxu2 }
 0x1f8   :  { %v6486_v47 = vadd.f32 %v714_v23, %v6265_v39  ;;  %v631_v23 = vpop.f32.mrf.mxu1 }
 0x1fa   :  { %8719 = vst [vmem:[#allocation17_spill] sm:$0xff] %v6486_v47  ;;  %v738_v34 = vmul.f32 %v6486_v47, %v6486_v47 }
 0x1fc   :  { %4881 = vmatmul.msk.f32.gmra.mxu3 %vm758_vm6, %v738_v34  ;;  %4897 = vmatmul.msk.f32.gmra.mxu0 %vm758_vm6, %v738_v34  ;;  %v1146_v34 = vsel %vm1130_vm4, %v6499_v1, -inf }
 0x1fd   :  { %1047 = vmax.xlane.f32.xlu2 %v1046_v46  ;;  %1292 = vmax.xlane.f32.xlu1 %v1291_v7  ;;  %v6543_v7 = vadd.f32 %v631_v23, %v6252_v10 }
 0x1fe   :  { %1144 = vmax.xlane.f32.xlu0 %v1143_v20 }
 0x1ff   :  { %v717_v63 = vpop.f32.mrf.mxu2 }
 0x200   :  { %v6502_v61 = vadd.f32 %v717_v63, %v6265_v39  ;;  %v634_v2 = vpop.f32.mrf.mxu1 }
 0x202   :  { %8720 = vst [vmem:[#allocation18_spill] sm:$0xff] %v6502_v61  ;;  %v739_v52 = vmul.f32 %v6502_v61, %v6502_v61  ;;  %v6511_v42 = vpack.i.bf16 %v6436_v48, %v6502_v61 }
 0x204   :  { %4882 = vmatmul.msk.f32.gmra.mxu3 %vm758_vm6, %v739_v52  ;;  %4898 = vmatmul.msk.f32.gmra.mxu0 %vm758_vm6, %v739_v52 }
 0x205   :  { %1195 = vmax.xlane.f32.xlu2 %v1194_v11  ;;  %953 = vmax.xlane.f32.xlu1 %v952_v30 }
 0x206   :  { %1098 = vmax.xlane.f32.xlu0 %v1097_v38  ;;  %v569_v38 = vpop.f32.mrf.mxu0 }
 0x207   :  { %v720_v13 = vpop.f32.mrf.mxu2  ;;  %v1084_v6 = vpop.xlane.xlu1 %1083 }
 0x208   :  { %v6522_v12 = vadd.f32 %v720_v13, %v6265_v39  ;;  %v987_v0 = vpop.xlane.xlu2 %986  ;;  %v6524_v15 = vpop.xlane.xlu0 %1180  ;;  %v1100_v13 = vsel %vm1033_vm5, %v6543_v7, -inf }
 0x20a   :  { %8721 = vst [vmem:[#allocation19_spill] sm:$0xff] %v6522_v12  ;;  %v740_v44 = vmul.f32 %v6522_v12, %v6522_v12  ;;  %v6530_v27 = vpack.i.bf16 %v6449_v21, %v6522_v12 }
 0x20c   :  { %4883 = vmatmul.msk.f32.gmra.mxu3 %vm758_vm6, %v740_v44  ;;  %4899 = vmatmul.msk.f32.gmra.mxu0 %vm758_vm6, %v740_v44  ;;  %v1003_v44 = vsel %vm65_vm0, %v6543_v7, -inf }
 0x20d   :  { %1050 = vmax.xlane.f32.xlu2 %v1049_v31  ;;  %1244 = vmax.xlane.f32.xlu1 %v1243_v37  ;;  %v6565_v31 = vadd.f32 %v566_v49, %v6263_v32  ;;  %v6575_v49 = vadd.f32 %v634_v2, %v6252_v10  ;;  %v1375_v2 = vsel %vm1324_vm9, %v987_v0, %v1084_v6 }
 0x20e   :  { %1147 = vmax.xlane.f32.xlu0 %v1146_v34 }
 0x20f   :  { %v723_v46 = vpop.f32.mrf.mxu2 }
 0x210   :  { %v6546_v18 = vadd.f32 %v723_v46, %v6265_v39  ;;  %v1278_v20 = vpop.xlane.xlu2 %1277  ;;  %v1133_v63 = vpop.xlane.xlu1 %1132  ;;  %v1197_v39 = vsel %vm1130_vm4, %v6543_v7, -inf  ;;  %v1149_v46 = vsel %vm1130_vm4, %v6565_v31, -inf }
 0x211   :  { %v1036_v52 = vpop.xlane.xlu0 %1035 }
 0x212   :  { %8722 = vst [vmem:[#allocation20_spill] sm:$0xff] %v6546_v18  ;;  %v741_v51 = vmul.f32 %v6546_v18, %v6546_v18  ;;  %v6552_v11 = vpack.i.bf16 %v6546_v18, %v6486_v47 }
 0x214   :  { %4884 = vmatmul.msk.f32.gmra.mxu3 %vm758_vm6, %v741_v51  ;;  %4900 = vmatmul.msk.f32.gmra.mxu0 %vm758_vm6, %v741_v51  ;;  %v955_v51 = vsel %vm65_vm0, %v6565_v31, -inf }
 0x215   :  { %1198 = vmax.xlane.f32.xlu1 %v1197_v39  ;;  %1101 = vmax.xlane.f32.xlu2 %v1100_v13  ;;  %v1294_v13 = vsel %vm1227_vm7, %v6543_v7, -inf }
 0x216   :  { %1004 = vmax.xlane.f32.xlu0 %v1003_v44 }
 0x218   :  { %v1184_v37 = vpop.xlane.xlu1 %1183  ;;  %v939_v23 = vpop.xlane.xlu2 %938 }
 0x219   :  { %v990_v34 = vpop.xlane.xlu0 %989  ;;  %v1325_v39 = vsel %vm1324_vm9, %v939_v23, %v1036_v52  ;;  %v1006_v52 = vsel %vm65_vm0, %v6575_v49, -inf  ;;  %v1246_v23 = vsel %vm1227_vm7, %v6565_v31, -inf }
 0x21a   :  { %v1342_v54 = vsel %vm1341_vm11, %v1325_v39, %v1133_v63 }
 0x21d   :  { %1150 = vmax.xlane.f32.xlu1 %v1149_v46  ;;  %956 = vmax.xlane.f32.xlu2 %v955_v51  ;;  %v1052_v46 = vsel %vm1033_vm5, %v6565_v31, -inf }
 0x21e   :  { %1295 = vmax.xlane.f32.xlu0 %v1294_v13 }
 0x220   :  { %v1136_v44 = vpop.xlane.xlu1 %1135  ;;  %v1230_v17 = vpop.xlane.xlu2 %1229 }
 0x221   :  { %v1359_v30 = vsel %vm1358_vm15, %v1342_v54, %v1230_v17  ;;  %v1281_v58 = vpop.xlane.xlu0 %1280  ;;  %v1391_v54 = vsel %vm1341_vm11, %v1375_v2, %v6524_v15  ;;  %v1200_v15 = vsel %vm1130_vm4, %v6575_v49, -inf }
 0x222   :  { %4902 = vmatmul.msk.f32.vlgmr.msrb.gmra.mxu1 %vm1423_vm13, %v1359_v30  ;;  %v1407_v30 = vsel %vm1358_vm15, %v1391_v54, %v1278_v20  ;;  %v1103_v20 = vsel %vm1033_vm5, %v6575_v49, -inf }
 0x223   :  { %v1424_v0 = vsel %vm1423_vm13, %v1407_v30, -inf }
 0x225   :  { %1007 = vmax.xlane.f32.xlu1 %v1006_v52  ;;  %1247 = vmax.xlane.f32.xlu2 %v1246_v23  ;;  %v1297_v23 = vsel %vm1227_vm7, %v6575_v49, -inf }
 0x226   :  { %1053 = vmax.xlane.f32.xlu0 %v1052_v46 }
 0x228   :  { %v6589_v17 = vpop.xlane.xlu1 %992  ;;  %v1087_v63 = vpop.xlane.xlu2 %1086 }
 0x229   :  { %v1376_v51 = vsel %vm1324_vm9, %v990_v34, %v1087_v63  ;;  %v1039_v39 = vpop.xlane.xlu0 %1038 }
 0x22a   :  { %v1392_v13 = vsel %vm1341_vm11, %v1376_v51, %v1184_v37 }
 0x22b   :  { %v1408_v6 = vsel %vm1358_vm15, %v1392_v13, %v1281_v58  ;;  %v6604_v58 = vadd.f32 %v569_v38, %v6263_v32 }
 0x22c   :  { %v1425_v52 = vsel %vm1423_vm13, %v1408_v6, -inf  ;;  %v637_v6 = vpop.f32.mrf.mxu1 }
 0x22d   :  { %v1426_v2 = vmax.f32 %v1424_v0, %v1425_v52  ;;  %1298 = vmax.xlane.f32.xlu1 %v1297_v23  ;;  %1201 = vmax.xlane.f32.xlu2 %v1200_v15  ;;  %v1152_v51 = vsel %vm1130_vm4, %v6604_v58, -inf  ;;  %v958_v13 = vsel %vm65_vm0, %v6604_v58, -inf  ;;  %v1055_v38 = vsel %vm1033_vm5, %v6604_v58, -inf }
 0x22e   :  { %1104 = vmax.xlane.f32.xlu0 %v1103_v20  ;;  %v6616_v15 = vadd.f32 %v637_v6, %v6252_v10 }
 0x22f   :  { %v1427_v37 = vrot.slane %v1426_v2, 4 }
 0x230   :  { %v6606_v34 = vpop.xlane.xlu1 %1283  ;;  %v942_v46 = vpop.xlane.xlu2 %941  ;;  %v1300_v6 = vsel %vm1227_vm7, %v6616_v15, -inf }
 0x231   :  { %v1428_v54 = vmax.f32 %v1426_v2, %v1427_v37  ;;  %v1090_v63 = vpop.xlane.xlu0 %1089  ;;  %v1326_v0 = vsel %vm1324_vm9, %v942_v46, %v1039_v39  ;;  %v1009_v39 = vsel %vm65_vm0, %v6616_v15, -inf  ;;  %v1249_v46 = vsel %vm1227_vm7, %v6604_v58, -inf }
 0x232   :  { %v1343_v37 = vsel %vm1341_vm11, %v1326_v0, %v1136_v44  ;;  %v572_v44 = vpop.f32.mrf.mxu0  ;;  %v1203_v0 = vsel %vm1130_vm4, %v6616_v15, -inf }
 0x233   :  { %v1429_v30 = vrot.slane %v1428_v54, 2 }
 0x235   :  { %1153 = vmax.xlane.f32.xlu1 %v1152_v51  ;;  %959 = vmax.xlane.f32.xlu2 %v958_v13  ;;  %v1430_v52 = vmax.f32 %v1428_v54, %v1429_v30  ;;  %v1106_v54 = vsel %vm1033_vm5, %v6616_v15, -inf  ;;  %v6629_v13 = vadd.f32 %v572_v44, %v6263_v32  ;;  %v640_v44 = vpop.f32.mrf.mxu1 }
 0x236   :  { %1056 = vmax.xlane.f32.xlu0 %v1055_v38 }
 0x237   :  { %v1431_v23 = vrot.slane %v1430_v52, 1  ;;  %v961_v38 = vsel %vm65_vm0, %v6629_v13, -inf }
 0x238   :  { %v1042_v2 = vpop.xlane.xlu1 %1041  ;;  %v1233_v20 = vpop.xlane.xlu2 %1232 }
 0x239   :  { %v945_v14 = vpop.xlane.xlu0 %944  ;;  %v1360_v57 = vsel %vm1358_vm15, %v1343_v37, %v1233_v20  ;;  %v1432_v25 = vmax.f32 %v1430_v52, %v1431_v23 }
 0x23a   :  { %4903 = vmatmul.msk.f32.gmra.mxu1 %vm1423_vm13, %v1360_v57  ;;  %v1327_v52 = vsel %vm1324_vm9, %v945_v14, %v1042_v2  ;;  %v1252_v14 = vsel %vm1227_vm7, %v6629_v13, -inf  ;;  %v6649_v2 = vadd.f32 %v640_v44, %v6252_v10 }
 0x23b   :  { %4919 = vmatmul.msk.f32.vlgmr.msrb.gmra.mxu2 %vm1423_vm13, %v1432_v25 }
 0x23d   :  { %1010 = vmax.xlane.f32.xlu1 %v1009_v39  ;;  %1250 = vmax.xlane.f32.xlu2 %v1249_v46  ;;  %v1058_v46 = vsel %vm1033_vm5, %v6629_v13, -inf }
 0x23e   :  { %1107 = vmax.xlane.f32.xlu0 %v1106_v54  ;;  %v1155_v54 = vsel %vm1130_vm4, %v6629_v13, -inf }
 0x240   :  { %v1187_v30 = vpop.xlane.xlu2 %1186  ;;  %v1093_v51 = vpop.xlane.xlu1 %1092 }
 0x241   :  { %v1236_v57 = vpop.xlane.xlu0 %1235 }
 0x243   :  { %4920 = vmatmul.msk.f32.gmra.mxu2 %vm1423_vm13, %v1432_v25 }
 0x245   :  { %1301 = vmax.xlane.f32.xlu1 %v1300_v6  ;;  %1204 = vmax.xlane.f32.xlu2 %v1203_v0 }
 0x246   :  { %962 = vmax.xlane.f32.xlu0 %v961_v38  ;;  %v1377_v38 = vsel %vm1324_vm9, %v6589_v17, %v1090_v63 }
 0x248   :  { %v1139_v23 = vpop.xlane.xlu2 %1138  ;;  %v1045_v20 = vpop.xlane.xlu1 %1044 }
 0x249   :  { %v1344_v37 = vsel %vm1341_vm11, %v1327_v52, %v1139_v23  ;;  %v1190_v39 = vpop.xlane.xlu0 %1189  ;;  %v1393_v52 = vsel %vm1341_vm11, %v1377_v38, %v1187_v30  ;;  %v1109_v23 = vsel %vm1033_vm5, %v6649_v2, -inf }
 0x24a   :  { %v1361_v25 = vsel %vm1358_vm15, %v1344_v37, %v1236_v57  ;;  %v1012_v37 = vsel %vm65_vm0, %v6649_v2, -inf  ;;  %v1409_v17 = vsel %vm1358_vm15, %v1393_v52, %v6606_v34  ;;  %v643_v52 = vpop.f32.mrf.mxu1 }
 0x24b   :  { %4904 = vmatmul.msk.f32.gmra.mxu1 %vm1423_vm13, %v1361_v25  ;;  %v575_v25 = vpop.f32.mrf.mxu0 }
 0x24c   :  { %v6666_v63 = vadd.f32 %v575_v25, %v6263_v32 }
 0x24d   :  { %1059 = vmax.xlane.f32.xlu1 %v1058_v46  ;;  %1156 = vmax.xlane.f32.xlu2 %v1155_v54  ;;  %v1206_v54 = vsel %vm1130_vm4, %v6649_v2, -inf }
 0x24e   :  { %1253 = vmax.xlane.f32.xlu0 %v1252_v14  ;;  %v1061_v34 = vsel %vm1033_vm5, %v6666_v63, -inf }
 0x250   :  { %v996_v6 = vpop.xlane.xlu2 %995  ;;  %v6651_v57 = vpop.xlane.xlu1 %1192 }
 0x251   :  { %v948_v0 = vpop.xlane.xlu0 %947  ;;  %v1378_v46 = vsel %vm1324_vm9, %v996_v6, %v1093_v51  ;;  %v1433_v51 = vsel %vm1423_vm13, %v1409_v17, -inf }
 0x252   :  { %v1394_v44 = vsel %vm1341_vm11, %v1378_v46, %v1190_v39  ;;  %v964_v39 = vsel %vm65_vm0, %v6666_v63, -inf  ;;  %v1328_v17 = vsel %vm1324_vm9, %v948_v0, %v1045_v20  ;;  %v1255_v20 = vsel %vm1227_vm7, %v6666_v63, -inf }
 0x255   :  { %1110 = vmax.xlane.f32.xlu1 %v1109_v23  ;;  %1013 = vmax.xlane.f32.xlu2 %v1012_v37  ;;  %v1303_v37 = vsel %vm1227_vm7, %v6649_v2, -inf }
 0x256   :  { %1207 = vmax.xlane.f32.xlu0 %v1206_v54  ;;  %v6679_v54 = vadd.f32 %v643_v52, %v6252_v10  ;;  %v578_v52 = vpop.f32.mrf.mxu0 }
 0x258   :  { %v1287_v30 = vpop.xlane.xlu2 %1286  ;;  %v951_v14 = vpop.xlane.xlu1 %950 }
 0x259   :  { %v1410_v38 = vsel %vm1358_vm15, %v1394_v44, %v1287_v30  ;;  %v1239_v48 = vpop.xlane.xlu0 %1238 }
 0x25a   :  { %v1434_v6 = vsel %vm1423_vm13, %v1410_v38, -inf }
 0x25b   :  { %v1435_v23 = vmax.f32 %v1433_v51, %v1434_v6 }
 0x25d   :  { %v1436_v25 = vrot.slane %v1435_v23, 4  ;;  %1304 = vmax.xlane.f32.xlu2 %v1303_v37  ;;  %1062 = vmax.xlane.f32.xlu1 %v1061_v34  ;;  %v1158_v34 = vsel %vm1130_vm4, %v6666_v63, -inf }
 0x25e   :  { %965 = vmax.xlane.f32.xlu0 %v964_v39 }
 0x25f   :  { %v1437_v46 = vmax.f32 %v1435_v23, %v1436_v25  ;;  %v1112_v23 = vsel %vm1033_vm5, %v6679_v54, -inf }
 0x260   :  { %v1142_v30 = vpop.xlane.xlu2 %1141  ;;  %v1242_v44 = vpop.xlane.xlu1 %1241 }
 0x261   :  { %v1438_v38 = vrot.slane %v1437_v46, 2  ;;  %v1345_v51 = vsel %vm1341_vm11, %v1328_v17, %v1142_v30  ;;  %v999_v6 = vpop.xlane.xlu0 %998  ;;  %v1015_v30 = vsel %vm65_vm0, %v6679_v54, -inf }
 0x262   :  { %v1362_v22 = vsel %vm1358_vm15, %v1345_v51, %v1239_v48  ;;  %v6692_v48 = vadd.f32 %v578_v52, %v6263_v32  ;;  %v1209_v51 = vsel %vm1130_vm4, %v6679_v54, -inf }
 0x263   :  { %4905 = vmatmul.msk.f32.gmra.mxu1 %vm1423_vm13, %v1362_v22  ;;  %v1439_v37 = vmax.f32 %v1437_v46, %v1438_v38  ;;  %v646_v46 = vpop.f32.mrf.mxu1 }
 0x264   :  { %v967_v38 = vsel %vm65_vm0, %v6692_v48, -inf }
 0x265   :  { %1159 = vmax.xlane.f32.xlu2 %v1158_v34  ;;  %1113 = vmax.xlane.f32.xlu1 %v1112_v23  ;;  %v1440_v0 = vrot.slane %v1439_v37, 1 }
 0x266   :  { %1256 = vmax.xlane.f32.xlu0 %v1255_v20 }
 0x267   :  { %v1441_v25 = vmax.f32 %v1439_v37, %v1440_v0  ;;  %v6702_v37 = vadd.f32 %v646_v46, %v6252_v10  ;;  %v1306_v46 = vsel %vm1227_vm7, %v6679_v54, -inf }
 0x268   :  { %v1096_v22 = vpop.xlane.xlu2 %1095  ;;  %v1002_v39 = vpop.xlane.xlu1 %1001 }
 0x269   :  { %v1290_v17 = vpop.xlane.xlu0 %1289  ;;  %4921 = vmatmul.msk.f32.gmra.mxu2 %vm1423_vm13, %v1441_v25 }
 0x26b   :  { %v649_v50 = vpop.f32.mrf.mxu1 }
 0x26d   :  { %1016 = vmax.xlane.f32.xlu2 %v1015_v30  ;;  %968 = vmax.xlane.f32.xlu1 %v967_v38  ;;  %v1379_v38 = vsel %vm1324_vm9, %v999_v6, %v1096_v22 }
 0x26e   :  { %1210 = vmax.xlane.f32.xlu0 %v1209_v51  ;;  %v1212_v51 = vsel %vm1130_vm4, %v6702_v37, -inf }
 0x270   :  { %v1048_v34 = vpop.xlane.xlu2 %1047  ;;  %v1293_v23 = vpop.xlane.xlu1 %1292 }
 0x271   :  { %v1329_v52 = vsel %vm1324_vm9, %v951_v14, %v1048_v34  ;;  %v1145_v20 = vpop.xlane.xlu0 %1144  ;;  %4922 = vmatmul.msk.f32.gmra.mxu2 %vm1423_vm13, %v1441_v25  ;;  %v1161_v14 = vsel %vm1130_vm4, %v6692_v48, -inf  ;;  %v1395_v25 = vsel %vm1341_vm11, %v1379_v38, %v6651_v57 }
 0x272   :  { %v1346_v0 = vsel %vm1341_vm11, %v1329_v52, %v1145_v20  ;;  %v1411_v52 = vsel %vm1358_vm15, %v1395_v25, %v1290_v17 }
 0x273   :  { %v1363_v30 = vsel %vm1358_vm15, %v1346_v0, %v1242_v44  ;;  %v6719_v44 = vadd.f32 %v649_v50, %v6252_v10  ;;  %v652_v38 = vpop.f32.mrf.mxu1  ;;  %v1442_v50 = vsel %vm1423_vm13, %v1411_v52, -inf }
 0x274   :  { %4906 = vmatmul.msk.f32.gmra.mxu1 %vm1423_vm13, %v1363_v30 }
 0x275   :  { %1307 = vmax.xlane.f32.xlu2 %v1306_v46  ;;  %1213 = vmax.xlane.f32.xlu1 %v1212_v51  ;;  %v1064_v46 = vsel %vm1033_vm5, %v6692_v48, -inf  ;;  %v1215_v57 = vsel %vm1130_vm4, %v6719_v44, -inf }
 0x276   :  { %1162 = vmax.xlane.f32.xlu0 %v1161_v14 }
 0x278   :  { %v1196_v6 = vpop.xlane.xlu2 %1195  ;;  %v954_v22 = vpop.xlane.xlu1 %953 }
 0x279   :  { %v1099_v34 = vpop.xlane.xlu0 %1098 }
 0x27a   :  { %v1380_v20 = vsel %vm1324_vm9, %v1002_v39, %v1099_v34  ;;  %v1018_v39 = vsel %vm65_vm0, %v6702_v37, -inf }
 0x27b   :  { %v1396_v0 = vsel %vm1341_vm11, %v1380_v20, %v1196_v6 }
 0x27c   :  { %v1412_v30 = vsel %vm1358_vm15, %v1396_v0, %v1293_v23  ;;  %v6734_v23 = vadd.f32 %v652_v38, %v6252_v10 }
 0x27d   :  { %v1443_v51 = vsel %vm1423_vm13, %v1412_v30, -inf  ;;  %1065 = vmax.xlane.f32.xlu2 %v1064_v46  ;;  %1216 = vmax.xlane.f32.xlu1 %v1215_v57  ;;  %v1115_v57 = vsel %vm1033_vm5, %v6702_v37, -inf }
 0x27e   :  { %v1444_v17 = vmax.f32 %v1442_v50, %v1443_v51  ;;  %1019 = vmax.xlane.f32.xlu0 %v1018_v39  ;;  %v1024_v46 = vsel %vm65_vm0, %v6734_v23, -inf  ;;  %v6746_v51 = vpop.f32.mrf.mxu0 }
 0x280   :  { %v1051_v14 = vpop.xlane.xlu2 %1050  ;;  %v1245_v25 = vpop.xlane.xlu1 %1244  ;;  %v1445_v6 = vrot.slane %v1444_v17, 4 }
 0x281   :  { %v1330_v34 = vsel %vm1324_vm9, %v954_v22, %v1051_v14  ;;  %v1148_v20 = vpop.xlane.xlu0 %1147  ;;  %v1309_v22 = vsel %vm1227_vm7, %v6702_v37, -inf }
 0x282   :  { %v1347_v52 = vsel %vm1341_vm11, %v1330_v34, %v1148_v20  ;;  %v1446_v0 = vmax.f32 %v1444_v17, %v1445_v6  ;;  %v1315_v34 = vsel %vm1227_vm7, %v6734_v23, -inf  ;;  %v1118_v20 = vsel %vm1033_vm5, %v6719_v44, -inf }
 0x283   :  { %v1364_v30 = vsel %vm1358_vm15, %v1347_v52, %v1245_v25  ;;  %v655_v52 = vpop.f32.mrf.mxu1 }
 0x284   :  { %4907 = vmatmul.msk.f32.gmra.mxu1 %vm1423_vm13, %v1364_v30  ;;  %v1447_v38 = vrot.slane %v1446_v0, 2  ;;  %v6756_v30 = vadd.f32 %v655_v52, %v6252_v10 }
 0x285   :  { %1025 = vmax.xlane.f32.xlu1 %v1024_v46  ;;  %1116 = vmax.xlane.f32.xlu2 %v1115_v57 }
 0x286   :  { %1310 = vmax.xlane.f32.xlu0 %v1309_v22  ;;  %v1448_v50 = vmax.f32 %v1446_v0, %v1447_v38  ;;  %v1021_v0 = vsel %vm65_vm0, %v6719_v44, -inf  ;;  %v6758_v38 = vpop.f32.mrf.mxu0  ;;  %v1221_v61 = vsel %vm1130_vm4, %v6756_v30, -inf }
 0x288   :  { %v1199_v39 = vpop.xlane.xlu1 %1198  ;;  %v1102_v17 = vpop.xlane.xlu2 %1101  ;;  %v1449_v14 = vrot.slane %v1448_v50, 1 }
 0x289   :  { %v1005_v25 = vpop.xlane.xlu0 %1004 }
 0x28a   :  { %v1450_v6 = vmax.f32 %v1448_v50, %v1449_v14  ;;  %v1218_v50 = vsel %vm1130_vm4, %v6734_v23, -inf  ;;  %v1027_v14 = vsel %vm65_vm0, %v6756_v30, -inf }
 0x28c   :  { %4923 = vmatmul.msk.f32.gmra.mxu2 %vm1423_vm13, %v1450_v6 }
 0x28d   :  { %1316 = vmax.xlane.f32.xlu1 %v1315_v34  ;;  %1119 = vmax.xlane.f32.xlu2 %v1118_v20  ;;  %v1312_v34 = vsel %vm1227_vm7, %v6719_v44, -inf }
 0x28e   :  { %1022 = vmax.xlane.f32.xlu0 %v1021_v0  ;;  %v6768_v60 = vpop.f32.mrf.mxu0 }
 0x290   :  { %v1151_v46 = vpop.xlane.xlu1 %1150  ;;  %v957_v57 = vpop.xlane.xlu2 %956 }
 0x291   :  { %v1296_v22 = vpop.xlane.xlu0 %1295 }
 0x294   :  { %4924 = vmatmul.msk.f32.gmra.mxu2 %vm1423_vm13, %v1450_v6 }
 0x295   :  { %1219 = vmax.xlane.f32.xlu2 %v1218_v50  ;;  %1028 = vmax.xlane.f32.xlu1 %v1027_v14  ;;  %v658_v50 = vpop.f32.mrf.mxu1  ;;  %v1121_v14 = vsel %vm1033_vm5, %v6734_v23, -inf }
 0x296   :  { %1313 = vmax.xlane.f32.xlu0 %v1312_v34  ;;  %v1318_v34 = vsel %vm1227_vm7, %v6756_v30, -inf }
 0x298   :  { %v1008_v20 = vpop.xlane.xlu1 %1007  ;;  %v1248_v52 = vpop.xlane.xlu2 %1247 }
 0x299   :  { %v1054_v0 = vpop.xlane.xlu0 %1053 }
 0x29a   :  { %v1331_v21 = vsel %vm1324_vm9, %v957_v57, %v1054_v0  ;;  %v1381_v57 = vsel %vm1324_vm9, %v1005_v25, %v1102_v17  ;;  %v6790_v25 = vpop.f32.mrf.mxu0 }
 0x29b   :  { %v1348_v6 = vsel %vm1341_vm11, %v1331_v21, %v1151_v46  ;;  %v6781_v21 = vadd.f32 %v658_v50, %v6252_v10  ;;  %v1397_v0 = vsel %vm1341_vm11, %v1381_v57, %v1199_v39  ;;  %v1124_v39 = vsel %vm1033_vm5, %v6756_v30, -inf }
 0x29c   :  { %v1365_v26 = vsel %vm1358_vm15, %v1348_v6, %v1248_v52 }
 0x29d   :  { %4908 = vmatmul.msk.f32.gmra.mxu1 %vm1423_vm13, %v1365_v26  ;;  %1222 = vmax.xlane.f32.xlu2 %v1221_v61  ;;  %v1413_v26 = vsel %vm1358_vm15, %v1397_v0, %v1296_v22  ;;  %v1030_v17 = vsel %vm65_vm0, %v6781_v21, -inf  ;;  %v1127_v22 = vsel %vm1033_vm5, %v6781_v21, -inf }
 0x29e   :  { %1122 = vmax.xlane.f32.xlu0 %v1121_v14  ;;  %1319 = vmax.xlane.f32.xlu1 %v1318_v34  ;;  %v1451_v10 = vsel %vm1423_vm13, %v1413_v26, -inf  ;;  %v1258_v26 = vsel %vm1227_vm7, %v6692_v48, -inf }
 0x2a0   :  { %v1299_v46 = vpop.xlane.xlu1 %1298  ;;  %v1202_v52 = vpop.xlane.xlu2 %1201 }
 0x2a1   :  { %v1105_v6 = vpop.xlane.xlu0 %1104 }
 0x2a2   :  { %v1382_v18 = vsel %vm1324_vm9, %v1008_v20, %v1105_v6  ;;  %v1224_v6 = vsel %vm1130_vm4, %v6781_v21, -inf }
 0x2a3   :  { %v1398_v61 = vsel %vm1341_vm11, %v1382_v18, %v1202_v52  ;;  %v1321_v52 = vsel %vm1227_vm7, %v6781_v21, -inf }
 0x2a4   :  { %v1414_v19 = vsel %vm1358_vm15, %v1398_v61, %v1299_v46 }
 0x2a5   :  { %v1452_v50 = vsel %vm1423_vm13, %v1414_v19, -inf  ;;  %1031 = vmax.xlane.f32.xlu2 %v1030_v17  ;;  %v6805_v17 = vpop.f32.mrf.mxu0 }
 0x2a6   :  { %v1453_v20 = vmax.f32 %v1451_v10, %v1452_v50  ;;  %1125 = vmax.xlane.f32.xlu0 %v1124_v39  ;;  %1128 = vmax.xlane.f32.xlu1 %v1127_v22  ;;  %v6809_v10 = vadd.f32 %v6746_v51, %v6263_v32  ;;  %v1982_v51 = vld [vmem:[%s8649_s7 + $0x78] sm:$0xff] }
 0x2a7   :  { %1983 = vmatpush.msrb.mxu3 %v1982_v51 }
 0x2a8   :  { %v1154_v18 = vpop.xlane.xlu1 %1153  ;;  %v960_v14 = vpop.xlane.xlu2 %959  ;;  %v1454_v34 = vrot.slane %v1453_v20, 4 }
 0x2a9   :  { %v1057_v57 = vpop.xlane.xlu0 %1056 }
 0x2aa   :  { %v1455_v46 = vmax.f32 %v1453_v20, %v1454_v34  ;;  %v1332_v19 = vsel %vm1324_vm9, %v960_v14, %v1057_v57 }
 0x2ab   :  { %v1349_v22 = vsel %vm1341_vm11, %v1332_v19, %v1154_v18  ;;  %v1067_v18 = vsel %vm1033_vm5, %v6809_v10, -inf  ;;  %v1981_v19 = vld [vmem:[%s8649_s7 + $0x70] sm:$0xff] }
 0x2ac   :  { %v1456_v0 = vrot.slane %v1455_v46, 2  ;;  %1984 = vmatpush.msrb.mxu3 %v1981_v19 }
 0x2ad   :  { %1322 = vmax.xlane.f32.xlu2 %v1321_v52  ;;  %v1164_v52 = vsel %vm1130_vm4, %v6809_v10, -inf }
 0x2ae   :  { %1225 = vmax.xlane.f32.xlu0 %v1224_v6  ;;  %1259 = vmax.xlane.f32.xlu1 %v1258_v26  ;;  %v1457_v61 = vmax.f32 %v1455_v46, %v1456_v0  ;;  %v970_v46 = vsel %vm65_vm0, %v6809_v10, -inf  ;;  %v889_v0 = vpop.f32.mrf.mxu0  ;;  %v1980_v6 = vld [vmem:[%s8649_s7 + $0x68] sm:$0xff] }
 0x2af   :  { %1985 = vmatpush.msrb.mxu3 %v1980_v6  ;;  %v1799_v51 = vsub.f32 %v6255_v29, %v889_v0  ;;  %v1976_v29 = vld [vmem:[%s8649_s7 + $0x48] sm:$0xff]  ;;  %v6864_v0 = vadd.f32 %v6768_v60, %v6263_v32 }
 0x2b0   :  { %v6811_v50 = vpop.xlane.xlu1 %1010  ;;  %v1251_v39 = vpop.xlane.xlu2 %1250  ;;  %v1458_v20 = vrot.slane %v1457_v61, 1 }
 0x2b1   :  { %v6814_v14 = vpop.xlane.xlu0 %1107  ;;  %v1366_v34 = vsel %vm1358_vm15, %v1349_v22, %v1251_v39  ;;  %v6840_v39 = vadd.f32 %v6758_v38, %v6263_v32 }
 0x2b2   :  { %4909 = vmatmul.msk.f32.gmra.mxu1 %vm1423_vm13, %v1366_v34  ;;  %v1459_v57 = vmax.f32 %v1457_v61, %v1458_v20  ;;  %v1979_v20 = vld [vmem:[%s8649_s7 + $0x60] sm:$0xff]  ;;  %v1261_v34 = vsel %vm1227_vm7, %v6809_v10, -inf }
 0x2b3   :  { %1986 = vmatpush.msrb.mxu3 %v1979_v20  ;;  %v973_v38 = vsel %vm65_vm0, %v6840_v39, -inf  ;;  %v1167_v60 = vsel %vm1130_vm4, %v6840_v39, -inf }
 0x2b4   :  { %4925 = vmatmul.msk.f32.gmra.mxu2 %vm1423_vm13, %v1459_v57 }
 0x2b5   :  { %971 = vmax.xlane.f32.xlu2 %v970_v46  ;;  %v1978_v46 = vld [vmem:[%s8649_s7 + $0x58] sm:$0xff] }
 0x2b6   :  { %1068 = vmax.xlane.f32.xlu0 %v1067_v18  ;;  %1165 = vmax.xlane.f32.xlu1 %v1164_v52  ;;  %v1070_v18 = vsel %vm1033_vm5, %v6840_v39, -inf  ;;  %v1977_v52 = vld [vmem:[%s8649_s7 + $0x50] sm:$0xff]  ;;  %v892_v35 = vpop.f32.mrf.mxu0 }
 0x2b7   :  { %1987 = vmatpush.msrb.mxu3 %v1978_v46  ;;  %v1975_v46 = vld [vmem:[%s8649_s7 + $0x40] sm:$0xff] }
 0x2b8   :  { %v6834_v26 = vpop.xlane.xlu1 %1301  ;;  %v6836_v61 = vpop.xlane.xlu2 %1204 }
 0x2b9   :  { %v963_v22 = vpop.xlane.xlu0 %962  ;;  %1988 = vmatpush.msrb.mxu3 %v1977_v52  ;;  %v1800_v52 = vsub.f32 %v6284_v56, %v892_v35 }
 0x2bb   :  { %1989 = vmatpush.msrb.mxu3 %v1976_v29 }
 0x2bc   :  { %4926 = vmatmul.msk.f32.gmra.mxu2 %vm1423_vm13, %v1459_v57 }
 0x2bd   :  { %1262 = vmax.xlane.f32.xlu2 %v1261_v34  ;;  %v824_v34 = vpop.f32.mrf.mxu3  ;;  %1990 = vmatpush.msrb.mxu3 %v1975_v46 }
 0x2be   :  { %974 = vmax.xlane.f32.xlu0 %v973_v38  ;;  %1071 = vmax.xlane.f32.xlu1 %v1070_v18  ;;  %v1655_v57 = vpop.f32.mrf.mxu2 }
 0x2bf   :  { %v1815_v19 = vsub.f32 %v1799_v51, %v1655_v57 }
 0x2c0   :  { %v1060_v6 = vpop.xlane.xlu1 %1059  ;;  %v1157_v20 = vpop.xlane.xlu2 %1156 }
 0x2c1   :  { %v1333_v38 = vsel %vm1324_vm9, %v963_v22, %v1060_v6  ;;  %v1254_v18 = vpop.xlane.xlu0 %1253  ;;  %v1831_v51 = vmul.f32 1.442695, %v1815_v19  ;;  %v1974_v22 = vld [vmem:[%s8649_s7 + $0x38] sm:$0xff]  ;;  %v1574_v6 = vpop.f32.mrf.mxu1  ;;  %v1703_v19 = vsub.f32 %v6268_v41, %v824_v34  ;;  %v1971_v41 = vld [vmem:[%s8649_s7 + $0x20] sm:$0xff] }
 0x2c2   :  { %v1350_v47 = vsel %vm1341_vm11, %v1333_v38, %v1157_v20  ;;  %v1264_v20 = vsel %vm1227_vm7, %v6840_v39, -inf  ;;  %v1973_v38 = vld [vmem:[%s8649_s7 + $0x30] sm:$0xff]  ;;  %1991 = vmatpush.msrb.mxu3 %v1974_v22 }
 0x2c3   :  { %v1367_v57 = vsel %vm1358_vm15, %v1350_v47, %v1254_v18  ;;  %v976_v47 = vsel %vm65_vm0, %v6864_v0, -inf  ;;  %5348 = vpow2.f32 %v1831_v51  ;;  %v1719_v35 = vsub.f32 %v1703_v19, %v1574_v6 }
 0x2c4   :  { %4910 = vmatmul.msk.f32.gmra.mxu1 %vm1423_vm13, %v1367_v57  ;;  %1992 = vmatpush.msrb.mxu3 %v1973_v38  ;;  %v1383_v51 = vsel %vm1324_vm9, %v6811_v50, %v6814_v14  ;;  %v1073_v6 = vsel %vm1033_vm5, %v6864_v0, -inf  ;;  %v1170_v50 = vsel %vm1130_vm4, %v6864_v0, -inf  ;;  %v1267_v14 = vsel %vm1227_vm7, %v6864_v0, -inf }
 0x2c5   :  { %1168 = vmax.xlane.f32.xlu2 %v1167_v60  ;;  %v1972_v60 = vld [vmem:[%s8649_s7 + $0x28] sm:$0xff]  ;;  %v827_v34 = vpop.f32.mrf.mxu3  ;;  %v1735_v22 = vmul.f32 1.442695, %v1719_v35  ;;  %v6911_v38 = vadd.f32 %v6790_v25, %v6263_v32  ;;  %v1969_v35 = vld [vmem:[%s8649_s7 + $0x10] sm:$0xff] }
 0x2c6   :  { %1265 = vmax.xlane.f32.xlu0 %v1264_v20  ;;  %977 = vmax.xlane.f32.xlu1 %v976_v47  ;;  %v1658_v29 = vpop.f32.mrf.mxu2  ;;  %v1970_v20 = vld [vmem:[%s8649_s7 + $0x18] sm:$0xff]  ;;  %v1968_v25 = vld [vmem:[%s8649_s7 + $0x8] sm:$0xff] }
 0x2c7   :  { %v1816_v56 = vsub.f32 %v1800_v52, %v1658_v29  ;;  %1993 = vmatpush.msrb.mxu3 %v1972_v60  ;;  %v1399_v52 = vsel %vm1341_vm11, %v1383_v51, %v6836_v61  ;;  %v1704_v61 = vsub.f32 %v6300_v24, %v827_v34  ;;  %8723 = vst [vmem:[#allocation21_spill] sm:$0xff] %v6911_v38 }
 0x2c8   :  { %v1111_v18 = vpop.xlane.xlu1 %1110  ;;  %v1014_v57 = vpop.xlane.xlu2 %1013 }
 0x2c9   :  { %v1833_v46 = vmul.f32 1.442695, %v1816_v56  ;;  %v1208_v12 = vpop.xlane.xlu0 %1207  ;;  %v5349_v47 = vpop.eup %5348  ;;  %v1384_v29 = vsel %vm1324_vm9, %v1014_v57, %v1111_v18  ;;  %1994 = vmatpush.msrb.mxu3 %v1971_v41  ;;  %v1415_v56 = vsel %vm1358_vm15, %v1399_v52, %v6834_v26 }
 0x2ca   :  { %v1577_v19 = vpop.f32.mrf.mxu1  ;;  %v1863_v57 = vadd.f32 0.0001, %v5349_v47  ;;  %v1400_v60 = vsel %vm1341_vm11, %v1384_v29, %v1208_v12  ;;  %v1460_v52 = vsel %vm1423_vm13, %v1415_v56, -inf  ;;  %v1967_v12 = vld [vmem:[%s8649_s7] sm:$0xff]  ;;  %s5462_s7 = smov 64  }
 0x2cb   :  { %5350 = vpow2.f32 %v1833_v46  ;;  %1995 = vmatpush.msrb.mxu3 %v1970_v20  ;;  %v1720_v18 = vsub.f32 %v1704_v61, %v1577_v19  ;;  %v979_v20 = vsel %vm65_vm0, %v6911_v38, -inf  ;;  %v1076_v61 = vsel %vm1033_vm5, %v6911_v38, -inf }
 0x2cc   :  { %5352 = vpow2.f32 %v1735_v22  ;;  %v6930_v19 = vmul.f32 0.17677669, %v1863_v57 }
 0x2cd   :  { %1074 = vmax.xlane.f32.xlu2 %v1073_v6  ;;  %1996 = vmatpush.msrb.mxu3 %v1969_v35  ;;  %v1737_v47 = vmul.f32 1.442695, %v1720_v18 }
 0x2ce   :  { %1171 = vmax.xlane.f32.xlu0 %v1170_v50  ;;  %1268 = vmax.xlane.f32.xlu1 %v1267_v14  ;;  %v1173_v14 = vsel %vm1130_vm4, %v6911_v38, -inf }
 0x2cf   :  { %1997 = vmatpush.msrb.mxu3 %v1968_v25  ;;  %5354 = vpow2.f32 %v1737_v47 }
 0x2d0   :  { %v1305_v24 = vpop.xlane.xlu2 %1304  ;;  %v1063_v46 = vpop.xlane.xlu1 %1062 }
 0x2d1   :  { %v5351_v41 = vpop.eup %5350  ;;  %v1416_v34 = vsel %vm1358_vm15, %v1400_v60, %v1305_v24  ;;  %v966_v26 = vpop.xlane.xlu0 %965  ;;  %1998 = vmatpush.msrb.mxu3 %v1967_v12 }
 0x2d2   :  { %v1864_v51 = vadd.f32 0.0001, %v5351_v41  ;;  %v1461_v22 = vsel %vm1423_vm13, %v1416_v34, -inf  ;;  %v5353_v56 = vpop.eup %5352  ;;  %v1334_v57 = vsel %vm1324_vm9, %v966_v26, %v1063_v46  ;;  %v6947_v41 = vadd.f32 %v6805_v17, %v6263_v32 }
 0x2d3   :  { %v1462_v6 = vmax.f32 %v1460_v52, %v1461_v22  ;;  %v1767_v34 = vadd.f32 0.0001, %v5353_v56  ;;  %v1270_v46 = vsel %vm1227_vm7, %v6911_v38, -inf  ;;  %v830_v56 = vpop.f32.mrf.mxu3 }
 0x2d4   :  { %v6932_v29 = vmul.f32 0.17677669, %v1864_v51  ;;  %8724 = vst [vmem:[#allocation22_spill] sm:$0xff] %v6947_v41  ;;  %v1079_v17 = vsel %vm1033_vm5, %v6947_v41, -inf  ;;  %v982_v47 = vsel %vm65_vm0, %v6947_v41, -inf }
 0x2d5   :  { %v1463_v50 = vrot.slane %v1462_v6, 4  ;;  %980 = vmax.xlane.f32.xlu2 %v979_v20  ;;  %v6956_v32 = vmul.f32 0.17677669, %v1767_v34 }
 0x2d6   :  { %1174 = vmax.xlane.f32.xlu1 %v1173_v14  ;;  %1077 = vmax.xlane.f32.xlu0 %v1076_v61  ;;  %v1895_v35 = vadd.f32 %v6932_v29, %v6930_v19  ;;  %v5355_v14 = vpop.eup %5354 }
 0x2d7   :  { %v1464_v18 = vmax.f32 %v1462_v6, %v1463_v50  ;;  %4935 = vmatpush.xpose.msk.msra.mxu0 %vm65_vm0, %v6932_v29 }
 0x2d8   :  { %v1160_v60 = vpop.xlane.xlu2 %1159  ;;  %v6943_v24 = vpop.xlane.xlu1 %1113  ;;  %v1896_v25 = vrot.slane %v1895_v35, 4 }
 0x2d9   :  { %v1465_v51 = vrot.slane %v1464_v18, 2  ;;  %v1351_v52 = vsel %vm1341_vm11, %v1334_v57, %v1160_v60  ;;  %v1257_v22 = vpop.xlane.xlu0 %1256 }
 0x2da   :  { %v1368_v12 = vsel %vm1358_vm15, %v1351_v52, %v1257_v22  ;;  %v1897_v6 = vadd.f32 %v1896_v25, %v1895_v35  ;;  %v1768_v25 = vadd.f32 0.0001, %v5355_v14  ;;  %v1176_v52 = vsel %vm1130_vm4, %v6947_v41, -inf }
 0x2db   :  { %v1466_v20 = vmax.f32 %v1464_v18, %v1465_v51  ;;  %4936 = vmatpush.xpose.msk.msra.mxu0 %vm65_vm0, %v6930_v19  ;;  %4911 = vmatmul.msk.f32.gmra.mxu1 %vm1423_vm13, %v1368_v12  ;;  %v895_v12 = vpop.f32.mrf.mxu0 }
 0x2dc   :  { %v1898_v26 = vrot.slane %v1897_v6, 2  ;;  %v1801_v14 = vsub.f32 %v6318_v55, %v895_v12 }
 0x2dd   :  { %1271 = vmax.xlane.f32.xlu2 %v1270_v46  ;;  %v1467_v50 = vrot.slane %v1466_v20, 1 }
 0x2de   :  { %1080 = vmax.xlane.f32.xlu1 %v1079_v17  ;;  %983 = vmax.xlane.f32.xlu0 %v982_v47  ;;  %v1899_v61 = vadd.f32 %v1898_v26, %v1897_v6  ;;  %v6970_v6 = vmul.f32 0.17677669, %v1768_v25  ;;  %v1580_v17 = vpop.f32.mrf.mxu1 }
 0x2df   :  { %4937 = vmatmul.msk.f32.vlgmr.msra.gmra.mxu0 %vm65_vm0, %v6956_v32  ;;  %v1468_v35 = vmax.f32 %v1466_v20, %v1467_v50  ;;  %v1273_v20 = vsel %vm1227_vm7, %v6947_v41, -inf  ;;  %v833_v50 = vpop.f32.mrf.mxu3 }
 0x2e0   :  { %v1017_v18 = vpop.xlane.xlu2 %1016  ;;  %v6964_v57 = vpop.xlane.xlu1 %968  ;;  %v1900_v60 = vrot.slane %v1899_v61, 1 }
 0x2e1   :  { %v1211_v34 = vpop.xlane.xlu0 %1210  ;;  %4927 = vmatmul.msk.f32.gmra.mxu2 %vm1423_vm13, %v1468_v35  ;;  %v1385_v55 = vsel %vm1324_vm9, %v1017_v18, %v6943_v24 }
 0x2e2   :  { %v1901_v51 = vadd.f32 %v1900_v60, %v1899_v61 }
 0x2e4   :  { %v1951_v22 = vmul.f32 %v1901_v51, %v6956_v32  ;;  %v1952_v60 = vmul.f32 %v1901_v51, %v6970_v6 }
 0x2e5   :  { %1177 = vmax.xlane.f32.xlu2 %v1176_v52  ;;  %v898_v52 = vpop.f32.mrf.mxu0 }
 0x2e6   :  { %1274 = vmax.xlane.f32.xlu0 %v1273_v20  ;;  %1999 = vmatmul.f32.vlgmr.msrb.gmra.mxu3 %v1951_v22  ;;  %v1583_v53 = vpop.f32.mrf.mxu1  ;;  %v1802_v43 = vsub.f32 %v6373_v62, %v898_v52  ;;  %v1706_v62 = vsub.f32 %v6395_v36, %v833_v50 }
 0x2e7   :  { %4938 = vmatmul.msk.f32.gmra.mxu0 %vm65_vm0, %v6970_v6  ;;  %v836_v41 = vpop.f32.mrf.mxu3 }
 0x2e8   :  { %v1308_v46 = vpop.xlane.xlu2 %1307  ;;  %v1214_v26 = vpop.xlane.xlu1 %1213 }
 0x2e9   :  { %v6976_v47 = vpop.xlane.xlu0 %1162  ;;  %4928 = vmatmul.msk.f32.gmra.mxu2 %vm1423_vm13, %v1468_v35 }
 0x2ec   :  { %v1661_v61 = vpop.f32.mrf.mxu2 }
 0x2ed   :  { %v1817_v25 = vsub.f32 %v1801_v14, %v1661_v61  ;;  %v1705_v14 = vsub.f32 %v6353_v3, %v830_v56  ;;  %v1401_v61 = vsel %vm1341_vm11, %v1385_v55, %v1211_v34  ;;  %v1722_v56 = vsub.f32 %v1706_v62, %v1583_v53 }
 0x2ee   :  { %2002 = vmatmul.f32.gmra.mxu3 %v1952_v60  ;;  %v1417_v52 = vsel %vm1358_vm15, %v1401_v61, %v1308_v46 }
 0x2ef   :  { %v1835_v45 = vmul.f32 1.442695, %v1817_v25  ;;  %v1721_v24 = vsub.f32 %v1705_v14, %v1580_v17  ;;  %v1469_v36 = vsel %vm1423_vm13, %v1417_v52, -inf }
 0x2f0   :  { %v6981_v22 = vpop.xlane.xlu2 %1065  ;;  %v6983_v20 = vpop.xlane.xlu1 %1216 }
 0x2f1   :  { %v1020_v59 = vpop.xlane.xlu0 %1019  ;;  %5356 = vpow2.f32 %v1835_v45  ;;  %v1586_v38 = vpop.f32.mrf.mxu1  ;;  %v1739_v17 = vmul.f32 1.442695, %v1721_v24 }
 0x2f4   :  { %v1664_v35 = vpop.f32.mrf.mxu2 }
 0x2f5   :  { %v1818_v12 = vsub.f32 %v1802_v43, %v1664_v35  ;;  %v1707_v35 = vsub.f32 %v6433_v5, %v836_v41 }
 0x2f7   :  { %v1837_v51 = vmul.f32 1.442695, %v1818_v12  ;;  %5144 = vrot.lane.b32.xlu1 %v6362_v9, %s5462_s7  ;;  %v5357_v3 = vpop.eup %5356  ;;  %v1723_v55 = vsub.f32 %v1707_v35, %v1586_v38 }
 0x2f8   :  { %v6992_v60 = vpop.xlane.xlu1 %1025  ;;  %v1117_v25 = vpop.xlane.xlu2 %1116 }
 0x2f9   :  { %5358 = vpow2.f32 %v1837_v51  ;;  %v1386_v45 = vsel %vm1324_vm9, %v1020_v59, %v1117_v25  ;;  %v1311_v43 = vpop.xlane.xlu0 %1310  ;;  %v839_v59 = vpop.f32.mrf.mxu3  ;;  %v1741_v51 = vmul.f32 1.442695, %v1722_v56 }
 0x2fa   :  { %v1402_v18 = vsel %vm1341_vm11, %v1386_v45, %v1214_v26  ;;  %5154 = vrot.lane.b32.xlu0 %v6327_v33, %s5462_s7  ;;  %v1865_v26 = vadd.f32 0.0001, %v5357_v3  ;;  %v1708_v61 = vsub.f32 %v6499_v1, %v839_v59  ;;  %5360 = vpow2.f32 %v1739_v17 }
 0x2fb   :  { %v1418_v34 = vsel %vm1358_vm15, %v1402_v18, %v1311_v43  ;;  %v1743_v43 = vmul.f32 1.442695, %v1723_v55  ;;  %5362 = vpow2.f32 %v1741_v51 }
 0x2fc   :  { %v1470_v46 = vsel %vm1423_vm13, %v1418_v34, -inf  ;;  %v7011_v45 = vmul.f32 0.17677669, %v1865_v26  ;;  %v901_v26 = vpop.f32.mrf.mxu0 }
 0x2fd   :  { %v1471_v50 = vmax.f32 %v1469_v36, %v1470_v46  ;;  %5149 = vrot.lane.b32.xlu2 %v6404_v4, %s5462_s7  ;;  %5364 = vpow2.f32 %v1743_v43 }
 0x2ff   :  { %v5359_v12 = vpop.eup %5358  ;;  %v1472_v14 = vrot.slane %v1471_v50, 4  ;;  %5164 = vrot.lane.b32.xlu1 %v6511_v42, %s5462_s7 }
 0x300   :  { %v1866_v53 = vadd.f32 0.0001, %v5359_v12  ;;  %v7008_v5 = vpop.xlane.xlu1 %1316  ;;  %v1120_v41 = vpop.xlane.xlu2 %1119 }
 0x301   :  { %v1473_v25 = vmax.f32 %v1471_v50, %v1472_v14  ;;  %v1023_v62 = vpop.xlane.xlu0 %1022  ;;  %v1589_v52 = vpop.f32.mrf.mxu1 }
 0x302   :  { %v7013_v38 = vmul.f32 0.17677669, %v1866_v53  ;;  %5179 = vrot.lane.b32.xlu0 %v6552_v11, %s5462_s7  ;;  %v1724_v18 = vsub.f32 %v1708_v61, %v1589_v52  ;;  %v5361_v36 = vpop.eup %5360  ;;  %v1803_v52 = vsub.f32 %v6417_v40, %v901_v26  ;;  %v1387_v43 = vsel %vm1324_vm9, %v1023_v62, %v1120_v41 }
 0x303   :  { %v1474_v24 = vrot.slane %v1473_v25, 2  ;;  %v5363_v17 = vpop.eup %5362  ;;  %v1769_v53 = vadd.f32 0.0001, %v5361_v36 }
 0x304   :  { %4939 = vmatpush.xpose.msk.msra.mxu1 %vm65_vm0, %v7013_v38  ;;  %v1902_v1 = vadd.f32 %v7013_v38, %v7011_v45  ;;  %v1745_v34 = vmul.f32 1.442695, %v1724_v18  ;;  %v5365_v14 = vpop.eup %5364  ;;  %v1770_v61 = vadd.f32 0.0001, %v5363_v17  ;;  %v1403_v17 = vsel %vm1341_vm11, %v1387_v43, %v6983_v20 }
 0x305   :  { %v1475_v3 = vmax.f32 %v1473_v25, %v1474_v24  ;;  %5159 = vrot.lane.b32.xlu2 %v6382_v28, %s5462_s7  ;;  %v1771_v18 = vadd.f32 0.0001, %v5365_v14  ;;  %v904_v14 = vpop.f32.mrf.mxu0 }
 0x306   :  { %v1903_v56 = vrot.slane %v1902_v1, 4  ;;  %5366 = vpow2.f32 %v1745_v34  ;;  %v1804_v43 = vsub.f32 %v6464_v16, %v904_v14 }
 0x307   :  { %5174 = vrot.lane.b32.xlu1 %v6530_v27, %s5462_s7  ;;  %v1476_v35 = vrot.slane %v1475_v3, 1 }
 0x308   :  { %v1220_v46 = vpop.xlane.xlu2 %1219  ;;  %v7025_v50 = vpop.xlane.xlu1 %1028  ;;  %4940 = vmatpush.xpose.msk.msra.mxu1 %vm65_vm0, %v7011_v45  ;;  %v1904_v59 = vadd.f32 %v1903_v56, %v1902_v1  ;;  %v7040_v56 = vmul.f32 0.17677669, %v1770_v61 }
 0x309   :  { %v1314_v55 = vpop.xlane.xlu0 %1313  ;;  %v1477_v12 = vmax.f32 %v1475_v3, %v1476_v35  ;;  %v7038_v3 = vmul.f32 0.17677669, %v1769_v53  ;;  %v7050_v53 = vmul.f32 0.17677669, %v1771_v18 }
 0x30a   :  { %2699 = vrot.lane.b32.xlu0 %v6956_v32, %s5463_s23  ;;  %v1905_v51 = vrot.slane %v1904_v59, 2  ;;  %v1419_v41 = vsel %vm1358_vm15, %v1403_v17, %v1314_v55 }
 0x30b   :  { %4929 = vmatmul.msk.f32.gmra.mxu2 %vm1423_vm13, %v1477_v12 }
 0x30c   :  { %v1906_v25 = vadd.f32 %v1905_v51, %v1904_v59  ;;  %v5367_v59 = vpop.eup %5366 }
 0x30d   :  { %5169 = vrot.lane.b32.xlu2 %v6473_v8, %s5462_s7  ;;  %v1772_v20 = vadd.f32 0.0001, %v5367_v59 }
 0x30e   :  { %v1907_v24 = vrot.slane %v1906_v25, 1 }
 0x30f   :  { %2701 = vrot.lane.b32.xlu1 %v6970_v6, %s5463_s23  ;;  %v1667_v1 = vpop.f32.mrf.mxu2 }
 0x310   :  { %v1819_v34 = vsub.f32 %v1803_v52, %v1667_v1  ;;  %v1223_v35 = vpop.xlane.xlu2 %1222  ;;  %v1908_v36 = vadd.f32 %v1907_v24, %v1906_v25  ;;  %v842_v24 = vpop.f32.mrf.mxu3 }
 0x311   :  { %v1320_v40 = vpop.xlane.xlu1 %1319  ;;  %v1123_v26 = vpop.xlane.xlu0 %1122  ;;  %v1709_v59 = vsub.f32 %v6565_v31, %v842_v24 }
 0x312   :  { %v1388_v62 = vsel %vm1324_vm9, %v6992_v60, %v1123_v26  ;;  %2740 = vrot.lane.b32.xlu0 %v7040_v56, %s5463_s23  ;;  %v1953_v51 = vmul.f32 %v1908_v36, %v7038_v3  ;;  %v1839_v25 = vmul.f32 1.442695, %v1819_v34  ;;  %v1478_v60 = vsel %vm1423_vm13, %v1419_v41, -inf }
 0x313   :  { %v1404_v61 = vsel %vm1341_vm11, %v1388_v62, %v1220_v46  ;;  %4930 = vmatmul.msk.f32.gmra.mxu2 %vm1423_vm13, %v1477_v12  ;;  %v7063_v12 = vmul.f32 0.17677669, %v1772_v20 }
 0x314   :  { %v1420_v55 = vsel %vm1358_vm15, %v1404_v61, %v7008_v5  ;;  %2005 = vmatmul.f32.gmra.mxu3 %v1953_v51  ;;  %5368 = vpow2.f32 %v1839_v25  ;;  %v1954_v51 = vmul.f32 %v1908_v36, %v7040_v56 }
 0x315   :  { %v1479_v52 = vsel %vm1423_vm13, %v1420_v55, -inf  ;;  %2777 = vrot.lane.b32.xlu2 %v7050_v53, %s5463_s23  ;;  %v1335_v55 = vsel %vm1324_vm9, %v6964_v57, %v6981_v22 }
 0x316   :  { %v1480_v18 = vmax.f32 %v1478_v60, %v1479_v52 }
 0x317   :  { %2738 = vrot.lane.b32.xlu1 %v7038_v3, %s5463_s23  ;;  %v1670_v46 = vpop.f32.mrf.mxu2 }
 0x318   :  { %v1481_v5 = vrot.slane %v1480_v18, 4  ;;  %v1820_v1 = vsub.f32 %v1804_v43, %v1670_v46  ;;  %v1032_v34 = vpop.xlane.xlu2 %1031 }
 0x319   :  { %v1129_v17 = vpop.xlane.xlu1 %1128  ;;  %v1126_v26 = vpop.xlane.xlu0 %1125 }
 0x31a   :  { %v1482_v41 = vmax.f32 %v1480_v18, %v1481_v5  ;;  %v1841_v62 = vmul.f32 1.442695, %v1820_v1  ;;  %2779 = vrot.lane.b32.xlu0 %v7063_v12, %s5463_s23  ;;  %v1592_v16 = vpop.f32.mrf.mxu1  ;;  %v1389_v14 = vsel %vm1324_vm9, %v7025_v50, %v1126_v26  ;;  %v5369_v31 = vpop.eup %5368  ;;  %v1390_v24 = vsel %vm1324_vm9, %v1032_v34, %v1129_v17 }
 0x31b   :  { %v1725_v61 = vsub.f32 %v1709_v59, %v1592_v16  ;;  %v1405_v60 = vsel %vm1341_vm11, %v1389_v14, %v1223_v35  ;;  %v1867_v43 = vadd.f32 0.0001, %v5369_v31  ;;  %v1352_v5 = vsel %vm1341_vm11, %v1335_v55, %v6976_v47 }
 0x31c   :  { %5370 = vpow2.f32 %v1841_v62  ;;  %2008 = vmatmul.f32.gmra.mxu3 %v1954_v51  ;;  %v1483_v20 = vrot.slane %v1482_v41, 2  ;;  %v1421_v18 = vsel %vm1358_vm15, %v1405_v60, %v1320_v40 }
 0x31d   :  { %v1747_v25 = vmul.f32 1.442695, %v1725_v61  ;;  %2705 = vrot.lane.b32.xlu2 %v6932_v29, %s5463_s23  ;;  %v1487_v40 = vsel %vm1423_vm13, %v1421_v18, -inf  ;;  %v7092_v17 = vmul.f32 0.17677669, %v1867_v43 }
 0x31e   :  { %v1484_v52 = vmax.f32 %v1482_v41, %v1483_v20 }
 0x31f   :  { %5372 = vpow2.f32 %v1747_v25  ;;  %2703 = vrot.lane.b32.xlu1 %v6930_v19, %s5463_s23 }
 0x320   :  { %v1323_v50 = vpop.xlane.xlu2 %1322  ;;  %v1485_v36 = vrot.slane %v1484_v52, 1 }
 0x321   :  { %v1260_v46 = vpop.xlane.xlu1 %1259  ;;  %v1226_v1 = vpop.xlane.xlu0 %1225 }
 0x322   :  { %v5371_v57 = vpop.eup %5370  ;;  %v1369_v22 = vsel %vm1358_vm15, %v1352_v5, %v1260_v46  ;;  %v1406_v35 = vsel %vm1341_vm11, %v1390_v24, %v1226_v1  ;;  %2744 = vrot.lane.b32.xlu0 %v7013_v38, %s5463_s23  ;;  %v1486_v59 = vmax.f32 %v1484_v52, %v1485_v36 }
 0x323   :  { %v1868_v26 = vadd.f32 0.0001, %v5371_v57  ;;  %v1422_v41 = vsel %vm1358_vm15, %v1406_v35, %v1323_v50  ;;  %4912 = vmatmul.msk.f32.gmra.mxu1 %vm1423_vm13, %v1369_v22  ;;  %v845_v50 = vpop.f32.mrf.mxu3  ;;  %v907_v35 = vpop.f32.mrf.mxu0 }
 0x324   :  { %v1488_v34 = vsel %vm1423_vm13, %v1422_v41, -inf  ;;  %4931 = vmatmul.msk.f32.gmra.mxu2 %vm1423_vm13, %v1486_v59  ;;  %v1710_v5 = vsub.f32 %v6604_v58, %v845_v50 }
 0x325   :  { %v5373_v47 = vpop.eup %5372  ;;  %v7094_v62 = vmul.f32 0.17677669, %v1868_v26  ;;  %v1489_v16 = vmax.f32 %v1487_v40, %v1488_v34 }
 0x326   :  { %v1773_v51 = vadd.f32 0.0001, %v5373_v47 }
 0x327   :  { %v1490_v14 = vrot.slane %v1489_v16, 4  ;;  %2742 = vrot.lane.b32.xlu1 %v7011_v45, %s5463_s23  ;;  %4943 = vmatpush.xpose.msk.msra.mxu2 %vm65_vm0, %v7094_v62  ;;  %v1909_v61 = vadd.f32 %v7094_v62, %v7092_v17 }
 0x328   :  { %v7102_v20 = vmul.f32 0.17677669, %v1773_v51  ;;  %v972_v25 = vpop.xlane.xlu2 %971 }
 0x329   :  { %v1491_v31 = vmax.f32 %v1489_v16, %v1490_v14  ;;  %v1166_v55 = vpop.xlane.xlu1 %1165  ;;  %v1069_v60 = vpop.xlane.xlu0 %1068  ;;  %v1910_v52 = vrot.slane %v1909_v61, 4 }
 0x32a   :  { %2816 = vrot.lane.b32.xlu2 %v7102_v20, %s5463_s23  ;;  %v1336_v24 = vsel %vm1324_vm9, %v972_v25, %v1069_v60  ;;  %v1805_v25 = vsub.f32 %v6543_v7, %v907_v35 }
 0x32b   :  { %v1492_v36 = vrot.slane %v1491_v31, 2  ;;  %4944 = vmatpush.xpose.msk.msra.mxu2 %vm65_vm0, %v7092_v17  ;;  %v1911_v43 = vadd.f32 %v1910_v52, %v1909_v61  ;;  %v1353_v40 = vsel %vm1341_vm11, %v1336_v24, %v1166_v55  ;;  %v848_v35 = vpop.f32.mrf.mxu3 }
 0x32c   :  { %4932 = vmatmul.msk.f32.gmra.mxu2 %vm1423_vm13, %v1486_v59 }
 0x32d   :  { %v1493_v18 = vmax.f32 %v1491_v31, %v1492_v36  ;;  %v1912_v46 = vrot.slane %v1911_v43, 2 }
 0x32f   :  { %v1595_v1 = vpop.f32.mrf.mxu1  ;;  %v1494_v57 = vrot.slane %v1493_v18, 1  ;;  %v1913_v22 = vadd.f32 %v1912_v46, %v1911_v43  ;;  %v910_v46 = vpop.f32.mrf.mxu0 }
 0x330   :  { %v1726_v26 = vsub.f32 %v1710_v5, %v1595_v1  ;;  %v1263_v41 = vpop.xlane.xlu2 %1262 }
 0x331   :  { %v1370_v34 = vsel %vm1358_vm15, %v1353_v40, %v1263_v41  ;;  %v1072_v47 = vpop.xlane.xlu1 %1071  ;;  %v975_v16 = vpop.xlane.xlu0 %974  ;;  %v1495_v51 = vmax.f32 %v1493_v18, %v1494_v57  ;;  %v1914_v59 = vrot.slane %v1913_v22, 1 }
 0x332   :  { %v1749_v14 = vmul.f32 1.442695, %v1726_v26  ;;  %2781 = vrot.lane.b32.xlu2 %v7092_v17, %s5463_s23  ;;  %4913 = vmatmul.msk.f32.gmra.mxu1 %vm1423_vm13, %v1370_v34  ;;  %v1337_v55 = vsel %vm1324_vm9, %v975_v16, %v1072_v47  ;;  %v1711_v34 = vsub.f32 %v6629_v13, %v848_v35 }
 0x333   :  { %v1915_v58 = vadd.f32 %v1914_v59, %v1913_v22  ;;  %v1806_v22 = vsub.f32 %v6575_v49, %v910_v46 }
 0x334   :  { %5374 = vpow2.f32 %v1749_v14  ;;  %4933 = vmatmul.msk.f32.gmra.mxu2 %vm1423_vm13, %v1495_v51 }
 0x335   :  { %v1955_v61 = vmul.f32 %v1915_v58, %v7050_v53  ;;  %v1956_v57 = vmul.f32 %v1915_v58, %v7063_v12 }
 0x337   :  { %v1673_v31 = vpop.f32.mrf.mxu2  ;;  %2011 = vmatmul.f32.gmra.mxu3 %v1955_v61 }
 0x338   :  { %v1821_v60 = vsub.f32 %v1805_v25, %v1673_v31  ;;  %v1169_v52 = vpop.xlane.xlu2 %1168 }
 0x339   :  { %v1354_v50 = vsel %vm1341_vm11, %v1337_v55, %v1169_v52  ;;  %v978_v36 = vpop.xlane.xlu1 %977  ;;  %v1266_v43 = vpop.xlane.xlu0 %1265 }
 0x33a   :  { %v5375_v24 = vpop.eup %5374  ;;  %v1371_v18 = vsel %vm1358_vm15, %v1354_v50, %v1266_v43  ;;  %v1843_v1 = vmul.f32 1.442695, %v1821_v60 }
 0x33b   :  { %v1774_v5 = vadd.f32 0.0001, %v5375_v24  ;;  %4914 = vmatmul.msk.f32.gmra.mxu1 %vm1423_vm13, %v1371_v18 }
 0x33c   :  { %4934 = vmatmul.msk.f32.gmra.mxu2 %vm1423_vm13, %v1495_v51  ;;  %5376 = vpow2.f32 %v1843_v1 }
 0x33d   :  { %v7124_v7 = vmul.f32 0.17677669, %v1774_v5 }
 0x33f   :  { %v1676_v26 = vpop.f32.mrf.mxu2  ;;  %2014 = vmatmul.f32.gmra.mxu3 %v1956_v57  ;;  %2818 = vrot.lane.b32.xlu0 %v7124_v7, %s5463_s23 }
 0x340   :  { %v1822_v41 = vsub.f32 %v1806_v22, %v1676_v26  ;;  %v1075_v40 = vpop.xlane.xlu2 %1074 }
 0x341   :  { %v1338_v47 = vsel %vm1324_vm9, %v978_v36, %v1075_v40  ;;  %v1269_v16 = vpop.xlane.xlu1 %1268  ;;  %v1172_v51 = vpop.xlane.xlu0 %1171 }
 0x342   :  { %v1845_v59 = vmul.f32 1.442695, %v1822_v41  ;;  %v1355_v14 = vsel %vm1341_vm11, %v1338_v47, %v1172_v51  ;;  %v1598_v58 = vpop.f32.mrf.mxu1  ;;  %v5377_v31 = vpop.eup %5376 }
 0x343   :  { %v1727_v49 = vsub.f32 %v1711_v34, %v1598_v58  ;;  %v1372_v61 = vsel %vm1358_vm15, %v1355_v14, %v1269_v16  ;;  %v1869_v55 = vadd.f32 0.0001, %v5377_v31 }
 0x344   :  { %5378 = vpow2.f32 %v1845_v59  ;;  %4945 = vmatmul.msk.f32.vlgmr.msra.gmra.mxu2 %vm65_vm0, %v7050_v53  ;;  %4915 = vmatmul.msk.f32.gmra.mxu1 %vm1423_vm13, %v1372_v61 }
 0x345   :  { %v1751_v25 = vmul.f32 1.442695, %v1727_v49  ;;  %v7141_v24 = vmul.f32 0.17677669, %v1869_v55  ;;  %v913_v55 = vpop.f32.mrf.mxu0 }
 0x347   :  { %5380 = vpow2.f32 %v1751_v25  ;;  %2783 = vrot.lane.b32.xlu0 %v7094_v62, %s5463_s23 }
 0x348   :  { %v981_v13 = vpop.xlane.xlu2 %980 }
 0x349   :  { %v1078_v60 = vpop.xlane.xlu0 %1077  ;;  %v1175_v36 = vpop.xlane.xlu1 %1174 }
 0x34a   :  { %v5379_v52 = vpop.eup %5378  ;;  %v1339_v46 = vsel %vm1324_vm9, %v981_v13, %v1078_v60  ;;  %v1807_v60 = vsub.f32 %v6616_v15, %v913_v55 }
 0x34b   :  { %v1870_v50 = vadd.f32 0.0001, %v5379_v52  ;;  %v1356_v35 = vsel %vm1341_vm11, %v1339_v46, %v1175_v36 }
 0x34c   :  { %4946 = vmatmul.msk.f32.gmra.mxu2 %vm65_vm0, %v7063_v12 }
 0x34d   :  { %v5381_v43 = vpop.eup %5380  ;;  %v7143_v18 = vmul.f32 0.17677669, %v1870_v50  ;;  %v916_v46 = vpop.f32.mrf.mxu0 }
 0x34e   :  { %v1775_v5 = vadd.f32 0.0001, %v5381_v43 }
 0x34f   :  { %2822 = vrot.lane.b32.xlu1 %v7143_v18, %s5463_s23  ;;  %4947 = vmatpush.xpose.msk.msra.mxu3 %vm65_vm0, %v7143_v18  ;;  %v1916_v1 = vadd.f32 %v7143_v18, %v7141_v24 }
 0x350   :  { %v7152_v57 = vmul.f32 0.17677669, %v1775_v5  ;;  %2820 = vrot.lane.b32.xlu0 %v7141_v24, %s5463_s23  ;;  %v1272_v22 = vpop.xlane.xlu2 %1271  ;;  %v1808_v5 = vsub.f32 %v6649_v2, %v916_v46 }
 0x351   :  { %v1373_v26 = vsel %vm1358_vm15, %v1356_v35, %v1272_v22  ;;  %v984_v41 = vpop.xlane.xlu0 %983  ;;  %v1917_v40 = vrot.slane %v1916_v1, 4  ;;  %v1081_v47 = vpop.xlane.xlu1 %1080 }
 0x352   :  { %8725 = vst [vmem:[#allocation23_spill] sm:$0xff] %v7152_v57  ;;  %2855 = vrot.lane.b32.xlu2 %v7152_v57, %s5463_s23  ;;  %4916 = vmatmul.msk.f32.gmra.mxu1 %vm1423_vm13, %v1373_v26  ;;  %v1340_v59 = vsel %vm1324_vm9, %v984_v41, %v1081_v47  ;;  %v851_v26 = vpop.f32.mrf.mxu3  ;;  %vm4736_vm9 = vcmask 195584  }
 0x353   :  { %4948 = vmatpush.xpose.msk.msra.mxu3 %vm65_vm0, %v7141_v24  ;;  %v1918_v34 = vadd.f32 %v1917_v40, %v1916_v1  ;;  %v1712_v47 = vsub.f32 %v6666_v63, %v851_v26 }
 0x355   :  { %v1919_v16 = vrot.slane %v1918_v34, 2  ;;  %v919_v26 = vpop.f32.mrf.mxu0 }
 0x357   :  { %v1920_v51 = vadd.f32 %v1919_v16, %v1918_v34 }
 0x358   :  { %v1178_v14 = vpop.xlane.xlu2 %1177  ;;  %v1601_v34 = vpop.f32.mrf.mxu1 }
 0x359   :  { %v1357_v58 = vsel %vm1341_vm11, %v1340_v59, %v1178_v14  ;;  %v1275_v49 = vpop.xlane.xlu0 %1274  ;;  %v1921_v61 = vrot.slane %v1920_v51, 1  ;;  %vm4807_vm11 = vcmask 392192  }
 0x35a   :  { %v1374_v25 = vsel %vm1358_vm15, %v1357_v58, %v1275_v49 }
 0x35b   :  { %4917 = vmatmul.msk.f32.gmra.mxu1 %vm1423_vm13, %v1374_v25  ;;  %v1922_v31 = vadd.f32 %v1921_v61, %v1920_v51  ;;  %v1728_v51 = vsub.f32 %v1712_v47, %v1601_v34  ;;  %v1809_v47 = vsub.f32 %v6679_v54, %v919_v26 }
 0x35d   :  { %v1957_v13 = vmul.f32 %v1922_v31, %v7102_v20  ;;  %v1958_v36 = vmul.f32 %v1922_v31, %v7124_v7  ;;  %v1753_v14 = vmul.f32 1.442695, %v1728_v51 }
 0x35f   :  { %2017 = vmatmul.f32.gmra.mxu3 %v1957_v13 }
 0x360   :  { %v7175_v35 = vpop.permute.xlu2 %5149 }
 0x363   :  { %4941 = vmatmul.msk.f32.vlgmr.msra.gmra.mxu1 %vm65_vm0, %v7038_v3 }
 0x364   :  { %v1679_v52 = vpop.f32.mrf.mxu2 }
 0x365   :  { %v1823_v50 = vsub.f32 %v1807_v60, %v1679_v52 }
 0x367   :  { %v1847_v43 = vmul.f32 1.442695, %v1823_v50  ;;  %2020 = vmatmul.f32.gmra.mxu3 %v1958_v36 }
 0x368   :  { %v7184_v58 = vpop.permute.xlu2 %5159 }
 0x369   :  { %5382 = vpow2.f32 %v1847_v43  ;;  %v7182_v2 = vpop.permute.xlu1 %5144 }
 0x36a   :  { %v5147_v31 = vunpack.i.h.bf16 %v7182_v2 }
 0x36b   :  { %4942 = vmatmul.msk.f32.gmra.mxu1 %vm65_vm0, %v7040_v56 }
 0x36c   :  { %v1682_v1 = vpop.f32.mrf.mxu2  ;;  %v7195_v13 = vpop.permute.xlu0 %5154 }
 0x36d   :  { %v1824_v22 = vsub.f32 %v1808_v5, %v1682_v1  ;;  %v5156_v50 = vunpack.i.l.bf16 %v7195_v13 }
 0x36f   :  { %v5383_v15 = vpop.eup %5382  ;;  %v1849_v41 = vmul.f32 1.442695, %v1824_v22 }
 0x370   :  { %v1871_v40 = vadd.f32 0.0001, %v5383_v15  ;;  %v7202_v36 = vpop.permute.xlu2 %5169 }
 0x371   :  { %5384 = vpow2.f32 %v1849_v41  ;;  %v7197_v55 = vpop.permute.xlu1 %5164  ;;  %v5171_v22 = vunpack.i.l.bf16 %v7202_v36 }
 0x372   :  { %v7178_v16 = vmul.f32 0.17677669, %v1871_v40  ;;  %5386 = vpow2.f32 %v1753_v14  ;;  %v5167_v46 = vunpack.i.h.bf16 %v7197_v55 }
 0x374   :  { %2859 = vrot.lane.b32.xlu0 %v7178_v16, %s5463_s23 }
 0x377   :  { %v5385_v59 = vpop.eup %5384 }
 0x378   :  { %v1872_v49 = vadd.f32 0.0001, %v5385_v59  ;;  %v5387_v52 = vpop.eup %5386 }
 0x379   :  { %v1776_v1 = vadd.f32 0.0001, %v5387_v52 }
 0x37a   :  { %v7186_v61 = vmul.f32 0.17677669, %v1872_v49  ;;  %v922_v49 = vpop.f32.mrf.mxu0 }
 0x37b   :  { %v7208_v40 = vmul.f32 0.17677669, %v1776_v1 }
 0x37c   :  { %2861 = vrot.lane.b32.xlu2 %v7186_v61, %s5463_s23  ;;  %4951 = vmatpush.xpose.msk.msrb.mxu0 %vm65_vm0, %v7186_v61  ;;  %v1923_v63 = vadd.f32 %v7186_v61, %v7178_v16 }
 0x37e   :  { %v1924_v25 = vrot.slane %v1923_v63, 4 }
 0x380   :  { %4952 = vmatpush.xpose.msk.msrb.mxu0 %vm65_vm0, %v7178_v16  ;;  %v1925_v60 = vadd.f32 %v1924_v25, %v1923_v63  ;;  %v1810_v25 = vsub.f32 %v6702_v37, %v922_v49 }
 0x382   :  { %v1926_v43 = vrot.slane %v1925_v60, 2  ;;  %v925_v54 = vpop.f32.mrf.mxu0 }
 0x383   :  { %4953 = vmatmul.msk.f32.vlgmr.msrb.gmra.mxu0 %vm65_vm0, %v7152_v57 }
 0x384   :  { %2447 = vmatpush.msra.mxu0 %v5147_v31  ;;  %v1927_v5 = vadd.f32 %v1926_v43, %v1925_v60 }
 0x386   :  { %2448 = vmatpush.msra.mxu0 %v5156_v50  ;;  %v1928_v15 = vrot.slane %v1927_v5, 1 }
 0x388   :  { %2571 = vmatpush.msrb.mxu0 %v5167_v46  ;;  %v1929_v41 = vadd.f32 %v1928_v15, %v1927_v5  ;;  %v854_v46 = vpop.f32.mrf.mxu3 }
 0x389   :  { %v1713_v1 = vsub.f32 %v6692_v48, %v854_v46 }
 0x38a   :  { %2572 = vmatpush.msrb.mxu0 %v5171_v22  ;;  %v1959_v34 = vmul.f32 %v1929_v41, %v7152_v57  ;;  %v1960_v63 = vmul.f32 %v1929_v41, %v7208_v40  ;;  %v928_v48 = vpop.f32.mrf.mxu0 }
 0x38b   :  { %4954 = vmatmul.msk.f32.gmra.mxu0 %vm65_vm0, %v7208_v40 }
 0x38c   :  { %2023 = vmatmul.f32.gmra.mxu3 %v1959_v34 }
 0x38e   :  { %v1685_v51 = vpop.f32.mrf.mxu2 }
 0x38f   :  { %v1825_v59 = vsub.f32 %v1809_v47, %v1685_v51  ;;  %v1811_v47 = vsub.f32 %v6719_v44, %v925_v54  ;;  %v1812_v54 = vsub.f32 %v6734_v23, %v928_v48 }
 0x391   :  { %v1851_v14 = vmul.f32 1.442695, %v1825_v59 }
 0x392   :  { %v931_v23 = vpop.f32.mrf.mxu0 }
 0x393   :  { %5388 = vpow2.f32 %v1851_v14 }
 0x394   :  { %2026 = vmatmul.f32.gmra.mxu3 %v1960_v63  ;;  %v857_v63 = vpop.f32.mrf.mxu3 }
 0x395   :  { %v1714_v46 = vsub.f32 %v6809_v10, %v857_v63 }
 0x396   :  { %v1688_v31 = vpop.f32.mrf.mxu2 }
 0x397   :  { %v1826_v60 = vsub.f32 %v1810_v25, %v1688_v31  ;;  %v5157_v25 = vunpack.i.h.bf16 %v7195_v13 }
 0x399   :  { %v5389_v52 = vpop.eup %5388  ;;  %v1853_v50 = vmul.f32 1.442695, %v1826_v60  ;;  %v5162_v60 = vunpack.i.h.bf16 %v7184_v58 }
 0x39a   :  { %v1873_v43 = vadd.f32 0.0001, %v5389_v52 }
 0x39b   :  { %5390 = vpow2.f32 %v1853_v50 }
 0x39c   :  { %v7216_v5 = vmul.f32 0.17677669, %v1873_v43 }
 0x39e   :  { %8726 = vst [vmem:[#allocation24_spill] sm:$0xff] %v7216_v5  ;;  %2898 = vrot.lane.b32.xlu0 %v7216_v5, %s5463_s23 }
 0x3a0   :  { %v1604_v22 = vpop.f32.mrf.mxu1 }
 0x3a1   :  { %v5391_v15 = vpop.eup %5390  ;;  %v1729_v26 = vsub.f32 %v1713_v1, %v1604_v22  ;;  %v7236_v1 = vpop.permute.xlu1 %5174 }
 0x3a2   :  { %v1874_v41 = vadd.f32 0.0001, %v5391_v15  ;;  %v5172_v15 = vunpack.i.h.bf16 %v7202_v36  ;;  %v860_v36 = vpop.f32.mrf.mxu3 }
 0x3a3   :  { %v1755_v37 = vmul.f32 1.442695, %v1729_v26 }
 0x3a4   :  { %v7221_v34 = vmul.f32 0.17677669, %v1874_v41 }
 0x3a5   :  { %5392 = vpow2.f32 %v1755_v37 }
 0x3a6   :  { %2900 = vrot.lane.b32.xlu2 %v7221_v34, %s5463_s23  ;;  %4955 = vmatpush.xpose.msk.msrb.mxu1 %vm65_vm0, %v7221_v34  ;;  %v1930_v51 = vadd.f32 %v7221_v34, %v7216_v5 }
 0x3a7   :  { %v1691_v59 = vpop.f32.mrf.mxu2 }
 0x3a8   :  { %v1827_v14 = vsub.f32 %v1811_v47, %v1691_v59  ;;  %v1931_v49 = vrot.slane %v1930_v51, 4 }
 0x3aa   :  { %4956 = vmatpush.xpose.msk.msrb.mxu1 %vm65_vm0, %v7216_v5  ;;  %v1932_v44 = vadd.f32 %v1931_v49, %v1930_v51  ;;  %v1855_v50 = vmul.f32 1.442695, %v1827_v14  ;;  %v5177_v51 = vunpack.i.h.bf16 %v7236_v1 }
 0x3ab   :  { %v5393_v31 = vpop.eup %5392 }
 0x3ac   :  { %v1777_v52 = vadd.f32 0.0001, %v5393_v31  ;;  %v1933_v43 = vrot.slane %v1932_v44, 2  ;;  %5394 = vpow2.f32 %v1855_v50 }
 0x3ae   :  { %2478 = vmatpush.msra.mxu1 %v5157_v25  ;;  %v7238_v22 = vmul.f32 0.17677669, %v1777_v52  ;;  %v1934_v13 = vadd.f32 %v1933_v43, %v1932_v44  ;;  %v1813_v25 = vsub.f32 %v6756_v30, %v931_v23  ;;  %v1715_v44 = vsub.f32 %v6840_v39, %v860_v36 }
 0x3af   :  { %v1694_v26 = vpop.f32.mrf.mxu2  ;;  %v1607_v41 = vpop.f32.mrf.mxu1 }
 0x3b0   :  { %2479 = vmatpush.msra.mxu1 %v5162_v60  ;;  %8727 = vst [vmem:[#allocation25_spill] sm:$0xff] %v7238_v22  ;;  %v1828_v37 = vsub.f32 %v1812_v54, %v1694_v26  ;;  %2894 = vrot.lane.b32.xlu0 %v7238_v22, %s5463_s23  ;;  %v1730_v47 = vsub.f32 %v1714_v46, %v1607_v41  ;;  %v1935_v10 = vrot.slane %v1934_v13, 1 }
 0x3b1   :  { %4957 = vmatmul.msk.f32.vlgmr.msrb.gmra.mxu1 %vm65_vm0, %v7238_v22 }
 0x3b2   :  { %2602 = vmatpush.msrb.mxu1 %v5172_v15  ;;  %v1857_v48 = vmul.f32 1.442695, %v1828_v37  ;;  %v1757_v59 = vmul.f32 1.442695, %v1730_v47  ;;  %v1936_v14 = vadd.f32 %v1935_v10, %v1934_v13  ;;  %v5395_v63 = vpop.eup %5394  ;;  %v934_v15 = vpop.f32.mrf.mxu0 }
 0x3b3   :  { %v1875_v50 = vadd.f32 0.0001, %v5395_v63  ;;  %v863_v47 = vpop.f32.mrf.mxu3  ;;  %v1814_v39 = vsub.f32 %v6781_v21, %v934_v15  ;;  %v7272_v15 = vpop.permute.xlu0 %5179 }
 0x3b4   :  { %2603 = vmatpush.msrb.mxu1 %v5177_v51  ;;  %5396 = vpow2.f32 %v1857_v48  ;;  %v1961_v49 = vmul.f32 %v1936_v14, %v7238_v22 }
 0x3b5   :  { %5398 = vpow2.f32 %v1757_v59  ;;  %v7249_v10 = vmul.f32 0.17677669, %v1875_v50  ;;  %v1716_v59 = vsub.f32 %v6864_v0, %v863_v47 }
 0x3b6   :  { %2029 = vmatmul.f32.gmra.mxu3 %v1961_v49 }
 0x3b7   :  { %v1697_v31 = vpop.f32.mrf.mxu2 }
 0x3b8   :  { %v1829_v60 = vsub.f32 %v1813_v25, %v1697_v31  ;;  %v1610_v52 = vpop.f32.mrf.mxu1 }
 0x3b9   :  { %v1731_v43 = vsub.f32 %v1715_v44, %v1610_v52  ;;  %v5146_v44 = vunpack.i.l.bf16 %v7182_v2 }
 0x3ba   :  { %v5397_v46 = vpop.eup %5396  ;;  %v1859_v54 = vmul.f32 1.442695, %v1829_v60 }
 0x3bb   :  { %v5399_v13 = vpop.eup %5398  ;;  %v1876_v26 = vadd.f32 0.0001, %v5397_v46  ;;  %v1759_v41 = vmul.f32 1.442695, %v1731_v43  ;;  %v5151_v43 = vunpack.i.l.bf16 %v7175_v35 }
 0x3bc   :  { %v1778_v37 = vadd.f32 0.0001, %v5399_v13  ;;  %5400 = vpow2.f32 %v1859_v54 }
 0x3bd   :  { %v7251_v30 = vmul.f32 0.17677669, %v1876_v26  ;;  %5402 = vpow2.f32 %v1759_v41  ;;  %v5166_v26 = vunpack.i.l.bf16 %v7197_v55 }
 0x3be   :  { %v7254_v23 = vmul.f32 0.17677669, %v1778_v37  ;;  %v5181_v37 = vunpack.i.l.bf16 %v7272_v15 }
 0x3bf   :  { %2939 = vrot.lane.b32.xlu2 %v7251_v30, %s5463_s23  ;;  %v1700_v51 = vpop.f32.mrf.mxu2  ;;  %4959 = vmatpush.xpose.msk.msrb.mxu2 %vm65_vm0, %v7251_v30  ;;  %v1937_v48 = vadd.f32 %v7251_v30, %v7249_v10 }
 0x3c0   :  { %8728 = vst [vmem:[#allocation26_spill] sm:$0xff] %v7254_v23  ;;  %v1830_v36 = vsub.f32 %v1814_v39, %v1700_v51  ;;  %4958 = vmatmul.msk.f32.gmra.mxu1 %vm65_vm0, %v7254_v23  ;;  %v1962_v21 = vmul.f32 %v1936_v14, %v7254_v23  ;;  %v866_v51 = vpop.f32.mrf.mxu3 }
 0x3c1   :  { %v1613_v49 = vpop.f32.mrf.mxu1  ;;  %v1938_v63 = vrot.slane %v1937_v48, 4 }
 0x3c2   :  { %v5401_v25 = vpop.eup %5400  ;;  %v1861_v31 = vmul.f32 1.442695, %v1830_v36  ;;  %v1732_v60 = vsub.f32 %v1716_v59, %v1613_v49  ;;  %2032 = vmatmul.f32.gmra.mxu3 %v1962_v21 }
 0x3c3   :  { %v5403_v52 = vpop.eup %5402  ;;  %v1877_v50 = vadd.f32 0.0001, %v5401_v25  ;;  %4960 = vmatpush.xpose.msk.msrb.mxu2 %vm65_vm0, %v7249_v10  ;;  %v1939_v0 = vadd.f32 %v1938_v63, %v1937_v48  ;;  %v8729_v63 = vld [vmem:[#allocation21_spill] sm:$0xff] }
 0x3c4   :  { %v1779_v46 = vadd.f32 0.0001, %v5403_v52  ;;  %5404 = vpow2.f32 %v1861_v31  ;;  %v1761_v54 = vmul.f32 1.442695, %v1732_v60  ;;  %v1717_v25 = vsub.f32 %v8729_v63, %v866_v51 }
 0x3c5   :  { %v7270_v14 = vmul.f32 0.17677669, %v1877_v50  ;;  %v1940_v13 = vrot.slane %v1939_v0, 2 }
 0x3c6   :  { %v7274_v2 = vmul.f32 0.17677669, %v1779_v46  ;;  %5406 = vpow2.f32 %v1761_v54 }
 0x3c7   :  { %2509 = vmatpush.msra.mxu2 %v5146_v44  ;;  %2976 = vrot.lane.b32.xlu2 %v7270_v14, %s5463_s23  ;;  %v1941_v41 = vadd.f32 %v1940_v13, %v1939_v0 }
 0x3c8   :  { %2933 = vrot.lane.b32.xlu1 %v7274_v2, %s5463_s23  ;;  %4961 = vmatmul.msk.f32.vlgmr.msrb.gmra.mxu2 %vm65_vm0, %v7274_v2  ;;  %v869_v46 = vpop.f32.mrf.mxu3 }
 0x3c9   :  { %2510 = vmatpush.msra.mxu2 %v5151_v43  ;;  %v1942_v47 = vrot.slane %v1941_v41, 1 }
 0x3ca   :  { %v5405_v39 = vpop.eup %5404 }
 0x3cb   :  { %2633 = vmatpush.msrb.mxu2 %v5166_v26  ;;  %v1878_v48 = vadd.f32 0.0001, %v5405_v39  ;;  %v1943_v59 = vadd.f32 %v1942_v47, %v1941_v41  ;;  %v8731_v26 = vld [vmem:[#allocation22_spill] sm:$0xff] }
 0x3cc   :  { %v5407_v55 = vpop.eup %5406  ;;  %v1718_v41 = vsub.f32 %v8731_v26, %v869_v46  ;;  %v5161_v46 = vunpack.i.l.bf16 %v7184_v58  ;;  %v5182_v58 = vunpack.i.h.bf16 %v7272_v15 }
 0x3cd   :  { %2634 = vmatpush.msrb.mxu2 %v5181_v37  ;;  %v7284_v36 = vmul.f32 0.17677669, %v1878_v48  ;;  %v1780_v21 = vadd.f32 0.0001, %v5407_v55  ;;  %v1963_v49 = vmul.f32 %v1943_v59, %v7274_v2 }
 0x3cf   :  { %v7288_v44 = vmul.f32 0.17677669, %v1780_v21  ;;  %2035 = vmatmul.f32.gmra.mxu3 %v1963_v49  ;;  %v1616_v31 = vpop.f32.mrf.mxu1  ;;  %v1944_v60 = vadd.f32 %v7284_v36, %v7270_v14 }
 0x3d0   :  { %4963 = vmatpush.xpose.msk.msrb.mxu3 %vm65_vm0, %v7284_v36  ;;  %v1733_v52 = vsub.f32 %v1717_v25, %v1616_v31  ;;  %2937 = vrot.lane.b32.xlu1 %v7249_v10, %s5463_s23 }
 0x3d1   :  { %8730 = vst [vmem:[#allocation21_spill] sm:$0xff] %v7288_v44  ;;  %2935 = vrot.lane.b32.xlu2 %v7288_v44, %s5463_s23  ;;  %4962 = vmatmul.msk.f32.gmra.mxu2 %vm65_vm0, %v7288_v44  ;;  %v1945_v50 = vrot.slane %v1944_v60, 4  ;;  %v1964_v54 = vmul.f32 %v1943_v59, %v7288_v44 }
 0x3d2   :  { %v1763_v0 = vmul.f32 1.442695, %v1733_v52  ;;  %v7316_v52 = vpop.f32.mrf.mxu3 }
 0x3d3   :  { %v1946_v43 = vadd.f32 %v1945_v50, %v1944_v60 }
 0x3d4   :  { %5408 = vpow2.f32 %v1763_v0  ;;  %4964 = vmatpush.xpose.msk.msrb.mxu3 %vm65_vm0, %v7270_v14  ;;  %v5152_v0 = vunpack.i.h.bf16 %v7175_v35 }
 0x3d5   :  { %v1947_v13 = vrot.slane %v1946_v43, 2 }
 0x3d7   :  { %2038 = vmatmul.f32.gmra.mxu3 %v1964_v54  ;;  %v1948_v37 = vadd.f32 %v1947_v13, %v1946_v43  ;;  %v5176_v54 = vunpack.i.l.bf16 %v7236_v1 }
 0x3d8   :  { %2978 = vrot.lane.b32.xlu1 %v7284_v36, %s5463_s23  ;;  %v1619_v47 = vpop.f32.mrf.mxu1 }
 0x3d9   :  { %v1734_v39 = vsub.f32 %v1718_v41, %v1619_v47  ;;  %2896 = vrot.lane.b32.xlu2 %v7254_v23, %s5463_s23  ;;  %v1949_v51 = vrot.slane %v1948_v37, 1  ;;  %v7400_v47 = vpop.permute.xlu2 %2777 }
 0x3da   :  { %v5409_v48 = vpop.eup %5408  ;;  %v7329_v43 = vpop.f32.mrf.mxu3 }
 0x3db   :  { %v1781_v55 = vadd.f32 0.0001, %v5409_v48  ;;  %v1765_v21 = vmul.f32 1.442695, %v1734_v39  ;;  %v1950_v59 = vadd.f32 %v1949_v51, %v1948_v37  ;;  %v7408_v39 = vpop.permute.xlu0 %2699 }
 0x3dd   :  { %v7308_v49 = vmul.f32 0.17677669, %v1781_v55  ;;  %5410 = vpow2.f32 %v1765_v21  ;;  %v7420_v55 = vpop.permute.xlu1 %2701 }
 0x3de   :  { %8734 = vst [vmem:[#allocation28_spill] sm:$0xff] %v7420_v55 }
 0x3df   :  { %v1965_v63 = vmul.f32 %v1950_v59, %v7308_v49 }
 0x3e0   :  { %2972 = vrot.lane.b32.xlu1 %v7308_v49, %s5463_s23 }
 0x3e1   :  { %5194 = vrot.lane.b32.xlu2 %v6327_v33, %s5464_s24  ;;  %2041 = vmatmul.f32.gmra.mxu3 %v1965_v63  ;;  %v7416_v48 = vpop.permute.xlu2 %2705 }
 0x3e2   :  { %v7338_v35 = vpop.f32.mrf.mxu3 }
 0x3e3   :  { %v5411_v25 = vpop.eup %5410 }
 0x3e4   :  { %v1782_v31 = vadd.f32 0.0001, %v5411_v25 }
 0x3e5   :  { %v7434_v25 = vpop.permute.xlu1 %2738 }
 0x3e6   :  { %v7314_v60 = vmul.f32 0.17677669, %v1782_v31 }
 0x3e8   :  { %8732 = vst [vmem:[#allocation22_spill] sm:$0xff] %v7314_v60  ;;  %2857 = vrot.lane.b32.xlu1 %v7208_v40, %s5463_s23  ;;  %2974 = vrot.lane.b32.xlu0 %v7314_v60, %s5463_s23  ;;  %v1966_v50 = vmul.f32 %v1950_v59, %v7314_v60  ;;  %v7424_v59 = vpop.permute.xlu0 %2740 }
 0x3e9   :  { %5209 = vrot.lane.b32.xlu2 %v6552_v11, %s5464_s24  ;;  %8735 = vst [vmem:[#allocation29_spill] sm:$0xff] %v7424_v59  ;;  %v7436_v31 = vpop.permute.xlu2 %2816 }
 0x3ea   :  { %2044 = vmatmul.f32.gmra.mxu3 %v1966_v50  ;;  %v7350_v13 = vpop.f32.mrf.mxu3 }
 0x3f0   :  { %5184 = vrot.lane.b32.xlu1 %v6362_v9, %s5464_s24  ;;  %5189 = vrot.lane.b32.xlu0 %v6404_v4, %s5464_s24  ;;  %v7438_v50 = vpop.permute.xlu0 %2779 }
 0x3f1   :  { %3387 = vrot.lane.b32.xlu2 %v7094_v62, %s5462_s7  ;;  %8737 = vst [vmem:[#allocation31_spill] sm:$0xff] %v7438_v50 }
 0x3f2   :  { %4949 = vmatmul.msk.f32.vlgmr.msra.gmra.mxu3 %vm65_vm0, %v7102_v20  ;;  %v7360_v15 = vpop.f32.mrf.mxu3 }
 0x3f3   :  { %2540 = vmatpush.msra.mxu3 %v5152_v0 }
 0x3f5   :  { %2541 = vmatpush.msra.mxu3 %v5161_v46  ;;  %v7450_v46 = vpop.permute.xlu2 %2781 }
 0x3f8   :  { %5199 = vrot.lane.b32.xlu1 %v6382_v28, %s5464_s24  ;;  %5204 = vrot.lane.b32.xlu0 %v6511_v42, %s5464_s24 }
 0x3f9   :  { %3348 = vrot.lane.b32.xlu2 %v7013_v38, %s5462_s7 }
 0x3fa   :  { %4950 = vmatmul.msk.f32.gmra.mxu3 %vm65_vm0, %v7124_v7  ;;  %v7368_v1 = vpop.f32.mrf.mxu3 }
 0x400   :  { %5214 = vrot.lane.b32.xlu1 %v6473_v8, %s5464_s24  ;;  %5219 = vrot.lane.b32.xlu0 %v6530_v27, %s5464_s24 }
 0x401   :  { %3424 = vrot.lane.b32.xlu2 %v7141_v24, %s5462_s7 }
 0x402   :  { %4965 = vmatmul.msk.f32.vlgmr.msrb.gmra.mxu3 %vm65_vm0, %v7308_v49  ;;  %v7376_v26 = vpop.f32.mrf.mxu3 }
 0x403   :  { %2664 = vmatpush.msrb.mxu3 %v5182_v58  ;;  %v7452_v58 = vpop.permute.xlu0 %2744 }
 0x405   :  { %2665 = vmatpush.msrb.mxu3 %v5176_v54 }
 0x408   :  { %3309 = vrot.lane.b32.xlu1 %v6932_v29, %s5462_s7  ;;  %3426 = vrot.lane.b32.xlu0 %v7143_v18, %s5462_s7 }
 0x409   :  { %3303 = vrot.lane.b32.xlu2 %v6956_v32, %s5462_s7 }
 0x40a   :  { %4966 = vmatmul.msk.f32.gmra.mxu3 %vm65_vm0, %v7314_v60  ;;  %v7384_v41 = vpop.f32.mrf.mxu3 }
 0x410   :  { %3385 = vrot.lane.b32.xlu1 %v7092_v17, %s5462_s7  ;;  %3307 = vrot.lane.b32.xlu0 %v6930_v19, %s5462_s7 }
 0x411   :  { %3383 = vrot.lane.b32.xlu2 %v7063_v12, %s5462_s7 }
 0x412   :  { %v7392_v37 = vpop.f32.mrf.mxu3 }
 0x418   :  { %3381 = vrot.lane.b32.xlu1 %v7050_v53, %s5462_s7  ;;  %3346 = vrot.lane.b32.xlu0 %v7011_v45, %s5462_s7 }
 0x419   :  { %3422 = vrot.lane.b32.xlu2 %v7124_v7, %s5462_s7 }
 0x41a   :  { %v7410_v51 = vpop.f32.mrf.mxu3 }
 0x41b   :  { %8733 = vst [vmem:[#allocation27_spill] sm:$0xff] %v7410_v51 }
 0x420   :  { %3420 = vrot.lane.b32.xlu1 %v7102_v20, %s5462_s7  ;;  %3342 = vrot.lane.b32.xlu0 %v7038_v3, %s5462_s7 }
 0x421   :  { %3344 = vrot.lane.b32.xlu2 %v7040_v56, %s5462_s7 }
 0x428   :  { %3543 = vrot.lane.b32.xlu1 %v7251_v30, %s5462_s7  ;;  %3305 = vrot.lane.b32.xlu0 %v6970_v6, %s5462_s7 }
 0x429   :  { %3463 = vrot.lane.b32.xlu2 %v7178_v16, %s5462_s7 }
 0x430   :  { %3465 = vrot.lane.b32.xlu1 %v7186_v61, %s5462_s7  ;;  %3541 = vrot.lane.b32.xlu0 %v7249_v10, %s5462_s7 }
 0x431   :  { %3502 = vrot.lane.b32.xlu2 %v7216_v5, %s5462_s7 }
 0x438   :  { %3504 = vrot.lane.b32.xlu1 %v7221_v34, %s5462_s7  ;;  %3537 = vrot.lane.b32.xlu0 %v7274_v2, %s5462_s7 }
 0x439   :  { %3498 = vrot.lane.b32.xlu2 %v7238_v22, %s5462_s7  ;;  %v7422_v21 = vpop.f32.mrf.mxu3 }
 0x440   :  { %3580 = vrot.lane.b32.xlu1 %v7270_v14, %s5462_s7  ;;  %3582 = vrot.lane.b32.xlu0 %v7284_v36, %s5462_s7 }
 0x441   :  { %3578 = vrot.lane.b32.xlu2 %v7314_v60, %s5462_s7 }
 0x445   :  { %v7432_v63 = vpop.f32.mrf.mxu3 }
 0x446   :  { %8736 = vst [vmem:[#allocation30_spill] sm:$0xff] %v7432_v63 }
 0x448   :  { %3459 = vrot.lane.b32.xlu1 %v7152_v57, %s5462_s7  ;;  %3576 = vrot.lane.b32.xlu0 %v7308_v49, %s5462_s7 }
 0x449   :  { %5229 = vrot.lane.b32.xlu2 %v6404_v4, %s5465_s25  ;;  %v7448_v4 = vpop.permute.xlu1 %2703 }
 0x450   :  { %3539 = vrot.lane.b32.xlu1 %v7288_v44, %s5462_s7  ;;  %3461 = vrot.lane.b32.xlu0 %v7208_v40, %s5462_s7  ;;  %v7466_v44 = vpop.permute.xlu0 %2818 }
 0x451   :  { %5244 = vrot.lane.b32.xlu2 %v6511_v42, %s5465_s25  ;;  %v7462_v42 = vpop.permute.xlu2 %2855  ;;  %v7464_v60 = vpop.permute.xlu1 %2742  ;;  %8740 = vst [vmem:[#allocation34_spill] sm:$0xff] %v7466_v44 }
 0x452   :  { %v7446_v0 = vpop.f32.mrf.mxu3  ;;  %8739 = vst [vmem:[#allocation33_spill] sm:$0xff] %v7462_v42 }
 0x458   :  { %3500 = vrot.lane.b32.xlu1 %v7254_v23, %s5462_s7  ;;  %5224 = vrot.lane.b32.xlu0 %v6362_v9, %s5465_s25 }
 0x459   :  { %5259 = vrot.lane.b32.xlu2 %v6530_v27, %s5465_s25  ;;  %v2137_v27 = vpop.f32.mrf.mxu0  ;;  %v7476_v23 = vpop.permute.xlu2 %2861 }
 0x45a   :  { %v7460_v54 = vpop.f32.mrf.mxu3  ;;  %v7478_v42 = vpop.permute.xlu1 %2822 }
 0x45b   :  { %8738 = vst [vmem:[#allocation32_spill] sm:$0xff] %v7460_v54 }
 0x460   :  { %5234 = vrot.lane.b32.xlu1 %v6327_v33, %s5465_s25  ;;  %5239 = vrot.lane.b32.xlu0 %v6382_v28, %s5465_s25  ;;  %v7486_v33 = vpop.permute.xlu0 %2783  ;;  %v2172_v28 = vpop.f32.mrf.mxu1 }
 0x461   :  { %4030 = vrot.lane.b32.xlu2 %v7143_v18, %s5466_s26  ;;  %v2207_v18 = vpop.f32.mrf.mxu2  ;;  %v7490_v54 = vpop.permute.xlu2 %2900  ;;  %v2390_v63 = vsel %vm2388_vm12, %v2172_v28, 0.0 }
 0x462   :  { %v2140_v44 = vpop.f32.mrf.mxu0  ;;  %v7493_v50 = vpop.permute.xlu1 %2933  ;;  %v2392_v28 = vsel %vm2388_vm12, %v2207_v18, 0.0 }
 0x463   :  { %8742 = vst [vmem:[#allocation36_spill] sm:$0xff] %v7493_v50 }
 0x464   :  { %v7474_v9 = vpop.f32.mrf.mxu3 }
 0x468   :  { %5249 = vrot.lane.b32.xlu1 %v6552_v11, %s5465_s25  ;;  %5254 = vrot.lane.b32.xlu0 %v6473_v8, %s5465_s25  ;;  %v2389_v8 = vsel %vm2388_vm12, %v2137_v27, 0.0 }
 0x469   :  { %3911 = vrot.lane.b32.xlu2 %v6930_v19, %s5466_s26  ;;  %v2391_v11 = vadd.f32 %v2390_v63, %v2389_v8  ;;  %v7502_v19 = vpop.permute.xlu0 %2820  ;;  %v7505_v55 = vpop.permute.xlu2 %2939  ;;  %v2404_v63 = vsel %vm2388_vm12, %v2140_v44, 0.0 }
 0x46a   :  { %v2277_v51 = vpop.f32.mrf.mxu0  ;;  %v7516_v27 = vpop.permute.xlu1 %2937 }
 0x46b   :  { %v2393_v57 = vadd.f32 %v2392_v28, %v2391_v11  ;;  %v2396_v8 = vsel %vm2388_vm12, %v2277_v51, 0.0 }
 0x46d   :  { %v7488_v22 = vpop.f32.mrf.mxu3 }
 0x46e   :  { %8741 = vst [vmem:[#allocation35_spill] sm:$0xff] %v7488_v22  ;;  %v2175_v22 = vpop.f32.mrf.mxu1 }
 0x470   :  { %3991 = vrot.lane.b32.xlu1 %v7094_v62, %s5466_s26  ;;  %3913 = vrot.lane.b32.xlu0 %v6932_v29, %s5466_s26  ;;  %v2210_v62 = vpop.f32.mrf.mxu2  ;;  %v2405_v29 = vsel %vm2388_vm12, %v2175_v22, 0.0 }
 0x471   :  { %3950 = vrot.lane.b32.xlu2 %v7011_v45, %s5466_s26  ;;  %v7518_v18 = vpop.permute.xlu0 %2859  ;;  %v7523_v5 = vpop.permute.xlu2 %2976 }
 0x472   :  { %v2280_v44 = vpop.f32.mrf.mxu0 }
 0x475   :  { %v2242_v59 = vpop.f32.mrf.mxu3 }
 0x476   :  { %v2394_v50 = vsel %vm2388_vm12, %v2242_v59, 0.0  ;;  %v2406_v59 = vadd.f32 %v2405_v29, %v2404_v63  ;;  %v2312_v22 = vpop.f32.mrf.mxu1  ;;  %v2411_v29 = vsel %vm2388_vm12, %v2280_v44, 0.0  ;;  %v2979_v63 = vpop.permute.xlu1 %2978 }
 0x477   :  { %v2395_v45 = vadd.f32 %v2394_v50, %v2393_v57 }
 0x478   :  { %3952 = vrot.lane.b32.xlu1 %v7013_v38, %s5466_s26  ;;  %3989 = vrot.lane.b32.xlu0 %v7092_v17, %s5466_s26  ;;  %v2407_v38 = vsel %vm2388_vm12, %v2210_v62, 0.0  ;;  %v2347_v57 = vpop.f32.mrf.mxu2 }
 0x479   :  { %3946 = vrot.lane.b32.xlu2 %v7038_v3, %s5466_s26  ;;  %v2397_v11 = vadd.f32 %v2396_v8, %v2395_v45  ;;  %v2408_v50 = vadd.f32 %v2407_v38, %v2406_v59  ;;  %v2398_v3 = vsel %vm2388_vm12, %v2312_v22, 0.0  ;;  %v7533_v45 = vpop.permute.xlu0 %2898  ;;  %v2400_v59 = vsel %vm2388_vm12, %v2347_v57, 0.0 }
 0x47b   :  { %v2399_v62 = vadd.f32 %v2398_v3, %v2397_v11 }
 0x47d   :  { %v2245_v28 = vpop.f32.mrf.mxu3 }
 0x47e   :  { %v2409_v17 = vsel %vm2388_vm12, %v2245_v28, 0.0  ;;  %v2315_v8 = vpop.f32.mrf.mxu1  ;;  %v7567_v3 = vpop.permute.xlu1 %2972 }
 0x47f   :  { %v2410_v51 = vadd.f32 %v2409_v17, %v2408_v50  ;;  %v7539_v17 = vpop.permute.xlu2 %2935 }
 0x480   :  { %4028 = vrot.lane.b32.xlu1 %v7141_v24, %s5466_s26  ;;  %3985 = vrot.lane.b32.xlu0 %v7050_v53, %s5466_s26  ;;  %v2401_v24 = vadd.f32 %v2400_v59, %v2399_v62  ;;  %v2350_v11 = vpop.f32.mrf.mxu2  ;;  %v8748_v59 = vld [vmem:[#allocation12_spill] sm:$0xff] }
 0x481   :  { %3909 = vrot.lane.b32.xlu2 %v6970_v6, %s5466_s26  ;;  %v2412_v22 = vadd.f32 %v2411_v29, %v2410_v51  ;;  %v2413_v6 = vsel %vm2388_vm12, %v2315_v8, 0.0  ;;  %v8749_v8 = vld [vmem:[#allocation10_spill] sm:$0xff] }
 0x483   :  { %v2414_v57 = vadd.f32 %v2413_v6, %v2412_v22  ;;  %v8750_v22 = vpack.i.bf16 %v8748_v59, %v8749_v8  ;;  %v8753_v6 = vld [vmem:[#allocation31_spill] sm:$0xff]  ;;  %v8773_v8 = vld [vmem:[#allocation20_spill] sm:$0xff] }
 0x485   :  { %v2382_v28 = vpop.f32.mrf.mxu3 }
 0x486   :  { %v2402_v38 = vsel %vm2388_vm12, %v2382_v28, 0.0  ;;  %v8751_v28 = vld [vmem:[#allocation28_spill] sm:$0xff] }
 0x487   :  { %v7537_v53 = vadd.f32 %v2402_v38, %v2401_v24  ;;  %v8752_v38 = vld [vmem:[#allocation29_spill] sm:$0xff] }
 0x488   :  { %3907 = vrot.lane.b32.xlu1 %v6956_v32, %s5466_s26  ;;  %4024 = vrot.lane.b32.xlu0 %v7102_v20, %s5466_s26  ;;  %v7558_v32 = vpop.permute.xlu0 %2894  ;;  %v2415_v20 = vsel %vm2388_vm12, %v2350_v11, 0.0  ;;  %v8754_v11 = vld [vmem:[#allocation30_spill] sm:$0xff] }
 0x489   :  { %8743 = vst [vmem:[#allocation37_spill] sm:$0xff] %v7537_v53  ;;  %4145 = vrot.lane.b32.xlu2 %v7249_v10, %s5466_s26  ;;  %4967 = vmatmul.msk.f32.vlgmr.msra.gmra.mxu0 %vm2388_vm12, %v7537_v53  ;;  %v2416_v50 = vadd.f32 %v2415_v20, %v2414_v57  ;;  %v2072_v57 = vsel %vm1423_vm13, %v8754_v11, 0.0  ;;  %v8755_v20 = vld [vmem:[#allocation34_spill] sm:$0xff]  ;;  %v8777_v11 = vld [vmem:[#allocation5_spill] sm:$0xff] }
 0x48a   :  { %4969 = vmatmul.msk.f32.vlgmr.msra.gmra.mxu1 %vm2388_vm12, %v7537_v53  ;;  %4971 = vmatmul.msk.f32.vlgmr.msra.gmra.mxu2 %vm2388_vm12, %v7537_v53 }
 0x48b   :  { %4973 = vmatmul.msk.f32.vlgmr.msra.gmra.mxu3 %vm2388_vm12, %v7537_v53  ;;  %4983 = vmatpush.xpose.msk.msra.mxu0 %vm65_vm0, %v7416_v48 }
 0x48c   :  { %4987 = vmatpush.xpose.msk.msra.mxu1 %vm65_vm0, %v7452_v58  ;;  %4991 = vmatpush.xpose.msk.msra.mxu2 %vm65_vm0, %v7486_v33  ;;  %v7582_v58 = vpop.permute.xlu2 %2896 }
 0x48d   :  { %4995 = vmatpush.xpose.msk.msra.mxu3 %vm65_vm0, %v7478_v42  ;;  %v2385_v10 = vpop.f32.mrf.mxu3 }
 0x48e   :  { %v2417_v44 = vsel %vm2388_vm12, %v2385_v10, 0.0  ;;  %v5469_v10 = vmov 1  }
 0x48f   :  { %v7570_v48 = vadd.f32 %v2417_v44, %v2416_v50  ;;  %4984 = vmatpush.xpose.msk.msra.mxu0 %vm65_vm0, %v7448_v4  ;;  %v2053_v4 = vsel %vm1423_vm13, %v7376_v26, 0.0  ;;  %v2057_v26 = vsel %vm1423_vm13, %v7422_v21, 0.0  ;;  %v2061_v21 = vsel %vm1423_vm13, %v7474_v9, 0.0  ;;  %5304 = vset.pattern.permute.xlu0 %v5469_v10  ;;  %v8756_v44 = vld [vmem:[#allocation32_spill] sm:$0xff] }
 0x490   :  { %4988 = vmatpush.xpose.msk.msra.mxu1 %vm65_vm0, %v7464_v60  ;;  %4992 = vmatpush.xpose.msk.msra.mxu2 %vm65_vm0, %v7450_v46  ;;  %v7592_v60 = vpop.permute.xlu0 %2974 }
 0x491   :  { %8744 = vst [vmem:[#allocation38_spill] sm:$0xff] %v7570_v48  ;;  %4996 = vmatpush.xpose.msk.msra.mxu3 %vm65_vm0, %v7502_v19  ;;  %3987 = vrot.lane.b32.xlu1 %v7063_v12, %s5466_s26  ;;  %v7598_v12 = vpop.permute.xlu1 %2857 }
 0x492   :  { %4147 = vrot.lane.b32.xlu0 %v7251_v30, %s5466_s26  ;;  %4141 = vrot.lane.b32.xlu2 %v7274_v2, %s5466_s26  ;;  %v2049_v30 = vsel %vm1423_vm13, %v7338_v35, 0.0 }
 0x493   :  { %4968 = vmatmul.msk.f32.gmra.mxu0 %vm2388_vm12, %v7570_v48  ;;  %4970 = vmatmul.msk.f32.gmra.mxu1 %vm2388_vm12, %v7570_v48 }
 0x494   :  { %4972 = vmatmul.msk.f32.gmra.mxu2 %vm2388_vm12, %v7570_v48  ;;  %4974 = vmatmul.msk.f32.gmra.mxu3 %vm2388_vm12, %v7570_v48  ;;  %v7612_v2 = vpop.permute.xlu2 %5194 }
 0x495   :  { %v5197_v9 = vunpack.i.h.bf16 %v7612_v2 }
 0x499   :  { %4026 = vrot.lane.b32.xlu1 %v7124_v7, %s5466_s26  ;;  %v2048_v7 = vsel %vm1423_vm13, %v7316_v52, 0.0  ;;  %v2055_v52 = vsel %vm1423_vm13, %v7392_v37, 0.0 }
 0x49a   :  { %4069 = vrot.lane.b32.xlu0 %v7186_v61, %s5466_s26  ;;  %4186 = vrot.lane.b32.xlu2 %v7284_v36, %s5466_s26  ;;  %v2051_v61 = vsel %vm1423_vm13, %v7360_v15, 0.0  ;;  %v5190_v36 = vpop.permute.xlu0 %5189  ;;  %v2050_v35 = vadd.f32 %v2049_v30, %v2048_v7  ;;  %v5185_v15 = vpop.permute.xlu1 %5184  ;;  %v2074_v30 = vsel %vm1423_vm13, %v8756_v44, 0.0 }
 0x49b   :  { %4975 = vmatmul.msk.f32.vlgmr.msrb.gmra.mxu0 %vm2388_vm12, %v7537_v53  ;;  %4977 = vmatmul.msk.f32.vlgmr.msrb.gmra.mxu1 %vm2388_vm12, %v7537_v53  ;;  %v5186_v19 = vunpack.i.l.bf16 %v5185_v15 }
 0x49c   :  { %4979 = vmatmul.msk.f32.vlgmr.msrb.gmra.mxu2 %vm2388_vm12, %v7537_v53  ;;  %4981 = vmatmul.msk.f32.vlgmr.msrb.gmra.mxu3 %vm2388_vm12, %v7537_v53 }
 0x49d   :  { %4999 = vmatpush.xpose.msk.msrb.mxu0 %vm65_vm0, %v7476_v23  ;;  %5003 = vmatpush.xpose.msk.msrb.mxu1 %vm65_vm0, %v7490_v54  ;;  %v2052_v23 = vadd.f32 %v2051_v61, %v2050_v35 }
 0x49e   :  { %5007 = vmatpush.xpose.msk.msrb.mxu2 %vm65_vm0, %v7505_v55  ;;  %5011 = vmatpush.xpose.msk.msrb.mxu3 %vm65_vm0, %v2979_v63 }
 0x49f   :  { %v2054_v55 = vadd.f32 %v2053_v4, %v2052_v23 }
 0x4a1   :  { %5000 = vmatpush.xpose.msk.msrb.mxu0 %vm65_vm0, %v7518_v18  ;;  %5004 = vmatpush.xpose.msk.msrb.mxu1 %vm65_vm0, %v7533_v45  ;;  %v2056_v37 = vadd.f32 %v2055_v52, %v2054_v55  ;;  %v8745_v45 = vld [vmem:[#allocation24_spill] sm:$0xff]  ;;  %v8758_v52 = vld [vmem:[#allocation25_spill] sm:$0xff] }
 0x4a2   :  { %5008 = vmatpush.xpose.msk.msrb.mxu2 %vm65_vm0, %v7516_v27  ;;  %5012 = vmatpush.xpose.msk.msrb.mxu3 %vm65_vm0, %v7523_v5  ;;  %v2059_v5 = vsel %vm1423_vm13, %v7446_v0, 0.0  ;;  %v7664_v46 = vpop.permute.xlu0 %5204  ;;  %v5187_v0 = vunpack.i.h.bf16 %v5185_v15  ;;  %v5200_v33 = vpop.permute.xlu1 %5199  ;;  %v5192_v27 = vunpack.i.h.bf16 %v5190_v36  ;;  %v8759_v15 = vld [vmem:[#allocation21_spill] sm:$0xff] }
 0x4a3   :  { %3948 = vrot.lane.b32.xlu1 %v7040_v56, %s5466_s26  ;;  %4108 = vrot.lane.b32.xlu0 %v7221_v34, %s5466_s26  ;;  %v7655_v56 = vpop.permute.xlu2 %5209  ;;  %v2058_v34 = vadd.f32 %v2057_v26, %v2056_v37  ;;  %v5201_v18 = vunpack.i.l.bf16 %v5200_v33  ;;  %v5207_v55 = vunpack.i.h.bf16 %v7664_v46  ;;  %v8760_v37 = vld [vmem:[#allocation8_spill] sm:$0xff] }
 0x4a4   :  { %4180 = vrot.lane.b32.xlu2 %v7308_v49, %s5466_s26  ;;  %4976 = vmatmul.msk.f32.gmra.mxu0 %vm2388_vm12, %v7570_v48  ;;  %v5467_v49 = vmov 0  }
 0x4a5   :  { %4978 = vmatmul.msk.f32.gmra.mxu1 %vm2388_vm12, %v7570_v48  ;;  %4980 = vmatmul.msk.f32.gmra.mxu2 %vm2388_vm12, %v7570_v48  ;;  %v2060_v54 = vadd.f32 %v2059_v5, %v2058_v34  ;;  %v8761_v5 = vld [vmem:[#allocation6_spill] sm:$0xff] }
 0x4a6   :  { %4982 = vmatmul.msk.f32.gmra.mxu3 %vm2388_vm12, %v7570_v48  ;;  %5303 = vset.pattern.permute.xlu2 %v5467_v49  ;;  %v8762_v34 = vpack.i.bf16 %v8760_v37, %v8761_v5 }
 0x4a7   :  { %v7666_v42 = vadd.f32 %v2061_v21, %v2060_v54  ;;  %v8763_v21 = vld [vmem:[#allocation33_spill] sm:$0xff] }
 0x4a9   :  { %5412 = vrcp.f32 %v7666_v42  ;;  %vm2083_vm1 = vweird.f32 %v7666_v42 }
 0x4aa   :  { %v5220_v62 = vpop.permute.xlu0 %5219  ;;  %v5215_v4 = vpop.permute.xlu1 %5214 }
 0x4ab   :  { %4067 = vrot.lane.b32.xlu1 %v7178_v16, %s5466_s26  ;;  %4184 = vrot.lane.b32.xlu0 %v7270_v14, %s5466_s26  ;;  %v2064_v16 = vsel %vm1423_vm13, %v7350_v13, 0.0  ;;  %v5196_v14 = vunpack.i.l.bf16 %v7612_v2  ;;  %v7691_v13 = vpop.permute.xlu2 %3387 }
 0x4ac   :  { %4065 = vrot.lane.b32.xlu2 %v7208_v40, %s5466_s26  ;;  %4985 = vmatmul.msk.f32.vlgmr.msra.gmra.mxu0 %vm65_vm0, %v7408_v39  ;;  %v5191_v40 = vunpack.i.l.bf16 %v5190_v36  ;;  %v5202_v39 = vunpack.i.h.bf16 %v5200_v33  ;;  %v8757_v36 = vld [vmem:[#allocation35_spill] sm:$0xff] }
 0x4ad   :  { %4989 = vmatmul.msk.f32.vlgmr.msra.gmra.mxu1 %vm65_vm0, %v7434_v25  ;;  %4993 = vmatmul.msk.f32.vlgmr.msra.gmra.mxu2 %vm65_vm0, %v7400_v47  ;;  %v2063_v25 = vsel %vm1423_vm13, %v7329_v43, 0.0  ;;  %v2066_v47 = vsel %vm1423_vm13, %v7368_v1, 0.0  ;;  %v8746_v43 = vld [vmem:[#allocation23_spill] sm:$0xff]  ;;  %v2076_v35 = vsel %vm1423_vm13, %v8757_v36, 0.0 }
 0x4ae   :  { %4997 = vmatmul.msk.f32.vlgmr.msra.gmra.mxu3 %vm65_vm0, %v7436_v31  ;;  %3067 = vmatpush.msra.mxu0 %v5187_v0  ;;  %v2065_v51 = vadd.f32 %v2064_v16, %v2063_v25  ;;  %v2068_v31 = vsel %vm1423_vm13, %v7384_v41, 0.0  ;;  %v8747_v1 = vld [vmem:[#allocation27_spill] sm:$0xff]  ;;  %v5206_v0 = vunpack.i.l.bf16 %v7664_v46  ;;  %v5212_v16 = vunpack.i.h.bf16 %v7655_v56 }
 0x4af   :  { %3096 = vmatpush.msra.mxu1 %v5197_v9  ;;  %3125 = vmatpush.msra.mxu2 %v5186_v19  ;;  %v2070_v63 = vsel %vm1423_vm13, %v8747_v1, 0.0  ;;  %v7707_v41 = vpop.eup %5412  ;;  %v5217_v9 = vunpack.i.h.bf16 %v5215_v4  ;;  %v8764_v19 = vld [vmem:[#allocation36_spill] sm:$0xff]  ;;  %v5221_v46 = vunpack.i.l.bf16 %v5220_v62 }
 0x4b0   :  { %3154 = vmatpush.msra.mxu3 %v5192_v27  ;;  %3068 = vmatpush.msra.mxu0 %v5196_v14  ;;  %v2067_v29 = vadd.f32 %v2066_v47, %v2065_v51  ;;  %v2079_v2 = vmul.f32 %v7707_v41, %v7666_v42  ;;  %v5216_v14 = vunpack.i.l.bf16 %v5215_v4  ;;  %v5211_v27 = vunpack.i.l.bf16 %v7655_v56  ;;  %v8766_v56 = vld [vmem:[#allocation26_spill] sm:$0xff]  ;;  %v8767_v47 = vld [vmem:[#allocation19_spill] sm:$0xff] }
 0x4b1   :  { %3097 = vmatpush.msra.mxu1 %v5202_v39  ;;  %3126 = vmatpush.msra.mxu2 %v5191_v40  ;;  %v5222_v40 = vunpack.i.h.bf16 %v5220_v62  ;;  %v5470_v39 = vmov 2   ;;  %vm2084_vm14 = vweird.f32 %v7707_v41  ;;  %v2089_v62 = vand.u32 2147483648, %v7666_v42 }
 0x4b2   :  { %3155 = vmatpush.msra.mxu3 %v5201_v18  ;;  %v2069_v24 = vadd.f32 %v2068_v31, %v2067_v29  ;;  %v7731_v26 = vpop.permute.xlu0 %3426  ;;  %v2080_v54 = vsub.f32 1.0, %v2079_v2  ;;  %5305 = vset.pattern.permute.xlu1 %v5470_v39  ;;  %v8768_v18 = vld [vmem:[#allocation17_spill] sm:$0xff]  ;;  %vm2085_vm2 = vmor %vm2083_vm1, %vm2084_vm14 }
 0x4b3   :  { %4106 = vrot.lane.b32.xlu1 %v8745_v45, %s5466_s26  ;;  %4063 = vrot.lane.b32.xlu0 %v8746_v43, %s5466_s26  ;;  %v7722_v61 = vpop.permute.xlu2 %3348  ;;  %v8769_v51 = vpack.i.bf16 %v8767_v47, %v8768_v18  ;;  %v2090_v1 = vor.u32 1.1754944e-38, %v2089_v62 }
 0x4b4   :  { %5264 = vrot.lane.b32.xlu2 %v8750_v22, %s5468_s27  ;;  %4986 = vmatmul.msk.f32.gmra.mxu0 %vm65_vm0, %v8751_v28  ;;  %v2071_v50 = vadd.f32 %v2070_v63, %v2069_v24  ;;  %v8771_v63 = vld [vmem:[#allocation9_spill] sm:$0xff] }
 0x4b5   :  { %4990 = vmatmul.msk.f32.gmra.mxu1 %vm65_vm0, %v8752_v38  ;;  %4994 = vmatmul.msk.f32.gmra.mxu2 %vm65_vm0, %v8753_v6  ;;  %v8776_v6 = vld [vmem:[#allocation7_spill] sm:$0xff] }
 0x4b6   :  { %4998 = vmatmul.msk.f32.gmra.mxu3 %vm65_vm0, %v8755_v20  ;;  %v2073_v7 = vadd.f32 %v2072_v57, %v2071_v50  ;;  %v8778_v57 = vpack.i.bf16 %v8776_v6, %v8777_v11  ;;  %v8779_v20 = vld [vmem:[#allocation15_spill] sm:$0xff]  ;;  %v8780_v50 = vld [vmem:[#allocation13_spill] sm:$0xff] }
 0x4b7   :  { %v8781_v44 = vpack.i.bf16 %v8779_v20, %v8780_v50 }
 0x4b8   :  { %v2075_v23 = vadd.f32 %v2074_v30, %v2073_v7  ;;  %v5471_v30 = vmov 3  }
 0x4ba   :  { %v7740_v33 = vadd.f32 %v2076_v35, %v2075_v23  ;;  %v7771_v29 = vpop.permute.xlu0 %3307 }
 0x4bb   :  { %4102 = vrot.lane.b32.xlu1 %v8758_v52, %s5466_s26  ;;  %4143 = vrot.lane.b32.xlu0 %v8759_v15, %s5466_s26  ;;  %v7756_v25 = vpop.permute.xlu2 %3424  ;;  %v8782_v52 = vld [vmem:[#allocation16_spill] sm:$0xff]  ;;  %v8783_v15 = vld [vmem:[#allocation14_spill] sm:$0xff] }
 0x4bc   :  { %5274 = vrot.lane.b32.xlu2 %v8762_v34, %s5468_s27  ;;  %5001 = vmatmul.msk.f32.vlgmr.msrb.gmra.mxu0 %vm65_vm0, %v8763_v21  ;;  %5414 = vrcp.f32 %v7740_v33  ;;  %v2104_v7 = vand.u32 2147483648, %v7740_v33  ;;  %vm2098_vm4 = vweird.f32 %v7740_v33  ;;  %v2102_v35 = vand.u32 2147483647, %v7740_v33 }
 0x4bd   :  { %5005 = vmatmul.msk.f32.vlgmr.msrb.gmra.mxu1 %vm65_vm0, %v7558_v32  ;;  %5009 = vmatmul.msk.f32.vlgmr.msrb.gmra.mxu2 %vm65_vm0, %v8764_v19  ;;  %v2081_v32 = vmul.f32 %v7707_v41, %v2080_v54 }
 0x4be   :  { %5013 = vmatmul.msk.f32.vlgmr.msrb.gmra.mxu3 %vm65_vm0, %v7567_v3  ;;  %3183 = vmatpush.msrb.mxu0 %v5207_v55  ;;  %v8765_v3 = vld [vmem:[#allocation22_spill] sm:$0xff]  ;;  %v8784_v55 = vpack.i.bf16 %v8782_v52, %v8783_v15  ;;  %v2105_v37 = vor.u32 1.1754944e-38, %v2104_v7  ;;  %vm2103_vm7 = vcmp.eq.f32.partialorder %v2102_v35, 8.507059e+37 }
 0x4bf   :  { %3212 = vmatpush.msrb.mxu1 %v5217_v9  ;;  %3241 = vmatpush.msrb.mxu2 %v5206_v0  ;;  %v2082_v31 = vadd.f32 %v7707_v41, %v2081_v32 }
 0x4c0   :  { %3270 = vmatpush.msrb.mxu3 %v5212_v16  ;;  %3184 = vmatpush.msrb.mxu0 %v5216_v14 }
 0x4c1   :  { %3213 = vmatpush.msrb.mxu1 %v5222_v40  ;;  %3242 = vmatpush.msrb.mxu2 %v5211_v27  ;;  %v2086_v43 = vsel %vm2085_vm2, %v7707_v41, %v2082_v31 }
 0x4c2   :  { %3271 = vmatpush.msrb.mxu3 %v5221_v46  ;;  %v5415_v45 = vpop.eup %5414  ;;  %v7789_v41 = vpop.permute.xlu0 %3346 }
 0x4c3   :  { %4182 = vrot.lane.b32.xlu1 %v8765_v3, %s5466_s26  ;;  %4104 = vrot.lane.b32.xlu0 %v8766_v56, %s5466_s26  ;;  %vm2099_vm10 = vweird.f32 %v5415_v45 }
 0x4c4   :  { %5289 = vrot.lane.b32.xlu2 %v8769_v51, %s5468_s27  ;;  %5002 = vmatmul.msk.f32.gmra.mxu0 %vm65_vm0, %v7598_v12  ;;  %v2087_v12 = vand.u32 2147483647, %v7666_v42  ;;  %v7787_v42 = vpop.permute.xlu2 %3303  ;;  %vm2100_vm5 = vmor %vm2098_vm4, %vm2099_vm10 }
 0x4c5   :  { %5006 = vmatmul.msk.f32.gmra.mxu1 %vm65_vm0, %v7582_v58  ;;  %5010 = vmatmul.msk.f32.gmra.mxu2 %vm65_vm0, %v7539_v17  ;;  %v2094_v58 = vmul.f32 %v5415_v45, %v7740_v33  ;;  %v8770_v17 = vld [vmem:[#allocation11_spill] sm:$0xff]  ;;  %v7820_v33 = vpop.permute.xlu1 %3309 }
 0x4c6   :  { %5014 = vmatmul.msk.f32.gmra.mxu3 %vm65_vm0, %v7592_v60  ;;  %vm2088_vm3 = vcmp.eq.f32.partialorder %v2087_v12, 8.507059e+37  ;;  %v8772_v59 = vpack.i.bf16 %v8770_v17, %v8771_v63  ;;  %v8774_v60 = vld [vmem:[#allocation18_spill] sm:$0xff] }
 0x4c7   :  { %v8775_v22 = vpack.i.bf16 %v8773_v8, %v8774_v60  ;;  %v2091_v28 = vsel %vm2088_vm3, %v2090_v1, %v2086_v43  ;;  %v2095_v24 = vsub.f32 1.0, %v2094_v58 }
 0x4c9   :  { %v2096_v38 = vmul.f32 %v5415_v45, %v2095_v24 }
 0x4ca   :  { %v7804_v4 = vpop.permute.xlu0 %3342 }
 0x4cb   :  { %5269 = vrot.lane.b32.xlu1 %v8772_v59, %s5468_s27  ;;  %5284 = vrot.lane.b32.xlu0 %v8775_v22, %s5468_s27  ;;  %v2097_v2 = vadd.f32 %v5415_v45, %v2096_v38 }
 0x4cc   :  { %2675 = vperm.xlu2 %5303, %v2091_v28   ;;  %v7800_v36 = vpop.permute.xlu2 %3383 }
 0x4cd   :  { %v2101_v23 = vsel %vm2100_vm5, %v5415_v45, %v2097_v2  ;;  %v7826_v19 = vpop.permute.xlu1 %3385 }
 0x4ce   :  { %v2106_v5 = vsel %vm2103_vm7, %v2105_v37, %v2101_v23 }
 0x4d2   :  { %v7813_v21 = vpop.permute.xlu0 %3305 }
 0x4d3   :  { %5279 = vrot.lane.b32.xlu1 %v8778_v57, %s5468_s27  ;;  %5299 = vrot.lane.b32.xlu0 %v8781_v44, %s5468_s27 }
 0x4d4   :  { %5306 = vset.pattern.permute.xlu2 %v5471_v30  ;;  %v7811_v34 = vpop.permute.xlu2 %3422 }
 0x4d5   :  { %4488 = vperm.xlu2 %5306, %v2091_v28   ;;  %v7836_v40 = vpop.permute.xlu1 %3381 }
 0x4da   :  { %v7818_v0 = vpop.permute.xlu0 %3541 }
 0x4db   :  { %5294 = vrot.lane.b32.xlu1 %v8784_v55, %s5468_s27  ;;  %3280 = vperm.xlu0 %5304, %v2091_v28  }
 0x4dc   :  { %v7816_v54 = vpop.permute.xlu2 %3344 }
 0x4dd   :  { %5308 = vset.pattern.permute.xlu2 %v5469_v10  ;;  %v7850_v18 = vpop.permute.xlu1 %3420 }
 0x4de   :  { %3284 = vperm.xlu2 %5308, %v2106_v5  }
 0x4e2   :  { %v7824_v9 = vpop.permute.xlu0 %3537 }
 0x4e3   :  { %3884 = vperm.xlu1 %5305, %v2091_v28   ;;  %5309 = vset.pattern.permute.xlu0 %v5470_v39 }
 0x4e4   :  { %3888 = vperm.xlu0 %5309, %v2106_v5   ;;  %v7822_v10 = vpop.permute.xlu2 %3463 }
 0x4e5   :  { %v7864_v1 = vpop.permute.xlu1 %3543 }
 0x4ea   :  { %v7830_v14 = vpop.permute.xlu0 %3582 }
 0x4eb   :  { %5307 = vset.pattern.permute.xlu1 %v5467_v49 }
 0x4ec   :  { %2680 = vperm.xlu1 %5307, %v2106_v5   ;;  %5311 = vset.pattern.permute.xlu0 %v5471_v30  ;;  %v7828_v16 = vpop.permute.xlu2 %3502 }
 0x4ed   :  { %v7878_v22 = vpop.permute.xlu1 %3465 }
 0x4f2   :  { %v7840_v32 = vpop.permute.xlu0 %3576 }
 0x4f4   :  { %5310 = vset.pattern.permute.xlu1 %v5471_v30  ;;  %v7838_v46 = vpop.permute.xlu2 %3498 }
 0x4f5   :  { %4492 = vperm.xlu1 %5310, %v2106_v5   ;;  %v7888_v20 = vpop.permute.xlu1 %3504 }
 0x4fa   :  { %v7854_v31 = vpop.permute.xlu0 %3461 }
 0x4fc   :  { %v7852_v51 = vpop.permute.xlu2 %3578 }
 0x502   :  { %v7874_v8 = vpop.permute.xlu0 %5224 }
 0x504   :  { %v7866_v58 = vpop.permute.xlu2 %5229 }
 0x506   :  { %v7832_v49 = vpop.f32.mrf.mxu0 }
 0x507   :  { %v7834_v27 = vpop.f32.mrf.mxu1 }
 0x50a   :  { %v7886_v57 = vpop.permute.xlu0 %5239 }
 0x50c   :  { %v7880_v28 = vpop.permute.xlu2 %5244 }
 0x50d   :  { %v7842_v39 = vpop.f32.mrf.mxu2 }
 0x50e   :  { %8785 = vst [vmem:[#allocation24_spill] sm:$0xff] %v7842_v39  ;;  %v7844_v3 = vpop.f32.mrf.mxu3 }
 0x510   :  { %v7846_v56 = vpop.f32.mrf.mxu0  ;;  %v7848_v47 = vpop.f32.mrf.mxu1 }
 0x511   :  { %8786 = vst [vmem:[#allocation23_spill] sm:$0xff] %v7846_v56 }
 0x512   :  { %v7895_v55 = vpop.permute.xlu0 %5254 }
 0x514   :  { %v7892_v35 = vpop.permute.xlu2 %5259 }
 0x517   :  { %v7856_v62 = vpop.f32.mrf.mxu2  ;;  %v7858_v12 = vpop.f32.mrf.mxu3 }
 0x518   :  { %8787 = vst [vmem:[#allocation27_spill] sm:$0xff] %v7856_v62  ;;  %v7860_v45 = vpop.f32.mrf.mxu0  ;;  %v7862_v43 = vpop.f32.mrf.mxu1 }
 0x519   :  { %8788 = vst [vmem:[#allocation12_spill] sm:$0xff] %v7858_v12 }
 0x51a   :  { %8789 = vst [vmem:[#allocation10_spill] sm:$0xff] %v7860_v45 }
 0x51b   :  { %8790 = vst [vmem:[#allocation28_spill] sm:$0xff] %v7862_v43 }
 0x51f   :  { %v7868_v17 = vpop.f32.mrf.mxu2  ;;  %v7870_v63 = vpop.f32.mrf.mxu3 }
 0x520   :  { %8791 = vst [vmem:[#allocation29_spill] sm:$0xff] %v7870_v63 }
 0x521   :  { %v7872_v59 = vpop.f32.mrf.mxu0 }
 0x522   :  { %8792 = vst [vmem:[#allocation31_spill] sm:$0xff] %v7872_v59  ;;  %v7876_v60 = vpop.f32.mrf.mxu1 }
 0x523   :  { %8793 = vst [vmem:[#allocation30_spill] sm:$0xff] %v7876_v60 }
 0x528   :  { %v7882_v24 = vpop.f32.mrf.mxu2 }
 0x529   :  { %8794 = vst [vmem:[#allocation34_spill] sm:$0xff] %v7882_v24  ;;  %v7884_v38 = vpop.f32.mrf.mxu3  ;;  %v2732_v6 = vpop.f32.mrf.mxu0 }
 0x52a   :  { %8795 = vst [vmem:[#allocation32_spill] sm:$0xff] %v7884_v38  ;;  %v2771_v11 = vpop.f32.mrf.mxu1  ;;  %v3011_v44 = vsel %vm2388_vm12, %v2732_v6, 0.0 }
 0x52b   :  { %v3012_v30 = vsel %vm2388_vm12, %v2771_v11, 0.0 }
 0x52c   :  { %v3013_v15 = vadd.f32 %v3012_v30, %v3011_v44  ;;  %v7904_v44 = vpop.permute.xlu2 %4030 }
 0x530   :  { %v2810_v50 = vpop.f32.mrf.mxu2 }
 0x531   :  { %v2849_v2 = vpop.f32.mrf.mxu3  ;;  %v2735_v7 = vpop.f32.mrf.mxu0  ;;  %v3014_v52 = vsel %vm2388_vm12, %v2810_v50, 0.0 }
 0x532   :  { %v2774_v23 = vpop.f32.mrf.mxu1  ;;  %v3015_v37 = vadd.f32 %v3014_v52, %v3013_v15  ;;  %v3016_v48 = vsel %vm2388_vm12, %v2849_v2, 0.0  ;;  %v3026_v53 = vsel %vm2388_vm12, %v2735_v7, 0.0  ;;  %v7902_v50 = vpop.permute.xlu1 %3580 }
 0x533   :  { %v3027_v6 = vsel %vm2388_vm12, %v2774_v23, 0.0  ;;  %v7907_v7 = vpop.permute.xlu0 %3913 }
 0x534   :  { %v3017_v60 = vadd.f32 %v3016_v48, %v3015_v37  ;;  %v3028_v30 = vadd.f32 %v3027_v6, %v3026_v53  ;;  %v7915_v6 = vpop.permute.xlu2 %3911 }
 0x538   :  { %v2813_v5 = vpop.f32.mrf.mxu2 }
 0x539   :  { %v2852_v38 = vpop.f32.mrf.mxu3  ;;  %v2888_v11 = vpop.f32.mrf.mxu0  ;;  %v3029_v43 = vsel %vm2388_vm12, %v2813_v5, 0.0 }
 0x53a   :  { %v3018_v24 = vsel %vm2388_vm12, %v2888_v11, 0.0  ;;  %v2927_v63 = vpop.f32.mrf.mxu1  ;;  %v3030_v15 = vadd.f32 %v3029_v43, %v3028_v30  ;;  %v3031_v48 = vsel %vm2388_vm12, %v2852_v38, 0.0 }
 0x53b   :  { %v3019_v52 = vadd.f32 %v3018_v24, %v3017_v60  ;;  %v3020_v2 = vsel %vm2388_vm12, %v2927_v63, 0.0  ;;  %v7913_v63 = vpop.permute.xlu1 %3459 }
 0x53c   :  { %v3032_v5 = vadd.f32 %v3031_v48, %v3030_v15 }
 0x53d   :  { %v3021_v23 = vadd.f32 %v3020_v2, %v3019_v52  ;;  %v7932_v52 = vpop.permute.xlu0 %3989 }
 0x540   :  { %v2966_v45 = vpop.f32.mrf.mxu2 }
 0x541   :  { %v3022_v37 = vsel %vm2388_vm12, %v2966_v45, 0.0  ;;  %v3005_v11 = vpop.f32.mrf.mxu3  ;;  %v2891_v12 = vpop.f32.mrf.mxu0 }
 0x542   :  { %v3023_v62 = vadd.f32 %v3022_v37, %v3021_v23  ;;  %v3033_v56 = vsel %vm2388_vm12, %v2891_v12, 0.0  ;;  %v3024_v53 = vsel %vm2388_vm12, %v3005_v11, 0.0  ;;  %v2930_v24 = vpop.f32.mrf.mxu1  ;;  %v5261_v23 = vunpack.i.l.bf16 %v7892_v35 }
 0x543   :  { %v3034_v43 = vadd.f32 %v3033_v56, %v3032_v5  ;;  %v3035_v45 = vsel %vm2388_vm12, %v2930_v24, 0.0 }
 0x544   :  { %v3025_v60 = vadd.f32 %v3024_v53, %v3023_v62 }
 0x545   :  { %v3036_v12 = vadd.f32 %v3035_v45, %v3034_v43 }
 0x546   :  { %4785 = vrot.lane.b32.xlu2 %v3025_v60, %s5472_s28  ;;  %5015 = vmatmul.msk.f32.vlgmr.msra.gmra.mxu0 %vm2388_vm12, %v3025_v60 }
 0x547   :  { %5017 = vmatmul.msk.f32.vlgmr.msra.gmra.mxu1 %vm2388_vm12, %v3025_v60  ;;  %5019 = vmatmul.msk.f32.vlgmr.msra.gmra.mxu2 %vm2388_vm12, %v3025_v60 }
 0x548   :  { %5021 = vmatmul.msk.f32.vlgmr.msra.gmra.mxu3 %vm2388_vm12, %v3025_v60  ;;  %5031 = vmatpush.xpose.msk.msra.mxu0 %vm65_vm0, %v7820_v33  ;;  %v2969_v56 = vpop.f32.mrf.mxu2 }
 0x549   :  { %5035 = vmatpush.xpose.msk.msra.mxu1 %vm65_vm0, %v7722_v61  ;;  %5039 = vmatpush.xpose.msk.msra.mxu2 %vm65_vm0, %v7691_v13  ;;  %v3037_v62 = vsel %vm2388_vm12, %v2969_v56, 0.0  ;;  %v3008_v38 = vpop.f32.mrf.mxu3  ;;  %v7946_v13 = vpop.permute.xlu1 %3539 }
 0x54a   :  { %5043 = vmatpush.xpose.msk.msra.mxu3 %vm65_vm0, %v7731_v26  ;;  %v3038_v30 = vadd.f32 %v3037_v62, %v3036_v12  ;;  %v3039_v15 = vsel %vm2388_vm12, %v3008_v38, 0.0  ;;  %v7948_v61 = vpop.permute.xlu2 %3950  ;;  %v7952_v26 = vpop.permute.xlu0 %3985 }
 0x54c   :  { %v3040_v2 = vadd.f32 %v3039_v15, %v3038_v30  ;;  %5032 = vmatpush.xpose.msk.msra.mxu0 %vm65_vm0, %v7771_v29 }
 0x54d   :  { %5036 = vmatpush.xpose.msk.msra.mxu1 %vm65_vm0, %v7789_v41  ;;  %5040 = vmatpush.xpose.msk.msra.mxu2 %vm65_vm0, %v7826_v19  ;;  %v5227_v19 = vunpack.i.h.bf16 %v7874_v8 }
 0x54e   :  { %5044 = vmatpush.xpose.msk.msra.mxu3 %vm65_vm0, %v7756_v25  ;;  %4787 = vrot.lane.b32.xlu1 %v3040_v2, %s5472_s28 }
 0x54f   :  { %5016 = vmatmul.msk.f32.gmra.mxu0 %vm2388_vm12, %v3040_v2  ;;  %5018 = vmatmul.msk.f32.gmra.mxu1 %vm2388_vm12, %v3040_v2 }
 0x550   :  { %5020 = vmatmul.msk.f32.gmra.mxu2 %vm2388_vm12, %v3040_v2  ;;  %5022 = vmatmul.msk.f32.gmra.mxu3 %vm2388_vm12, %v3040_v2 }
 0x551   :  { %v7962_v25 = vpop.permute.xlu1 %3500 }
 0x552   :  { %v7964_v29 = vpop.permute.xlu2 %3946  ;;  %v7978_v41 = vpop.permute.xlu0 %4024 }
 0x557   :  { %5023 = vmatmul.msk.f32.vlgmr.msrb.gmra.mxu0 %vm2388_vm12, %v3025_v60  ;;  %5025 = vmatmul.msk.f32.vlgmr.msrb.gmra.mxu1 %vm2388_vm12, %v3025_v60 }
 0x558   :  { %5027 = vmatmul.msk.f32.vlgmr.msrb.gmra.mxu2 %vm2388_vm12, %v3025_v60  ;;  %5029 = vmatmul.msk.f32.vlgmr.msrb.gmra.mxu3 %vm2388_vm12, %v3025_v60 }
 0x559   :  { %5047 = vmatpush.xpose.msk.msrb.mxu0 %vm65_vm0, %v7878_v22  ;;  %5051 = vmatpush.xpose.msk.msrb.mxu1 %vm65_vm0, %v7888_v20  ;;  %v5235_v33 = vpop.permute.xlu1 %5234  ;;  %v5242_v22 = vunpack.i.h.bf16 %v7886_v57 }
 0x55a   :  { %5055 = vmatpush.xpose.msk.msrb.mxu2 %vm65_vm0, %v7864_v1  ;;  %5059 = vmatpush.xpose.msk.msrb.mxu3 %vm65_vm0, %v7830_v14  ;;  %v5226_v14 = vunpack.i.l.bf16 %v7874_v8  ;;  %v5236_v1 = vunpack.i.l.bf16 %v5235_v33  ;;  %v7998_v20 = vpop.permute.xlu0 %4147  ;;  %v5247_v8 = vunpack.i.h.bf16 %v7880_v28 }
 0x55d   :  { %5048 = vmatpush.xpose.msk.msrb.mxu0 %vm65_vm0, %v7822_v10  ;;  %5052 = vmatpush.xpose.msk.msrb.mxu1 %vm65_vm0, %v7828_v16  ;;  %v7984_v10 = vpop.permute.xlu2 %3909  ;;  %v5237_v16 = vunpack.i.h.bf16 %v5235_v33 }
 0x55e   :  { %5056 = vmatpush.xpose.msk.msrb.mxu2 %vm65_vm0, %v7818_v0  ;;  %5060 = vmatpush.xpose.msk.msrb.mxu3 %vm65_vm0, %v7902_v50  ;;  %v5232_v0 = vunpack.i.h.bf16 %v7866_v58  ;;  %v5256_v50 = vunpack.i.l.bf16 %v7895_v55 }
 0x55f   :  { %5024 = vmatmul.msk.f32.gmra.mxu0 %vm2388_vm12, %v3040_v2  ;;  %5026 = vmatmul.msk.f32.gmra.mxu1 %vm2388_vm12, %v3040_v2 }
 0x560   :  { %5028 = vmatmul.msk.f32.gmra.mxu2 %vm2388_vm12, %v3040_v2  ;;  %5030 = vmatmul.msk.f32.gmra.mxu3 %vm2388_vm12, %v3040_v2 }
 0x567   :  { %5033 = vmatmul.msk.f32.vlgmr.msra.gmra.mxu0 %vm65_vm0, %v7787_v42  ;;  %5037 = vmatmul.msk.f32.vlgmr.msra.gmra.mxu1 %vm65_vm0, %v7804_v4  ;;  %v5231_v42 = vunpack.i.l.bf16 %v7866_v58  ;;  %v5241_v4 = vunpack.i.l.bf16 %v7886_v57  ;;  %v5250_v58 = vpop.permute.xlu1 %5249  ;;  %v5257_v57 = vunpack.i.h.bf16 %v7895_v55 }
 0x568   :  { %5041 = vmatmul.msk.f32.vlgmr.msra.gmra.mxu2 %vm65_vm0, %v7836_v40  ;;  %5045 = vmatmul.msk.f32.vlgmr.msra.gmra.mxu3 %vm65_vm0, %v7850_v18  ;;  %v8002_v40 = vpop.permute.xlu2 %4145  ;;  %v8012_v18 = vpop.permute.xlu0 %4069 }
 0x569   :  { %3671 = vmatpush.msra.mxu0 %v5227_v19  ;;  %3700 = vmatpush.msra.mxu1 %v5237_v16 }
 0x56a   :  { %3729 = vmatpush.msra.mxu2 %v5226_v14  ;;  %3758 = vmatpush.msra.mxu3 %v5232_v0 }
 0x56b   :  { %3672 = vmatpush.msra.mxu0 %v5236_v1  ;;  %3701 = vmatpush.msra.mxu1 %v5242_v22 }
 0x56c   :  { %3730 = vmatpush.msra.mxu2 %v5231_v42  ;;  %3759 = vmatpush.msra.mxu3 %v5241_v4 }
 0x56f   :  { %5034 = vmatmul.msk.f32.gmra.mxu0 %vm65_vm0, %v7813_v21  ;;  %5038 = vmatmul.msk.f32.gmra.mxu1 %vm65_vm0, %v7816_v54  ;;  %v5246_v21 = vunpack.i.l.bf16 %v7880_v28  ;;  %v5252_v54 = vunpack.i.h.bf16 %v5250_v58 }
 0x570   :  { %5042 = vmatmul.msk.f32.gmra.mxu2 %vm65_vm0, %v7800_v36  ;;  %5046 = vmatmul.msk.f32.gmra.mxu3 %vm65_vm0, %v7811_v34  ;;  %v8021_v36 = vpop.permute.xlu2 %4141  ;;  %v5262_v34 = vunpack.i.h.bf16 %v7892_v35  ;;  %v8030_v28 = vpop.permute.xlu0 %4108 }
 0x571   :  { %v8044_v35 = vpop.permute.xlu1 %3991 }
 0x577   :  { %5049 = vmatmul.msk.f32.vlgmr.msrb.gmra.mxu0 %vm65_vm0, %v7913_v63  ;;  %5053 = vmatmul.msk.f32.vlgmr.msrb.gmra.mxu1 %vm65_vm0, %v7838_v46  ;;  %v5251_v46 = vunpack.i.l.bf16 %v5250_v58 }
 0x578   :  { %5057 = vmatmul.msk.f32.vlgmr.msrb.gmra.mxu2 %vm65_vm0, %v7824_v9  ;;  %5061 = vmatmul.msk.f32.vlgmr.msrb.gmra.mxu3 %vm65_vm0, %v7840_v32  ;;  %v8040_v9 = vpop.permute.xlu2 %4186  ;;  %v8042_v32 = vpop.permute.xlu0 %4184 }
 0x579   :  { %3787 = vmatpush.msrb.mxu0 %v5247_v8  ;;  %3816 = vmatpush.msrb.mxu1 %v5257_v57 }
 0x57a   :  { %3845 = vmatpush.msrb.mxu2 %v5246_v21  ;;  %3874 = vmatpush.msrb.mxu3 %v5252_v54 }
 0x57b   :  { %3788 = vmatpush.msrb.mxu0 %v5256_v50  ;;  %3817 = vmatpush.msrb.mxu1 %v5262_v34 }
 0x57c   :  { %3846 = vmatpush.msrb.mxu2 %v5251_v46  ;;  %3875 = vmatpush.msrb.mxu3 %v5261_v23 }
 0x57f   :  { %5050 = vmatmul.msk.f32.gmra.mxu0 %vm65_vm0, %v7854_v31  ;;  %5054 = vmatmul.msk.f32.gmra.mxu1 %vm65_vm0, %v7962_v25  ;;  %v8050_v31 = vpop.permute.xlu1 %3952 }
 0x580   :  { %5058 = vmatmul.msk.f32.gmra.mxu2 %vm65_vm0, %v7946_v13  ;;  %5062 = vmatmul.msk.f32.gmra.mxu3 %vm65_vm0, %v7852_v51  ;;  %v8046_v55 = vpop.permute.xlu2 %4180  ;;  %v8048_v48 = vpop.permute.xlu0 %4063 }
 0x587   :  { %v8056_v5 = vpop.permute.xlu1 %4028 }
 0x588   :  { %v8052_v37 = vpop.permute.xlu2 %4065  ;;  %v8054_v11 = vpop.permute.xlu0 %4143 }
 0x58f   :  { %v8062_v60 = vpop.permute.xlu1 %3907 }
 0x590   :  { %v8058_v53 = vpop.permute.xlu2 %5264  ;;  %v8060_v51 = vpop.permute.xlu0 %4104 }
 0x597   :  { %v8068_v63 = vpop.permute.xlu1 %3987 }
 0x598   :  { %v8064_v43 = vpop.permute.xlu2 %5274  ;;  %v8066_v24 = vpop.permute.xlu0 %5284 }
 0x59f   :  { %v8074_v56 = vpop.permute.xlu1 %4026 }
 0x5a0   :  { %v8070_v45 = vpop.permute.xlu2 %5289  ;;  %v8072_v12 = vpop.permute.xlu0 %5299 }
 0x5a7   :  { %v8080_v25 = vpop.permute.xlu1 %3948 }
 0x5a8   :  { %v8076_v62 = vpop.permute.xlu2 %2675  ;;  %v3281_v38 = vpop.permute.xlu0 %3280 }
 0x5af   :  { %v8086_v42 = vpop.permute.xlu1 %4067 }
 0x5b0   :  { %v8082_v33 = vpop.permute.xlu2 %4488 }
 0x5b1   :  { %8796 = vst [vmem:[#allocation35_spill] sm:$0xff] %v8082_v33 }
 0x5b8   :  { %v3285_v4 = vpop.permute.xlu2 %3284 }
 0x5c3   :  { %v3070_v30 = vpop.f32.mrf.mxu0 }
 0x5c4   :  { %v3287_v15 = vmul.f32 %v3281_v38, %v3070_v30  ;;  %v3099_v2 = vpop.f32.mrf.mxu1 }
 0x5c5   :  { %v3289_v13 = vmul.f32 %v3281_v38, %v3099_v2 }
 0x5c6   :  { %4527 = vrot.lane.b32.xlu2 %v3287_v15, %s5473_s29 }
 0x5c7   :  { %4531 = vrot.lane.b32.xlu0 %v3289_v13, %s5473_s29 }
 0x5ca   :  { %v3128_v19 = vpop.f32.mrf.mxu2 }
 0x5cb   :  { %v3291_v16 = vmul.f32 %v3281_v38, %v3128_v19  ;;  %v3157_v0 = vpop.f32.mrf.mxu3 }
 0x5cc   :  { %v3293_v14 = vmul.f32 %v3281_v38, %v3157_v0  ;;  %v3073_v1 = vpop.f32.mrf.mxu0  ;;  %v3102_v22 = vpop.f32.mrf.mxu1 }
 0x5cd   :  { %4535 = vrot.lane.b32.xlu1 %v3291_v16, %s5473_s29  ;;  %v3288_v58 = vmul.f32 %v3285_v4, %v3073_v1  ;;  %v3290_v21 = vmul.f32 %v3285_v4, %v3102_v22  ;;  %v8092_v16 = vpop.permute.xlu1 %4106 }
 0x5ce   :  { %4539 = vrot.lane.b32.xlu2 %v3293_v14, %s5473_s29 }
 0x5d3   :  { %v3131_v8 = vpop.f32.mrf.mxu2  ;;  %v3160_v57 = vpop.f32.mrf.mxu3 }
 0x5d4   :  { %v3292_v54 = vmul.f32 %v3285_v4, %v3131_v8  ;;  %v3186_v34 = vpop.f32.mrf.mxu0  ;;  %v3215_v50 = vpop.f32.mrf.mxu1  ;;  %v3294_v23 = vmul.f32 %v3285_v4, %v3160_v57 }
 0x5d5   :  { %4529 = vrot.lane.b32.xlu1 %v3288_v58, %s5473_s29  ;;  %v3295_v15 = vmul.f32 %v3281_v38, %v3186_v34  ;;  %v3297_v0 = vmul.f32 %v3281_v38, %v3215_v50 }
 0x5d6   :  { %4537 = vrot.lane.b32.xlu0 %v3292_v54, %s5473_s29  ;;  %4533 = vrot.lane.b32.xlu2 %v3290_v21, %s5473_s29  ;;  %v8099_v21 = vpop.permute.xlu1 %4102 }
 0x5db   :  { %v3244_v46 = vpop.f32.mrf.mxu2  ;;  %v3273_v30 = vpop.f32.mrf.mxu3 }
 0x5dc   :  { %v3299_v2 = vmul.f32 %v3281_v38, %v3244_v46  ;;  %v3189_v13 = vpop.f32.mrf.mxu0  ;;  %v3218_v19 = vpop.f32.mrf.mxu1  ;;  %v3301_v22 = vmul.f32 %v3281_v38, %v3273_v30 }
 0x5dd   :  { %4541 = vrot.lane.b32.xlu1 %v3294_v23, %s5473_s29  ;;  %v3296_v58 = vmul.f32 %v3285_v4, %v3189_v13  ;;  %v3298_v46 = vmul.f32 %v3285_v4, %v3218_v19 }
 0x5de   :  { %4543 = vrot.lane.b32.xlu0 %v3295_v15, %s5473_s29  ;;  %4551 = vrot.lane.b32.xlu2 %v3299_v2, %s5473_s29 }
 0x5e3   :  { %v3247_v14 = vpop.f32.mrf.mxu2  ;;  %v3276_v1 = vpop.f32.mrf.mxu3 }
 0x5e4   :  { %v3336_v8 = vpop.f32.mrf.mxu0  ;;  %v3375_v57 = vpop.f32.mrf.mxu1  ;;  %v3300_v54 = vmul.f32 %v3285_v4, %v3247_v14  ;;  %v3302_v15 = vmul.f32 %v3285_v4, %v3276_v1 }
 0x5e5   :  { %4547 = vrot.lane.b32.xlu1 %v3297_v0, %s5473_s29  ;;  %v3615_v50 = vsel %vm2388_vm12, %v3336_v8, 0.0  ;;  %v3616_v38 = vsel %vm2388_vm12, %v3375_v57, 0.0 }
 0x5e6   :  { %4555 = vrot.lane.b32.xlu0 %v3301_v22, %s5473_s29  ;;  %4545 = vrot.lane.b32.xlu2 %v3296_v58, %s5473_s29  ;;  %v3617_v0 = vadd.f32 %v3616_v38, %v3615_v50  ;;  %v8107_v22 = vpop.permute.xlu1 %4182 }
 0x5e7   :  { %8797 = vst [vmem:[#allocation25_spill] sm:$0xff] %v8107_v22 }
 0x5eb   :  { %v3414_v34 = vpop.f32.mrf.mxu2  ;;  %v3453_v23 = vpop.f32.mrf.mxu3 }
 0x5ec   :  { %v3339_v30 = vpop.f32.mrf.mxu0  ;;  %v3378_v2 = vpop.f32.mrf.mxu1  ;;  %v3618_v13 = vsel %vm2388_vm12, %v3414_v34, 0.0  ;;  %v3620_v1 = vsel %vm2388_vm12, %v3453_v23, 0.0 }
 0x5ed   :  { %4553 = vrot.lane.b32.xlu1 %v3300_v54, %s5473_s29  ;;  %v3619_v14 = vadd.f32 %v3618_v13, %v3617_v0  ;;  %v3630_v58 = vsel %vm2388_vm12, %v3339_v30, 0.0  ;;  %v3631_v8 = vsel %vm2388_vm12, %v3378_v2, 0.0 }
 0x5ee   :  { %4549 = vrot.lane.b32.xlu0 %v3298_v46, %s5473_s29  ;;  %4557 = vrot.lane.b32.xlu2 %v3302_v15, %s5473_s29  ;;  %v3632_v15 = vadd.f32 %v3631_v8, %v3630_v58  ;;  %v8117_v22 = vpop.permute.xlu1 %5269 }
 0x5ef   :  { %v3621_v54 = vadd.f32 %v3620_v1, %v3619_v14 }
 0x5f3   :  { %v3417_v19 = vpop.f32.mrf.mxu2  ;;  %v3456_v4 = vpop.f32.mrf.mxu3 }
 0x5f4   :  { %v3492_v57 = vpop.f32.mrf.mxu0  ;;  %v3531_v33 = vpop.f32.mrf.mxu1  ;;  %v3633_v46 = vsel %vm2388_vm12, %v3417_v19, 0.0  ;;  %v3635_v23 = vsel %vm2388_vm12, %v3456_v4, 0.0 }
 0x5f5   :  { %v3622_v34 = vsel %vm2388_vm12, %v3492_v57, 0.0  ;;  %v3634_v38 = vadd.f32 %v3633_v46, %v3632_v15  ;;  %v3624_v13 = vsel %vm2388_vm12, %v3531_v33, 0.0 }
 0x5f6   :  { %v3623_v50 = vadd.f32 %v3622_v34, %v3621_v54 }
 0x5f7   :  { %v3636_v14 = vadd.f32 %v3635_v23, %v3634_v38  ;;  %v8800_v23 = vld [vmem:[#allocation31_spill] sm:$0xff] }
 0x5f8   :  { %v3625_v0 = vadd.f32 %v3624_v13, %v3623_v50  ;;  %v5280_v50 = vpop.permute.xlu1 %5279 }
 0x5fb   :  { %v3570_v59 = vpop.f32.mrf.mxu2  ;;  %v3609_v39 = vpop.f32.mrf.mxu3 }
 0x5fc   :  { %v3626_v30 = vsel %vm2388_vm12, %v3570_v59, 0.0  ;;  %v3495_v2 = vpop.f32.mrf.mxu0  ;;  %v3628_v19 = vsel %vm2388_vm12, %v3609_v39, 0.0  ;;  %v3534_v54 = vpop.f32.mrf.mxu1 }
 0x5fd   :  { %v3627_v1 = vadd.f32 %v3626_v30, %v3625_v0  ;;  %v3637_v57 = vsel %vm2388_vm12, %v3495_v2, 0.0  ;;  %v3639_v33 = vsel %vm2388_vm12, %v3534_v54, 0.0 }
 0x5fe   :  { %v3638_v8 = vadd.f32 %v3637_v57, %v3636_v14  ;;  %v8802_v57 = vld [vmem:[#allocation27_spill] sm:$0xff] }
 0x5ff   :  { %v3629_v58 = vadd.f32 %v3628_v19, %v3627_v1 }
 0x600   :  { %v3640_v59 = vadd.f32 %v3639_v33, %v3638_v8 }
 0x601   :  { %4791 = vrot.lane.b32.xlu0 %v3629_v58, %s5466_s26  ;;  %5063 = vmatmul.msk.f32.vlgmr.msra.gmra.mxu0 %vm2388_vm12, %v3629_v58 }
 0x602   :  { %5065 = vmatmul.msk.f32.vlgmr.msra.gmra.mxu1 %vm2388_vm12, %v3629_v58  ;;  %5067 = vmatmul.msk.f32.vlgmr.msra.gmra.mxu2 %vm2388_vm12, %v3629_v58 }
 0x603   :  { %5069 = vmatmul.msk.f32.vlgmr.msra.gmra.mxu3 %vm2388_vm12, %v3629_v58  ;;  %5079 = vmatpush.xpose.msk.msra.mxu0 %vm65_vm0, %v7907_v7  ;;  %v3573_v39 = vpop.f32.mrf.mxu2  ;;  %v3612_v4 = vpop.f32.mrf.mxu3 }
 0x604   :  { %5083 = vmatpush.xpose.msk.msra.mxu1 %vm65_vm0, %v8050_v31  ;;  %5087 = vmatpush.xpose.msk.msra.mxu2 %vm65_vm0, %v8044_v35  ;;  %v3641_v34 = vsel %vm2388_vm12, %v3573_v39, 0.0  ;;  %v3643_v15 = vsel %vm2388_vm12, %v3612_v4, 0.0  ;;  %v8171_v7 = vpop.permute.xlu2 %4785  ;;  %v5282_v35 = vunpack.i.h.bf16 %v5280_v50  ;;  %v5272_v31 = vunpack.i.h.bf16 %v8117_v22 }
 0x605   :  { %5091 = vmatpush.xpose.msk.msra.mxu3 %vm65_vm0, %v7904_v44  ;;  %v3642_v46 = vadd.f32 %v3641_v34, %v3640_v59  ;;  %v8155_v44 = vpop.permute.xlu1 %5294  ;;  %v8803_v59 = vld [vmem:[#allocation12_spill] sm:$0xff]  ;;  %v8804_v34 = vld [vmem:[#allocation10_spill] sm:$0xff] }
 0x607   :  { %v8137_v38 = vadd.f32 %v3643_v15, %v3642_v46  ;;  %5080 = vmatpush.xpose.msk.msra.mxu0 %vm65_vm0, %v7915_v6  ;;  %v2691_v46 = vmul.f32 %v8076_v62, %v8804_v34 }
 0x608   :  { %5084 = vmatpush.xpose.msk.msra.mxu1 %vm65_vm0, %v7948_v61  ;;  %5088 = vmatpush.xpose.msk.msra.mxu2 %vm65_vm0, %v7932_v52  ;;  %v2683_v52 = vmul.f32 %v8076_v62, %v7832_v49  ;;  %v5267_v49 = vunpack.i.h.bf16 %v8058_v53 }
 0x609   :  { %5092 = vmatpush.xpose.msk.msra.mxu3 %vm65_vm0, %v8056_v5  ;;  %5064 = vmatmul.msk.f32.gmra.mxu0 %vm2388_vm12, %v8137_v38 }
 0x60a   :  { %5066 = vmatmul.msk.f32.gmra.mxu1 %vm2388_vm12, %v8137_v38  ;;  %5068 = vmatmul.msk.f32.gmra.mxu2 %vm2388_vm12, %v8137_v38 }
 0x60b   :  { %5070 = vmatmul.msk.f32.gmra.mxu3 %vm2388_vm12, %v8137_v38 }
 0x60d   :  { %v8185_v6 = vpop.permute.xlu1 %3884 }
 0x611   :  { %5071 = vmatmul.msk.f32.vlgmr.msrb.gmra.mxu0 %vm2388_vm12, %v3629_v58 }
 0x612   :  { %5073 = vmatmul.msk.f32.vlgmr.msrb.gmra.mxu1 %vm2388_vm12, %v3629_v58  ;;  %5075 = vmatmul.msk.f32.vlgmr.msrb.gmra.mxu2 %vm2388_vm12, %v3629_v58 }
 0x613   :  { %5077 = vmatmul.msk.f32.vlgmr.msrb.gmra.mxu3 %vm2388_vm12, %v3629_v58  ;;  %5095 = vmatpush.xpose.msk.msrb.mxu0 %vm65_vm0, %v8012_v18  ;;  %v5266_v18 = vunpack.i.l.bf16 %v8058_v53 }
 0x614   :  { %5099 = vmatpush.xpose.msk.msrb.mxu1 %vm65_vm0, %v8030_v28  ;;  %5103 = vmatpush.xpose.msk.msrb.mxu2 %vm65_vm0, %v7998_v20  ;;  %v5276_v20 = vunpack.i.l.bf16 %v8064_v43  ;;  %v5277_v28 = vunpack.i.h.bf16 %v8064_v43  ;;  %v8228_v43 = vpop.permute.xlu0 %3888 }
 0x615   :  { %5107 = vmatpush.xpose.msk.msrb.mxu3 %vm65_vm0, %v8040_v9  ;;  %v5281_v9 = vunpack.i.l.bf16 %v5280_v50  ;;  %v8208_v5 = vpop.permute.xlu1 %2680 }
 0x616   :  { %v2692_v30 = vmul.f32 %v8208_v5, %v8800_v23  ;;  %v2688_v19 = vmul.f32 %v8208_v5, %v8802_v57  ;;  %v2690_v39 = vmul.f32 %v8208_v5, %v8803_v59 }
 0x617   :  { %5096 = vmatpush.xpose.msk.msrb.mxu0 %vm65_vm0, %v8086_v42  ;;  %v5301_v42 = vunpack.i.l.bf16 %v8072_v12 }
 0x618   :  { %5100 = vmatpush.xpose.msk.msrb.mxu1 %vm65_vm0, %v8092_v16  ;;  %5104 = vmatpush.xpose.msk.msrb.mxu2 %vm65_vm0, %v8002_v40  ;;  %v5302_v16 = vunpack.i.h.bf16 %v8072_v12 }
 0x619   :  { %5108 = vmatpush.xpose.msk.msrb.mxu3 %vm65_vm0, %v8042_v32  ;;  %5072 = vmatmul.msk.f32.gmra.mxu0 %vm2388_vm12, %v8137_v38  ;;  %v5271_v32 = vunpack.i.l.bf16 %v8117_v22  ;;  %v5292_v22 = vunpack.i.h.bf16 %v8070_v45 }
 0x61a   :  { %5074 = vmatmul.msk.f32.gmra.mxu1 %vm2388_vm12, %v8137_v38  ;;  %5076 = vmatmul.msk.f32.gmra.mxu2 %vm2388_vm12, %v8137_v38 }
 0x61b   :  { %5078 = vmatmul.msk.f32.gmra.mxu3 %vm2388_vm12, %v8137_v38 }
 0x61d   :  { %v8223_v53 = vpop.permute.xlu1 %4492 }
 0x620   :  { %v4528_v61 = vpop.permute.xlu2 %4527 }
 0x621   :  { %5081 = vmatmul.msk.f32.vlgmr.msra.gmra.mxu0 %vm65_vm0, %v8062_v60  ;;  %v8195_v40 = vsel %vm4703_vm8, %v2683_v52, %v4528_v61  ;;  %v8805_v52 = vld [vmem:[#allocation28_spill] sm:$0xff] }
 0x622   :  { %5085 = vmatmul.msk.f32.vlgmr.msra.gmra.mxu1 %vm65_vm0, %v7964_v29  ;;  %5089 = vmatmul.msk.f32.vlgmr.msra.gmra.mxu2 %vm65_vm0, %v7952_v26  ;;  %v2689_v26 = vmul.f32 %v8076_v62, %v7844_v3  ;;  %v2686_v3 = vmul.f32 %v8208_v5, %v7848_v47  ;;  %v5287_v47 = vunpack.i.h.bf16 %v8066_v24  ;;  %v2693_v61 = vmul.f32 %v8076_v62, %v8805_v52 }
 0x623   :  { %5093 = vmatmul.msk.f32.vlgmr.msra.gmra.mxu3 %vm65_vm0, %v7978_v41  ;;  %4275 = vmatpush.msra.mxu0 %v5276_v20 }
 0x624   :  { %4304 = vmatpush.msra.mxu1 %v5277_v28  ;;  %4333 = vmatpush.msra.mxu2 %v5266_v18  ;;  %v8806_v18 = vld [vmem:[#allocation29_spill] sm:$0xff] }
 0x625   :  { %4362 = vmatpush.msra.mxu3 %v5267_v49  ;;  %4276 = vmatpush.msra.mxu0 %v5281_v9  ;;  %v2697_v28 = vmul.f32 %v8076_v62, %v8806_v18 }
 0x626   :  { %4305 = vmatpush.msra.mxu1 %v5282_v35  ;;  %4334 = vmatpush.msra.mxu2 %v5271_v32  ;;  %v8807_v35 = vld [vmem:[#allocation34_spill] sm:$0xff] }
 0x627   :  { %4363 = vmatpush.msra.mxu3 %v5272_v31  ;;  %v2696_v31 = vmul.f32 %v8208_v5, %v8807_v35 }
 0x628   :  { %v4540_v29 = vpop.permute.xlu2 %4539 }
 0x629   :  { %5082 = vmatmul.msk.f32.gmra.mxu0 %vm65_vm0, %v7984_v10  ;;  %v8215_v41 = vsel %vm4703_vm8, %v2689_v26, %v4540_v29  ;;  %v5296_v10 = vunpack.i.l.bf16 %v8155_v44  ;;  %v8808_v29 = vld [vmem:[#allocation30_spill] sm:$0xff] }
 0x62a   :  { %5086 = vmatmul.msk.f32.gmra.mxu1 %vm65_vm0, %v8080_v25  ;;  %5090 = vmatmul.msk.f32.gmra.mxu2 %vm65_vm0, %v8068_v63  ;;  %v5286_v63 = vunpack.i.l.bf16 %v8066_v24  ;;  %v2695_v24 = vmul.f32 %v8076_v62, %v7868_v17  ;;  %v8798_v17 = vld [vmem:[#allocation25_spill] sm:$0xff] }
 0x62b   :  { %5094 = vmatmul.msk.f32.gmra.mxu3 %vm65_vm0, %v8074_v56  ;;  %v5297_v56 = vunpack.i.h.bf16 %v8155_v44 }
 0x630   :  { %v4534_v60 = vpop.permute.xlu2 %4533 }
 0x631   :  { %5097 = vmatmul.msk.f32.vlgmr.msrb.gmra.mxu0 %vm65_vm0, %v8048_v48  ;;  %v8233_v25 = vsel %vm4703_vm8, %v2686_v3, %v4534_v60  ;;  %v5291_v48 = vunpack.i.l.bf16 %v8070_v45  ;;  %v2694_v3 = vmul.f32 %v8208_v5, %v8808_v29 }
 0x632   :  { %5101 = vmatmul.msk.f32.vlgmr.msrb.gmra.mxu1 %vm65_vm0, %v8099_v21  ;;  %5105 = vmatmul.msk.f32.vlgmr.msrb.gmra.mxu2 %vm65_vm0, %v8021_v36  ;;  %v8248_v36 = vpop.permute.xlu1 %4787 }
 0x633   :  { %5109 = vmatmul.msk.f32.vlgmr.msrb.gmra.mxu3 %vm65_vm0, %v8046_v55  ;;  %4391 = vmatpush.msrb.mxu0 %v5296_v10  ;;  %v2685_v55 = vmul.f32 %v8076_v62, %v7834_v27  ;;  %v8799_v27 = vld [vmem:[#allocation24_spill] sm:$0xff] }
 0x634   :  { %4420 = vmatpush.msrb.mxu1 %v5297_v56  ;;  %4449 = vmatpush.msrb.mxu2 %v5286_v63  ;;  %v2687_v0 = vmul.f32 %v8076_v62, %v8799_v27 }
 0x635   :  { %4478 = vmatpush.msrb.mxu3 %v5287_v47  ;;  %4392 = vmatpush.msrb.mxu0 %v5301_v42 }
 0x636   :  { %4421 = vmatpush.msrb.mxu1 %v5302_v16  ;;  %4450 = vmatpush.msrb.mxu2 %v5291_v48 }
 0x637   :  { %4479 = vmatpush.msrb.mxu3 %v5292_v22 }
 0x638   :  { %v4552_v21 = vpop.permute.xlu2 %4551 }
 0x639   :  { %5098 = vmatmul.msk.f32.gmra.mxu0 %vm65_vm0, %v8052_v37  ;;  %v4532_v12 = vpop.permute.xlu0 %4531  ;;  %v8257_v45 = vsel %vm4703_vm8, %v2695_v24, %v4552_v21 }
 0x63a   :  { %5102 = vmatmul.msk.f32.gmra.mxu1 %vm65_vm0, %v8060_v51  ;;  %5106 = vmatmul.msk.f32.gmra.mxu2 %vm65_vm0, %v8054_v11  ;;  %v8264_v13 = vsel %vm4703_vm8, %v2685_v55, %v4532_v12  ;;  %v8801_v11 = vld [vmem:[#allocation23_spill] sm:$0xff] }
 0x63b   :  { %5110 = vmatmul.msk.f32.gmra.mxu3 %vm65_vm0, %v8798_v17  ;;  %v2684_v1 = vmul.f32 %v8208_v5, %v8801_v11 }
 0x63f   :  { %v4536_v37 = vpop.permute.xlu1 %4535 }
 0x640   :  { %v8273_v2 = vsel %vm4703_vm8, %v2687_v0, %v4536_v37  ;;  %v4546_v51 = vpop.permute.xlu2 %4545 }
 0x641   :  { %v8276_v14 = vsel %vm4703_vm8, %v2692_v30, %v4546_v51 }
 0x647   :  { %v4530_v58 = vpop.permute.xlu1 %4529 }
 0x648   :  { %v4538_v8 = vpop.permute.xlu0 %4537  ;;  %v8283_v54 = vsel %vm4703_vm8, %v2684_v1, %v4530_v58 }
 0x649   :  { %v8286_v33 = vsel %vm4703_vm8, %v2688_v19, %v4538_v8 }
 0x64f   :  { %v4542_v4 = vpop.permute.xlu1 %4541 }
 0x650   :  { %v8293_v15 = vsel %vm4703_vm8, %v2690_v39, %v4542_v4  ;;  %v4544_v50 = vpop.permute.xlu0 %4543 }
 0x651   :  { %v8296_v44 = vsel %vm4703_vm8, %v2691_v46, %v4544_v50 }
 0x657   :  { %v4548_v20 = vpop.permute.xlu1 %4547 }
 0x658   :  { %v8303_v49 = vsel %vm4703_vm8, %v2693_v61, %v4548_v20  ;;  %v4556_v9 = vpop.permute.xlu0 %4555 }
 0x659   :  { %v8306_v32 = vsel %vm4703_vm8, %v2697_v28, %v4556_v9 }
 0x65f   :  { %v4554_v26 = vpop.permute.xlu1 %4553 }
 0x660   :  { %v8313_v60 = vsel %vm4703_vm8, %v2696_v31, %v4554_v26  ;;  %v4550_v10 = vpop.permute.xlu0 %4549 }
 0x661   :  { %v8316_v62 = vsel %vm4703_vm8, %v2694_v3, %v4550_v10 }
 0x67e   :  { %v3674_v63 = vpop.f32.mrf.mxu0 }
 0x67f   :  { %v3891_v56 = vmul.f32 %v8185_v6, %v3674_v63  ;;  %v3703_v47 = vpop.f32.mrf.mxu1 }
 0x680   :  { %v3893_v42 = vmul.f32 %v8185_v6, %v3703_v47 }
 0x681   :  { %4591 = vrot.lane.b32.xlu1 %v3891_v56, %s5472_s28 }
 0x682   :  { %4595 = vrot.lane.b32.xlu2 %v3893_v42, %s5472_s28 }
 0x685   :  { %v3732_v48 = vpop.f32.mrf.mxu2 }
 0x686   :  { %v3895_v16 = vmul.f32 %v8185_v6, %v3732_v48  ;;  %v3761_v22 = vpop.f32.mrf.mxu3  ;;  %v3677_v24 = vpop.f32.mrf.mxu0 }
 0x687   :  { %v3897_v55 = vmul.f32 %v8185_v6, %v3761_v22  ;;  %v3706_v21 = vpop.f32.mrf.mxu1  ;;  %v3892_v17 = vmul.f32 %v8228_v43, %v3677_v24 }
 0x688   :  { %4599 = vrot.lane.b32.xlu0 %v3895_v16, %s5472_s28  ;;  %v3894_v23 = vmul.f32 %v8228_v43, %v3706_v21 }
 0x689   :  { %4603 = vrot.lane.b32.xlu1 %v3897_v55, %s5472_s28 }
 0x68d   :  { %v3735_v12 = vpop.f32.mrf.mxu2 }
 0x68e   :  { %v3896_v27 = vmul.f32 %v8228_v43, %v3735_v12  ;;  %v3764_v0 = vpop.f32.mrf.mxu3  ;;  %v3790_v37 = vpop.f32.mrf.mxu0 }
 0x68f   :  { %v3819_v30 = vpop.f32.mrf.mxu1  ;;  %v3898_v11 = vmul.f32 %v8228_v43, %v3764_v0  ;;  %v3899_v1 = vmul.f32 %v8185_v6, %v3790_v37 }
 0x690   :  { %4593 = vrot.lane.b32.xlu0 %v3892_v17, %s5472_s28  ;;  %4601 = vrot.lane.b32.xlu2 %v3896_v27, %s5472_s28  ;;  %v3901_v39 = vmul.f32 %v8185_v6, %v3819_v30 }
 0x691   :  { %4597 = vrot.lane.b32.xlu1 %v3894_v23, %s5472_s28 }
 0x695   :  { %v3848_v51 = vpop.f32.mrf.mxu2 }
 0x696   :  { %v3877_v57 = vpop.f32.mrf.mxu3  ;;  %v3793_v19 = vpop.f32.mrf.mxu0  ;;  %v3903_v58 = vmul.f32 %v8185_v6, %v3848_v51 }
 0x697   :  { %v3822_v8 = vpop.f32.mrf.mxu1  ;;  %v3905_v4 = vmul.f32 %v8185_v6, %v3877_v57  ;;  %v3900_v50 = vmul.f32 %v8228_v43, %v3793_v19 }
 0x698   :  { %4605 = vrot.lane.b32.xlu0 %v3898_v11, %s5472_s28  ;;  %4607 = vrot.lane.b32.xlu2 %v3899_v1, %s5472_s28  ;;  %v3902_v20 = vmul.f32 %v8228_v43, %v3822_v8 }
 0x699   :  { %4615 = vrot.lane.b32.xlu1 %v3903_v58, %s5472_s28 }
 0x69d   :  { %v3851_v59 = vpop.f32.mrf.mxu2 }
 0x69e   :  { %v3880_v34 = vpop.f32.mrf.mxu3  ;;  %v3940_v46 = vpop.f32.mrf.mxu0  ;;  %v3904_v18 = vmul.f32 %v8228_v43, %v3851_v59 }
 0x69f   :  { %v3979_v52 = vpop.f32.mrf.mxu1  ;;  %v4219_v28 = vsel %vm2388_vm12, %v3940_v46, 0.0  ;;  %v3906_v31 = vmul.f32 %v8228_v43, %v3880_v34 }
 0x6a0   :  { %4611 = vrot.lane.b32.xlu0 %v3901_v39, %s5472_s28  ;;  %4619 = vrot.lane.b32.xlu2 %v3905_v4, %s5472_s28  ;;  %v4220_v6 = vsel %vm2388_vm12, %v3979_v52, 0.0 }
 0x6a1   :  { %4609 = vrot.lane.b32.xlu1 %v3900_v50, %s5472_s28  ;;  %v4221_v3 = vadd.f32 %v4220_v6, %v4219_v28 }
 0x6a5   :  { %v4018_v61 = vpop.f32.mrf.mxu2 }
 0x6a6   :  { %v4057_v9 = vpop.f32.mrf.mxu3  ;;  %v3943_v35 = vpop.f32.mrf.mxu0  ;;  %v4222_v29 = vsel %vm2388_vm12, %v4018_v61, 0.0 }
 0x6a7   :  { %v3982_v26 = vpop.f32.mrf.mxu1  ;;  %v4223_v10 = vadd.f32 %v4222_v29, %v4221_v3  ;;  %v4224_v56 = vsel %vm2388_vm12, %v4057_v9, 0.0  ;;  %v4234_v47 = vsel %vm2388_vm12, %v3943_v35, 0.0  ;;  %v8809_v9 = vld [vmem:[#allocation35_spill] sm:$0xff] }
 0x6a8   :  { %4617 = vrot.lane.b32.xlu0 %v3904_v18, %s5472_s28  ;;  %4613 = vrot.lane.b32.xlu2 %v3902_v20, %s5472_s28  ;;  %v4235_v42 = vsel %vm2388_vm12, %v3982_v26, 0.0 }
 0x6a9   :  { %4621 = vrot.lane.b32.xlu1 %v3906_v31, %s5472_s28  ;;  %v4225_v16 = vadd.f32 %v4224_v56, %v4223_v10  ;;  %v4236_v21 = vadd.f32 %v4235_v42, %v4234_v47 }
 0x6ad   :  { %v4021_v63 = vpop.f32.mrf.mxu2 }
 0x6ae   :  { %v4060_v48 = vpop.f32.mrf.mxu3  ;;  %v4096_v43 = vpop.f32.mrf.mxu0  ;;  %v4237_v55 = vsel %vm2388_vm12, %v4021_v63, 0.0 }
 0x6af   :  { %v4226_v22 = vsel %vm2388_vm12, %v4096_v43, 0.0  ;;  %v4135_v24 = vpop.f32.mrf.mxu1  ;;  %v4238_v17 = vadd.f32 %v4237_v55, %v4236_v21  ;;  %v4239_v23 = vsel %vm2388_vm12, %v4060_v48, 0.0 }
 0x6b0   :  { %v4227_v12 = vadd.f32 %v4226_v22, %v4225_v16  ;;  %v4228_v27 = vsel %vm2388_vm12, %v4135_v24, 0.0 }
 0x6b1   :  { %v4240_v1 = vadd.f32 %v4239_v23, %v4238_v17 }
 0x6b2   :  { %v4229_v0 = vadd.f32 %v4228_v27, %v4227_v12 }
 0x6b5   :  { %v4174_v37 = vpop.f32.mrf.mxu2 }
 0x6b6   :  { %v4230_v30 = vsel %vm2388_vm12, %v4174_v37, 0.0  ;;  %v4213_v51 = vpop.f32.mrf.mxu3  ;;  %v4099_v11 = vpop.f32.mrf.mxu0 }
 0x6b7   :  { %v4231_v57 = vadd.f32 %v4230_v30, %v4229_v0  ;;  %v4241_v19 = vsel %vm2388_vm12, %v4099_v11, 0.0  ;;  %v4232_v58 = vsel %vm2388_vm12, %v4213_v51, 0.0  ;;  %v4138_v39 = vpop.f32.mrf.mxu1 }
 0x6b8   :  { %v4242_v59 = vadd.f32 %v4241_v19, %v4240_v1  ;;  %v4243_v4 = vsel %vm2388_vm12, %v4138_v39, 0.0 }
 0x6b9   :  { %v8363_v8 = vadd.f32 %v4232_v58, %v4231_v57 }
 0x6ba   :  { %v4244_v34 = vadd.f32 %v4243_v4, %v4242_v59  ;;  %v8434_v59 = vpop.permute.xlu2 %4557 }
 0x6bb   :  { %5111 = vmatmul.msk.f32.vlgmr.msra.gmra.mxu0 %vm2388_vm12, %v8363_v8  ;;  %5113 = vmatmul.msk.f32.vlgmr.msra.gmra.mxu1 %vm2388_vm12, %v8363_v8 }
 0x6bc   :  { %5115 = vmatmul.msk.f32.vlgmr.msra.gmra.mxu2 %vm2388_vm12, %v8363_v8  ;;  %5117 = vmatmul.msk.f32.vlgmr.msra.gmra.mxu3 %vm2388_vm12, %v8363_v8 }
 0x6bd   :  { %v4177_v46 = vpop.f32.mrf.mxu2 }
 0x6be   :  { %v4245_v50 = vsel %vm2388_vm12, %v4177_v46, 0.0  ;;  %v4216_v52 = vpop.f32.mrf.mxu3 }
 0x6bf   :  { %v4246_v61 = vadd.f32 %v4245_v50, %v4244_v34  ;;  %v4247_v20 = vsel %vm2388_vm12, %v4216_v52, 0.0 }
 0x6c1   :  { %v8376_v18 = vadd.f32 %v4247_v20, %v4246_v61 }
 0x6c3   :  { %5112 = vmatmul.msk.f32.gmra.mxu0 %vm2388_vm12, %v8376_v18  ;;  %5114 = vmatmul.msk.f32.gmra.mxu1 %vm2388_vm12, %v8376_v18 }
 0x6c4   :  { %5116 = vmatmul.msk.f32.gmra.mxu2 %vm2388_vm12, %v8376_v18  ;;  %5118 = vmatmul.msk.f32.gmra.mxu3 %vm2388_vm12, %v8376_v18 }
 0x6cb   :  { %5119 = vmatmul.msk.f32.vlgmr.msrb.gmra.mxu0 %vm2388_vm12, %v8363_v8  ;;  %5121 = vmatmul.msk.f32.vlgmr.msrb.gmra.mxu1 %vm2388_vm12, %v8363_v8 }
 0x6cc   :  { %5123 = vmatmul.msk.f32.vlgmr.msrb.gmra.mxu2 %vm2388_vm12, %v8363_v8  ;;  %5125 = vmatmul.msk.f32.vlgmr.msrb.gmra.mxu3 %vm2388_vm12, %v8363_v8 }
 0x6d3   :  { %5120 = vmatmul.msk.f32.gmra.mxu0 %vm2388_vm12, %v8376_v18  ;;  %5122 = vmatmul.msk.f32.gmra.mxu1 %vm2388_vm12, %v8376_v18 }
 0x6d4   :  { %5124 = vmatmul.msk.f32.gmra.mxu2 %vm2388_vm12, %v8376_v18  ;;  %5126 = vmatmul.msk.f32.gmra.mxu3 %vm2388_vm12, %v8376_v18 }
 0x6dc   :  { %v4596_v39 = vpop.permute.xlu2 %4595 }
 0x6ea   :  { %v4602_v34 = vpop.permute.xlu2 %4601 }
 0x6f2   :  { %v8444_v52 = vpop.permute.xlu2 %4607 }
 0x6f3   :  { %v4592_v4 = vpop.permute.xlu1 %4591 }
 0x6fb   :  { %v4604_v50 = vpop.permute.xlu1 %4603 }
 0x703   :  { %v4598_v20 = vpop.permute.xlu1 %4597 }
 0x738   :  { %v4278_v28 = vpop.f32.mrf.mxu0  ;;  %v4307_v6 = vpop.f32.mrf.mxu1 }
 0x739   :  { %v4495_v35 = vmul.f32 %v8809_v9, %v4278_v28  ;;  %v4497_v31 = vmul.f32 %v8809_v9, %v4307_v6  ;;  %v8446_v28 = vpop.permute.xlu2 %4619  ;;  %v8448_v6 = vpop.permute.xlu1 %4615 }
 0x73b   :  { %4655 = vrot.lane.b32.xlu0 %v4495_v35, %s5460_s15  ;;  %4659 = vrot.lane.b32.xlu1 %v4497_v31, %s5460_s15 }
 0x73f   :  { %v4336_v26 = vpop.f32.mrf.mxu2  ;;  %v4365_v29 = vpop.f32.mrf.mxu3 }
 0x740   :  { %v4499_v3 = vmul.f32 %v8809_v9, %v4336_v26  ;;  %v4501_v10 = vmul.f32 %v8809_v9, %v4365_v29  ;;  %v4281_v63 = vpop.f32.mrf.mxu0  ;;  %v4310_v56 = vpop.f32.mrf.mxu1  ;;  %v5416_v29 = vld [vmem:[%s8642_s0 + $0x20] sm:$0xff] }
 0x741   :  { %v4496_v42 = vmul.f32 %v8223_v53, %v4281_v63  ;;  %v4498_v43 = vmul.f32 %v8223_v53, %v4310_v56 }
 0x742   :  { %4663 = vrot.lane.b32.xlu2 %v4499_v3, %s5460_s15 }
 0x743   :  { %4667 = vrot.lane.b32.xlu0 %v4501_v10, %s5460_s15 }
 0x747   :  { %v4339_v47 = vpop.f32.mrf.mxu2  ;;  %v4368_v16 = vpop.f32.mrf.mxu3 }
 0x748   :  { %v4500_v48 = vmul.f32 %v8223_v53, %v4339_v47  ;;  %v4394_v22 = vpop.f32.mrf.mxu0  ;;  %v4502_v55 = vmul.f32 %v8223_v53, %v4368_v16  ;;  %v4423_v17 = vpop.f32.mrf.mxu1  ;;  %v4722_v16 = vsel %vm2388_vm12, %v8264_v13, %v4596_v39  ;;  %v5419_v13 = vld [vmem:[%s8642_s0] sm:$0xff]  ;;  %v5422_v39 = vld [vmem:[%s8642_s0 + $0x30] sm:$0xff] }
 0x749   :  { %v4503_v21 = vmul.f32 %v8809_v9, %v4394_v22  ;;  %v4505_v37 = vmul.f32 %v8809_v9, %v4423_v17  ;;  %v4720_v22 = vsel %vm2388_vm12, %v8195_v40, %v4592_v4  ;;  %v5420_v40 = vld [vmem:[%s8642_s0 + $0x10] sm:$0xff] }
 0x74a   :  { %4665 = vrot.lane.b32.xlu1 %v4500_v48, %s5460_s15  ;;  %4657 = vrot.lane.b32.xlu2 %v4496_v42, %s5460_s15  ;;  %v5417_v42 = vld [vmem:[%s8642_s0 + $0x8] sm:$0xff] }
 0x74b   :  { %4661 = vrot.lane.b32.xlu0 %v4498_v43, %s5460_s15 }
 0x74f   :  { %v4452_v24 = vpop.f32.mrf.mxu2  ;;  %v4481_v27 = vpop.f32.mrf.mxu3 }
 0x750   :  { %v4507_v12 = vmul.f32 %v8809_v9, %v4452_v24  ;;  %v4397_v0 = vpop.f32.mrf.mxu0  ;;  %v4509_v23 = vmul.f32 %v8809_v9, %v4481_v27  ;;  %v4426_v51 = vpop.f32.mrf.mxu1 }
 0x751   :  { %v4504_v30 = vmul.f32 %v8223_v53, %v4397_v0  ;;  %v4506_v57 = vmul.f32 %v8223_v53, %v4426_v51  ;;  %v8452_v9 = vpop.permute.xlu1 %4609  ;;  %v4726_v51 = vsel %vm2388_vm12, %v8215_v41, %v4604_v50  ;;  %v4725_v41 = vsel %vm2388_vm12, %v8286_v33, %v4602_v34  ;;  %v5424_v33 = vld [vmem:[%s8642_s0 + $0x68] sm:$0xff] }
 0x752   :  { %4671 = vrot.lane.b32.xlu1 %v4503_v21, %s5460_s15  ;;  %4669 = vrot.lane.b32.xlu2 %v4502_v55, %s5460_s15 }
 0x753   :  { %4679 = vrot.lane.b32.xlu0 %v4507_v12, %s5460_s15  ;;  %v5418_v12 = vld [vmem:[%s8642_s0 + $0x38] sm:$0xff] }
 0x757   :  { %v4455_v11 = vpop.f32.mrf.mxu2  ;;  %v4484_v1 = vpop.f32.mrf.mxu3 }
 0x758   :  { %v4508_v19 = vmul.f32 %v8223_v53, %v4455_v11  ;;  %v4510_v58 = vmul.f32 %v8223_v53, %v4484_v1  ;;  %v8442_v53 = vpop.permute.xlu0 %4791 }
 0x759   :  { %v8466_v47 = vpop.permute.xlu1 %4621 }
 0x75a   :  { %4683 = vrot.lane.b32.xlu1 %v4509_v23, %s5460_s15  ;;  %4675 = vrot.lane.b32.xlu2 %v4505_v37, %s5460_s15 }
 0x75b   :  { %4673 = vrot.lane.b32.xlu0 %v4504_v30, %s5460_s15 }
 0x760   :  { %v4600_v46 = vpop.permute.xlu0 %4599 }
 0x761   :  { %v4724_v35 = vsel %vm2388_vm12, %v8273_v2, %v4600_v46 }
 0x762   :  { %4677 = vrot.lane.b32.xlu1 %v4506_v57, %s5460_s15  ;;  %4681 = vrot.lane.b32.xlu2 %v4508_v19, %s5460_s15  ;;  %v5421_v57 = vld [vmem:[%s8642_s0 + $0x50] sm:$0xff] }
 0x763   :  { %4685 = vrot.lane.b32.xlu0 %v4510_v58, %s5460_s15 }
 0x768   :  { %v4594_v61 = vpop.permute.xlu0 %4593 }
 0x769   :  { %v4721_v10 = vsel %vm2388_vm12, %v8283_v54, %v4594_v61  ;;  %v4723_v61 = vsel %vm2388_vm12, %v8233_v25, %v4598_v20  ;;  %v5425_v25 = vld [vmem:[%s8642_s0 + $0x18] sm:$0xff] }
 0x76a   :  { %4797 = vrot.lane.b32.xlu1 %v8363_v8, %s5465_s25  ;;  %4793 = vrot.lane.b32.xlu2 %v8137_v38, %s5466_s26  ;;  %v8450_v38 = vpop.permute.xlu2 %4613 }
 0x76b   :  { %4799 = vrot.lane.b32.xlu0 %v8376_v18, %s5465_s25 }
 0x770   :  { %v4606_v8 = vpop.permute.xlu0 %4605 }
 0x771   :  { %v4727_v43 = vsel %vm2388_vm12, %v8293_v15, %v4606_v8 }
 0x778   :  { %v4612_v18 = vpop.permute.xlu0 %4611 }
 0x779   :  { %v4730_v23 = vsel %vm2388_vm12, %v8303_v49, %v4612_v18 }
 0x780   :  { %v4618_v56 = vpop.permute.xlu0 %4617 }
 0x781   :  { %v4733_v49 = vsel %vm2388_vm12, %v8313_v60, %v4618_v56 }
 0x79c   :  { %v4664_v31 = vpop.permute.xlu2 %4663 }
 0x79d   :  { %v4741_v26 = vsel %vm4736_vm9, %v4724_v35, %v4664_v31  ;;  %v5423_v31 = vld [vmem:[%s8642_s0 + $0x28] sm:$0xff] }
 0x79e   :  { %v4757_v3 = vadd.f32 %v5416_v29, %v4741_v26  ;;  %v4728_v29 = vsel %vm2388_vm12, %v8296_v44, %v8444_v52 }
 0x7a0   :  { %4773 = vst.msk [vmem:[%s8650_s8 + $0x20] sm:$0xff] %vm65_vm0, %v4757_v3 }
 0x7a4   :  { %v4658_v63 = vpop.permute.xlu2 %4657 }
 0x7a5   :  { %v4738_v2 = vsel %vm4736_vm9, %v4721_v10, %v4658_v63  ;;  %v4732_v10 = vsel %vm2388_vm12, %v8257_v45, %v8448_v6  ;;  %v4734_v45 = vsel %vm2388_vm12, %v8306_v32, %v8446_v28  ;;  %v4729_v6 = vsel %vm2388_vm12, %v8276_v14, %v8452_v9  ;;  %v8810_v14 = vld [vmem:[#allocation32_spill] sm:$0xff] }
 0x7a6   :  { %v4754_v48 = vadd.f32 %v5417_v42, %v4738_v2  ;;  %v5426_v2 = vld [vmem:[%s8642_s0 + $0x40] sm:$0xff]  ;;  %v2698_v28 = vmul.f32 %v8208_v5, %v8810_v14 }
 0x7a8   :  { %4770 = vst.msk [vmem:[%s8650_s8 + $0x8] sm:$0xff] %vm65_vm0, %v4754_v48  ;;  %v4719_v9 = vsel %vm4703_vm8, %v2698_v28, %v8434_v59  ;;  %v5431_v59 = vld [vmem:[%s8642_s0 + $0x78] sm:$0xff] }
 0x7ac   :  { %v4670_v54 = vpop.permute.xlu2 %4669 }
 0x7ad   :  { %v4744_v24 = vsel %vm4736_vm9, %v4727_v43, %v4670_v54  ;;  %v4656_v55 = vpop.permute.xlu0 %4655  ;;  %v4660_v21 = vpop.permute.xlu1 %4659  ;;  %v5427_v43 = vld [vmem:[%s8642_s0 + $0x60] sm:$0xff] }
 0x7ae   :  { %v4760_v17 = vadd.f32 %v5418_v12, %v4744_v24  ;;  %v4737_v27 = vsel %vm4736_vm9, %v4720_v22, %v4656_v55  ;;  %v4739_v15 = vsel %vm4736_vm9, %v4722_v16, %v4660_v21  ;;  %v5428_v22 = vld [vmem:[%s8642_s0 + $0x70] sm:$0xff]  ;;  %v5429_v21 = vld [vmem:[%s8642_s0 + $0x48] sm:$0xff]  ;;  %v4731_v12 = vsel %vm2388_vm12, %v8316_v62, %v8450_v38  ;;  %v8811_v38 = vld [vmem:[#allocation37_spill] sm:$0xff] }
 0x7af   :  { %v4753_v0 = vadd.f32 %v5419_v13, %v4737_v27  ;;  %v4755_v37 = vadd.f32 %v5420_v40, %v4739_v15  ;;  %v4735_v27 = vsel %vm2388_vm12, %v4719_v9, %v8466_v47  ;;  %v4803_v47 = vsel %vm2388_vm12, %v8811_v38, %v8171_v7 }
 0x7b0   :  { %4776 = vst.msk [vmem:[%s8650_s8 + $0x38] sm:$0xff] %vm65_vm0, %v4760_v17 }
 0x7b1   :  { %4769 = vst.msk [vmem:[%s8650_s8] sm:$0xff] %vm65_vm0, %v4753_v0  ;;  %v5430_v0 = vld [vmem:[%s8642_s0 + $0x58] sm:$0xff] }
 0x7b2   :  { %4771 = vst.msk [vmem:[%s8650_s8 + $0x10] sm:$0xff] %vm65_vm0, %v4755_v37 }
 0x7b4   :  { %v4676_v30 = vpop.permute.xlu2 %4675 }
 0x7b5   :  { %v4747_v11 = vsel %vm4736_vm9, %v4730_v23, %v4676_v30  ;;  %v4668_v1 = vpop.permute.xlu0 %4667  ;;  %v8812_v23 = vld [vmem:[#allocation38_spill] sm:$0xff] }
 0x7b6   :  { %v4763_v19 = vadd.f32 %v5421_v57, %v4747_v11  ;;  %v4743_v58 = vsel %vm4736_vm9, %v4726_v51, %v4668_v1  ;;  %v4804_v30 = vsel %vm2388_vm12, %v8812_v23, %v8248_v36  ;;  %v4805_v51 = vsel %vm65_vm0, %v4803_v47, %v8442_v53 }
 0x7b7   :  { %v4759_v4 = vadd.f32 %v5422_v39, %v4743_v58 }
 0x7b8   :  { %4779 = vst.msk [vmem:[%s8650_s8 + $0x50] sm:$0xff] %vm65_vm0, %v4763_v19 }
 0x7b9   :  { %4775 = vst.msk [vmem:[%s8650_s8 + $0x30] sm:$0xff] %vm65_vm0, %v4759_v4 }
 0x7bc   :  { %v4666_v46 = vpop.permute.xlu1 %4665  ;;  %v4682_v50 = vpop.permute.xlu2 %4681 }
 0x7bd   :  { %v4742_v8 = vsel %vm4736_vm9, %v4725_v41, %v4666_v46  ;;  %v4750_v18 = vsel %vm4736_vm9, %v4733_v49, %v4682_v50  ;;  %v4662_v35 = vpop.permute.xlu0 %4661 }
 0x7be   :  { %v4758_v26 = vadd.f32 %v5423_v31, %v4742_v8  ;;  %v4766_v60 = vadd.f32 %v5424_v33, %v4750_v18  ;;  %v4740_v34 = vsel %vm4736_vm9, %v4723_v61, %v4662_v35 }
 0x7bf   :  { %v4756_v20 = vadd.f32 %v5425_v25, %v4740_v34 }
 0x7c0   :  { %4774 = vst.msk [vmem:[%s8650_s8 + $0x28] sm:$0xff] %vm65_vm0, %v4758_v26 }
 0x7c1   :  { %4782 = vst.msk [vmem:[%s8650_s8 + $0x68] sm:$0xff] %vm65_vm0, %v4766_v60 }
 0x7c2   :  { %4772 = vst.msk [vmem:[%s8650_s8 + $0x18] sm:$0xff] %vm65_vm0, %v4756_v20 }
 0x7c4   :  { %v4672_v3 = vpop.permute.xlu1 %4671  ;;  %v4794_v62 = vpop.permute.xlu2 %4793 }
 0x7c5   :  { %v4745_v63 = vsel %vm4736_vm9, %v4728_v29, %v4672_v3  ;;  %v4680_v56 = vpop.permute.xlu0 %4679  ;;  %v4806_v1 = vsel %vm65_vm0, %v4804_v30, %v4794_v62 }
 0x7c6   :  { %v4761_v42 = vadd.f32 %v5426_v2, %v4745_v63  ;;  %v4749_v48 = vsel %vm4736_vm9, %v4732_v10, %v4680_v56 }
 0x7c7   :  { %v4765_v44 = vadd.f32 %v5427_v43, %v4749_v48 }
 0x7c8   :  { %4777 = vst.msk [vmem:[%s8650_s8 + $0x40] sm:$0xff] %vm65_vm0, %v4761_v42 }
 0x7c9   :  { %4781 = vst.msk [vmem:[%s8650_s8 + $0x60] sm:$0xff] %vm65_vm0, %v4765_v44 }
 0x7cc   :  { %v4684_v52 = vpop.permute.xlu1 %4683 }
 0x7cd   :  { %v4751_v54 = vsel %vm4736_vm9, %v4734_v45, %v4684_v52  ;;  %v4674_v16 = vpop.permute.xlu0 %4673 }
 0x7ce   :  { %v4767_v24 = vadd.f32 %v5428_v22, %v4751_v54  ;;  %v4746_v55 = vsel %vm4736_vm9, %v4729_v6, %v4674_v16 }
 0x7cf   :  { %v4762_v32 = vadd.f32 %v5429_v21, %v4746_v55 }
 0x7d0   :  { %4783 = vst.msk [vmem:[%s8650_s8 + $0x70] sm:$0xff] %vm65_vm0, %v4767_v24 }
 0x7d1   :  { %4778 = vst.msk [vmem:[%s8650_s8 + $0x48] sm:$0xff] %vm65_vm0, %v4762_v32 }
 0x7d4   :  { %v4678_v17 = vpop.permute.xlu1 %4677 }
 0x7d5   :  { %v4748_v15 = vsel %vm4736_vm9, %v4731_v12, %v4678_v17  ;;  %v4686_v13 = vpop.permute.xlu0 %4685 }
 0x7d6   :  { %v4764_v40 = vadd.f32 %v5430_v0, %v4748_v15  ;;  %v4752_v5 = vsel %vm4736_vm9, %v4735_v27, %v4686_v13 }
 0x7d7   :  { %v4768_v37 = vadd.f32 %v5431_v59, %v4752_v5 }
 0x7d8   :  { %4780 = vst.msk [vmem:[%s8650_s8 + $0x58] sm:$0xff] %vm65_vm0, %v4764_v40 }
 0x7d9   :  { %4784 = vst.msk [vmem:[%s8650_s8 + $0x78] sm:$0xff] %vm65_vm0, %v4768_v37 }
 0x7dc   :  { %v4798_v11 = vpop.permute.xlu1 %4797 }
 0x7dd   :  { %v4808_v57 = vsel %vm4807_vm11, %v4805_v51, %v4798_v11  ;;  %v4800_v19 = vpop.permute.xlu0 %4799 }
 0x7de   :  { %4810 = vst.msk [vmem:[%s8651_s9] sm:$0xff] %vm758_vm6, %v4808_v57  ;;  %v4809_v58 = vsel %vm4807_vm11, %v4806_v1, %v4800_v19 }
 0x7df   :  { %4811 = vst.msk [vmem:[%s8651_s9 + $0x8] sm:$0xff] %vm758_vm6, %v4809_v58 }
 0x7e0   :  { %4820 = vsyncpa [#allocation3], 1 }

</bundles_post_ra>
